<compile_context>
chip_gen: v6e
topology: v6e:2x2x1
jax: 0.10.0
libtpu: 0.0.40
codegen_flags: <defaults>
</compile_context>

<pallas_src>
import functools

import jax
import jax.numpy as jnp
from jax.experimental import pallas as pl
from jax.experimental.pallas import tpu as pltpu


# ----------------------------------------------------------------------------
# Fused trunk kernel: 3-layer point-wise MLP (BN folded) + max over points,
# optionally followed (last grid step only) by the STN fully-connected head.
# grid = (N // tile_n,)  -- single reduction axis over point tiles.
# ----------------------------------------------------------------------------
def _trunk_kernel(*refs, relu_last, chunk_rows, with_fc):
    if with_fc:
        (x_ref, w1_ref, b1_ref, w2_ref, b2_ref, w3_ref, b3_ref,
         fw1_ref, fb1_ref, fw2_ref, fb2_ref, fw3_ref, fb3_ref,
         o_ref, acc_ref) = refs
    else:
        (x_ref, w1_ref, b1_ref, w2_ref, b2_ref, w3_ref, b3_ref,
         o_ref, acc_ref) = refs

    B, TN, _ = x_ref.shape
    d_feat = w3_ref.shape[-1]
    step = pl.program_id(0)

    @pl.when(step == 0)
    def _():
        acc_ref[...] = jnp.full(acc_ref.shape, -jnp.inf, acc_ref.dtype)

    ch = min(chunk_rows, TN)
    n_chunks = TN // ch

    # Static per-batch loop (B is tiny); no concatenates, standard 2-D dots.
    for b in range(B):
        # Layer 1 (6 -> 64): per-batch weight so the STN 3x3 transform can be
        # folded in.  K=6 -> negligible FLOPs, kept in f32 so the folded
        # transform is not bf16-rounded.
        h1 = jnp.dot(x_ref[b], w1_ref[b], preferred_element_type=jnp.float32)
        h1 = jnp.maximum(h1 + b1_ref[...], 0.0)                   # (TN, 64)

        # Layer 2 (64 -> 128): bf16 MXU inputs, f32 accumulation.
        h2 = jnp.dot(h1.astype(jnp.bfloat16), w2_ref[...],
                     preferred_element_type=jnp.float32)
        h2 = jnp.maximum(h2 + b2_ref[...], 0.0)                   # (TN, 128)

        # Layer 3 (128 -> 1024) fused with the point max, chunked over rows so
        # the live (rows, 1024) f32 slab stays ~chunk_rows x 1024.  The last
        # bias and final ReLU are deferred to the accumulator (max-monotone).
        part = jnp.full((1, d_feat), -jnp.inf, jnp.float32)
        for c in range(n_chunks):                                 # static unroll
            h3c = jnp.dot(h2[c * ch:(c + 1) * ch].astype(jnp.bfloat16),
                          w3_ref[...], preferred_element_type=jnp.float32)
            part = jnp.maximum(part, jnp.max(h3c, axis=0, keepdims=True))
        acc_ref[b:b + 1, :] = jnp.maximum(acc_ref[b:b + 1, :], part)

    @pl.when(step == pl.num_programs(0) - 1)
    def _():
        feat = acc_ref[...] + b3_ref[...]          # deferred conv3/bn3 bias
        if relu_last:
            feat = jnp.maximum(feat, 0.0)          # deferred final ReLU (STN)
        if with_fc:
            # STN FC head folded into the last reduction step (M = B, tiny).
            h = jnp.maximum(
                jnp.dot(feat.astype(jnp.bfloat16), fw1_ref[...],
                        preferred_element_type=jnp.float32) + fb1_ref[...], 0.0)
            h = jnp.maximum(
                jnp.dot(h.astype(jnp.bfloat16), fw2_ref[...],
                        preferred_element_type=jnp.float32) + fb2_ref[...], 0.0)
            feat = (jnp.dot(h.astype(jnp.bfloat16), fw3_ref[...],
                            preferred_element_type=jnp.float32) + fb3_ref[...])
        o_ref[...] = feat


def _trunk(x_bnc, w1_b, b1, w2, b2, w3, b3, *, relu_last, fc, tile_n,
           chunk_rows, vmem_limit_bytes):
    """Point-wise MLP trunk + global max (+ optional folded STN FC head).

    x_bnc : (B, N, 6) f32 channels-last points
    w1_b  : (B, 6, 64) f32 per-batch first-layer weight (STN transform folded
            for the encoder; broadcast of the shared weight for the STN).
    """
    B, N, C0 = x_bnc.shape
    n_steps = N // tile_n
    d_feat = w3.shape[1]
    d_out = fc[4].shape[1] if fc is not None else d_feat

    full = lambda a: pl.BlockSpec(a.shape, lambda n: (0,) * a.ndim)
    ins = [x_bnc, w1_b, b1, w2, b2, w3, b3]
    in_specs = ([pl.BlockSpec((B, tile_n, C0), lambda n: (0, n, 0))]
                + [full(a) for a in ins[1:]])
    if fc is not None:
        ins += list(fc)
        in_specs += [full(a) for a in fc]

    kernel = functools.partial(_trunk_kernel, relu_last=relu_last,
                               chunk_rows=chunk_rows, with_fc=fc is not None)
    return pl.pallas_call(
        kernel,
        out_shape=jax.ShapeDtypeStruct((B, d_out), jnp.float32),
        grid=(n_steps,),
        in_specs=in_specs,
        out_specs=pl.BlockSpec((B, d_out), lambda n: (0, 0)),
        scratch_shapes=[pltpu.VMEM((B, d_feat), jnp.float32)],
        compiler_params=pltpu.CompilerParams(
            dimension_semantics=("arbitrary",),
            vmem_limit_bytes=vmem_limit_bytes),
    )(*ins)


# ----------------------------------------------------------------------------
# Deterministic parameter construction (BN folded into conv/linear weights).
# Conv1d(k=1) / Linear weight (out, in) is folded into channels-last (in, out)
# form so the kernel computes x @ W + b.
# ----------------------------------------------------------------------------
_EPS = 1e-5


def _make_layer_bn(key, cin, cout):
    ks = jax.random.split(key, 6)
    w = jax.random.normal(ks[0], (cout, cin), jnp.float32) / jnp.sqrt(float(cin))
    b = 0.05 * jax.random.normal(ks[1], (cout,), jnp.float32)
    gamma = 1.0 + 0.1 * jax.random.normal(ks[2], (cout,), jnp.float32)
    beta = 0.05 * jax.random.normal(ks[3], (cout,), jnp.float32)
    mean = 0.05 * jax.random.normal(ks[4], (cout,), jnp.float32)
    var = 1.0 + 0.5 * jax.random.uniform(ks[5], (cout,), jnp.float32)
    s = gamma * jax.lax.rsqrt(var + _EPS)
    w_f = (w * s[:, None]).T                       # (cin, cout)
    b_f = ((b - mean) * s + beta).reshape(1, cout)
    return w_f, b_f


def _make_layer(key, cin, cout):
    ks = jax.random.split(key, 2)
    w = jax.random.normal(ks[0], (cout, cin), jnp.float32) / jnp.sqrt(float(cin))
    b = 0.05 * jax.random.normal(ks[1], (cout,), jnp.float32)
    return w.T, b.reshape(1, cout)


def init_params(key):
    ks = jax.random.split(key, 9)
    bf = lambda a: a.astype(jnp.bfloat16)
    s1w, s1b = _make_layer_bn(ks[0], 6, 64)
    s2w, s2b = _make_layer_bn(ks[1], 64, 128)
    s3w, s3b = _make_layer_bn(ks[2], 128, 1024)
    f1w, f1b = _make_layer_bn(ks[3], 1024, 512)
    f2w, f2b = _make_layer_bn(ks[4], 512, 256)
    f3w, f3b = _make_layer(ks[5], 256, 9)
    e1w, e1b = _make_layer_bn(ks[6], 6, 64)
    e2w, e2b = _make_layer_bn(ks[7], 64, 128)
    e3w, e3b = _make_layer_bn(ks[8], 128, 1024)
    return {
        # first-layer weights stay f32 (STN transform folded / broadcast
        # per batch, K=6 so f32 matmul is free)
        "stn_w1": s1w, "stn_b1": s1b,
        "stn_w2": bf(s2w), "stn_b2": s2b,
        "stn_w3": bf(s3w), "stn_b3": s3b,
        "stn_fc": (bf(f1w), f1b, bf(f2w), f2b, bf(f3w), f3b),
        "enc_w1": e1w, "enc_b1": e1b,
        "enc_w2": bf(e2w), "enc_b2": e2b,
        "enc_w3": bf(e3w), "enc_b3": e3b,
    }


# ----------------------------------------------------------------------------
# Full PointNetEncoder forward (global_feat=True, feature_transform=False)
# ----------------------------------------------------------------------------
def pointnet_encoder_forward(x_bcn, params, *, tile_n=2048, chunk_rows=512):
    # x_bcn: (B, 6, N)  -- PyTorch NCL layout
    B, C, N = x_bcn.shape
    assert C == 6
    tile_n = min(tile_n, N)
    assert N % tile_n == 0 and tile_n % 8 == 0, (N, tile_n)
    if tile_n % chunk_rows != 0:
        chunk_rows = tile_n
    assert tile_n % chunk_rows == 0 and chunk_rows % 8 == 0, (tile_n, chunk_rows)

    # Channels-last view shared by both trunk kernels; the STN transform is
    # folded into the encoder first-layer weight, so bmm + concat (x_cat) is
    # never materialized in HBM.
    x_bnc = jnp.transpose(x_bcn, (0, 2, 1))                  # (B, N, 6)

    vmem = 48 * 1024 * 1024  # fits worst-case live set at tile_n=2048, B=2

    # ---- STN3d trunk + folded FC head -> trans (B, 3, 3) ----
    w1_stn = jnp.broadcast_to(params["stn_w1"][None], (B, 6, 64))
    stn9 = _trunk(x_bnc, w1_stn, params["stn_b1"], params["stn_w2"],
                  params["stn_b2"], params["stn_w3"], params["stn_b3"],
                  relu_last=True, fc=params["stn_fc"],
                  tile_n=tile_n, chunk_rows=chunk_rows,
                  vmem_limit_bytes=vmem)                     # (B, 9)
    trans = (stn9 + jnp.eye(3, dtype=jnp.float32).reshape(1, 9)).reshape(B, 3, 3)

    # ---- encoder trunk with trans folded into its first-layer weight ----
    w1 = params["enc_w1"]                                    # (6, 64) f32
    w1_eff = jnp.concatenate(
        [jnp.einsum("bij,jk->bik", trans, w1[:3]),           # xyz rows @ trans
         jnp.broadcast_to(w1[3:][None], (B, 3, 64))],        # remaining feats
        axis=1)                                              # (B, 6, 64) f32
    return _trunk(x_bnc, w1_eff, params["enc_b1"], params["enc_w2"],
                  params["enc_b2"], params["enc_w3"], params["enc_b3"],
                  relu_last=False, fc=None,
                  tile_n=tile_n, chunk_rows=chunk_rows,
                  vmem_limit_bytes=vmem)                     # (B, 1024)


# ----------------------------------------------------------------------------
# Pure-jnp reference (f32 math, same folded params) for a sanity check.
# ----------------------------------------------------------------------------
def _reference_forward(x_bcn, params):
    f32 = lambda a: a.astype(jnp.float32)
    relu = lambda a: jnp.maximum(a, 0.0)
    B = x_bcn.shape[0]
    x = jnp.transpose(x_bcn, (0, 2, 1))                      # (B, N, 6)

    h = relu(x @ f32(params["stn_w1"]) + params["stn_b1"])
    h = relu(h @ f32(params["stn_w2"]) + params["stn_b2"])
    h = relu(h @ f32(params["stn_w3"]) + params["stn_b3"])
    g = jnp.max(h, axis=1)                                   # (B, 1024)
    fw1, fb1, fw2, fb2, fw3, fb3 = params["stn_fc"]
    g = relu(g @ f32(fw1) + fb1)
    g = relu(g @ f32(fw2) + fb2)
    stn9 = g @ f32(fw3) + fb3
    trans = (stn9 + jnp.eye(3, dtype=jnp.float32).reshape(1, 9)).reshape(B, 3, 3)

    new_xyz = jnp.einsum("bnc,bcd->bnd", x[:, :, :3], trans)
    xc = jnp.concatenate([new_xyz, x[:, :, 3:]], axis=-1)    # (B, N, 6)
    h = relu(xc @ f32(params["enc_w1"]) + params["enc_b1"])
    h = relu(h @ f32(params["enc_w2"]) + params["enc_b2"])
    h = h @ f32(params["enc_w3"]) + params["enc_b3"]         # no relu last
    return jnp.max(h, axis=1)                                # (B, 1024)


if __name__ == "__main__":
    key = jax.random.PRNGKey(0)
    k_x, k_p = jax.random.split(key)

    B, C, N = 2, 6, 512                                      # small test shapes
    x = jax.random.normal(k_x, (B, C, N), jnp.float32)
    params = init_params(k_p)

    fwd = jax.jit(pointnet_encoder_forward,
                  static_argnames=("tile_n", "chunk_rows"))
    out = fwd(x, params, tile_n=128, chunk_rows=64)          # grid=(4,), 2 chunks
    out = jax.block_until_ready(out)

    assert out.shape == (B, 1024), out.shape
    assert bool(jnp.all(jnp.isfinite(out)))

    ref = _reference_forward(x, params)
    err = float(jnp.max(jnp.abs(out - ref)))
    assert err < 0.3, f"mismatch vs jnp reference: max abs err = {err}"

    print("KERNEL_OK")
</pallas_src>

<mosaic_0001>
module attributes {stable_mosaic.version = 11 : i64} {
  func.func @_trunk_kernel(%arg0: i32, %arg1: memref<2x128x6xf32, #tpu.memory_space<vmem>>, %arg2: memref<2x6x64xf32, #tpu.memory_space<vmem>>, %arg3: memref<1x64xf32, #tpu.memory_space<vmem>>, %arg4: memref<64x128xbf16, #tpu.memory_space<vmem>>, %arg5: memref<1x128xf32, #tpu.memory_space<vmem>>, %arg6: memref<128x1024xbf16, #tpu.memory_space<vmem>>, %arg7: memref<1x1024xf32, #tpu.memory_space<vmem>>, %arg8: memref<1024x512xbf16, #tpu.memory_space<vmem>>, %arg9: memref<1x512xf32, #tpu.memory_space<vmem>>, %arg10: memref<512x256xbf16, #tpu.memory_space<vmem>>, %arg11: memref<1x256xf32, #tpu.memory_space<vmem>>, %arg12: memref<256x9xbf16, #tpu.memory_space<vmem>>, %arg13: memref<1x9xf32, #tpu.memory_space<vmem>>, %arg14: memref<2x9xf32, #tpu.memory_space<vmem>>, %arg15: memref<2x1024xf32, #tpu.memory_space<vmem>>) attributes {dimension_semantics = [#tpu.dimension_semantics<arbitrary>], iteration_bounds = array<i64: 4>, scalar_prefetch = 0 : i64, scratch_operands = 1 : i64, tpu.core_type = #tpu.core_type<tc>, window_params = [{transform_indices = @transform_0, window_bounds = array<i64: 2, 128, 6>}, {pipeline_mode = #tpu.pipeline_mode<synchronous>, transform_indices = @transform_1, window_bounds = array<i64: 2, 6, 64>}, {pipeline_mode = #tpu.pipeline_mode<synchronous>, transform_indices = @transform_2, window_bounds = array<i64: 1, 64>}, {pipeline_mode = #tpu.pipeline_mode<synchronous>, transform_indices = @transform_3, window_bounds = array<i64: 64, 128>}, {pipeline_mode = #tpu.pipeline_mode<synchronous>, transform_indices = @transform_4, window_bounds = array<i64: 1, 128>}, {pipeline_mode = #tpu.pipeline_mode<synchronous>, transform_indices = @transform_5, window_bounds = array<i64: 128, 1024>}, {pipeline_mode = #tpu.pipeline_mode<synchronous>, transform_indices = @transform_6, window_bounds = array<i64: 1, 1024>}, {pipeline_mode = #tpu.pipeline_mode<synchronous>, transform_indices = @transform_7, window_bounds = array<i64: 1024, 512>}, {pipeline_mode = #tpu.pipeline_mode<synchronous>, transform_indices = @transform_8, window_bounds = array<i64: 1, 512>}, {pipeline_mode = #tpu.pipeline_mode<synchronous>, transform_indices = @transform_9, window_bounds = array<i64: 512, 256>}, {pipeline_mode = #tpu.pipeline_mode<synchronous>, transform_indices = @transform_10, window_bounds = array<i64: 1, 256>}, {pipeline_mode = #tpu.pipeline_mode<synchronous>, transform_indices = @transform_11, window_bounds = array<i64: 256, 9>}, {pipeline_mode = #tpu.pipeline_mode<synchronous>, transform_indices = @transform_12, window_bounds = array<i64: 1, 9>}, {pipeline_mode = #tpu.pipeline_mode<synchronous>, transform_indices = @transform_13, window_bounds = array<i64: 2, 9>}]} {
    %c0_i32 = arith.constant 0 : i32
    %0 = arith.cmpi eq, %arg0, %c0_i32 : i32
    %1 = arith.extui %0 : i1 to i32
    %c0_i32_0 = arith.constant 0 : i32
    %2 = arith.cmpi ne, %1, %c0_i32_0 : i32
    scf.if %2 {
      %cst_57 = arith.constant 0xFF800000 : f32
      %78 = vector.broadcast %cst_57 : f32 to vector<2x1024xf32>
      %c0_58 = arith.constant 0 : index
      %c0_59 = arith.constant 0 : index
      %79 = vector.load %arg15[%c0_58, %c0_59] : memref<2x1024xf32, #tpu.memory_space<vmem>>, vector<2x1024xf32>
      tpu.vector_store %arg15[%c0_58, %c0_59], %78 {strides = array<i32>} : memref<2x1024xf32, #tpu.memory_space<vmem>>, vector<2x1024xf32>,
    } else {
    }
    %c0 = arith.constant 0 : index
    %c0_1 = arith.constant 0 : index
    %c0_2 = arith.constant 0 : index
    %3 = vector.load %arg1[%c0, %c0_1, %c0_2] : memref<2x128x6xf32, #tpu.memory_space<vmem>>, vector<1x128x6xf32>
    %4 = vector.shape_cast %3 : vector<1x128x6xf32> to vector<128x6xf32>
    %c0_3 = arith.constant 0 : index
    %c0_4 = arith.constant 0 : index
    %c0_5 = arith.constant 0 : index
    %5 = vector.load %arg2[%c0_3, %c0_4, %c0_5] : memref<2x6x64xf32, #tpu.memory_space<vmem>>, vector<1x6x64xf32>
    %6 = vector.shape_cast %5 : vector<1x6x64xf32> to vector<6x64xf32>
    %cst = arith.constant dense<0.000000e+00> : vector<128x64xf32>
    %7 = tpu.matmul %4, %6, %cst {dimension_numbers = #tpu.dot_dimension_numbers<[1], [0], [0], [1], [0, 0, 1, 1], [], []>} : vector<128x6xf32>, vector<6x64xf32>, vector<128x64xf32> -> vector<128x64xf32>
    %c0_6 = arith.constant 0 : index
    %c0_7 = arith.constant 0 : index
    %8 = vector.load %arg3[%c0_6, %c0_7] : memref<1x64xf32, #tpu.memory_space<vmem>>, vector<1x64xf32>
    %9 = vector.broadcast %8 : vector<1x64xf32> to vector<128x64xf32>
    %10 = arith.addf %7, %9 : vector<128x64xf32>
    %cst_8 = arith.constant 0.000000e+00 : f32
    %11 = vector.broadcast %cst_8 : f32 to vector<128x64xf32>
    %12 = arith.maximumf %10, %11 : vector<128x64xf32>
    %13 = arith.truncf %12 : vector<128x64xf32> to vector<128x64xbf16>
    %c0_9 = arith.constant 0 : index
    %c0_10 = arith.constant 0 : index
    %14 = vector.load %arg4[%c0_9, %c0_10] : memref<64x128xbf16, #tpu.memory_space<vmem>>, vector<64x128xbf16>
    %cst_11 = arith.constant dense<0.000000e+00> : vector<128x128xf32>
    %15 = tpu.matmul %13, %14, %cst_11 {dimension_numbers = #tpu.dot_dimension_numbers<[1], [0], [0], [1], [0, 0, 1, 1], [], []>} : vector<128x64xbf16>, vector<64x128xbf16>, vector<128x128xf32> -> vector<128x128xf32>
    %c0_12 = arith.constant 0 : index
    %c0_13 = arith.constant 0 : index
    %16 = vector.load %arg5[%c0_12, %c0_13] : memref<1x128xf32, #tpu.memory_space<vmem>>, vector<1x128xf32>
    %17 = vector.broadcast %16 : vector<1x128xf32> to vector<128x128xf32>
    %18 = arith.addf %15, %17 : vector<128x128xf32>
    %cst_14 = arith.constant 0.000000e+00 : f32
    %19 = vector.broadcast %cst_14 : f32 to vector<128x128xf32>
    %20 = arith.maximumf %18, %19 : vector<128x128xf32>
    %cst_15 = arith.constant 0xFF800000 : f32
    %21 = vector.broadcast %cst_15 : f32 to vector<1x1024xf32>
    %22 = vector.extract_strided_slice %20 {offsets = [0, 0], sizes = [64, 128], strides = [1, 1]} : vector<128x128xf32> to vector<64x128xf32>
    %23 = arith.truncf %22 : vector<64x128xf32> to vector<64x128xbf16>
    %c0_16 = arith.constant 0 : index
    %c0_17 = arith.constant 0 : index
    %24 = vector.load %arg6[%c0_16, %c0_17] : memref<128x1024xbf16, #tpu.memory_space<vmem>>, vector<128x1024xbf16>
    %cst_18 = arith.constant dense<0.000000e+00> : vector<64x1024xf32>
    %25 = tpu.matmul %23, %24, %cst_18 {dimension_numbers = #tpu.dot_dimension_numbers<[1], [0], [0], [1], [0, 0, 1, 1], [], []>} : vector<64x128xbf16>, vector<128x1024xbf16>, vector<64x1024xf32> -> vector<64x1024xf32>
    %cst_19 = arith.constant dense<0xFF800000> : vector<1024xf32>
    %26 = vector.multi_reduction <maximumf>, %25, %cst_19 [0] : vector<64x1024xf32> to vector<1024xf32>
    %27 = vector.shape_cast %26 : vector<1024xf32> to vector<1x1024xf32>
    %28 = arith.maximumf %21, %27 : vector<1x1024xf32>
    %29 = vector.extract_strided_slice %20 {offsets = [64, 0], sizes = [64, 128], strides = [1, 1]} : vector<128x128xf32> to vector<64x128xf32>
    %30 = arith.truncf %29 : vector<64x128xf32> to vector<64x128xbf16>
    %c0_20 = arith.constant 0 : index
    %c0_21 = arith.constant 0 : index
    %31 = vector.load %arg6[%c0_20, %c0_21] : memref<128x1024xbf16, #tpu.memory_space<vmem>>, vector<128x1024xbf16>
    %cst_22 = arith.constant dense<0.000000e+00> : vector<64x1024xf32>
    %32 = tpu.matmul %30, %31, %cst_22 {dimension_numbers = #tpu.dot_dimension_numbers<[1], [0], [0], [1], [0, 0, 1, 1], [], []>} : vector<64x128xbf16>, vector<128x1024xbf16>, vector<64x1024xf32> -> vector<64x1024xf32>
    %cst_23 = arith.constant dense<0xFF800000> : vector<1024xf32>
    %33 = vector.multi_reduction <maximumf>, %32, %cst_23 [0] : vector<64x1024xf32> to vector<1024xf32>
    %34 = vector.shape_cast %33 : vector<1024xf32> to vector<1x1024xf32>
    %35 = arith.maximumf %28, %34 : vector<1x1024xf32>
    %c0_24 = arith.constant 0 : index
    %c0_25 = arith.constant 0 : index
    %36 = vector.load %arg15[%c0_24, %c0_25] : memref<2x1024xf32, #tpu.memory_space<vmem>>, vector<1x1024xf32>
    %37 = arith.maximumf %36, %35 : vector<1x1024xf32>
    %c0_26 = arith.constant 0 : index
    %c0_27 = arith.constant 0 : index
    %38 = vector.load %arg15[%c0_26, %c0_27] : memref<2x1024xf32, #tpu.memory_space<vmem>>, vector<1x1024xf32>
    tpu.vector_store %arg15[%c0_26, %c0_27], %37 {strides = array<i32>} : memref<2x1024xf32, #tpu.memory_space<vmem>>, vector<1x1024xf32>,
    %c1 = arith.constant 1 : index
    %c0_28 = arith.constant 0 : index
    %c0_29 = arith.constant 0 : index
    %39 = vector.load %arg1[%c1, %c0_28, %c0_29] : memref<2x128x6xf32, #tpu.memory_space<vmem>>, vector<1x128x6xf32>
    %40 = vector.shape_cast %39 : vector<1x128x6xf32> to vector<128x6xf32>
    %c1_30 = arith.constant 1 : index
    %c0_31 = arith.constant 0 : index
    %c0_32 = arith.constant 0 : index
    %41 = vector.load %arg2[%c1_30, %c0_31, %c0_32] : memref<2x6x64xf32, #tpu.memory_space<vmem>>, vector<1x6x64xf32>
    %42 = vector.shape_cast %41 : vector<1x6x64xf32> to vector<6x64xf32>
    %cst_33 = arith.constant dense<0.000000e+00> : vector<128x64xf32>
    %43 = tpu.matmul %40, %42, %cst_33 {dimension_numbers = #tpu.dot_dimension_numbers<[1], [0], [0], [1], [0, 0, 1, 1], [], []>} : vector<128x6xf32>, vector<6x64xf32>, vector<128x64xf32> -> vector<128x64xf32>
    %c0_34 = arith.constant 0 : index
    %c0_35 = arith.constant 0 : index
    %44 = vector.load %arg3[%c0_34, %c0_35] : memref<1x64xf32, #tpu.memory_space<vmem>>, vector<1x64xf32>
    %45 = vector.broadcast %44 : vector<1x64xf32> to vector<128x64xf32>
    %46 = arith.addf %43, %45 : vector<128x64xf32>
    %cst_36 = arith.constant 0.000000e+00 : f32
    %47 = vector.broadcast %cst_36 : f32 to vector<128x64xf32>
    %48 = arith.maximumf %46, %47 : vector<128x64xf32>
    %49 = arith.truncf %48 : vector<128x64xf32> to vector<128x64xbf16>
    %c0_37 = arith.constant 0 : index
    %c0_38 = arith.constant 0 : index
    %50 = vector.load %arg4[%c0_37, %c0_38] : memref<64x128xbf16, #tpu.memory_space<vmem>>, vector<64x128xbf16>
    %cst_39 = arith.constant dense<0.000000e+00> : vector<128x128xf32>
    %51 = tpu.matmul %49, %50, %cst_39 {dimension_numbers = #tpu.dot_dimension_numbers<[1], [0], [0], [1], [0, 0, 1, 1], [], []>} : vector<128x64xbf16>, vector<64x128xbf16>, vector<128x128xf32> -> vector<128x128xf32>
    %c0_40 = arith.constant 0 : index
    %c0_41 = arith.constant 0 : index
    %52 = vector.load %arg5[%c0_40, %c0_41] : memref<1x128xf32, #tpu.memory_space<vmem>>, vector<1x128xf32>
    %53 = vector.broadcast %52 : vector<1x128xf32> to vector<128x128xf32>
    %54 = arith.addf %51, %53 : vector<128x128xf32>
    %cst_42 = arith.constant 0.000000e+00 : f32
    %55 = vector.broadcast %cst_42 : f32 to vector<128x128xf32>
    %56 = arith.maximumf %54, %55 : vector<128x128xf32>
    %cst_43 = arith.constant 0xFF800000 : f32
    %57 = vector.broadcast %cst_43 : f32 to vector<1x1024xf32>
    %58 = vector.extract_strided_slice %56 {offsets = [0, 0], sizes = [64, 128], strides = [1, 1]} : vector<128x128xf32> to vector<64x128xf32>
    %59 = arith.truncf %58 : vector<64x128xf32> to vector<64x128xbf16>
    %c0_44 = arith.constant 0 : index
    %c0_45 = arith.constant 0 : index
    %60 = vector.load %arg6[%c0_44, %c0_45] : memref<128x1024xbf16, #tpu.memory_space<vmem>>, vector<128x1024xbf16>
    %cst_46 = arith.constant dense<0.000000e+00> : vector<64x1024xf32>
    %61 = tpu.matmul %59, %60, %cst_46 {dimension_numbers = #tpu.dot_dimension_numbers<[1], [0], [0], [1], [0, 0, 1, 1], [], []>} : vector<64x128xbf16>, vector<128x1024xbf16>, vector<64x1024xf32> -> vector<64x1024xf32>
    %cst_47 = arith.constant dense<0xFF800000> : vector<1024xf32>
    %62 = vector.multi_reduction <maximumf>, %61, %cst_47 [0] : vector<64x1024xf32> to vector<1024xf32>
    %63 = vector.shape_cast %62 : vector<1024xf32> to vector<1x1024xf32>
    %64 = arith.maximumf %57, %63 : vector<1x1024xf32>
    %65 = vector.extract_strided_slice %56 {offsets = [64, 0], sizes = [64, 128], strides = [1, 1]} : vector<128x128xf32> to vector<64x128xf32>
    %66 = arith.truncf %65 : vector<64x128xf32> to vector<64x128xbf16>
    %c0_48 = arith.constant 0 : index
    %c0_49 = arith.constant 0 : index
    %67 = vector.load %arg6[%c0_48, %c0_49] : memref<128x1024xbf16, #tpu.memory_space<vmem>>, vector<128x1024xbf16>
    %cst_50 = arith.constant dense<0.000000e+00> : vector<64x1024xf32>
    %68 = tpu.matmul %66, %67, %cst_50 {dimension_numbers = #tpu.dot_dimension_numbers<[1], [0], [0], [1], [0, 0, 1, 1], [], []>} : vector<64x128xbf16>, vector<128x1024xbf16>, vector<64x1024xf32> -> vector<64x1024xf32>
    %cst_51 = arith.constant dense<0xFF800000> : vector<1024xf32>
    %69 = vector.multi_reduction <maximumf>, %68, %cst_51 [0] : vector<64x1024xf32> to vector<1024xf32>
    %70 = vector.shape_cast %69 : vector<1024xf32> to vector<1x1024xf32>
    %71 = arith.maximumf %64, %70 : vector<1x1024xf32>
    %c1_52 = arith.constant 1 : index
    %c0_53 = arith.constant 0 : index
    %72 = vector.load %arg15[%c1_52, %c0_53] : memref<2x1024xf32, #tpu.memory_space<vmem>>, vector<1x1024xf32>
    %73 = arith.maximumf %72, %71 : vector<1x1024xf32>
    %c1_54 = arith.constant 1 : index
    %c0_55 = arith.constant 0 : index
    %74 = vector.load %arg15[%c1_54, %c0_55] : memref<2x1024xf32, #tpu.memory_space<vmem>>, vector<1x1024xf32>
    tpu.vector_store %arg15[%c1_54, %c0_55], %73 {strides = array<i32>} : memref<2x1024xf32, #tpu.memory_space<vmem>>, vector<1x1024xf32>,
    %c3_i32 = arith.constant 3 : i32
    %75 = arith.cmpi eq, %arg0, %c3_i32 : i32
    %76 = arith.extui %75 : i1 to i32
    %c0_i32_56 = arith.constant 0 : i32
    %77 = arith.cmpi ne, %76, %c0_i32_56 : i32
    scf.if %77 {
      %c0_57 = arith.constant 0 : index
      %c0_58 = arith.constant 0 : index
      %78 = vector.load %arg15[%c0_57, %c0_58] : memref<2x1024xf32, #tpu.memory_space<vmem>>, vector<2x1024xf32>
      %c0_59 = arith.constant 0 : index
      %c0_60 = arith.constant 0 : index
      %79 = vector.load %arg7[%c0_59, %c0_60] : memref<1x1024xf32, #tpu.memory_space<vmem>>, vector<1x1024xf32>
      %80 = vector.broadcast %79 : vector<1x1024xf32> to vector<2x1024xf32>
      %81 = arith.addf %78, %80 : vector<2x1024xf32>
      %cst_61 = arith.constant 0.000000e+00 : f32
      %82 = vector.broadcast %cst_61 : f32 to vector<2x1024xf32>
      %83 = arith.maximumf %81, %82 : vector<2x1024xf32>
      %84 = arith.truncf %83 : vector<2x1024xf32> to vector<2x1024xbf16>
      %c0_62 = arith.constant 0 : index
      %c0_63 = arith.constant 0 : index
      %85 = vector.load %arg8[%c0_62, %c0_63] : memref<1024x512xbf16, #tpu.memory_space<vmem>>, vector<1024x512xbf16>
      %cst_64 = arith.constant dense<0.000000e+00> : vector<2x512xf32>
      %86 = tpu.matmul %84, %85, %cst_64 {dimension_numbers = #tpu.dot_dimension_numbers<[1], [0], [0], [1], [0, 0, 1, 1], [], []>} : vector<2x1024xbf16>, vector<1024x512xbf16>, vector<2x512xf32> -> vector<2x512xf32>
      %c0_65 = arith.constant 0 : index
      %c0_66 = arith.constant 0 : index
      %87 = vector.load %arg9[%c0_65, %c0_66] : memref<1x512xf32, #tpu.memory_space<vmem>>, vector<1x512xf32>
      %88 = vector.broadcast %87 : vector<1x512xf32> to vector<2x512xf32>
      %89 = arith.addf %86, %88 : vector<2x512xf32>
      %cst_67 = arith.constant 0.000000e+00 : f32
      %90 = vector.broadcast %cst_67 : f32 to vector<2x512xf32>
      %91 = arith.maximumf %89, %90 : vector<2x512xf32>
      %92 = arith.truncf %91 : vector<2x512xf32> to vector<2x512xbf16>
      %c0_68 = arith.constant 0 : index
      %c0_69 = arith.constant 0 : index
      %93 = vector.load %arg10[%c0_68, %c0_69] : memref<512x256xbf16, #tpu.memory_space<vmem>>, vector<512x256xbf16>
      %cst_70 = arith.constant dense<0.000000e+00> : vector<2x256xf32>
      %94 = tpu.matmul %92, %93, %cst_70 {dimension_numbers = #tpu.dot_dimension_numbers<[1], [0], [0], [1], [0, 0, 1, 1], [], []>} : vector<2x512xbf16>, vector<512x256xbf16>, vector<2x256xf32> -> vector<2x256xf32>
      %c0_71 = arith.constant 0 : index
      %c0_72 = arith.constant 0 : index
      %95 = vector.load %arg11[%c0_71, %c0_72] : memref<1x256xf32, #tpu.memory_space<vmem>>, vector<1x256xf32>
      %96 = vector.broadcast %95 : vector<1x256xf32> to vector<2x256xf32>
      %97 = arith.addf %94, %96 : vector<2x256xf32>
      %cst_73 = arith.constant 0.000000e+00 : f32
      %98 = vector.broadcast %cst_73 : f32 to vector<2x256xf32>
      %99 = arith.maximumf %97, %98 : vector<2x256xf32>
      %100 = arith.truncf %99 : vector<2x256xf32> to vector<2x256xbf16>
      %c0_74 = arith.constant 0 : index
      %c0_75 = arith.constant 0 : index
      %101 = vector.load %arg12[%c0_74, %c0_75] : memref<256x9xbf16, #tpu.memory_space<vmem>>, vector<256x9xbf16>
      %cst_76 = arith.constant dense<0.000000e+00> : vector<2x9xf32>
      %102 = tpu.matmul %100, %101, %cst_76 {dimension_numbers = #tpu.dot_dimension_numbers<[1], [0], [0], [1], [0, 0, 1, 1], [], []>} : vector<2x256xbf16>, vector<256x9xbf16>, vector<2x9xf32> -> vector<2x9xf32>
      %c0_77 = arith.constant 0 : index
      %c0_78 = arith.constant 0 : index
      %103 = vector.load %arg13[%c0_77, %c0_78] : memref<1x9xf32, #tpu.memory_space<vmem>>, vector<1x9xf32>
      %104 = vector.broadcast %103 : vector<1x9xf32> to vector<2x9xf32>
      %105 = arith.addf %102, %104 : vector<2x9xf32>
      %c0_79 = arith.constant 0 : index
      %c0_80 = arith.constant 0 : index
      %106 = vector.load %arg14[%c0_79, %c0_80] : memref<2x9xf32, #tpu.memory_space<vmem>>, vector<2x9xf32>
      tpu.vector_store %arg14[%c0_79, %c0_80], %105 {strides = array<i32>} : memref<2x9xf32, #tpu.memory_space<vmem>>, vector<2x9xf32>,
    } else {
    }
    return
  }
  func.func @transform_0(%arg0: i32) -> (i32, i32, i32) {
    %c0_i32 = arith.constant 0 : i32
    %c0_i32_0 = arith.constant 0 : i32
    %c0_i32_1 = arith.constant 0 : i32
    return %c0_i32, %arg0, %c0_i32_0 : i32, i32, i32
  }
  func.func @transform_1(%arg0: i32) -> (i32, i32, i32) {
    %c0_i32 = arith.constant 0 : i32
    %c0_i32_0 = arith.constant 0 : i32
    %c0_i32_1 = arith.constant 0 : i32
    %c0_i32_2 = arith.constant 0 : i32
    return %c0_i32, %c0_i32_0, %c0_i32_1 : i32, i32, i32
  }
  func.func @transform_2(%arg0: i32) -> (i32, i32) {
    %c0_i32 = arith.constant 0 : i32
    %c0_i32_0 = arith.constant 0 : i32
    %c0_i32_1 = arith.constant 0 : i32
    return %c0_i32, %c0_i32_0 : i32, i32
  }
  func.func @transform_3(%arg0: i32) -> (i32, i32) {
    %c0_i32 = arith.constant 0 : i32
    %c0_i32_0 = arith.constant 0 : i32
    %c0_i32_1 = arith.constant 0 : i32
    return %c0_i32, %c0_i32_0 : i32, i32
  }
  func.func @transform_4(%arg0: i32) -> (i32, i32) {
    %c0_i32 = arith.constant 0 : i32
    %c0_i32_0 = arith.constant 0 : i32
    %c0_i32_1 = arith.constant 0 : i32
    return %c0_i32, %c0_i32_0 : i32, i32
  }
  func.func @transform_5(%arg0: i32) -> (i32, i32) {
    %c0_i32 = arith.constant 0 : i32
    %c0_i32_0 = arith.constant 0 : i32
    %c0_i32_1 = arith.constant 0 : i32
    return %c0_i32, %c0_i32_0 : i32, i32
  }
  func.func @transform_6(%arg0: i32) -> (i32, i32) {
    %c0_i32 = arith.constant 0 : i32
    %c0_i32_0 = arith.constant 0 : i32
    %c0_i32_1 = arith.constant 0 : i32
    return %c0_i32, %c0_i32_0 : i32, i32
  }
  func.func @transform_7(%arg0: i32) -> (i32, i32) {
    %c0_i32 = arith.constant 0 : i32
    %c0_i32_0 = arith.constant 0 : i32
    %c0_i32_1 = arith.constant 0 : i32
    return %c0_i32, %c0_i32_0 : i32, i32
  }
  func.func @transform_8(%arg0: i32) -> (i32, i32) {
    %c0_i32 = arith.constant 0 : i32
    %c0_i32_0 = arith.constant 0 : i32
    %c0_i32_1 = arith.constant 0 : i32
    return %c0_i32, %c0_i32_0 : i32, i32
  }
  func.func @transform_9(%arg0: i32) -> (i32, i32) {
    %c0_i32 = arith.constant 0 : i32
    %c0_i32_0 = arith.constant 0 : i32
    %c0_i32_1 = arith.constant 0 : i32
    return %c0_i32, %c0_i32_0 : i32, i32
  }
  func.func @transform_10(%arg0: i32) -> (i32, i32) {
    %c0_i32 = arith.constant 0 : i32
    %c0_i32_0 = arith.constant 0 : i32
    %c0_i32_1 = arith.constant 0 : i32
    return %c0_i32, %c0_i32_0 : i32, i32
  }
  func.func @transform_11(%arg0: i32) -> (i32, i32) {
    %c0_i32 = arith.constant 0 : i32
    %c0_i32_0 = arith.constant 0 : i32
    %c0_i32_1 = arith.constant 0 : i32
    return %c0_i32, %c0_i32_0 : i32, i32
  }
  func.func @transform_12(%arg0: i32) -> (i32, i32) {
    %c0_i32 = arith.constant 0 : i32
    %c0_i32_0 = arith.constant 0 : i32
    %c0_i32_1 = arith.constant 0 : i32
    return %c0_i32, %c0_i32_0 : i32, i32
  }
  func.func @transform_13(%arg0: i32) -> (i32, i32) {
    %c0_i32 = arith.constant 0 : i32
    %c0_i32_0 = arith.constant 0 : i32
    %c0_i32_1 = arith.constant 0 : i32
    return %c0_i32, %c0_i32_0 : i32, i32
  }
}

module attributes {stable_mosaic.version = 11 : i64} {
  func.func @_trunk_kernel(%arg0: i32, %arg1: memref<2x128x6xf32, #tpu.memory_space<vmem>>, %arg2: memref<2x6x64xf32, #tpu.memory_space<vmem>>, %arg3: memref<1x64xf32, #tpu.memory_space<vmem>>, %arg4: memref<64x128xbf16, #tpu.memory_space<vmem>>, %arg5: memref<1x128xf32, #tpu.memory_space<vmem>>, %arg6: memref<128x1024xbf16, #tpu.memory_space<vmem>>, %arg7: memref<1x1024xf32, #tpu.memory_space<vmem>>, %arg8: memref<2x1024xf32, #tpu.memory_space<vmem>>, %arg9: memref<2x1024xf32, #tpu.memory_space<vmem>>) attributes {dimension_semantics = [#tpu.dimension_semantics<arbitrary>], iteration_bounds = array<i64: 4>, scalar_prefetch = 0 : i64, scratch_operands = 1 : i64, tpu.core_type = #tpu.core_type<tc>, window_params = [{transform_indices = @transform_0, window_bounds = array<i64: 2, 128, 6>}, {pipeline_mode = #tpu.pipeline_mode<synchronous>, transform_indices = @transform_1, window_bounds = array<i64: 2, 6, 64>}, {pipeline_mode = #tpu.pipeline_mode<synchronous>, transform_indices = @transform_2, window_bounds = array<i64: 1, 64>}, {pipeline_mode = #tpu.pipeline_mode<synchronous>, transform_indices = @transform_3, window_bounds = array<i64: 64, 128>}, {pipeline_mode = #tpu.pipeline_mode<synchronous>, transform_indices = @transform_4, window_bounds = array<i64: 1, 128>}, {pipeline_mode = #tpu.pipeline_mode<synchronous>, transform_indices = @transform_5, window_bounds = array<i64: 128, 1024>}, {pipeline_mode = #tpu.pipeline_mode<synchronous>, transform_indices = @transform_6, window_bounds = array<i64: 1, 1024>}, {pipeline_mode = #tpu.pipeline_mode<synchronous>, transform_indices = @transform_7, window_bounds = array<i64: 2, 1024>}]} {
    %c0_i32 = arith.constant 0 : i32
    %0 = arith.cmpi eq, %arg0, %c0_i32 : i32
    %1 = arith.extui %0 : i1 to i32
    %c0_i32_0 = arith.constant 0 : i32
    %2 = arith.cmpi ne, %1, %c0_i32_0 : i32
    scf.if %2 {
      %cst_57 = arith.constant 0xFF800000 : f32
      %78 = vector.broadcast %cst_57 : f32 to vector<2x1024xf32>
      %c0_58 = arith.constant 0 : index
      %c0_59 = arith.constant 0 : index
      %79 = vector.load %arg9[%c0_58, %c0_59] : memref<2x1024xf32, #tpu.memory_space<vmem>>, vector<2x1024xf32>
      tpu.vector_store %arg9[%c0_58, %c0_59], %78 {strides = array<i32>} : memref<2x1024xf32, #tpu.memory_space<vmem>>, vector<2x1024xf32>,
    } else {
    }
    %c0 = arith.constant 0 : index
    %c0_1 = arith.constant 0 : index
    %c0_2 = arith.constant 0 : index
    %3 = vector.load %arg1[%c0, %c0_1, %c0_2] : memref<2x128x6xf32, #tpu.memory_space<vmem>>, vector<1x128x6xf32>
    %4 = vector.shape_cast %3 : vector<1x128x6xf32> to vector<128x6xf32>
    %c0_3 = arith.constant 0 : index
    %c0_4 = arith.constant 0 : index
    %c0_5 = arith.constant 0 : index
    %5 = vector.load %arg2[%c0_3, %c0_4, %c0_5] : memref<2x6x64xf32, #tpu.memory_space<vmem>>, vector<1x6x64xf32>
    %6 = vector.shape_cast %5 : vector<1x6x64xf32> to vector<6x64xf32>
    %cst = arith.constant dense<0.000000e+00> : vector<128x64xf32>
    %7 = tpu.matmul %4, %6, %cst {dimension_numbers = #tpu.dot_dimension_numbers<[1], [0], [0], [1], [0, 0, 1, 1], [], []>} : vector<128x6xf32>, vector<6x64xf32>, vector<128x64xf32> -> vector<128x64xf32>
    %c0_6 = arith.constant 0 : index
    %c0_7 = arith.constant 0 : index
    %8 = vector.load %arg3[%c0_6, %c0_7] : memref<1x64xf32, #tpu.memory_space<vmem>>, vector<1x64xf32>
    %9 = vector.broadcast %8 : vector<1x64xf32> to vector<128x64xf32>
    %10 = arith.addf %7, %9 : vector<128x64xf32>
    %cst_8 = arith.constant 0.000000e+00 : f32
    %11 = vector.broadcast %cst_8 : f32 to vector<128x64xf32>
    %12 = arith.maximumf %10, %11 : vector<128x64xf32>
    %13 = arith.truncf %12 : vector<128x64xf32> to vector<128x64xbf16>
    %c0_9 = arith.constant 0 : index
    %c0_10 = arith.constant 0 : index
    %14 = vector.load %arg4[%c0_9, %c0_10] : memref<64x128xbf16, #tpu.memory_space<vmem>>, vector<64x128xbf16>
    %cst_11 = arith.constant dense<0.000000e+00> : vector<128x128xf32>
    %15 = tpu.matmul %13, %14, %cst_11 {dimension_numbers = #tpu.dot_dimension_numbers<[1], [0], [0], [1], [0, 0, 1, 1], [], []>} : vector<128x64xbf16>, vector<64x128xbf16>, vector<128x128xf32> -> vector<128x128xf32>
    %c0_12 = arith.constant 0 : index
    %c0_13 = arith.constant 0 : index
    %16 = vector.load %arg5[%c0_12, %c0_13] : memref<1x128xf32, #tpu.memory_space<vmem>>, vector<1x128xf32>
    %17 = vector.broadcast %16 : vector<1x128xf32> to vector<128x128xf32>
    %18 = arith.addf %15, %17 : vector<128x128xf32>
    %cst_14 = arith.constant 0.000000e+00 : f32
    %19 = vector.broadcast %cst_14 : f32 to vector<128x128xf32>
    %20 = arith.maximumf %18, %19 : vector<128x128xf32>
    %cst_15 = arith.constant 0xFF800000 : f32
    %21 = vector.broadcast %cst_15 : f32 to vector<1x1024xf32>
    %22 = vector.extract_strided_slice %20 {offsets = [0, 0], sizes = [64, 128], strides = [1, 1]} : vector<128x128xf32> to vector<64x128xf32>
    %23 = arith.truncf %22 : vector<64x128xf32> to vector<64x128xbf16>
    %c0_16 = arith.constant 0 : index
    %c0_17 = arith.constant 0 : index
    %24 = vector.load %arg6[%c0_16, %c0_17] : memref<128x1024xbf16, #tpu.memory_space<vmem>>, vector<128x1024xbf16>
    %cst_18 = arith.constant dense<0.000000e+00> : vector<64x1024xf32>
    %25 = tpu.matmul %23, %24, %cst_18 {dimension_numbers = #tpu.dot_dimension_numbers<[1], [0], [0], [1], [0, 0, 1, 1], [], []>} : vector<64x128xbf16>, vector<128x1024xbf16>, vector<64x1024xf32> -> vector<64x1024xf32>
    %cst_19 = arith.constant dense<0xFF800000> : vector<1024xf32>
    %26 = vector.multi_reduction <maximumf>, %25, %cst_19 [0] : vector<64x1024xf32> to vector<1024xf32>
    %27 = vector.shape_cast %26 : vector<1024xf32> to vector<1x1024xf32>
    %28 = arith.maximumf %21, %27 : vector<1x1024xf32>
    %29 = vector.extract_strided_slice %20 {offsets = [64, 0], sizes = [64, 128], strides = [1, 1]} : vector<128x128xf32> to vector<64x128xf32>
    %30 = arith.truncf %29 : vector<64x128xf32> to vector<64x128xbf16>
    %c0_20 = arith.constant 0 : index
    %c0_21 = arith.constant 0 : index
    %31 = vector.load %arg6[%c0_20, %c0_21] : memref<128x1024xbf16, #tpu.memory_space<vmem>>, vector<128x1024xbf16>
    %cst_22 = arith.constant dense<0.000000e+00> : vector<64x1024xf32>
    %32 = tpu.matmul %30, %31, %cst_22 {dimension_numbers = #tpu.dot_dimension_numbers<[1], [0], [0], [1], [0, 0, 1, 1], [], []>} : vector<64x128xbf16>, vector<128x1024xbf16>, vector<64x1024xf32> -> vector<64x1024xf32>
    %cst_23 = arith.constant dense<0xFF800000> : vector<1024xf32>
    %33 = vector.multi_reduction <maximumf>, %32, %cst_23 [0] : vector<64x1024xf32> to vector<1024xf32>
    %34 = vector.shape_cast %33 : vector<1024xf32> to vector<1x1024xf32>
    %35 = arith.maximumf %28, %34 : vector<1x1024xf32>
    %c0_24 = arith.constant 0 : index
    %c0_25 = arith.constant 0 : index
    %36 = vector.load %arg9[%c0_24, %c0_25] : memref<2x1024xf32, #tpu.memory_space<vmem>>, vector<1x1024xf32>
    %37 = arith.maximumf %36, %35 : vector<1x1024xf32>
    %c0_26 = arith.constant 0 : index
    %c0_27 = arith.constant 0 : index
    %38 = vector.load %arg9[%c0_26, %c0_27] : memref<2x1024xf32, #tpu.memory_space<vmem>>, vector<1x1024xf32>
    tpu.vector_store %arg9[%c0_26, %c0_27], %37 {strides = array<i32>} : memref<2x1024xf32, #tpu.memory_space<vmem>>, vector<1x1024xf32>,
    %c1 = arith.constant 1 : index
    %c0_28 = arith.constant 0 : index
    %c0_29 = arith.constant 0 : index
    %39 = vector.load %arg1[%c1, %c0_28, %c0_29] : memref<2x128x6xf32, #tpu.memory_space<vmem>>, vector<1x128x6xf32>
    %40 = vector.shape_cast %39 : vector<1x128x6xf32> to vector<128x6xf32>
    %c1_30 = arith.constant 1 : index
    %c0_31 = arith.constant 0 : index
    %c0_32 = arith.constant 0 : index
    %41 = vector.load %arg2[%c1_30, %c0_31, %c0_32] : memref<2x6x64xf32, #tpu.memory_space<vmem>>, vector<1x6x64xf32>
    %42 = vector.shape_cast %41 : vector<1x6x64xf32> to vector<6x64xf32>
    %cst_33 = arith.constant dense<0.000000e+00> : vector<128x64xf32>
    %43 = tpu.matmul %40, %42, %cst_33 {dimension_numbers = #tpu.dot_dimension_numbers<[1], [0], [0], [1], [0, 0, 1, 1], [], []>} : vector<128x6xf32>, vector<6x64xf32>, vector<128x64xf32> -> vector<128x64xf32>
    %c0_34 = arith.constant 0 : index
    %c0_35 = arith.constant 0 : index
    %44 = vector.load %arg3[%c0_34, %c0_35] : memref<1x64xf32, #tpu.memory_space<vmem>>, vector<1x64xf32>
    %45 = vector.broadcast %44 : vector<1x64xf32> to vector<128x64xf32>
    %46 = arith.addf %43, %45 : vector<128x64xf32>
    %cst_36 = arith.constant 0.000000e+00 : f32
    %47 = vector.broadcast %cst_36 : f32 to vector<128x64xf32>
    %48 = arith.maximumf %46, %47 : vector<128x64xf32>
    %49 = arith.truncf %48 : vector<128x64xf32> to vector<128x64xbf16>
    %c0_37 = arith.constant 0 : index
    %c0_38 = arith.constant 0 : index
    %50 = vector.load %arg4[%c0_37, %c0_38] : memref<64x128xbf16, #tpu.memory_space<vmem>>, vector<64x128xbf16>
    %cst_39 = arith.constant dense<0.000000e+00> : vector<128x128xf32>
    %51 = tpu.matmul %49, %50, %cst_39 {dimension_numbers = #tpu.dot_dimension_numbers<[1], [0], [0], [1], [0, 0, 1, 1], [], []>} : vector<128x64xbf16>, vector<64x128xbf16>, vector<128x128xf32> -> vector<128x128xf32>
    %c0_40 = arith.constant 0 : index
    %c0_41 = arith.constant 0 : index
    %52 = vector.load %arg5[%c0_40, %c0_41] : memref<1x128xf32, #tpu.memory_space<vmem>>, vector<1x128xf32>
    %53 = vector.broadcast %52 : vector<1x128xf32> to vector<128x128xf32>
    %54 = arith.addf %51, %53 : vector<128x128xf32>
    %cst_42 = arith.constant 0.000000e+00 : f32
    %55 = vector.broadcast %cst_42 : f32 to vector<128x128xf32>
    %56 = arith.maximumf %54, %55 : vector<128x128xf32>
    %cst_43 = arith.constant 0xFF800000 : f32
    %57 = vector.broadcast %cst_43 : f32 to vector<1x1024xf32>
    %58 = vector.extract_strided_slice %56 {offsets = [0, 0], sizes = [64, 128], strides = [1, 1]} : vector<128x128xf32> to vector<64x128xf32>
    %59 = arith.truncf %58 : vector<64x128xf32> to vector<64x128xbf16>
    %c0_44 = arith.constant 0 : index
    %c0_45 = arith.constant 0 : index
    %60 = vector.load %arg6[%c0_44, %c0_45] : memref<128x1024xbf16, #tpu.memory_space<vmem>>, vector<128x1024xbf16>
    %cst_46 = arith.constant dense<0.000000e+00> : vector<64x1024xf32>
    %61 = tpu.matmul %59, %60, %cst_46 {dimension_numbers = #tpu.dot_dimension_numbers<[1], [0], [0], [1], [0, 0, 1, 1], [], []>} : vector<64x128xbf16>, vector<128x1024xbf16>, vector<64x1024xf32> -> vector<64x1024xf32>
    %cst_47 = arith.constant dense<0xFF800000> : vector<1024xf32>
    %62 = vector.multi_reduction <maximumf>, %61, %cst_47 [0] : vector<64x1024xf32> to vector<1024xf32>
    %63 = vector.shape_cast %62 : vector<1024xf32> to vector<1x1024xf32>
    %64 = arith.maximumf %57, %63 : vector<1x1024xf32>
    %65 = vector.extract_strided_slice %56 {offsets = [64, 0], sizes = [64, 128], strides = [1, 1]} : vector<128x128xf32> to vector<64x128xf32>
    %66 = arith.truncf %65 : vector<64x128xf32> to vector<64x128xbf16>
    %c0_48 = arith.constant 0 : index
    %c0_49 = arith.constant 0 : index
    %67 = vector.load %arg6[%c0_48, %c0_49] : memref<128x1024xbf16, #tpu.memory_space<vmem>>, vector<128x1024xbf16>
    %cst_50 = arith.constant dense<0.000000e+00> : vector<64x1024xf32>
    %68 = tpu.matmul %66, %67, %cst_50 {dimension_numbers = #tpu.dot_dimension_numbers<[1], [0], [0], [1], [0, 0, 1, 1], [], []>} : vector<64x128xbf16>, vector<128x1024xbf16>, vector<64x1024xf32> -> vector<64x1024xf32>
    %cst_51 = arith.constant dense<0xFF800000> : vector<1024xf32>
    %69 = vector.multi_reduction <maximumf>, %68, %cst_51 [0] : vector<64x1024xf32> to vector<1024xf32>
    %70 = vector.shape_cast %69 : vector<1024xf32> to vector<1x1024xf32>
    %71 = arith.maximumf %64, %70 : vector<1x1024xf32>
    %c1_52 = arith.constant 1 : index
    %c0_53 = arith.constant 0 : index
    %72 = vector.load %arg9[%c1_52, %c0_53] : memref<2x1024xf32, #tpu.memory_space<vmem>>, vector<1x1024xf32>
    %73 = arith.maximumf %72, %71 : vector<1x1024xf32>
    %c1_54 = arith.constant 1 : index
    %c0_55 = arith.constant 0 : index
    %74 = vector.load %arg9[%c1_54, %c0_55] : memref<2x1024xf32, #tpu.memory_space<vmem>>, vector<1x1024xf32>
    tpu.vector_store %arg9[%c1_54, %c0_55], %73 {strides = array<i32>} : memref<2x1024xf32, #tpu.memory_space<vmem>>, vector<1x1024xf32>,
    %c3_i32 = arith.constant 3 : i32
    %75 = arith.cmpi eq, %arg0, %c3_i32 : i32
    %76 = arith.extui %75 : i1 to i32
    %c0_i32_56 = arith.constant 0 : i32
    %77 = arith.cmpi ne, %76, %c0_i32_56 : i32
    scf.if %77 {
      %c0_57 = arith.constant 0 : index
      %c0_58 = arith.constant 0 : index
      %78 = vector.load %arg9[%c0_57, %c0_58] : memref<2x1024xf32, #tpu.memory_space<vmem>>, vector<2x1024xf32>
      %c0_59 = arith.constant 0 : index
      %c0_60 = arith.constant 0 : index
      %79 = vector.load %arg7[%c0_59, %c0_60] : memref<1x1024xf32, #tpu.memory_space<vmem>>, vector<1x1024xf32>
      %80 = vector.broadcast %79 : vector<1x1024xf32> to vector<2x1024xf32>
      %81 = arith.addf %78, %80 : vector<2x1024xf32>
      %c0_61 = arith.constant 0 : index
      %c0_62 = arith.constant 0 : index
      %82 = vector.load %arg8[%c0_61, %c0_62] : memref<2x1024xf32, #tpu.memory_space<vmem>>, vector<2x1024xf32>
      tpu.vector_store %arg8[%c0_61, %c0_62], %81 {strides = array<i32>} : memref<2x1024xf32, #tpu.memory_space<vmem>>, vector<2x1024xf32>,
    } else {
    }
    return
  }
  func.func @transform_0(%arg0: i32) -> (i32, i32, i32) {
    %c0_i32 = arith.constant 0 : i32
    %c0_i32_0 = arith.constant 0 : i32
    %c0_i32_1 = arith.constant 0 : i32
    return %c0_i32, %arg0, %c0_i32_0 : i32, i32, i32
  }
  func.func @transform_1(%arg0: i32) -> (i32, i32, i32) {
    %c0_i32 = arith.constant 0 : i32
    %c0_i32_0 = arith.constant 0 : i32
    %c0_i32_1 = arith.constant 0 : i32
    %c0_i32_2 = arith.constant 0 : i32
    return %c0_i32, %c0_i32_0, %c0_i32_1 : i32, i32, i32
  }
  func.func @transform_2(%arg0: i32) -> (i32, i32) {
    %c0_i32 = arith.constant 0 : i32
    %c0_i32_0 = arith.constant 0 : i32
    %c0_i32_1 = arith.constant 0 : i32
    return %c0_i32, %c0_i32_0 : i32, i32
  }
  func.func @transform_3(%arg0: i32) -> (i32, i32) {
    %c0_i32 = arith.constant 0 : i32
    %c0_i32_0 = arith.constant 0 : i32
    %c0_i32_1 = arith.constant 0 : i32
    return %c0_i32, %c0_i32_0 : i32, i32
  }
  func.func @transform_4(%arg0: i32) -> (i32, i32) {
    %c0_i32 = arith.constant 0 : i32
    %c0_i32_0 = arith.constant 0 : i32
    %c0_i32_1 = arith.constant 0 : i32
    return %c0_i32, %c0_i32_0 : i32, i32
  }
  func.func @transform_5(%arg0: i32) -> (i32, i32) {
    %c0_i32 = arith.constant 0 : i32
    %c0_i32_0 = arith.constant 0 : i32
    %c0_i32_1 = arith.constant 0 : i32
    return %c0_i32, %c0_i32_0 : i32, i32
  }
  func.func @transform_6(%arg0: i32) -> (i32, i32) {
    %c0_i32 = arith.constant 0 : i32
    %c0_i32_0 = arith.constant 0 : i32
    %c0_i32_1 = arith.constant 0 : i32
    return %c0_i32, %c0_i32_0 : i32, i32
  }
  func.func @transform_7(%arg0: i32) -> (i32, i32) {
    %c0_i32 = arith.constant 0 : i32
    %c0_i32_0 = arith.constant 0 : i32
    %c0_i32_1 = arith.constant 0 : i32
    return %c0_i32, %c0_i32_0 : i32, i32
  }
}

</mosaic_0001>

<bundles_post_ra>
// kernel: pointnet_encoder_forward.3
= control target key start
LH: loop header
LB: loop body
LE: loop exit
PB: predicated region body
PF: predicated region fallthrough
CT: control target
= control target key end

     0   :  { %12 = vsyncpa [#allocation5], 0  ;;  %s4437_s24 = smov 0   ;;  %s4439_s25 = smov 0   ;;  %s5913_s0 = inlined_call_operand.vmem [shape: f32[2,512,6], index: 0, kind: input, shape index: {}]   ;;  %s5914_s1 = inlined_call_operand.vmem [shape: f32[2,6,64], index: 1, kind: input, shape index: {}]   ;;  %s5915_s2 = inlined_call_operand.vmem [shape: f32[1,64], index: 2, kind: input, shape index: {}]   ;;  %s5916_s3 = inlined_call_operand.vmem [shape: bf16[64,128], index: 3, kind: input, shape index: {}]   ;;  %s5917_s4 = inlined_call_operand.vmem [shape: f32[1,128], index: 4, kind: input, shape index: {}]   ;;  %s5918_s5 = inlined_call_operand.vmem [shape: bf16[128,1024], index: 5, kind: input, shape index: {}]   ;;  %s5919_s6 = inlined_call_operand.vmem [shape: f32[1,1024], index: 6, kind: input, shape index: {}]   ;;  %s5920_s7 = inlined_call_operand.hbm [shape: f32[2,1024], index: 7, kind: output, shape index: {}]  }
   0x1   :  { %s4441_s26 = smov 0  }
   0x2 LB: > { %s4453_s27 = sadd.s32 4294967295, %s4390_s26   ;;  %s4456_s28 = sadd.s32 1, %s4390_s26   ;;  %s4390_s26 = sphi %s4441_s26, %s6024_s26   ;;  %s4386_s25 = sphi %s4439_s25, %s6023_s25   ;;  %s4382_s24 = sphi %s4437_s24, %s6022_s24  }
   0x3   : > { %s22_s29 = ssub.s32 %s4390_s26, %s4456_s28  ;;  %s25_s30 = sadd.s32 1, %s4386_s25 }
   0x4   : > { %p23_p0 = scmp.eq.s32.totalorder %s22_s29, 0  ;;  %p32_p1 = scmp.ne.s32.totalorder %s4386_s25, %s4382_s24 }
   0x5   : > { %p33_p2 = scmp.eq.s32.totalorder %s4390_s26, 0  ;;  %p3919_p4 = scmp.ge.s32.totalorder %s4390_s26, 4 }
   0x6   : > { %s4465_s8 = scalar_select %p23_p0, %s4386_s25, %s25_s30  }
   0x7   : > { %p34_p3 = por %p33_p2, %p32_p1  ;;  %223 = sbr.rel (%p3919_p4) target bundleno = 32 (0x20), region = 40 }
   0xc   : > { %226 = sbr.rel (!%p34_p3) target bundleno = 32 (0x20), region = 44  ;;  %s228_s9 = sand.u32 (%p34_p3), 1, %s4386_s25  }
   0xd   : > { %s4138_s10 = sshll.u32 (%p34_p3), %s4390_s26, 7  ;;  %s3920_s11 = sshll.u32 (%p34_p3), %s228_s9, 8 }
   0xe   : > { %s4473_s14 = scalar_lea.vmem (%p34_p3), %s5913_s0, %s4138_s10  ;;  %s4478_s15 = scalar_lea.vmem (%p34_p3), [#allocation3], %s3920_s11 }
   0xf   : > { %v324_v0 = vld [vmem:[%s4473_s14] sm:$0xff] (%p34_p3)  ;;  %v326_v1 = vld [vmem:[%s4473_s14 + $0x8] sm:$0xff] (%p34_p3)  ;;  %v328_v2 = vld [vmem:[%s4473_s14 + $0x10] sm:$0xff] (%p34_p3) }
  0x10   : > { %325 = vst [vmem:[%s4478_s15] sm:$0xff] (%p34_p3), %v324_v0  ;;  %327 = vst [vmem:[%s4478_s15 + $0x8] sm:$0xff] (%p34_p3), %v326_v1  ;;  %v330_v3 = vld [vmem:[%s4473_s14 + $0x18] sm:$0xff] (%p34_p3)  ;;  %v332_v4 = vld [vmem:[%s4473_s14 + $0x20] sm:$0xff] (%p34_p3) }
  0x11   : > { %329 = vst [vmem:[%s4478_s15 + $0x10] sm:$0xff] %v328_v2  ;;  %v334_v5 = vld [vmem:[%s4473_s14 + $0x28] sm:$0xff]  ;;  %331 = vst [vmem:[%s4478_s15 + $0x18] sm:$0xff] %v330_v3  ;;  %v336_v6 = vld [vmem:[%s4473_s14 + $0x30] sm:$0xff] }
  0x12   : > { %333 = vst [vmem:[%s4478_s15 + $0x20] sm:$0xff] %v332_v4  ;;  %335 = vst [vmem:[%s4478_s15 + $0x28] sm:$0xff] %v334_v5  ;;  %v338_v7 = vld [vmem:[%s4473_s14 + $0x38] sm:$0xff]  ;;  %v340_v8 = vld [vmem:[%s4473_s14 + $0x40] sm:$0xff] }
  0x13   : > { %337 = vst [vmem:[%s4478_s15 + $0x30] sm:$0xff] %v336_v6  ;;  %339 = vst [vmem:[%s4478_s15 + $0x38] sm:$0xff] %v338_v7  ;;  %v342_v9 = vld [vmem:[%s4473_s14 + $0x48] sm:$0xff]  ;;  %v344_v10 = vld [vmem:[%s4473_s14 + $0x50] sm:$0xff] }
  0x14   : > { %341 = vst [vmem:[%s4478_s15 + $0x40] sm:$0xff] %v340_v8  ;;  %v346_v11 = vld [vmem:[%s4473_s14 + $0x58] sm:$0xff]  ;;  %343 = vst [vmem:[%s4478_s15 + $0x48] sm:$0xff] %v342_v9  ;;  %v348_v12 = vld [vmem:[%s4473_s14 + $0x60] sm:$0xff] }
  0x15   : > { %345 = vst [vmem:[%s4478_s15 + $0x50] sm:$0xff] %v344_v10  ;;  %347 = vst [vmem:[%s4478_s15 + $0x58] sm:$0xff] %v346_v11  ;;  %v350_v13 = vld [vmem:[%s4473_s14 + $0x68] sm:$0xff]  ;;  %v352_v14 = vld [vmem:[%s4473_s14 + $0x70] sm:$0xff] }
  0x16   : > { %349 = vst [vmem:[%s4478_s15 + $0x60] sm:$0xff] %v348_v12  ;;  %351 = vst [vmem:[%s4478_s15 + $0x68] sm:$0xff] %v350_v13  ;;  %v354_v15 = vld [vmem:[%s4473_s14 + $0x78] sm:$0xff]  ;;  %v356_v16 = vld [vmem:[%s4473_s14 + $0x200] sm:$0xff] }
  0x17   : > { %353 = vst [vmem:[%s4478_s15 + $0x70] sm:$0xff] %v352_v14  ;;  %v358_v17 = vld [vmem:[%s4473_s14 + $0x208] sm:$0xff]  ;;  %355 = vst [vmem:[%s4478_s15 + $0x78] sm:$0xff] %v354_v15  ;;  %v360_v18 = vld [vmem:[%s4473_s14 + $0x210] sm:$0xff] }
  0x18   : > { %357 = vst [vmem:[%s4478_s15 + $0x80] sm:$0xff] %v356_v16  ;;  %359 = vst [vmem:[%s4478_s15 + $0x88] sm:$0xff] %v358_v17  ;;  %v362_v19 = vld [vmem:[%s4473_s14 + $0x218] sm:$0xff]  ;;  %v364_v20 = vld [vmem:[%s4473_s14 + $0x220] sm:$0xff] }
  0x19   : > { %361 = vst [vmem:[%s4478_s15 + $0x90] sm:$0xff] %v360_v18  ;;  %363 = vst [vmem:[%s4478_s15 + $0x98] sm:$0xff] %v362_v19  ;;  %v366_v21 = vld [vmem:[%s4473_s14 + $0x228] sm:$0xff]  ;;  %v368_v22 = vld [vmem:[%s4473_s14 + $0x230] sm:$0xff] }
  0x1a   : > { %365 = vst [vmem:[%s4478_s15 + $0xa0] sm:$0xff] %v364_v20  ;;  %v370_v23 = vld [vmem:[%s4473_s14 + $0x238] sm:$0xff]  ;;  %367 = vst [vmem:[%s4478_s15 + $0xa8] sm:$0xff] %v366_v21  ;;  %v372_v24 = vld [vmem:[%s4473_s14 + $0x240] sm:$0xff] }
  0x1b   : > { %369 = vst [vmem:[%s4478_s15 + $0xb0] sm:$0xff] %v368_v22  ;;  %371 = vst [vmem:[%s4478_s15 + $0xb8] sm:$0xff] %v370_v23  ;;  %v374_v25 = vld [vmem:[%s4473_s14 + $0x248] sm:$0xff]  ;;  %v376_v26 = vld [vmem:[%s4473_s14 + $0x250] sm:$0xff] }
  0x1c   : > { %373 = vst [vmem:[%s4478_s15 + $0xc0] sm:$0xff] %v372_v24  ;;  %375 = vst [vmem:[%s4478_s15 + $0xc8] sm:$0xff] %v374_v25  ;;  %v378_v27 = vld [vmem:[%s4473_s14 + $0x258] sm:$0xff]  ;;  %v380_v28 = vld [vmem:[%s4473_s14 + $0x260] sm:$0xff] }
  0x1d   : > { %377 = vst [vmem:[%s4478_s15 + $0xd0] sm:$0xff] %v376_v26  ;;  %v382_v29 = vld [vmem:[%s4473_s14 + $0x268] sm:$0xff]  ;;  %379 = vst [vmem:[%s4478_s15 + $0xd8] sm:$0xff] %v378_v27  ;;  %v384_v30 = vld [vmem:[%s4473_s14 + $0x270] sm:$0xff] }
  0x1e   : > { %381 = vst [vmem:[%s4478_s15 + $0xe0] sm:$0xff] %v380_v28  ;;  %383 = vst [vmem:[%s4478_s15 + $0xe8] sm:$0xff] %v382_v29  ;;  %v386_v31 = vld [vmem:[%s4473_s14 + $0x278] sm:$0xff] }
  0x1f   : > { %385 = vst [vmem:[%s4478_s15 + $0xf0] sm:$0xff] %v384_v30  ;;  %387 = vst [vmem:[%s4478_s15 + $0xf8] sm:$0xff] %v386_v31 }
  0x20 PF: > { %p3923_p5 = scmp.ge.s32.totalorder %s4390_s26, 1  ;;  %p392_p6 = scmp.lt.s32.totalorder %s4390_s26, 5 }
  0x22   : > { %p393_p7 = pnand %p3923_p5, %p392_p6 }
  0x24   : > { %396 = sbr.rel (%p393_p7) target bundleno = 1382 (0x566), region = 82 }
  0x29   : > { %s399_s16 = sand.u32 1, %s4382_s24   ;;  %p3925_p8 = scmp.ne.s32.totalorder %s4453_s27, 0 }
  0x2a   : > { %s3924_s17 = sshll.u32 %s399_s16, 8 }
  0x2b   : > { %s4544_s18 = scalar_lea.vmem [#allocation3], %s3924_s17  ;;  %430 = sbr.rel (%p3925_p8) target bundleno = 50 (0x32), region = 90 }
  0x30   : > { %v4392_v32 = vmov -inf  }
  0x31   : > { %431 = vst [vmem:[#allocation2] sm:$0xff] %v4392_v32  ;;  %432 = vst [vmem:[#allocation2 + $0x8] sm:$0xff] %v4392_v32 }
  0x32 PF: > { %v449_v33 = vld [vmem:[%s5914_s1] sm:$0x3f]  ;;  %vm506_vm0 = vcmask 1045504   ;;  %v433_v34 = vld [vmem:[%s4544_s18] sm:$0xff]  ;;  %vm457_vm1 = vcmask 48128   ;;  %v434_v35 = vld [vmem:[%s4544_s18 + $0x8] sm:$0xff] }
  0x33   : > { %4197 = vmatprep.subr.msk.mxu0 %vm506_vm0, %v449_v33  ;;  %4199 = vmatprep.mubr.msk.f32.mxu0 %vm457_vm1, %v433_v34  ;;  %v435_v36 = vld [vmem:[%s4544_s18 + $0x10] sm:$0xff]  ;;  %v436_v37 = vld [vmem:[%s4544_s18 + $0x18] sm:$0xff]  ;;  %v437_v38 = vld [vmem:[%s4544_s18 + $0x20] sm:$0xff]  ;;  %vm718_vm2 = vcmask 523264   ;;  %p4133_p9 = scmp.ne.s32.totalorder %s4453_s27, 3 }
  0x34   : > { %4198 = vmatpush3.msk.msra.mxu0 %vm506_vm0, %v449_v33  ;;  %v438_v39 = vld [vmem:[%s4544_s18 + $0x28] sm:$0xff]  ;;  %v439_v41 = vld [vmem:[%s4544_s18 + $0x30] sm:$0xff]  ;;  %v440_v42 = vld [vmem:[%s4544_s18 + $0x38] sm:$0xff] }
  0x35   : > { %4200 = vmatmul.mubr.msk.f32.vlgmr.msra.gmra.mxu0 %vm457_vm1, %v434_v35  ;;  %v4332_v40 = vld [vmem:[%s5916_s3 + $0x18] sm:$0xff]   ;;  %v441_v43 = vld [vmem:[%s4544_s18 + $0x40] sm:$0xff]  ;;  %v443_v45 = vld [vmem:[%s4544_s18 + $0x50] sm:$0xff] }
  0x36   : > { %4202 = vmatprep.mubr.msk.f32.mxu0 %vm457_vm1, %v435_v36  ;;  %4223 = vmatprep.subr.bf16.mxu1 %v4332_v40  ;;  %v442_v44 = vld [vmem:[%s4544_s18 + $0x48] sm:$0xff]  ;;  %v444_v46 = vld [vmem:[%s4544_s18 + $0x58] sm:$0xff]  ;;  %v445_v47 = vld [vmem:[%s4544_s18 + $0x60] sm:$0xff] }
  0x37   : > { %4224 = vmatpush3.bf16.msra.mxu1 %v4332_v40  ;;  %v446_v48 = vld [vmem:[%s4544_s18 + $0x68] sm:$0xff]  ;;  %v447_v49 = vld [vmem:[%s4544_s18 + $0x70] sm:$0xff]  ;;  %v448_v50 = vld [vmem:[%s4544_s18 + $0x78] sm:$0xff] }
  0x38   : > { %v4333_v51 = vld [vmem:[%s5916_s3 + $0x10] sm:$0xff]   ;;  %v4334_v52 = vld [vmem:[%s5916_s3 + $0x8] sm:$0xff]   ;;  %v4335_v53 = vld [vmem:[%s5916_s3] sm:$0xff]  }
  0x39   : > { %4203 = vmatmul.mubr.msk.f32.gmra.mxu0 %vm457_vm1, %v436_v37  ;;  %4225 = vmatprep.subr.bf16.mxu1 %v4333_v51  ;;  %v916_v54 = vld [vmem:[%s5918_s5 + $0x1c0] sm:$0xff]  ;;  %v917_v56 = vld [vmem:[%s5918_s5 + $0x1c8] sm:$0xff] }
  0x3a   : > { %4205 = vmatprep.mubr.msk.f32.mxu0 %vm457_vm1, %v437_v38  ;;  %v920_v55 = vld [vmem:[%s5918_s5 + $0x1e0] sm:$0xff]  ;;  %v921_v59 = vld [vmem:[%s5918_s5 + $0x1e8] sm:$0xff] }
  0x3b   : > { %4226 = vmatpush3.bf16.msra.mxu1 %v4333_v51  ;;  %v4605_v57 = vcombine.low %v916_v54, %v920_v55  ;;  %v4607_v58 = vcombine.high %v916_v54, %v920_v55  ;;  %v908_v60 = vld [vmem:[%s5918_s5 + $0x180] sm:$0xff]  ;;  %v4618_v62 = vcombine.low %v917_v56, %v921_v59  ;;  %v4620_v63 = vcombine.high %v917_v56, %v921_v59  ;;  %v909_v27 = vld [vmem:[%s5918_s5 + $0x188] sm:$0xff] }
  0x3c   : > { %4227 = vmatprep.subr.bf16.mxu1 %v4334_v52  ;;  %v912_v61 = vld [vmem:[%s5918_s5 + $0x1a0] sm:$0xff]  ;;  %v913_v28 = vld [vmem:[%s5918_s5 + $0x1a8] sm:$0xff] }
  0x3d   : > { %4206 = vmatmul.mubr.msk.f32.gmra.mxu0 %vm457_vm1, %v438_v39  ;;  %v4622_v0 = vcombine.high %v908_v60, %v912_v61  ;;  %v900_v1 = vld [vmem:[%s5918_s5 + $0x140] sm:$0xff]  ;;  %1244 = vmatprep.subr.bf16.mxu0 %v4607_v58  ;;  %v4633_v3 = vcombine.low %v908_v60, %v912_v61  ;;  %v4685_v36 = vcombine.high %v909_v27, %v913_v28  ;;  %v901_v38 = vld [vmem:[%s5918_s5 + $0x148] sm:$0xff] }
  0x3e   : > { %4208 = vmatprep.mubr.msk.f32.mxu0 %vm457_vm1, %v439_v41  ;;  %v904_v2 = vld [vmem:[%s5918_s5 + $0x160] sm:$0xff]  ;;  %1245 = vmatpush1.bf16.msra.mxu0 %v4605_v57  ;;  %v905_v39 = vld [vmem:[%s5918_s5 + $0x168] sm:$0xff] }
  0x3f   : > { %4228 = vmatpush3.bf16.msra.mxu1 %v4334_v52  ;;  %1246 = vmatprep.subr.bf16.mxu0 %v4622_v0  ;;  %v4636_v4 = vcombine.high %v900_v1, %v904_v2  ;;  %v892_v5 = vld [vmem:[%s5918_s5 + $0x100] sm:$0xff]  ;;  %v4645_v7 = vcombine.low %v900_v1, %v904_v2  ;;  %v4711_v54 = vcombine.low %v901_v38, %v905_v39  ;;  %v885_v1 = vld [vmem:[%s5918_s5 + $0xc8] sm:$0xff] }
  0x40   : > { %4229 = vmatprep.subr.bf16.mxu1 %v4335_v53  ;;  %v896_v6 = vld [vmem:[%s5918_s5 + $0x120] sm:$0xff]  ;;  %v889_v2 = vld [vmem:[%s5918_s5 + $0xe8] sm:$0xff] }
  0x41   : > { %4209 = vmatmul.mubr.msk.f32.gmra.mxu0 %vm457_vm1, %v440_v42  ;;  %v4648_v8 = vcombine.high %v892_v5, %v896_v6  ;;  %v884_v9 = vld [vmem:[%s5918_s5 + $0xc0] sm:$0xff]  ;;  %v4657_v11 = vcombine.low %v892_v5, %v896_v6 }
  0x42   : > { %4211 = vmatprep.mubr.msk.f32.mxu0 %vm457_vm1, %v441_v43  ;;  %1247 = vmatpush1.bf16.msra.mxu0 %v4633_v3  ;;  %v888_v10 = vld [vmem:[%s5918_s5 + $0xe0] sm:$0xff]  ;;  %v4696_v43 = vcombine.low %v909_v27, %v913_v28 }
  0x43   : > { %4230 = vmatpush3.bf16.msra.mxu1 %v4335_v53  ;;  %1248 = vmatprep.subr.bf16.mxu0 %v4636_v4  ;;  %v4660_v12 = vcombine.high %v884_v9, %v888_v10  ;;  %v4663_v13 = vcombine.low %v884_v9, %v888_v10  ;;  %v4670_v14 = vld [vmem:[%s5915_s2] ss:$0 sm:$0xff] }
  0x44   : > { %1317 = vmatprep.subr.bf16.mxu1 %v4620_v63 }
  0x45   : > { %4212 = vmatmul.mubr.msk.f32.gmra.mxu0 %vm457_vm1, %v442_v44 }
  0x46   : > { %4214 = vmatprep.mubr.msk.f32.mxu0 %vm457_vm1, %v443_v45  ;;  %1249 = vmatpush1.bf16.msra.mxu0 %v4645_v7 }
  0x47   : > { %1250 = vmatprep.subr.bf16.mxu0 %v4648_v8 }
  0x49   : > { %4215 = vmatmul.mubr.msk.f32.gmra.mxu0 %vm457_vm1, %v444_v46 }
  0x4a   : > { %4217 = vmatprep.mubr.msk.f32.mxu0 %vm457_vm1, %v445_v47  ;;  %1251 = vmatpush1.bf16.msra.mxu0 %v4657_v11  ;;  %v4700_v47 = vcombine.high %v901_v38, %v905_v39  ;;  %v880_v38 = vld [vmem:[%s5918_s5 + $0xa0] sm:$0xff]  ;;  %v877_v39 = vld [vmem:[%s5918_s5 + $0x88] sm:$0xff] }
  0x4b   : > { %1252 = vmatprep.subr.bf16.mxu0 %v4660_v12 }
  0x4d   : > { %4218 = vmatmul.mubr.msk.f32.gmra.mxu0 %vm457_vm1, %v446_v48 }
  0x4e   : > { %4220 = vmatprep.mubr.msk.f32.mxu0 %vm457_vm1, %v447_v49  ;;  %1253 = vmatpush1.bf16.msra.mxu0 %v4663_v13  ;;  %v893_v49 = vld [vmem:[%s5918_s5 + $0x108] sm:$0xff] }
  0x51   : > { %4221 = vmatmul.mubr.msk.f32.gmra.mxu0 %vm457_vm1, %v448_v50  ;;  %v897_v50 = vld [vmem:[%s5918_s5 + $0x128] sm:$0xff] }
  0x52   : > { %v4715_v60 = vcombine.high %v893_v49, %v897_v50  ;;  %v4726_v10 = vcombine.low %v893_v49, %v897_v50  ;;  %v873_v50 = vld [vmem:[%s5918_s5 + $0x68] sm:$0xff] }
  0xf5   : > { %v4201_v15 = vpop.f32.mrf.mxu0 }
  0xf6   : > { %v582_v16 = vadd.f32 %v4201_v15, %v4670_v14 }
  0xf7   : > { %v576_v17 = vpop.f32.mrf.mxu0 }
  0xf8   : > { %v577_v18 = vadd.f32 %v4670_v14, %v576_v17  ;;  %v656_v20 = vmax.f32 %v582_v16, 0.0 }
  0xf9   : > { %v4204_v19 = vpop.f32.mrf.mxu0 }
  0xfa   : > { %v655_v21 = vmax.f32 %v577_v18, 0.0  ;;  %v592_v22 = vadd.f32 %v4204_v19, %v4670_v14  ;;  %v4730_v18 = vcombine.high %v885_v1, %v889_v2 }
  0xfb   : > { %v586_v23 = vpop.f32.mrf.mxu0 }
  0xfc   : > { %v587_v24 = vadd.f32 %v4670_v14, %v586_v23  ;;  %v671_v25 = vpack.c.bf16 %v656_v20, %v655_v21  ;;  %v658_v29 = vmax.f32 %v592_v22, 0.0  ;;  %v4735_v23 = vcombine.low %v885_v1, %v889_v2  ;;  %v865_v1 = vld [vmem:[%s5918_s5 + $0x28] sm:$0xff] }
  0xfd   : > { %v4207_v26 = vpop.f32.mrf.mxu0 }
  0xfe   : > { %v657_v30 = vmax.f32 %v587_v24, 0.0  ;;  %v602_v31 = vadd.f32 %v4207_v26, %v4670_v14  ;;  %4231 = vmatprep.mubr.msk.bf16.mxu1 %vm718_vm2, %v671_v25 }
  0xff   : > { %v596_v32 = vpop.f32.mrf.mxu0 }
 0x100   : > { %v672_v33 = vpack.c.bf16 %v658_v29, %v657_v30  ;;  %v660_v34 = vmax.f32 %v602_v31, 0.0  ;;  %v597_v35 = vadd.f32 %v4670_v14, %v596_v32 }
 0x101   : > { %v4210_v37 = vpop.f32.mrf.mxu0 }
 0x102   : > { %v659_v40 = vmax.f32 %v597_v35, 0.0  ;;  %v612_v41 = vadd.f32 %v4210_v37, %v4670_v14  ;;  %4232 = vmatmul.mubr.msk.bf16.vlgmr.msra.gmra.mxu1 %vm718_vm2, %v672_v33  ;;  %v876_v37 = vld [vmem:[%s5918_s5 + $0x80] sm:$0xff] }
 0x103   : > { %v606_v42 = vpop.f32.mrf.mxu0  ;;  %1318 = vmatpush1.bf16.msra.mxu1 %v4618_v62 }
 0x104   : > { %v673_v44 = vpack.c.bf16 %v660_v34, %v659_v40  ;;  %v662_v45 = vmax.f32 %v612_v41, 0.0  ;;  %v607_v46 = vadd.f32 %v4670_v14, %v606_v42  ;;  %1319 = vmatprep.subr.bf16.mxu1 %v4685_v36  ;;  %v4754_v40 = vcombine.high %v876_v37, %v880_v38 }
 0x105   : > { %v4213_v48 = vpop.f32.mrf.mxu0  ;;  %v4759_v41 = vcombine.low %v876_v37, %v880_v38  ;;  %v915_v37 = vld [vmem:[%s5918_s5 + $0x1b8] sm:$0xff] }
 0x106   : > { %v661_v51 = vmax.f32 %v607_v46, 0.0  ;;  %4235 = vmatprep.mubr.msk.bf16.mxu1 %vm718_vm2, %v673_v44  ;;  %v622_v52 = vadd.f32 %v4213_v48, %v4670_v14  ;;  %1254 = vmatprep.subr.bf16.mxu0 %v4754_v40  ;;  %v872_v46 = vld [vmem:[%s5918_s5 + $0x60] sm:$0xff]  ;;  %v869_v48 = vld [vmem:[%s5918_s5 + $0x48] sm:$0xff] }
 0x107   : > { %v616_v53 = vpop.f32.mrf.mxu0  ;;  %1320 = vmatpush1.bf16.msra.mxu1 %v4696_v43  ;;  %1255 = vmatpush1.bf16.msra.mxu0 %v4759_v41 }
 0x108   : > { %v674_v55 = vpack.c.bf16 %v662_v45, %v661_v51  ;;  %v664_v56 = vmax.f32 %v622_v52, 0.0  ;;  %v617_v59 = vadd.f32 %v4670_v14, %v616_v53  ;;  %1321 = vmatprep.subr.bf16.mxu1 %v4700_v47  ;;  %v868_v45 = vld [vmem:[%s5918_s5 + $0x40] sm:$0xff]  ;;  %v4785_v52 = vcombine.low %v869_v48, %v873_v50 }
 0x109   : > { %v4216_v61 = vpop.f32.mrf.mxu0  ;;  %v4778_v49 = vcombine.high %v868_v45, %v872_v46  ;;  %v4783_v51 = vcombine.low %v868_v45, %v872_v46  ;;  %v4787_v53 = vcombine.high %v869_v48, %v873_v50 }
 0x10a   : > { %4236 = vmatmul.mubr.msk.bf16.gmra.mxu1 %vm718_vm2, %v674_v55  ;;  %v663_v5 = vmax.f32 %v617_v59, 0.0  ;;  %v632_v6 = vadd.f32 %v4216_v61, %v4670_v14  ;;  %v860_v55 = vld [vmem:[%s5918_s5] sm:$0xff]  ;;  %v861_v59 = vld [vmem:[%s5918_s5 + $0x8] sm:$0xff] }
 0x10b   : > { %v626_v9 = vpop.f32.mrf.mxu0  ;;  %1322 = vmatpush1.bf16.msra.mxu1 %v4711_v54  ;;  %1256 = vmatprep.subr.bf16.mxu0 %v4778_v49 }
 0x10c   : > { %v675_v15 = vpack.c.bf16 %v664_v56, %v663_v5  ;;  %v666_v16 = vmax.f32 %v632_v6, 0.0  ;;  %v627_v17 = vadd.f32 %v4670_v14, %v626_v9  ;;  %1323 = vmatprep.subr.bf16.mxu1 %v4715_v60  ;;  %1257 = vmatpush1.bf16.msra.mxu0 %v4783_v51  ;;  %v864_v56 = vld [vmem:[%s5918_s5 + $0x20] sm:$0xff]  ;;  %v4809_v5 = vcombine.low %v861_v59, %v865_v1  ;;  %v918_v9 = vld [vmem:[%s5918_s5 + $0x1d0] sm:$0xff] }
 0x10d   : > { %v4219_v19 = vpop.f32.mrf.mxu0  ;;  %v4802_v61 = vcombine.high %v860_v55, %v864_v56  ;;  %v4807_v2 = vcombine.low %v860_v55, %v864_v56  ;;  %v4811_v6 = vcombine.high %v861_v59, %v865_v1  ;;  %v902_v55 = vld [vmem:[%s5918_s5 + $0x150] sm:$0xff]  ;;  %v903_v1 = vld [vmem:[%s5918_s5 + $0x158] sm:$0xff] }
 0x10e   : > { %v665_v20 = vmax.f32 %v627_v17, 0.0  ;;  %4239 = vmatprep.mubr.msk.bf16.mxu1 %vm718_vm2, %v675_v15  ;;  %v642_v21 = vadd.f32 %v4219_v19, %v4670_v14  ;;  %v922_v15 = vld [vmem:[%s5918_s5 + $0x1f0] sm:$0xff]  ;;  %v923_v19 = vld [vmem:[%s5918_s5 + $0x1f8] sm:$0xff] }
 0x10f   : > { %v636_v22 = vpop.f32.mrf.mxu0  ;;  %1324 = vmatpush1.bf16.msra.mxu1 %v4726_v10  ;;  %1258 = vmatprep.subr.bf16.mxu0 %v4802_v61  ;;  %v4826_v17 = vcombine.high %v918_v9, %v922_v15  ;;  %v906_v59 = vld [vmem:[%s5918_s5 + $0x170] sm:$0xff] }
 0x110   : > { %v676_v24 = vpack.c.bf16 %v666_v16, %v665_v20  ;;  %v668_v25 = vmax.f32 %v642_v21, 0.0  ;;  %v637_v26 = vadd.f32 %v4670_v14, %v636_v22  ;;  %1325 = vmatprep.subr.bf16.mxu1 %v4730_v18  ;;  %1259 = vmatpush1.bf16.msra.mxu0 %v4807_v2  ;;  %v919_v16 = vld [vmem:[%s5918_s5 + $0x1d8] sm:$0xff]  ;;  %v5924_v20 = vmov 0  }
 0x111   : > { %v4222_v27 = vpop.f32.mrf.mxu0  ;;  %1276 = vmatprep.mubr.bf16.mxu0 %v5924_v20  ;;  %v4833_v21 = vcombine.low %v918_v9, %v922_v15  ;;  %v4835_v22 = vcombine.low %v919_v16, %v923_v19  ;;  %1390 = vmatprep.subr.bf16.mxu0 %v4826_v17  ;;  %v907_v9 = vld [vmem:[%s5918_s5 + $0x178] sm:$0xff] }
 0x112   : > { %4240 = vmatmul.mubr.msk.bf16.gmra.mxu1 %vm718_vm2, %v676_v24  ;;  %v667_v28 = vmax.f32 %v637_v26, 0.0  ;;  %v652_v29 = vadd.f32 %v4222_v27, %v4670_v14  ;;  %v4837_v24 = vcombine.high %v919_v16, %v923_v19  ;;  %v4844_v27 = vld [vmem:[%s5917_s4] ss:$0 sm:$0xff] }
 0x113   : > { %v646_v30 = vpop.f32.mrf.mxu0  ;;  %1326 = vmatpush1.bf16.msra.mxu1 %v4735_v23  ;;  %5957 = vst [vmem:[#allocation7_spill] sm:$0xff] %v4835_v22 }
 0x114   : > { %v677_v31 = vpack.c.bf16 %v668_v25, %v667_v28  ;;  %v670_v32 = vmax.f32 %v652_v29, 0.0  ;;  %v647_v33 = vadd.f32 %v4670_v14, %v646_v30  ;;  %v881_v14 = vld [vmem:[%s5918_s5 + $0xa8] sm:$0xff] }
 0x115   : > { %v4761_v42 = vcombine.low %v877_v39, %v881_v14  ;;  %v4763_v44 = vcombine.high %v877_v39, %v881_v14 }
 0x116   : > { %v669_v34 = vmax.f32 %v647_v33, 0.0  ;;  %4243 = vmatprep.mubr.msk.bf16.mxu1 %vm718_vm2, %v677_v31 }
 0x117   : > { %1327 = vmatprep.subr.bf16.mxu1 %v4763_v44 }
 0x118   : > { %v678_v35 = vpack.c.bf16 %v670_v32, %v669_v34  ;;  %1328 = vmatpush1.bf16.msra.mxu1 %v4761_v42  ;;  %v910_v32 = vld [vmem:[%s5918_s5 + $0x190] sm:$0xff] }
 0x119   : > { %1329 = vmatprep.subr.bf16.mxu1 %v4787_v53  ;;  %v914_v34 = vld [vmem:[%s5918_s5 + $0x1b0] sm:$0xff] }
 0x11a   : > { %4244 = vmatmul.mubr.msk.bf16.gmra.mxu1 %vm718_vm2, %v678_v35  ;;  %v911_v35 = vld [vmem:[%s5918_s5 + $0x198] sm:$0xff]  ;;  %v4865_v48 = vcombine.high %v910_v32, %v914_v34  ;;  %v4888_v16 = vcombine.low %v910_v32, %v914_v34 }
 0x11b   : > { %1349 = vmatprep.mubr.bf16.mxu1 %v5924_v20  ;;  %v4867_v50 = vcombine.high %v911_v35, %v915_v37  ;;  %v4890_v19 = vcombine.low %v911_v35, %v915_v37  ;;  %v899_v32 = vld [vmem:[%s5918_s5 + $0x138] sm:$0xff]  ;;  %v4912_v37 = vcombine.low %v902_v55, %v906_v59 }
 0x11c   : > { %1330 = vmatpush1.bf16.msra.mxu1 %v4785_v52  ;;  %5958 = vst [vmem:[#allocation8_spill] sm:$0xff] %v4865_v48 }
 0x11d   : > { %1331 = vmatprep.subr.bf16.mxu1 %v4811_v6  ;;  %5959 = vst [vmem:[#allocation9_spill] sm:$0xff] %v4867_v50  ;;  %5962 = vst [vmem:[#allocation12_spill] sm:$0xff] %v4912_v37 }
 0x120   : > { %1332 = vmatpush1.bf16.msra.mxu1 %v4809_v5 }
 0x121   : > { %1463 = vmatprep.subr.bf16.mxu1 %v4837_v24 }
 0x1c2   : > { %v4233_v25 = vpop.f32.mrf.mxu1 }
 0x1c3   : > { %v786_v15 = vadd.f32 %v4233_v25, %v4844_v27  ;;  %v4897_v25 = vcombine.high %v902_v55, %v906_v59  ;;  %v886_v55 = vld [vmem:[%s5918_s5 + $0xd0] sm:$0xff] }
 0x1c4   : > { %v777_v26 = vpop.f32.mrf.mxu1  ;;  %v890_v59 = vld [vmem:[%s5918_s5 + $0xf0] sm:$0xff] }
 0x1c5   : > { %v778_v29 = vadd.f32 %v4844_v27, %v777_v26  ;;  %v894_v26 = vld [vmem:[%s5918_s5 + $0x110] sm:$0xff]  ;;  %5960 = vst [vmem:[#allocation10_spill] sm:$0xff] %v4897_v25  ;;  %v842_v35 = vmax.f32 %v786_v15, 0.0 }
 0x1c6   : > { %v4234_v28 = vpop.f32.mrf.mxu1 }
 0x1c7   : > { %v840_v38 = vmax.f32 %v778_v29, 0.0  ;;  %v789_v45 = vadd.f32 %v4234_v28, %v4844_v27  ;;  %v4899_v29 = vcombine.high %v903_v1, %v907_v9 }
 0x1c8   : > { %v780_v30 = vpop.f32.mrf.mxu1 }
 0x1c9   : > { %v781_v31 = vadd.f32 %v4844_v27, %v780_v30  ;;  %v843_v28 = vmax.f32 %v789_v45, 0.0  ;;  %5961 = vst [vmem:[#allocation11_spill] sm:$0xff] %v4899_v29  ;;  %v898_v30 = vld [vmem:[%s5918_s5 + $0x130] sm:$0xff] }
 0x1ca   : > { %v4851_v33 = vpop.f32.mrf.mxu1 }
 0x1cb   : > { %v841_v39 = vmax.f32 %v781_v31, 0.0  ;;  %v895_v31 = vld [vmem:[%s5918_s5 + $0x118] sm:$0xff] }
 0x1cc   : > { %v793_v14 = vpop.f32.mrf.mxu1  ;;  %v4920_v45 = vcombine.high %v895_v31, %v899_v32  ;;  %v4946_v15 = vcombine.low %v895_v31, %v899_v32  ;;  %v4968_v31 = vcombine.low %v886_v55, %v890_v59 }
 0x1cd   : > { %v4863_v46 = vpack.c.bf16 %v841_v39, %v840_v38  ;;  %v4916_v38 = vcombine.low %v903_v1, %v907_v9  ;;  %v4918_v39 = vcombine.high %v894_v26, %v898_v30  ;;  %v887_v1 = vld [vmem:[%s5918_s5 + $0xd8] sm:$0xff]  ;;  %v4944_v9 = vcombine.low %v894_v26, %v898_v30  ;;  %v882_v26 = vld [vmem:[%s5918_s5 + $0xb0] sm:$0xff] }
 0x1ce   : > { %v4872_v56 = vpop.f32.mrf.mxu1  ;;  %5965 = vst [vmem:[#allocation15_spill] sm:$0xff] %v4920_v45  ;;  %v879_v30 = vld [vmem:[%s5918_s5 + $0x98] sm:$0xff]  ;;  %5969 = vst [vmem:[#allocation18_spill] sm:$0xff] %v4968_v31 }
 0x1cf   : > { %1277 = vmatmul.mubr.bf16.vlgmr.msra.gmra.mxu0 %v4863_v46  ;;  %1350 = vmatmul.mubr.bf16.vlgmr.msra.gmra.mxu1 %v4863_v46  ;;  %5963 = vst [vmem:[#allocation13_spill] sm:$0xff] %v4916_v38  ;;  %5964 = vst [vmem:[#allocation14_spill] sm:$0xff] %v4918_v39 }
 0x1d0   : > { %1391 = vmatpush1.bf16.msra.mxu0 %v4833_v21  ;;  %1464 = vmatpush1.bf16.msra.mxu1 %v4835_v22  ;;  %v796_v34 = vpop.f32.mrf.mxu1 }
 0x1d1   : > { %1392 = vmatprep.subr.bf16.mxu0 %v4865_v48  ;;  %1465 = vmatprep.subr.bf16.mxu1 %v4867_v50  ;;  %v4922_v50 = vpack.c.bf16 %v843_v28, %v842_v35  ;;  %v794_v48 = vadd.f32 %v4844_v27, %v793_v14  ;;  %v797_v22 = vadd.f32 %v4844_v27, %v796_v34  ;;  %v891_v14 = vld [vmem:[%s5918_s5 + $0xf8] sm:$0xff]  ;;  %v878_v28 = vld [vmem:[%s5918_s5 + $0x90] sm:$0xff] }
 0x1d2   : > { %1286 = vmatprep.mubr.bf16.mxu0 %v5924_v20  ;;  %1359 = vmatprep.mubr.bf16.mxu1 %v5924_v20  ;;  %v4953_v20 = vcombine.high %v886_v55, %v890_v59  ;;  %v4972_v32 = vcombine.low %v887_v1, %v891_v14  ;;  %v870_v55 = vld [vmem:[%s5918_s5 + $0x50] sm:$0xff] }
 0x1d3   : > { %v844_v34 = vmax.f32 %v794_v48, 0.0  ;;  %v845_v35 = vmax.f32 %v797_v22, 0.0  ;;  %v883_v22 = vld [vmem:[%s5918_s5 + $0xb8] sm:$0xff]  ;;  %v5968_v48 = vmov 0   ;;  %v874_v59 = vld [vmem:[%s5918_s5 + $0x70] sm:$0xff] }
 0x1d4   : > { %1393 = vmatpush1.bf16.msra.mxu0 %v4888_v16  ;;  %1466 = vmatpush1.bf16.msra.mxu1 %v4890_v19  ;;  %5966 = vst [vmem:[#allocation16_spill] sm:$0xff] %v4953_v20 }
 0x1d5   : > { %1394 = vmatprep.subr.bf16.mxu0 %v4897_v25  ;;  %1467 = vmatprep.subr.bf16.mxu1 %v4899_v29  ;;  %v4955_v29 = vcombine.high %v887_v1, %v891_v14  ;;  %v4982_v25 = vpack.c.bf16 %v845_v35, %v844_v34  ;;  %v5002_v1 = vcombine.low %v878_v28, %v882_v26 }
 0x1d6   : > { %v5004_v14 = vcombine.low %v879_v30, %v883_v22 }
 0x1d7   : > { %1287 = vmatmul.mubr.bf16.gmra.mxu0 %v4922_v50  ;;  %1360 = vmatmul.mubr.bf16.gmra.mxu1 %v4922_v50  ;;  %5967 = vst [vmem:[#allocation17_spill] sm:$0xff] %v4955_v29 }
 0x1d8   : > { %1395 = vmatpush1.bf16.msra.mxu0 %v4912_v37  ;;  %1468 = vmatpush1.bf16.msra.mxu1 %v4916_v38  ;;  %v802_v38 = vadd.f32 %v4851_v33, %v4844_v27  ;;  %v805_v37 = vadd.f32 %v4872_v56, %v4844_v27  ;;  %v871_v33 = vld [vmem:[%s5918_s5 + $0x58] sm:$0xff]  ;;  %5972 = vst [vmem:[#allocation21_spill] sm:$0xff] %v5004_v14 }
 0x1d9   : > { %1396 = vmatprep.subr.bf16.mxu0 %v4918_v39  ;;  %1469 = vmatprep.subr.bf16.mxu1 %v4920_v45  ;;  %v4974_v45 = vcombine.high %v878_v28, %v882_v26  ;;  %v4976_v39 = vcombine.high %v879_v30, %v883_v22  ;;  %v875_v56 = vld [vmem:[%s5918_s5 + $0x78] sm:$0xff]  ;;  %v5028_v26 = vcombine.low %v870_v55, %v874_v59 }
 0x1da   : > { %1296 = vmatprep.mubr.bf16.mxu0 %v5968_v48  ;;  %1369 = vmatprep.mubr.bf16.mxu1 %v5968_v48  ;;  %v846_v34 = vmax.f32 %v802_v38, 0.0  ;;  %v847_v35 = vmax.f32 %v805_v37, 0.0  ;;  %v866_v37 = vld [vmem:[%s5918_s5 + $0x30] sm:$0xff]  ;;  %v863_v38 = vld [vmem:[%s5918_s5 + $0x18] sm:$0xff]  ;;  %v5030_v30 = vcombine.low %v871_v33, %v875_v56 }
 0x1db   : > { %5970 = vst [vmem:[#allocation19_spill] sm:$0xff] %v4974_v45  ;;  %5971 = vst [vmem:[#allocation20_spill] sm:$0xff] %v4976_v39  ;;  %v867_v28 = vld [vmem:[%s5918_s5 + $0x38] sm:$0xff] }
 0x1dc   : > { %1397 = vmatpush1.bf16.msra.mxu0 %v4944_v9  ;;  %1470 = vmatpush1.bf16.msra.mxu1 %v4946_v15  ;;  %v859_v22 = vpack.c.bf16 %v847_v35, %v846_v34  ;;  %v4031_v34 = vld [vmem:[%s4544_s18 + $0xd0] sm:$0xff]  ;;  %v4032_v35 = vld [vmem:[%s4544_s18 + $0xd8] sm:$0xff] }
 0x1dd   : > { %1398 = vmatprep.subr.bf16.mxu0 %v4953_v20  ;;  %1471 = vmatprep.subr.bf16.mxu1 %v4955_v29  ;;  %v5008_v29 = vcombine.high %v870_v55, %v874_v59  ;;  %v5010_v20 = vcombine.high %v871_v33, %v875_v56  ;;  %v5042_v55 = vcombine.low %v863_v38, %v867_v28  ;;  %v4026_v59 = vld [vmem:[%s4544_s18 + $0xa8] sm:$0xff]  ;;  %v4027_v33 = vld [vmem:[%s4544_s18 + $0xb0] sm:$0xff]  ;;  %v4028_v56 = vld [vmem:[%s4544_s18 + $0xb8] sm:$0xff] }
 0x1df   : > { %1297 = vmatmul.mubr.bf16.gmra.mxu0 %v4982_v25  ;;  %1370 = vmatmul.mubr.bf16.gmra.mxu1 %v4982_v25 }
 0x1e0   : > { %1399 = vmatpush1.bf16.msra.mxu0 %v4968_v31  ;;  %1472 = vmatpush1.bf16.msra.mxu1 %v4972_v32  ;;  %v862_v31 = vld [vmem:[%s5918_s5 + $0x10] sm:$0xff] }
 0x1e1   : > { %1400 = vmatprep.subr.bf16.mxu0 %v4974_v45  ;;  %1473 = vmatprep.subr.bf16.mxu1 %v4976_v39  ;;  %v5034_v39 = vcombine.high %v862_v31, %v866_v37  ;;  %v5036_v45 = vcombine.high %v863_v38, %v867_v28  ;;  %v4034_v38 = vld [vmem:[%s4544_s18 + $0xe8] sm:$0xff]  ;;  %v4035_v28 = vld [vmem:[%s4544_s18 + $0xf0] sm:$0xff] }
 0x1e2   : > { %1306 = vmatprep.mubr.bf16.mxu0 %v5968_v48  ;;  %1379 = vmatprep.mubr.bf16.mxu1 %v5968_v48 }
 0x1e4   : > { %1401 = vmatpush1.bf16.msra.mxu0 %v5002_v1  ;;  %1474 = vmatpush1.bf16.msra.mxu1 %v5004_v14  ;;  %v5040_v14 = vcombine.low %v862_v31, %v866_v37  ;;  %v4024_v31 = vld [vmem:[%s4544_s18 + $0x98] sm:$0xff]  ;;  %v4033_v37 = vld [vmem:[%s4544_s18 + $0xe0] sm:$0xff] }
 0x1e5   : > { %1402 = vmatprep.subr.bf16.mxu0 %v5008_v29  ;;  %1475 = vmatprep.subr.bf16.mxu1 %v5010_v20 }
 0x1e7   : > { %1307 = vmatmul.mubr.bf16.gmra.mxu0 %v859_v22  ;;  %1380 = vmatmul.mubr.bf16.gmra.mxu1 %v859_v22 }
 0x1e8   : > { %1403 = vmatpush1.bf16.msra.mxu0 %v5028_v26  ;;  %1476 = vmatpush1.bf16.msra.mxu1 %v5030_v30 }
 0x1e9   : > { %1404 = vmatprep.subr.bf16.mxu0 %v5034_v39  ;;  %1477 = vmatprep.subr.bf16.mxu1 %v5036_v45 }
 0x1ea   : > { %1422 = vmatprep.mubr.bf16.mxu0 %v5968_v48  ;;  %1495 = vmatprep.mubr.bf16.mxu1 %v5968_v48 }
 0x1ec   : > { %1405 = vmatpush1.bf16.msra.mxu0 %v5040_v14  ;;  %1478 = vmatpush1.bf16.msra.mxu1 %v5042_v55 }
 0x1ed   : > { %1644 = vmatprep.subr.bf16.mxu0 %v4607_v58  ;;  %1717 = vmatprep.subr.bf16.mxu1 %v4620_v63  ;;  %v4241_v58 = vpop.f32.mrf.mxu1 }
 0x1ef   : > { %1423 = vmatmul.mubr.bf16.vlgmr.msra.gmra.mxu0 %v4863_v46  ;;  %1496 = vmatmul.mubr.bf16.vlgmr.msra.gmra.mxu1 %v4863_v46  ;;  %v5983_v46 = vld [vmem:[#allocation17_spill] sm:$0xff] }
 0x1f0   : > { %1645 = vmatpush1.bf16.msra.mxu0 %v4605_v57  ;;  %1718 = vmatpush1.bf16.msra.mxu1 %v4618_v62  ;;  %v809_v57 = vpop.f32.mrf.mxu1 }
 0x1f1   : > { %1646 = vmatprep.subr.bf16.mxu0 %v4622_v0  ;;  %1719 = vmatprep.subr.bf16.mxu1 %v4685_v36  ;;  %v810_v0 = vadd.f32 %v4844_v27, %v809_v57 }
 0x1f2   : > { %1432 = vmatprep.mubr.bf16.mxu0 %v5968_v48  ;;  %1505 = vmatprep.mubr.bf16.mxu1 %v5968_v48  ;;  %v4242_v62 = vpop.f32.mrf.mxu1 }
 0x1f4   : > { %1647 = vmatpush1.bf16.msra.mxu0 %v4633_v3  ;;  %1720 = vmatpush1.bf16.msra.mxu1 %v4696_v43  ;;  %v812_v63 = vpop.f32.mrf.mxu1 }
 0x1f5   : > { %1648 = vmatprep.subr.bf16.mxu0 %v4636_v4  ;;  %1721 = vmatprep.subr.bf16.mxu1 %v4700_v47  ;;  %v813_v3 = vadd.f32 %v4844_v27, %v812_v63  ;;  %v5973_v47 = vld [vmem:[#allocation7_spill] sm:$0xff] }
 0x1f6   : > { %v4245_v4 = vpop.f32.mrf.mxu1 }
 0x1f7   : > { %1433 = vmatmul.mubr.bf16.gmra.mxu0 %v4922_v50  ;;  %1506 = vmatmul.mubr.bf16.gmra.mxu1 %v4922_v50  ;;  %v5984_v50 = vld [vmem:[#allocation18_spill] sm:$0xff] }
 0x1f8   : > { %1649 = vmatpush1.bf16.msra.mxu0 %v4645_v7  ;;  %1722 = vmatpush1.bf16.msra.mxu1 %v4711_v54  ;;  %v848_v7 = vmax.f32 %v810_v0, 0.0 }
 0x1f9   : > { %1650 = vmatprep.subr.bf16.mxu0 %v4648_v8  ;;  %1723 = vmatprep.subr.bf16.mxu1 %v4715_v60  ;;  %v849_v8 = vmax.f32 %v813_v3, 0.0  ;;  %v4338_v3 = vld [vmem:[%s5916_s3 + $0x8] sm:$0xff]  }
 0x1fa   : > { %1442 = vmatprep.mubr.bf16.mxu0 %v5968_v48  ;;  %1515 = vmatprep.mubr.bf16.mxu1 %v5968_v48 }
 0x1fb   : > { %v5100_v36 = vpack.c.bf16 %v849_v8, %v848_v7 }
 0x1fc   : > { %1651 = vmatpush1.bf16.msra.mxu0 %v4657_v11  ;;  %1724 = vmatpush1.bf16.msra.mxu1 %v4726_v10  ;;  %v825_v11 = vpop.f32.mrf.mxu1  ;;  %v5974_v10 = vld [vmem:[#allocation8_spill] sm:$0xff] }
 0x1fd   : > { %1652 = vmatprep.subr.bf16.mxu0 %v4660_v12  ;;  %1725 = vmatprep.subr.bf16.mxu1 %v4730_v18  ;;  %v818_v12 = vadd.f32 %v4241_v58, %v4844_v27  ;;  %v5975_v18 = vld [vmem:[#allocation9_spill] sm:$0xff] }
 0x1fe   : > { %v4246_v43 = vpop.f32.mrf.mxu1 }
 0x1ff   : > { %1443 = vmatmul.mubr.bf16.gmra.mxu0 %v4982_v25  ;;  %1516 = vmatmul.mubr.bf16.gmra.mxu1 %v4982_v25  ;;  %v850_v54 = vmax.f32 %v818_v12, 0.0  ;;  %v5985_v25 = vld [vmem:[#allocation19_spill] sm:$0xff] }
 0x200   : > { %1653 = vmatpush1.bf16.msra.mxu0 %v4663_v13  ;;  %1726 = vmatpush1.bf16.msra.mxu1 %v4735_v23  ;;  %v821_v13 = vadd.f32 %v4242_v62, %v4844_v27  ;;  %v828_v23 = vpop.f32.mrf.mxu1 }
 0x201   : > { %1654 = vmatprep.subr.bf16.mxu0 %v4754_v40  ;;  %1727 = vmatprep.subr.bf16.mxu1 %v4763_v44  ;;  %v5976_v44 = vld [vmem:[#allocation10_spill] sm:$0xff] }
 0x202   : > { %1452 = vmatprep.mubr.bf16.mxu0 %v5968_v48  ;;  %1525 = vmatprep.mubr.bf16.mxu1 %v5968_v48  ;;  %v851_v60 = vmax.f32 %v821_v13, 0.0 }
 0x204   : > { %1655 = vmatpush1.bf16.msra.mxu0 %v4759_v41  ;;  %1728 = vmatpush1.bf16.msra.mxu1 %v4761_v42  ;;  %v1641_v40 = vpack.c.bf16 %v851_v60, %v850_v54  ;;  %v826_v41 = vadd.f32 %v4844_v27, %v825_v11  ;;  %v829_v42 = vadd.f32 %v4844_v27, %v828_v23 }
 0x205   : > { %1656 = vmatprep.subr.bf16.mxu0 %v4778_v49  ;;  %1729 = vmatprep.subr.bf16.mxu1 %v4787_v53  ;;  %v5977_v49 = vld [vmem:[#allocation11_spill] sm:$0xff] }
 0x206   : > { %v852_v53 = vmax.f32 %v826_v41, 0.0 }
 0x207   : > { %1453 = vmatmul.mubr.bf16.gmra.mxu0 %v859_v22  ;;  %1526 = vmatmul.mubr.bf16.gmra.mxu1 %v859_v22  ;;  %v4337_v22 = vld [vmem:[%s5916_s3 + $0x10] sm:$0xff]  }
 0x208   : > { %1657 = vmatpush1.bf16.msra.mxu0 %v4783_v51  ;;  %1730 = vmatpush1.bf16.msra.mxu1 %v4785_v52  ;;  %v5978_v51 = vld [vmem:[#allocation12_spill] sm:$0xff]  ;;  %v5979_v52 = vld [vmem:[#allocation13_spill] sm:$0xff] }
 0x209   : > { %1658 = vmatprep.subr.bf16.mxu0 %v4802_v61  ;;  %1731 = vmatprep.subr.bf16.mxu1 %v4811_v6  ;;  %v853_v61 = vmax.f32 %v829_v42, 0.0  ;;  %v834_v6 = vadd.f32 %v4245_v4, %v4844_v27 }
 0x20a   : > { %1676 = vmatprep.mubr.bf16.mxu0 %v5968_v48  ;;  %1749 = vmatprep.mubr.bf16.mxu1 %v5968_v48 }
 0x20c   : > { %1659 = vmatpush1.bf16.msra.mxu0 %v4807_v2  ;;  %1732 = vmatpush1.bf16.msra.mxu1 %v4809_v5  ;;  %v5980_v2 = vld [vmem:[#allocation14_spill] sm:$0xff]  ;;  %v5981_v5 = vld [vmem:[#allocation15_spill] sm:$0xff] }
 0x20d   : > { %1790 = vmatprep.subr.bf16.mxu0 %v4826_v17  ;;  %1863 = vmatprep.subr.bf16.mxu1 %v4837_v24  ;;  %v837_v17 = vadd.f32 %v4246_v43, %v4844_v27  ;;  %v5982_v24 = vld [vmem:[#allocation16_spill] sm:$0xff]  ;;  %v5987_v27 = vld [vmem:[#allocation21_spill] sm:$0xff] }
 0x20f   : > { %1677 = vmatmul.mubr.bf16.vlgmr.msra.gmra.mxu0 %v5100_v36  ;;  %1750 = vmatmul.mubr.bf16.vlgmr.msra.gmra.mxu1 %v5100_v36 }
 0x210   : > { %1791 = vmatpush1.bf16.msra.mxu0 %v4833_v21  ;;  %1864 = vmatpush1.bf16.msra.mxu1 %v5973_v47  ;;  %v1642_v21 = vpack.c.bf16 %v853_v61, %v852_v53 }
 0x211   : > { %1792 = vmatprep.subr.bf16.mxu0 %v5974_v10  ;;  %1865 = vmatprep.subr.bf16.mxu1 %v5975_v18 }
 0x212   : > { %1686 = vmatprep.mubr.bf16.mxu0 %v5968_v48  ;;  %1759 = vmatprep.mubr.bf16.mxu1 %v5968_v48 }
 0x214   : > { %1793 = vmatpush1.bf16.msra.mxu0 %v4888_v16  ;;  %1866 = vmatpush1.bf16.msra.mxu1 %v4890_v19  ;;  %v854_v16 = vmax.f32 %v834_v6, 0.0  ;;  %v855_v19 = vmax.f32 %v837_v17, 0.0 }
 0x215   : > { %1794 = vmatprep.subr.bf16.mxu0 %v5976_v44  ;;  %1867 = vmatprep.subr.bf16.mxu1 %v5977_v49 }
 0x217   : > { %1687 = vmatmul.mubr.bf16.gmra.mxu0 %v1641_v40  ;;  %1760 = vmatmul.mubr.bf16.gmra.mxu1 %v1641_v40 }
 0x218   : > { %1795 = vmatpush1.bf16.msra.mxu0 %v5978_v51  ;;  %1868 = vmatpush1.bf16.msra.mxu1 %v5979_v52 }
 0x219   : > { %1796 = vmatprep.subr.bf16.mxu0 %v5980_v2  ;;  %1869 = vmatprep.subr.bf16.mxu1 %v5981_v5 }
 0x21a   : > { %1696 = vmatprep.mubr.bf16.mxu0 %v5968_v48  ;;  %1769 = vmatprep.mubr.bf16.mxu1 %v5968_v48 }
 0x21c   : > { %1797 = vmatpush1.bf16.msra.mxu0 %v4944_v9  ;;  %1870 = vmatpush1.bf16.msra.mxu1 %v4946_v15  ;;  %v5986_v9 = vld [vmem:[#allocation20_spill] sm:$0xff]  ;;  %v1643_v15 = vpack.c.bf16 %v855_v19, %v854_v16 }
 0x21d   : > { %1798 = vmatprep.subr.bf16.mxu0 %v5982_v24  ;;  %1871 = vmatprep.subr.bf16.mxu1 %v5983_v46 }
 0x21f   : > { %1697 = vmatmul.mubr.bf16.gmra.mxu0 %v1642_v21  ;;  %1770 = vmatmul.mubr.bf16.gmra.mxu1 %v1642_v21 }
 0x220   : > { %1799 = vmatpush1.bf16.msra.mxu0 %v5984_v50  ;;  %1872 = vmatpush1.bf16.msra.mxu1 %v4972_v32  ;;  %v4025_v32 = vld [vmem:[%s4544_s18 + $0xa0] sm:$0xff] }
 0x221   : > { %1800 = vmatprep.subr.bf16.mxu0 %v5985_v25  ;;  %1873 = vmatprep.subr.bf16.mxu1 %v5986_v9 }
 0x222   : > { %1706 = vmatprep.mubr.bf16.mxu0 %v5968_v48  ;;  %1779 = vmatprep.mubr.bf16.mxu1 %v5968_v48 }
 0x224   : > { %1801 = vmatpush1.bf16.msra.mxu0 %v5002_v1  ;;  %1874 = vmatpush1.bf16.msra.mxu1 %v5987_v27  ;;  %v4029_v1 = vld [vmem:[%s4544_s18 + $0xc0] sm:$0xff] }
 0x225   : > { %1802 = vmatprep.subr.bf16.mxu0 %v5008_v29  ;;  %1875 = vmatprep.subr.bf16.mxu1 %v5010_v20  ;;  %v4037_v29 = vld [vmem:[%s5914_s1 + $0x8] sm:$0x3f]  ;;  %v4021_v20 = vld [vmem:[%s4544_s18 + $0x80] sm:$0xff] }
 0x227   : > { %1707 = vmatmul.mubr.bf16.gmra.mxu0 %v1643_v15  ;;  %1780 = vmatmul.mubr.bf16.gmra.mxu1 %v1643_v15 }
 0x228   : > { %1803 = vmatpush1.bf16.msra.mxu0 %v5028_v26  ;;  %1876 = vmatpush1.bf16.msra.mxu1 %v5030_v30  ;;  %v4036_v26 = vld [vmem:[%s4544_s18 + $0xf8] sm:$0xff]  ;;  %v4336_v30 = vld [vmem:[%s5916_s3 + $0x18] sm:$0xff]  }
 0x229   : > { %1804 = vmatprep.subr.bf16.mxu0 %v5034_v39  ;;  %1877 = vmatprep.subr.bf16.mxu1 %v5036_v45  ;;  %v4022_v39 = vld [vmem:[%s4544_s18 + $0x88] sm:$0xff]  ;;  %v4023_v45 = vld [vmem:[%s4544_s18 + $0x90] sm:$0xff] }
 0x22a   : > { %1822 = vmatprep.mubr.bf16.mxu0 %v5968_v48  ;;  %1895 = vmatprep.mubr.bf16.mxu1 %v5968_v48 }
 0x22c   : > { %1805 = vmatpush1.bf16.msra.mxu0 %v5040_v14  ;;  %1878 = vmatpush1.bf16.msra.mxu1 %v5042_v55  ;;  %v4030_v14 = vld [vmem:[%s4544_s18 + $0xc8] sm:$0xff] }
 0x22d   : > { %4247 = vmatprep.subr.msk.mxu0 %vm506_vm0, %v4037_v29  ;;  %4273 = vmatprep.subr.bf16.mxu1 %v4336_v30 }
 0x22f   : > { %1823 = vmatmul.mubr.bf16.vlgmr.msra.gmra.mxu0 %v5100_v36  ;;  %1896 = vmatmul.mubr.bf16.vlgmr.msra.gmra.mxu1 %v5100_v36  ;;  %v4339_v36 = vld [vmem:[%s5916_s3] sm:$0xff]  }
 0x230   : > { %4248 = vmatpush3.msk.msra.mxu0 %vm506_vm0, %v4037_v29  ;;  %1832 = vmatprep.mubr.bf16.mxu0 %v5968_v48 }
 0x231   : > { %1905 = vmatprep.mubr.bf16.mxu1 %v5968_v48  ;;  %4274 = vmatpush3.bf16.msra.mxu1 %v4336_v30 }
 0x232   : > { %4275 = vmatprep.subr.bf16.mxu1 %v4337_v22 }
 0x235   : > { %4276 = vmatpush3.bf16.msra.mxu1 %v4337_v22 }
 0x236   : > { %4277 = vmatprep.subr.bf16.mxu1 %v4338_v3 }
 0x237   : > { %1833 = vmatmul.mubr.bf16.gmra.mxu0 %v1641_v40  ;;  %1906 = vmatmul.mubr.bf16.gmra.mxu1 %v1641_v40 }
 0x238   : > { %1842 = vmatprep.mubr.bf16.mxu0 %v5968_v48  ;;  %1915 = vmatprep.mubr.bf16.mxu1 %v5968_v48 }
 0x239   : > { %4278 = vmatpush3.bf16.msra.mxu1 %v4338_v3 }
 0x23a   : > { %4279 = vmatprep.subr.bf16.mxu1 %v4339_v36 }
 0x23d   : > { %4280 = vmatpush3.bf16.msra.mxu1 %v4339_v36 }
 0x23f   : > { %1843 = vmatmul.mubr.bf16.gmra.mxu0 %v1642_v21  ;;  %1916 = vmatmul.mubr.bf16.gmra.mxu1 %v1642_v21 }
 0x240   : > { %1852 = vmatprep.mubr.bf16.mxu0 %v5968_v48  ;;  %1925 = vmatprep.mubr.bf16.mxu1 %v5968_v48 }
 0x247   : > { %1853 = vmatmul.mubr.bf16.gmra.mxu0 %v1643_v15  ;;  %1926 = vmatmul.mubr.bf16.gmra.mxu1 %v1643_v15 }
 0x248   : > { %4249 = vmatprep.mubr.msk.f32.mxu0 %vm457_vm1, %v4021_v20 }
 0x24f   : > { %4250 = vmatmul.mubr.msk.f32.vlgmr.msra.gmra.mxu0 %vm457_vm1, %v4022_v39 }
 0x250   : > { %4252 = vmatprep.mubr.msk.f32.mxu0 %vm457_vm1, %v4023_v45 }
 0x253   : > { %4253 = vmatmul.mubr.msk.f32.gmra.mxu0 %vm457_vm1, %v4024_v31 }
 0x254   : > { %4255 = vmatprep.mubr.msk.f32.mxu0 %vm457_vm1, %v4025_v32 }
 0x257   : > { %4256 = vmatmul.mubr.msk.f32.gmra.mxu0 %vm457_vm1, %v4026_v59 }
 0x258   : > { %4258 = vmatprep.mubr.msk.f32.mxu0 %vm457_vm1, %v4027_v33 }
 0x25b   : > { %4259 = vmatmul.mubr.msk.f32.gmra.mxu0 %vm457_vm1, %v4028_v56 }
 0x25c   : > { %4261 = vmatprep.mubr.msk.f32.mxu0 %vm457_vm1, %v4029_v1 }
 0x25f   : > { %4262 = vmatmul.mubr.msk.f32.gmra.mxu0 %vm457_vm1, %v4030_v14 }
 0x260   : > { %4264 = vmatprep.mubr.msk.f32.mxu0 %vm457_vm1, %v4031_v34 }
 0x263   : > { %4265 = vmatmul.mubr.msk.f32.gmra.mxu0 %vm457_vm1, %v4032_v35 }
 0x264   : > { %4267 = vmatprep.mubr.msk.f32.mxu0 %vm457_vm1, %v4033_v37 }
 0x267   : > { %4268 = vmatmul.mubr.msk.f32.gmra.mxu0 %vm457_vm1, %v4034_v38 }
 0x268   : > { %4270 = vmatprep.mubr.msk.f32.mxu0 %vm457_vm1, %v4035_v28 }
 0x26b   : > { %4271 = vmatmul.mubr.msk.f32.gmra.mxu0 %vm457_vm1, %v4036_v26 }
 0x26c   : > { %2951 = vmatprep.mubr.bf16.mxu0 %v5968_v48 }
 0x28f   : > { %v1278_v55 = vpop.f32.mrf.mxu0  ;;  %v1351_v58 = vpop.f32.mrf.mxu1 }
 0x291   : > { %v1280_v57 = vpop.f32.mrf.mxu0  ;;  %v1353_v62 = vpop.f32.mrf.mxu1 }
 0x293   : > { %v1282_v63 = vpop.f32.mrf.mxu0  ;;  %v1355_v0 = vpop.f32.mrf.mxu1 }
 0x294   : > { %v1536_v4 = vmax.f32 %v1278_v55, %v1282_v63  ;;  %v1562_v7 = vmax.f32 %v1351_v58, %v1355_v0 }
 0x295   : > { %v1284_v8 = vpop.f32.mrf.mxu0  ;;  %v1357_v11 = vpop.f32.mrf.mxu1 }
 0x296   : > { %v1549_v43 = vmax.f32 %v1280_v57, %v1284_v8  ;;  %v1575_v47 = vmax.f32 %v1353_v62, %v1357_v11  ;;  %v2592_v8 = vld [vmem:[%s5918_s5 + $0x1c8] sm:$0xff] }
 0x297   : > { %v1288_v12 = vpop.f32.mrf.mxu0  ;;  %v1361_v13 = vpop.f32.mrf.mxu1  ;;  %v2596_v11 = vld [vmem:[%s5918_s5 + $0x1e8] sm:$0xff] }
 0x298   : > { %v1537_v54 = vmax.f32 %v1536_v4, %v1288_v12  ;;  %v1563_v60 = vmax.f32 %v1562_v7, %v1361_v13  ;;  %v2591_v4 = vld [vmem:[%s5918_s5 + $0x1c0] sm:$0xff] }
 0x299   : > { %v1290_v10 = vpop.f32.mrf.mxu0  ;;  %v1363_v18 = vpop.f32.mrf.mxu1  ;;  %v2595_v7 = vld [vmem:[%s5918_s5 + $0x1e0] sm:$0xff] }
 0x29a   : > { %v1550_v23 = vmax.f32 %v1549_v43, %v1290_v10  ;;  %v1576_v40 = vmax.f32 %v1575_v47, %v1363_v18  ;;  %v5230_v36 = vcombine.low %v2591_v4, %v2595_v7  ;;  %v5232_v43 = vcombine.high %v2591_v4, %v2595_v7  ;;  %v2587_v10 = vld [vmem:[%s5918_s5 + $0x1a0] sm:$0xff] }
 0x29b   : > { %v1292_v41 = vpop.f32.mrf.mxu0  ;;  %v1365_v42 = vpop.f32.mrf.mxu1 }
 0x29c   : > { %v1538_v44 = vmax.f32 %v1537_v54, %v1292_v41  ;;  %v1564_v49 = vmax.f32 %v1563_v60, %v1365_v42  ;;  %v2583_v60 = vld [vmem:[%s5918_s5 + $0x180] sm:$0xff]  ;;  %2919 = vmatprep.subr.bf16.mxu0 %v5232_v43  ;;  %v5241_v42 = vcombine.low %v2592_v8, %v2596_v11 }
 0x29d   : > { %v1294_v51 = vpop.f32.mrf.mxu0  ;;  %v1367_v52 = vpop.f32.mrf.mxu1  ;;  %2920 = vmatpush1.bf16.msra.mxu0 %v5230_v36 }
 0x29e   : > { %v1551_v2 = vmax.f32 %v1550_v23, %v1294_v51  ;;  %v1577_v5 = vmax.f32 %v1576_v40, %v1367_v52  ;;  %v2579_v51 = vld [vmem:[%s5918_s5 + $0x160] sm:$0xff] }
 0x29f   : > { %v1298_v53 = vpop.f32.mrf.mxu0  ;;  %v1371_v61 = vpop.f32.mrf.mxu1 }
 0x2a0   : > { %v1539_v6 = vmax.f32 %v1538_v44, %v1298_v53  ;;  %v1565_v17 = vmax.f32 %v1564_v49, %v1371_v61  ;;  %v5243_v44 = vcombine.high %v2592_v8, %v2596_v11  ;;  %v2575_v49 = vld [vmem:[%s5918_s5 + $0x140] sm:$0xff] }
 0x2a1   : > { %v1300_v21 = vpop.f32.mrf.mxu0  ;;  %v1373_v24 = vpop.f32.mrf.mxu1 }
 0x2a2   : > { %v1552_v46 = vmax.f32 %v1551_v2, %v1300_v21  ;;  %v1578_v50 = vmax.f32 %v1577_v5, %v1373_v24  ;;  %2992 = vmatprep.subr.bf16.mxu1 %v5243_v44  ;;  %v5253_v5 = vcombine.low %v2583_v60, %v2587_v10  ;;  %v5257_v24 = vcombine.high %v2575_v49, %v2579_v51 }
 0x2a3   : > { %v1302_v16 = vpop.f32.mrf.mxu0  ;;  %v1375_v19 = vpop.f32.mrf.mxu1 }
 0x2a4   : > { %v1540_v25 = vmax.f32 %v1539_v6, %v1302_v16  ;;  %v1566_v9 = vmax.f32 %v1565_v17, %v1375_v19  ;;  %v5255_v6 = vcombine.high %v2583_v60, %v2587_v10 }
 0x2a5   : > { %v1304_v27 = vpop.f32.mrf.mxu0  ;;  %v1377_v15 = vpop.f32.mrf.mxu1 }
 0x2a6   : > { %v1553_v39 = vmax.f32 %v1552_v46, %v1304_v27  ;;  %v1579_v45 = vmax.f32 %v1578_v50, %v1377_v15  ;;  %v2567_v46 = vld [vmem:[%s5918_s5 + $0x100] sm:$0xff]  ;;  %2921 = vmatprep.subr.bf16.mxu0 %v5255_v6 }
 0x2a7   : > { %v1308_v29 = vpop.f32.mrf.mxu0  ;;  %v1381_v20 = vpop.f32.mrf.mxu1  ;;  %v2571_v50 = vld [vmem:[%s5918_s5 + $0x120] sm:$0xff]  ;;  %2922 = vmatpush1.bf16.msra.mxu0 %v5253_v5 }
 0x2a8   : > { %v1541_v31 = vmax.f32 %v1540_v25, %v1308_v29  ;;  %v1567_v32 = vmax.f32 %v1566_v9, %v1381_v20  ;;  %v5267_v25 = vcombine.low %v2575_v49, %v2579_v51  ;;  %2923 = vmatprep.subr.bf16.mxu0 %v5257_v24  ;;  %v5270_v15 = vcombine.high %v2567_v46, %v2571_v50 }
 0x2a9   : > { %v1310_v59 = vpop.f32.mrf.mxu0  ;;  %v1383_v33 = vpop.f32.mrf.mxu1 }
 0x2aa   : > { %v5206_v56 = vmax.f32 %v1553_v39, %v1310_v59  ;;  %v5208_v1 = vmax.f32 %v1579_v45, %v1383_v33 }
 0x2ab   : > { %v1312_v14 = vpop.f32.mrf.mxu0  ;;  %v1385_v34 = vpop.f32.mrf.mxu1  ;;  %2924 = vmatpush1.bf16.msra.mxu0 %v5267_v25 }
 0x2ac   : > { %v5210_v35 = vmax.f32 %v1541_v31, %v1312_v14  ;;  %v5212_v37 = vmax.f32 %v1567_v32, %v1385_v34  ;;  %v2559_v31 = vld [vmem:[%s5918_s5 + $0xc0] sm:$0xff]  ;;  %2925 = vmatprep.subr.bf16.mxu0 %v5270_v15 }
 0x2ad   : > { %v5214_v38 = vpop.f32.mrf.mxu0  ;;  %v5216_v28 = vpop.f32.mrf.mxu1  ;;  %v2563_v32 = vld [vmem:[%s5918_s5 + $0xe0] sm:$0xff] }
 0x2af   : > { %v1424_v26 = vpop.f32.mrf.mxu0  ;;  %v1497_v30 = vpop.f32.mrf.mxu1 }
 0x2b1   : > { %v1426_v22 = vpop.f32.mrf.mxu0  ;;  %v1499_v55 = vpop.f32.mrf.mxu1 }
 0x2b3   : > { %v1428_v58 = vpop.f32.mrf.mxu0  ;;  %v1501_v57 = vpop.f32.mrf.mxu1 }
 0x2b4   : > { %v1588_v62 = vmax.f32 %v1424_v26, %v1428_v58  ;;  %v1614_v63 = vmax.f32 %v1497_v30, %v1501_v57  ;;  %v5279_v26 = vcombine.low %v2567_v46, %v2571_v50 }
 0x2b5   : > { %v1430_v0 = vpop.f32.mrf.mxu0  ;;  %v1503_v3 = vpop.f32.mrf.mxu1 }
 0x2b6   : > { %v1601_v47 = vmax.f32 %v1426_v22, %v1430_v0  ;;  %v1627_v54 = vmax.f32 %v1499_v55, %v1503_v3  ;;  %v5282_v55 = vcombine.high %v2559_v31, %v2563_v32  ;;  %2926 = vmatpush1.bf16.msra.mxu0 %v5279_v26  ;;  %v5285_v0 = vcombine.low %v2559_v31, %v2563_v32 }
 0x2b7   : > { %v1434_v12 = vpop.f32.mrf.mxu0  ;;  %v1507_v13 = vpop.f32.mrf.mxu1 }
 0x2b8   : > { %v1589_v18 = vmax.f32 %v1588_v62, %v1434_v12  ;;  %v1615_v23 = vmax.f32 %v1614_v63, %v1507_v13  ;;  %2927 = vmatprep.subr.bf16.mxu0 %v5282_v55 }
 0x2b9   : > { %v1436_v40 = vpop.f32.mrf.mxu0  ;;  %v1509_v41 = vpop.f32.mrf.mxu1 }
 0x2ba   : > { %v1602_v52 = vmax.f32 %v1601_v47, %v1436_v40  ;;  %v1628_v53 = vmax.f32 %v1627_v54, %v1509_v41  ;;  %2928 = vmatpush1.bf16.msra.mxu0 %v5285_v0 }
 0x2bb   : > { %v1438_v61 = vpop.f32.mrf.mxu0  ;;  %v1511_v2 = vpop.f32.mrf.mxu1 }
 0x2bc   : > { %v1590_v17 = vmax.f32 %v1589_v18, %v1438_v61  ;;  %v1616_v21 = vmax.f32 %v1615_v23, %v1511_v2 }
 0x2bd   : > { %v1440_v16 = vpop.f32.mrf.mxu0  ;;  %v1513_v19 = vpop.f32.mrf.mxu1 }
 0x2be   : > { %v1603_v29 = vmax.f32 %v1602_v52, %v1440_v16  ;;  %v1629_v20 = vmax.f32 %v1628_v53, %v1513_v19 }
 0x2bf   : > { %v1444_v9 = vpop.f32.mrf.mxu0  ;;  %v1517_v27 = vpop.f32.mrf.mxu1 }
 0x2c0   : > { %v1591_v39 = vmax.f32 %v1590_v17, %v1444_v9  ;;  %v1617_v45 = vmax.f32 %v1616_v21, %v1517_v27 }
 0x2c1   : > { %v1446_v59 = vpop.f32.mrf.mxu0  ;;  %v1519_v33 = vpop.f32.mrf.mxu1 }
 0x2c2   : > { %v1604_v14 = vmax.f32 %v1603_v29, %v1446_v59  ;;  %v1630_v34 = vmax.f32 %v1629_v20, %v1519_v33  ;;  %v1555_v33 = vmax.f32 %v5206_v56, %v5214_v38 }
 0x2c3   : > { %v1448_v30 = vpop.f32.mrf.mxu0  ;;  %v1521_v22 = vpop.f32.mrf.mxu1 }
 0x2c4   : > { %v1592_v58 = vmax.f32 %v1591_v39, %v1448_v30  ;;  %v1618_v57 = vmax.f32 %v1617_v45, %v1521_v22  ;;  %v1556_v56 = vrot.slane %v1555_v33, 4 }
 0x2c5   : > { %v1450_v62 = vpop.f32.mrf.mxu0  ;;  %v1523_v63 = vpop.f32.mrf.mxu1 }
 0x2c6   : > { %v1605_v7 = vmax.f32 %v1604_v14, %v1450_v62  ;;  %v1631_v8 = vmax.f32 %v1630_v34, %v1523_v63  ;;  %v1581_v14 = vmax.f32 %v5208_v1, %v5216_v28 }
 0x2c7   : > { %v1454_v3 = vpop.f32.mrf.mxu0  ;;  %v1527_v4 = vpop.f32.mrf.mxu1 }
 0x2c8   : > { %v1593_v11 = vmax.f32 %v1592_v58, %v1454_v3  ;;  %v1619_v12 = vmax.f32 %v1618_v57, %v1527_v4  ;;  %v1582_v38 = vrot.slane %v1581_v14, 4 }
 0x2c9   : > { %v1456_v13 = vpop.f32.mrf.mxu0  ;;  %v1529_v47 = vpop.f32.mrf.mxu1 }
 0x2ca   : > { %v5288_v54 = vmax.f32 %v1605_v7, %v1456_v13  ;;  %v5290_v60 = vmax.f32 %v1631_v8, %v1529_v47  ;;  %v1569_v13 = vrot.slane %v5212_v37, 4 }
 0x2cb   : > { %v1458_v10 = vpop.f32.mrf.mxu0  ;;  %v1531_v18 = vpop.f32.mrf.mxu1 }
 0x2cc   : > { %v5293_v23 = vmax.f32 %v1593_v11, %v1458_v10  ;;  %v5295_v40 = vmax.f32 %v1619_v12, %v1531_v18  ;;  %v1543_v12 = vrot.slane %v5210_v35, 4 }
 0x2cd   : > { %v5297_v41 = vpop.f32.mrf.mxu0  ;;  %v5299_v49 = vpop.f32.mrf.mxu1 }
 0x2cf   : > { %v1678_v51 = vpop.f32.mrf.mxu0  ;;  %v1751_v52 = vpop.f32.mrf.mxu1 }
 0x2d1   : > { %v1680_v53 = vpop.f32.mrf.mxu0  ;;  %v1753_v61 = vpop.f32.mrf.mxu1 }
 0x2d3   : > { %v1682_v2 = vpop.f32.mrf.mxu0  ;;  %v1755_v17 = vpop.f32.mrf.mxu1 }
 0x2d4   : > { %v1936_v32 = vmax.f32 %v1678_v51, %v1682_v2  ;;  %v1962_v59 = vmax.f32 %v1751_v52, %v1755_v17 }
 0x2d5   : > { %v1684_v21 = vpop.f32.mrf.mxu0  ;;  %v1757_v46 = vpop.f32.mrf.mxu1 }
 0x2d6   : > { %v1949_v22 = vmax.f32 %v1680_v53, %v1684_v21  ;;  %v1975_v58 = vmax.f32 %v1753_v61, %v1757_v46  ;;  %v1544_v46 = vmax.f32 %v5210_v35, %v1543_v12 }
 0x2d7   : > { %v1688_v50 = vpop.f32.mrf.mxu0  ;;  %v1761_v16 = vpop.f32.mrf.mxu1 }
 0x2d8   : > { %v1937_v57 = vmax.f32 %v1936_v32, %v1688_v50  ;;  %v1963_v62 = vmax.f32 %v1962_v59, %v1761_v16  ;;  %v1570_v50 = vmax.f32 %v5212_v37, %v1569_v13  ;;  %v1557_v16 = vmax.f32 %v1555_v33, %v1556_v56 }
 0x2d9   : > { %v1690_v19 = vpop.f32.mrf.mxu0  ;;  %v1763_v9 = vpop.f32.mrf.mxu1 }
 0x2da   : > { %v1950_v4 = vmax.f32 %v1949_v22, %v1690_v19  ;;  %v1976_v7 = vmax.f32 %v1975_v58, %v1763_v9  ;;  %v1583_v19 = vmax.f32 %v1581_v14, %v1582_v38  ;;  %v1545_v58 = vrot.slane %v1544_v46, 2 }
 0x2db   : > { %v1692_v27 = vpop.f32.mrf.mxu0  ;;  %v1765_v29 = vpop.f32.mrf.mxu1 }
 0x2dc   : > { %v1938_v8 = vmax.f32 %v1937_v57, %v1692_v27  ;;  %v1964_v11 = vmax.f32 %v1963_v62, %v1765_v29  ;;  %v1571_v57 = vrot.slane %v1570_v50, 2  ;;  %v1558_v62 = vrot.slane %v1557_v16, 2 }
 0x2dd   : > { %v1694_v20 = vpop.f32.mrf.mxu0  ;;  %v1767_v39 = vpop.f32.mrf.mxu1  ;;  %v1584_v35 = vrot.slane %v1583_v19, 2  ;;  %v1546_v38 = vmax.f32 %v1544_v46, %v1545_v58 }
 0x2de   : > { %v1951_v28 = vmax.f32 %v1950_v4, %v1694_v20  ;;  %v1977_v10 = vmax.f32 %v1976_v7, %v1767_v39 }
 0x2df   : > { %v1698_v45 = vpop.f32.mrf.mxu0  ;;  %v1771_v31 = vpop.f32.mrf.mxu1 }
 0x2e0   : > { %v1939_v18 = vmax.f32 %v1938_v8, %v1698_v45  ;;  %v1965_v51 = vmax.f32 %v1964_v11, %v1771_v31 }
 0x2e1   : > { %v1700_v34 = vpop.f32.mrf.mxu0  ;;  %v1773_v30 = vpop.f32.mrf.mxu1 }
 0x2e2   : > { %v1952_v61 = vmax.f32 %v1951_v28, %v1700_v34  ;;  %v1978_v2 = vmax.f32 %v1977_v10, %v1773_v30  ;;  %v1585_v28 = vmax.f32 %v1583_v19, %v1584_v35 }
 0x2e3   : > { %v1702_v63 = vpop.f32.mrf.mxu0  ;;  %v1775_v3 = vpop.f32.mrf.mxu1 }
 0x2e4   : > { %v1940_v17 = vmax.f32 %v1939_v18, %v1702_v63  ;;  %v1966_v21 = vmax.f32 %v1965_v51, %v1775_v3 }
 0x2e5   : > { %v1704_v47 = vpop.f32.mrf.mxu0  ;;  %v1777_v1 = vpop.f32.mrf.mxu1 }
 0x2e6   : > { %v1953_v29 = vmax.f32 %v1952_v61, %v1704_v47  ;;  %v1979_v32 = vmax.f32 %v1978_v2, %v1777_v1  ;;  %v1572_v47 = vmax.f32 %v1570_v50, %v1571_v57  ;;  %v1559_v1 = vmax.f32 %v1557_v16, %v1558_v62 }
 0x2e7   : > { %v1708_v52 = vpop.f32.mrf.mxu0  ;;  %v1781_v53 = vpop.f32.mrf.mxu1  ;;  %v4394_v2 = vmov 1966171168   ;;  %v1547_v50 = vrot.slane %v1546_v38, 1 }
 0x2e8   : > { %v1941_v20 = vmax.f32 %v1940_v17, %v1708_v52  ;;  %v1967_v39 = vmax.f32 %v1966_v21, %v1781_v53  ;;  %v2062_v17 = vunpack.c.l.s4 %v4394_v2  ;;  %v2064_v21 = vlaneseq }
 0x2e9   : > { %v1710_v9 = vpop.f32.mrf.mxu0  ;;  %v1783_v27 = vpop.f32.mrf.mxu1  ;;  %v1573_v16 = vrot.slane %v1572_v47, 1  ;;  %v1560_v19 = vrot.slane %v1559_v1, 1 }
 0x2ea   : > { %v1954_v59 = vmax.f32 %v1953_v29, %v1710_v9  ;;  %v1980_v22 = vmax.f32 %v1979_v32, %v1783_v27  ;;  %v2063_v58 = vunpack.c.0.s8 %v2062_v17  ;;  %v5317_v57 = vshrl.u32 %v2064_v21, 7 }
 0x2eb   : > { %v1712_v45 = vpop.f32.mrf.mxu0  ;;  %v1785_v31 = vpop.f32.mrf.mxu1 }
 0x2ec   : > { %v1942_v34 = vmax.f32 %v1941_v20, %v1712_v45  ;;  %v1968_v30 = vmax.f32 %v1967_v39, %v1785_v31  ;;  %v1586_v39 = vrot.slane %v1585_v28, 1  ;;  %5988 = vst [vmem:[#allocation7_spill] sm:$0xff] %v5317_v57 }
 0x2ed   : > { %v1714_v63 = vpop.f32.mrf.mxu0  ;;  %v1787_v37 = vpop.f32.mrf.mxu1 }
 0x2ee   : > { %v1943_v33 = vrot.slane %v1942_v34, 4  ;;  %v1969_v14 = vrot.slane %v1968_v30, 4  ;;  %v1955_v3 = vmax.f32 %v1954_v59, %v1714_v63  ;;  %v1981_v4 = vmax.f32 %v1980_v22, %v1787_v37 }
 0x2ef   : > { %v5309_v7 = vpop.f32.mrf.mxu0  ;;  %v5311_v8 = vpop.f32.mrf.mxu1 }
 0x2f0   : > { %v1944_v11 = vmax.f32 %v1942_v34, %v1943_v33  ;;  %v1970_v12 = vmax.f32 %v1968_v30, %v1969_v14  ;;  %v1956_v13 = vrot.slane %v1955_v3, 4  ;;  %v1982_v56 = vrot.slane %v1981_v4, 4 }
 0x2f1   : > { %v5313_v10 = vpop.f32.mrf.mxu0  ;;  %v5315_v18 = vpop.f32.mrf.mxu1 }
 0x2f2   : > { %v1945_v51 = vrot.slane %v1944_v11, 2  ;;  %v1971_v52 = vrot.slane %v1970_v12, 2  ;;  %v1957_v53 = vmax.f32 %v1955_v3, %v1956_v13  ;;  %v1983_v61 = vmax.f32 %v1981_v4, %v1982_v56 }
 0x2f3   : > { %v1828_v9 = vpop.f32.mrf.mxu0  ;;  %v1901_v27 = vpop.f32.mrf.mxu1  ;;  %v1548_v3 = vmax.f32 %v1546_v38, %v1547_v50  ;;  %v1574_v4 = vmax.f32 %v1572_v47, %v1573_v16  ;;  %v1561_v13 = vmax.f32 %v1559_v1, %v1560_v19  ;;  %v1587_v56 = vmax.f32 %v1585_v28, %v1586_v39 }
 0x2f4   : > { %v1946_v29 = vmax.f32 %v1944_v11, %v1945_v51  ;;  %v1972_v32 = vmax.f32 %v1970_v12, %v1971_v52  ;;  %v1958_v20 = vrot.slane %v1957_v53, 2  ;;  %v1984_v46 = vrot.slane %v1983_v61, 2 }
 0x2f5   : > { %v1830_v45 = vpop.f32.mrf.mxu0  ;;  %v1903_v31 = vpop.f32.mrf.mxu1  ;;  %v1607_v47 = vmax.f32 %v5288_v54, %v5297_v41  ;;  %v1988_v19 = vmax.f32 %v5309_v7, %v1828_v9  ;;  %v2014_v39 = vmax.f32 %v5311_v8, %v1901_v27 }
 0x2f6   : > { %v1947_v59 = vrot.slane %v1946_v29, 1  ;;  %v1973_v22 = vrot.slane %v1972_v32, 1  ;;  %v1959_v34 = vmax.f32 %v1957_v53, %v1958_v20  ;;  %v1985_v30 = vmax.f32 %v1983_v61, %v1984_v46 }
 0x2f7   : > { %v1834_v62 = vpop.f32.mrf.mxu0  ;;  %v1907_v35 = vpop.f32.mrf.mxu1  ;;  %v5320_v53 = vsub.s32 %v2063_v58, %v5317_v57  ;;  %v2027_v54 = vmax.f32 %v5315_v18, %v1903_v31  ;;  %v1608_v7 = vrot.slane %v1607_v47, 4 }
 0x2f8   : > { %v1948_v63 = vmax.f32 %v1946_v29, %v1947_v59  ;;  %v1974_v37 = vmax.f32 %v1972_v32, %v1973_v22  ;;  %v1960_v33 = vrot.slane %v1959_v34, 1  ;;  %v1986_v14 = vrot.slane %v1985_v30, 1 }
 0x2f9   : > { %v1836_v11 = vpop.f32.mrf.mxu0  ;;  %v1909_v12 = vpop.f32.mrf.mxu1  ;;  %5989 = vst [vmem:[#allocation8_spill] sm:$0xff] %v5320_v53  ;;  %v1633_v22 = vmax.f32 %v5290_v60, %v5299_v49  ;;  %v1989_v41 = vmax.f32 %v1988_v19, %v1834_v62 }
 0x2fa   : > { %v1961_v51 = vmax.f32 %v1959_v34, %v1960_v33  ;;  %v1987_v52 = vmax.f32 %v1985_v30, %v1986_v14  ;;  %v2040_v17 = vmax.f32 %v1548_v3, %v1948_v63  ;;  %v2042_v21 = vmax.f32 %v1574_v4, %v1974_v37 }
 0x2fb   : > { %v1838_v61 = vpop.f32.mrf.mxu0  ;;  %v1911_v2 = vpop.f32.mrf.mxu1  ;;  %v2001_v34 = vmax.f32 %v5313_v10, %v1830_v45  ;;  %v2015_v37 = vmax.f32 %v2014_v39, %v1907_v35  ;;  %v1595_v33 = vrot.slane %v5293_v23, 4  ;;  %v1621_v14 = vrot.slane %v5295_v40, 4 }
 0x2fc   : > { %v2041_v20 = vmax.f32 %v1561_v13, %v1961_v51  ;;  %v2043_v29 = vmax.f32 %v1587_v56, %v1987_v52  ;;  %v2028_v3 = vmax.f32 %v2027_v54, %v1909_v12  ;;  %v1990_v60 = vmax.f32 %v1989_v41, %v1838_v61 }
 0x2fd   : > { %v1840_v32 = vpop.f32.mrf.mxu0  ;;  %v1913_v46 = vpop.f32.mrf.mxu1  ;;  %v2002_v27 = vmax.f32 %v2001_v34, %v1836_v11  ;;  %v2016_v49 = vmax.f32 %v2015_v37, %v1911_v2  ;;  %v1634_v10 = vrot.slane %v1633_v22, 4  ;;  %v1596_v31 = vmax.f32 %v5293_v23, %v1595_v33  ;;  %v5341_v33 = vld [vmem:[%s5915_s2] ss:$0 sm:$0xff] }
 0x2fe   : > { %v2057_v59 = vcombine.low %v2040_v17, %v2041_v20  ;;  %v2058_v38 = vcombine.low %v2042_v21, %v2043_v29  ;;  %v2029_v56 = vmax.f32 %v2028_v3, %v1913_v46  ;;  %v1622_v62 = vmax.f32 %v5295_v40, %v1621_v14 }
 0x2ff   : > { %v1844_v1 = vpop.f32.mrf.mxu0  ;;  %v1917_v28 = vpop.f32.mrf.mxu1  ;;  %v2003_v13 = vmax.f32 %v2002_v27, %v1840_v32  ;;  %v1609_v35 = vmax.f32 %v1607_v47, %v1608_v7  ;;  %v1635_v61 = vmax.f32 %v1633_v22, %v1634_v10 }
 0x300   : > { %v2067_v50 = vrot.slane %v2057_v59, %v5320_v53  ;;  %v2074_v16 = vrot.slane %v2058_v38, %v5320_v53  ;;  %v1991_v51 = vmax.f32 %v1990_v60, %v1844_v1  ;;  %v2017_v18 = vmax.f32 %v2016_v49, %v1917_v28 }
 0x301   : > { %v1846_v30 = vpop.f32.mrf.mxu0  ;;  %v1919_v58 = vpop.f32.mrf.mxu1  ;;  %v1597_v1 = vrot.slane %v1596_v31, 2  ;;  %v1623_v28 = vrot.slane %v1622_v62, 2  ;;  %v1636_v34 = vrot.slane %v1635_v61, 2 }
 0x302   : > { %v5331_v63 = vcombine.low %v2067_v50, %v2074_v16  ;;  %v2004_v21 = vmax.f32 %v2003_v13, %v1846_v30  ;;  %v2030_v20 = vmax.f32 %v2029_v56, %v1919_v58  ;;  %v1610_v50 = vrot.slane %v1609_v35, 2 }
 0x303   : > { %v1848_v9 = vpop.f32.mrf.mxu0  ;;  %v1921_v8 = vpop.f32.mrf.mxu1  ;;  %v1598_v14 = vmax.f32 %v1596_v31, %v1597_v1  ;;  %v1624_v7 = vmax.f32 %v1622_v62, %v1623_v28  ;;  %v1637_v10 = vmax.f32 %v1635_v61, %v1636_v34  ;;  %v2584_v61 = vld [vmem:[%s5918_s5 + $0x188] sm:$0xff] }
 0x304   : > { %v1992_v11 = vmax.f32 %v1991_v51, %v1848_v9  ;;  %v2018_v12 = vmax.f32 %v2017_v18, %v1921_v8  ;;  %v1611_v9 = vmax.f32 %v1609_v35, %v1610_v50 }
 0x305   : > { %v1850_v45 = vpop.f32.mrf.mxu0  ;;  %v1923_v4 = vpop.f32.mrf.mxu1 }
 0x306   : > { %v2005_v59 = vmax.f32 %v2004_v21, %v1850_v45  ;;  %v2031_v38 = vmax.f32 %v2030_v20, %v1923_v4  ;;  %v1612_v21 = vrot.slane %v1611_v9, 1 }
 0x307   : > { %v1854_v52 = vpop.f32.mrf.mxu0  ;;  %v1927_v17 = vpop.f32.mrf.mxu1 }
 0x308   : > { %v1993_v32 = vmax.f32 %v1992_v11, %v1854_v52  ;;  %v2019_v46 = vmax.f32 %v2018_v12, %v1927_v17  ;;  %v1599_v52 = vrot.slane %v1598_v14, 1  ;;  %v1625_v17 = vrot.slane %v1624_v7, 1 }
 0x309   : > { %v1856_v2 = vpop.f32.mrf.mxu0  ;;  %v1929_v29 = vpop.f32.mrf.mxu1 }
 0x30a   : > { %v2006_v40 = vmax.f32 %v2005_v59, %v1856_v2  ;;  %v2032_v47 = vmax.f32 %v2031_v38, %v1929_v29  ;;  %v2588_v2 = vld [vmem:[%s5918_s5 + $0x1a8] sm:$0xff]  ;;  %v1638_v29 = vrot.slane %v1637_v10, 1 }
 0x30b   : > { %v1858_v23 = vpop.f32.mrf.mxu0  ;;  %v1931_v16 = vpop.f32.mrf.mxu1 }
 0x30c   : > { %v1994_v19 = vmax.f32 %v1993_v32, %v1858_v23  ;;  %v2020_v39 = vmax.f32 %v2019_v46, %v1931_v16  ;;  %v1600_v16 = vmax.f32 %v1598_v14, %v1599_v52  ;;  %v1639_v14 = vmax.f32 %v1637_v10, %v1638_v29 }
 0x30d   : > { %v1860_v30 = vpop.f32.mrf.mxu0  ;;  %v1933_v58 = vpop.f32.mrf.mxu1 }
 0x30e   : > { %v1995_v54 = vrot.slane %v1994_v19, 4  ;;  %v2021_v22 = vrot.slane %v2020_v39, 4  ;;  %v2007_v41 = vmax.f32 %v2006_v40, %v1860_v30  ;;  %v2033_v37 = vmax.f32 %v2032_v47, %v1933_v58 }
 0x30f   : > { %v4251_v8 = vpop.f32.mrf.mxu0 }
 0x310   : > { %v1996_v27 = vmax.f32 %v1994_v19, %v1995_v54  ;;  %v2022_v3 = vmax.f32 %v2020_v39, %v2021_v22  ;;  %v2008_v60 = vrot.slane %v2007_v41, 4  ;;  %v2034_v49 = vrot.slane %v2033_v37, 4 }
 0x311   : > { %v2258_v45 = vadd.f32 %v4251_v8, %v5341_v33  ;;  %v2252_v4 = vpop.f32.mrf.mxu0  ;;  %v5353_v39 = vcombine.high %v2584_v61, %v2588_v2  ;;  %v1626_v22 = vmax.f32 %v1624_v7, %v1625_v17 }
 0x312   : > { %v1997_v13 = vrot.slane %v1996_v27, 2  ;;  %v2023_v56 = vrot.slane %v2022_v3, 2  ;;  %v2009_v51 = vmax.f32 %v2007_v41, %v2008_v60  ;;  %v2035_v18 = vmax.f32 %v2033_v37, %v2034_v49 }
 0x313   : > { %v2253_v31 = vadd.f32 %v5341_v33, %v2252_v4  ;;  %v4254_v62 = vpop.f32.mrf.mxu0  ;;  %v2332_v59 = vmax.f32 %v2258_v45, 0.0 }
 0x314   : > { %v1998_v35 = vmax.f32 %v1996_v27, %v1997_v13  ;;  %v2024_v20 = vmax.f32 %v2022_v3, %v2023_v56  ;;  %v2010_v11 = vrot.slane %v2009_v51, 2  ;;  %v2036_v12 = vrot.slane %v2035_v18, 2 }
 0x315   : > { %v2331_v38 = vmax.f32 %v2253_v31, 0.0  ;;  %v2268_v32 = vadd.f32 %v4254_v62, %v5341_v33  ;;  %v2262_v46 = vpop.f32.mrf.mxu0  ;;  %v1613_v3 = vmax.f32 %v1611_v9, %v1612_v21  ;;  %v2576_v31 = vld [vmem:[%s5918_s5 + $0x148] sm:$0xff]  ;;  %v5366_v62 = vcombine.low %v2584_v61, %v2588_v2 }
 0x316   : > { %v1999_v1 = vrot.slane %v1998_v35, 1  ;;  %v2025_v28 = vrot.slane %v2024_v20, 1  ;;  %v2011_v50 = vmax.f32 %v2009_v51, %v2010_v11  ;;  %v2037_v23 = vmax.f32 %v2035_v18, %v2036_v12  ;;  %v2580_v9 = vld [vmem:[%s5918_s5 + $0x168] sm:$0xff] }
 0x317   : > { %v2347_v40 = vpack.c.bf16 %v2332_v59, %v2331_v38  ;;  %v2263_v47 = vadd.f32 %v5341_v33, %v2262_v46  ;;  %v4257_v19 = vpop.f32.mrf.mxu0  ;;  %v2334_v41 = vmax.f32 %v2268_v32, 0.0  ;;  %v5371_v38 = vcombine.high %v2576_v31, %v2580_v9  ;;  %v2568_v2 = vld [vmem:[%s5918_s5 + $0x108] sm:$0xff] }
 0x318   : > { %v2000_v34 = vmax.f32 %v1998_v35, %v1999_v1  ;;  %v2026_v30 = vmax.f32 %v2024_v20, %v2025_v28  ;;  %v2012_v58 = vrot.slane %v2011_v50, 1  ;;  %v2038_v54 = vrot.slane %v2037_v23, 1  ;;  %v2572_v28 = vld [vmem:[%s5918_s5 + $0x128] sm:$0xff] }
 0x319   : > { %v2333_v37 = vmax.f32 %v2263_v47, 0.0  ;;  %v2278_v8 = vadd.f32 %v4257_v19, %v5341_v33  ;;  %4281 = vmatprep.mubr.msk.bf16.mxu1 %vm718_vm2, %v2347_v40  ;;  %v2272_v27 = vpop.f32.mrf.mxu0 }
 0x31a   : > { %v2013_v60 = vmax.f32 %v2011_v50, %v2012_v58  ;;  %v2039_v49 = vmax.f32 %v2037_v23, %v2038_v54  ;;  %v2044_v45 = vmax.f32 %v1600_v16, %v2000_v34  ;;  %v2273_v56 = vadd.f32 %v5341_v33, %v2272_v27  ;;  %v2048_v27 = vld [vmem:[#allocation2] ss:$2 sm:$0xff] }
 0x31b   : > { %v2348_v4 = vpack.c.bf16 %v2334_v41, %v2333_v37  ;;  %v2336_v13 = vmax.f32 %v2278_v8, 0.0  ;;  %v4260_v51 = vpop.f32.mrf.mxu0  ;;  %v2046_v18 = vmax.f32 %v1626_v22, %v2026_v30  ;;  %v5383_v23 = vcombine.low %v2576_v31, %v2580_v9  ;;  %v2560_v37 = vld [vmem:[%s5918_s5 + $0xc8] sm:$0xff] }
 0x31c   : > { %v2045_v52 = vmax.f32 %v1613_v3, %v2013_v60  ;;  %v2047_v7 = vmax.f32 %v1639_v14, %v2039_v49  ;;  %v2288_v17 = vadd.f32 %v4260_v51, %v5341_v33  ;;  %v2335_v10 = vmax.f32 %v2273_v56, 0.0  ;;  %v2564_v8 = vld [vmem:[%s5918_s5 + $0xe8] sm:$0xff] }
 0x31d   : > { %4282 = vmatmul.mubr.msk.bf16.vlgmr.msra.gmra.mxu1 %vm718_vm2, %v2348_v4  ;;  %v2282_v21 = vpop.f32.mrf.mxu0  ;;  %v5388_v30 = vcombine.high %v2568_v2, %v2572_v28  ;;  %v2097_v58 = vrot.slane %v5331_v63, %v5320_v53  ;;  %v5401_v14 = vcombine.low %v2568_v2, %v2572_v28  ;;  %v5412_v9 = vcombine.low %v2560_v37, %v2564_v8  ;;  %v2556_v2 = vld [vmem:[%s5918_s5 + $0xa8] sm:$0xff] }
 0x31e   : > { %v2059_v35 = vcombine.low %v2044_v45, %v2045_v52  ;;  %v2060_v20 = vcombine.low %v2046_v18, %v2047_v7  ;;  %v2338_v11 = vmax.f32 %v2288_v17, 0.0  ;;  %v2283_v12 = vadd.f32 %v5341_v33, %v2282_v21  ;;  %2993 = vmatpush1.bf16.msra.mxu1 %v5241_v42 }
 0x31f   : > { %v2349_v29 = vpack.c.bf16 %v2336_v13, %v2335_v10  ;;  %v4263_v59 = vpop.f32.mrf.mxu0  ;;  %2994 = vmatprep.subr.bf16.mxu1 %v5353_v39  ;;  %v5406_v13 = vcombine.high %v2560_v37, %v2564_v8  ;;  %v2535_v37 = vld [vmem:[%s5918_s5] sm:$0xff] }
 0x320   : > { %v2081_v32 = vrot.slane %v2059_v35, %v5320_v53  ;;  %v2088_v46 = vrot.slane %v2060_v20, %v5320_v53  ;;  %v2337_v1 = vmax.f32 %v2283_v12, 0.0  ;;  %v2298_v61 = vadd.f32 %v4263_v59, %v5341_v33  ;;  %v2539_v8 = vld [vmem:[%s5918_s5 + $0x20] sm:$0xff] }
 0x321   : > { %4285 = vmatprep.mubr.msk.bf16.mxu1 %vm718_vm2, %v2349_v29  ;;  %v2292_v50 = vpop.f32.mrf.mxu0 }
 0x322   : > { %v2090_v16 = vcombine.low %v2081_v32, %v2088_v46  ;;  %v2350_v40 = vpack.c.bf16 %v2338_v11, %v2337_v1  ;;  %v2340_v47 = vmax.f32 %v2298_v61, 0.0  ;;  %v2293_v19 = vadd.f32 %v5341_v33, %v2292_v50  ;;  %2995 = vmatpush1.bf16.msra.mxu1 %v5366_v62  ;;  %v2551_v46 = vld [vmem:[%s5918_s5 + $0x80] sm:$0xff] }
 0x323   : > { %v4266_v34 = vpop.f32.mrf.mxu0  ;;  %2996 = vmatprep.subr.bf16.mxu1 %v5371_v38  ;;  %v2555_v1 = vld [vmem:[%s5918_s5 + $0xa0] sm:$0xff] }
 0x324   : > { %v2104_v54 = vrot.slane %v2090_v16, %v5320_v53  ;;  %v2339_v22 = vmax.f32 %v2293_v19, 0.0  ;;  %v2308_v41 = vadd.f32 %v4266_v34, %v5341_v33  ;;  %v5431_v61 = vcombine.high %v2551_v46, %v2555_v1  ;;  %v2544_v19 = vld [vmem:[%s5918_s5 + $0x48] sm:$0xff] }
 0x325   : > { %4286 = vmatmul.mubr.msk.bf16.gmra.mxu1 %vm718_vm2, %v2350_v40  ;;  %v2302_v3 = vpop.f32.mrf.mxu0  ;;  %v5436_v28 = vcombine.low %v2551_v46, %v2555_v1  ;;  %v2543_v40 = vld [vmem:[%s5918_s5 + $0x40] sm:$0xff]  ;;  %v2589_v46 = vld [vmem:[%s5918_s5 + $0x1b0] sm:$0xff]  ;;  %v2586_v1 = vld [vmem:[%s5918_s5 + $0x198] sm:$0xff] }
 0x326   : > { %v2105_v63 = vcombine.low %v2097_v58, %v2104_v54  ;;  %v2351_v60 = vpack.c.bf16 %v2340_v47, %v2339_v22  ;;  %v2342_v49 = vmax.f32 %v2308_v41, 0.0  ;;  %v2303_v45 = vadd.f32 %v5341_v33, %v2302_v3  ;;  %2997 = vmatpush1.bf16.msra.mxu1 %v5383_v23  ;;  %2929 = vmatprep.subr.bf16.mxu0 %v5431_v61  ;;  %v2547_v47 = vld [vmem:[%s5918_s5 + $0x60] sm:$0xff]  ;;  %v2548_v58 = vld [vmem:[%s5918_s5 + $0x68] sm:$0xff] }
 0x327   : > { %v4269_v4 = vpop.f32.mrf.mxu0  ;;  %2998 = vmatprep.subr.bf16.mxu1 %v5388_v30  ;;  %2930 = vmatpush1.bf16.msra.mxu0 %v5436_v28  ;;  %v5455_v34 = vcombine.high %v2543_v40, %v2547_v47  ;;  %v5460_v54 = vcombine.low %v2543_v40, %v2547_v47  ;;  %v5462_v22 = vcombine.low %v2544_v19, %v2548_v58 }
 0x328   : > { %v2107_v56 = vmax.f32 %v2048_v27, %v2105_v63  ;;  %v2341_v51 = vmax.f32 %v2303_v45, 0.0  ;;  %4289 = vmatprep.mubr.msk.bf16.mxu1 %vm718_vm2, %v2351_v60  ;;  %v2318_v18 = vadd.f32 %v4269_v4, %v5341_v33  ;;  %v5464_v41 = vcombine.high %v2544_v19, %v2548_v58  ;;  %v2536_v27 = vld [vmem:[%s5918_s5 + $0x8] sm:$0xff]  ;;  %v2593_v4 = vld [vmem:[%s5918_s5 + $0x1d0] sm:$0xff] }
 0x329   : > { %v2312_v52 = vpop.f32.mrf.mxu0  ;;  %2931 = vmatprep.subr.bf16.mxu0 %v5455_v34  ;;  %v5479_v3 = vcombine.high %v2535_v37, %v2539_v8  ;;  %v2540_v63 = vld [vmem:[%s5918_s5 + $0x28] sm:$0xff]  ;;  %v5484_v60 = vcombine.low %v2535_v37, %v2539_v8 }
 0x32a   : > { %2108 = vst [vmem:[#allocation2] ss:$2 sm:$0xff] %v2107_v56  ;;  %v2352_v7 = vpack.c.bf16 %v2342_v49, %v2341_v51  ;;  %v2344_v17 = vmax.f32 %v2318_v18, 0.0  ;;  %v2313_v31 = vadd.f32 %v5341_v33, %v2312_v52  ;;  %2999 = vmatpush1.bf16.msra.mxu1 %v5401_v14  ;;  %v5486_v49 = vcombine.low %v2536_v27, %v2540_v63  ;;  %v2597_v56 = vld [vmem:[%s5918_s5 + $0x1f0] sm:$0xff]  ;;  %v2594_v51 = vld [vmem:[%s5918_s5 + $0x1d8] sm:$0xff] }
 0x32b   : > { %v4272_v10 = vpop.f32.mrf.mxu0  ;;  %3000 = vmatprep.subr.bf16.mxu1 %v5406_v13  ;;  %2932 = vmatpush1.bf16.msra.mxu0 %v5460_v54  ;;  %v5488_v45 = vcombine.high %v2536_v27, %v2540_v63  ;;  %v5503_v18 = vcombine.high %v2593_v4, %v2597_v56  ;;  %v2598_v52 = vld [vmem:[%s5918_s5 + $0x1f8] sm:$0xff]  ;;  %v2577_v27 = vld [vmem:[%s5918_s5 + $0x150] sm:$0xff] }
 0x32c   : > { %v2343_v21 = vmax.f32 %v2313_v31, 0.0  ;;  %v2328_v35 = vadd.f32 %v4272_v10, %v5341_v33  ;;  %2933 = vmatprep.subr.bf16.mxu0 %v5479_v3  ;;  %v5512_v31 = vcombine.high %v2594_v51, %v2598_v52 }
 0x32d   : > { %4290 = vmatmul.mubr.msk.bf16.gmra.mxu1 %vm718_vm2, %v2352_v7  ;;  %v2322_v20 = vpop.f32.mrf.mxu0  ;;  %v5508_v7 = vcombine.low %v2593_v4, %v2597_v56  ;;  %v2581_v4 = vld [vmem:[%s5918_s5 + $0x170] sm:$0xff]  ;;  %v2578_v56 = vld [vmem:[%s5918_s5 + $0x158] sm:$0xff] }
 0x32e   : > { %v2353_v11 = vpack.c.bf16 %v2344_v17, %v2343_v21  ;;  %v2346_v12 = vmax.f32 %v2328_v35, 0.0  ;;  %v2323_v29 = vadd.f32 %v5341_v33, %v2322_v20  ;;  %3001 = vmatpush1.bf16.msra.mxu1 %v5412_v9  ;;  %v2552_v33 = vld [vmem:[%s5918_s5 + $0x88] sm:$0xff]  ;;  %v5510_v17 = vcombine.low %v2594_v51, %v2598_v52  ;;  %v5519_v35 = vld [vmem:[%s5917_s4] ss:$0 sm:$0xff]  ;;  %v2582_v51 = vld [vmem:[%s5918_s5 + $0x178] sm:$0xff] }
 0x32f   : > { %v5438_v50 = vcombine.low %v2552_v33, %v2556_v2  ;;  %v5440_v16 = vcombine.high %v2552_v33, %v2556_v2  ;;  %2934 = vmatpush1.bf16.msra.mxu0 %v5484_v60  ;;  %v2590_v33 = vld [vmem:[%s5918_s5 + $0x1b8] sm:$0xff] }
 0x330   : > { %v2345_v59 = vmax.f32 %v2323_v29, 0.0  ;;  %4293 = vmatprep.mubr.msk.bf16.mxu1 %vm718_vm2, %v2353_v11  ;;  %5990 = vst [vmem:[#allocation9_spill] sm:$0xff] %v5510_v17  ;;  %3065 = vmatprep.subr.bf16.mxu0 %v5503_v18  ;;  %v5542_v8 = vcombine.high %v2586_v1, %v2590_v33 }
 0x331   : > { %3002 = vmatprep.subr.bf16.mxu1 %v5440_v16 }
 0x332   : > { %v2354_v32 = vpack.c.bf16 %v2346_v12, %v2345_v59  ;;  %3003 = vmatpush1.bf16.msra.mxu1 %v5438_v50  ;;  %v2585_v59 = vld [vmem:[%s5918_s5 + $0x190] sm:$0xff]  ;;  %5992 = vst [vmem:[#allocation11_spill] sm:$0xff] %v5542_v8 }
 0x333   : > { %3004 = vmatprep.subr.bf16.mxu1 %v5464_v41  ;;  %v5540_v37 = vcombine.high %v2585_v59, %v2589_v46 }
 0x335   : > { %4294 = vmatmul.mubr.msk.bf16.gmra.mxu1 %vm718_vm2, %v2354_v32  ;;  %5991 = vst [vmem:[#allocation10_spill] sm:$0xff] %v5540_v37 }
 0x336   : > { %3024 = vmatprep.mubr.bf16.mxu1 %v5968_v48  ;;  %3005 = vmatpush1.bf16.msra.mxu1 %v5462_v22 }
 0x337   : > { %3006 = vmatprep.subr.bf16.mxu1 %v5488_v45 }
 0x33a   : > { %3007 = vmatpush1.bf16.msra.mxu1 %v5486_v49 }
 0x33b   : > { %3138 = vmatprep.subr.bf16.mxu1 %v5512_v31 }
 0x3dd   : > { %v4283_v10 = vpop.f32.mrf.mxu1 }
 0x3de   : > { %v2461_v52 = vadd.f32 %v4283_v10, %v5519_v35  ;;  %v5572_v10 = vcombine.high %v2577_v27, %v2581_v4 }
 0x3df   : > { %v2452_v21 = vpop.f32.mrf.mxu1 }
 0x3e0   : > { %v2453_v11 = vadd.f32 %v5519_v35, %v2452_v21  ;;  %v5563_v21 = vcombine.low %v2585_v59, %v2589_v46  ;;  %5993 = vst [vmem:[#allocation12_spill] sm:$0xff] %v5572_v10  ;;  %v2573_v59 = vld [vmem:[%s5918_s5 + $0x130] sm:$0xff]  ;;  %v2570_v46 = vld [vmem:[%s5918_s5 + $0x118] sm:$0xff] }
 0x3e1   : > { %v4284_v20 = vpop.f32.mrf.mxu1 }
 0x3e2   : > { %v2515_v2 = vmax.f32 %v2453_v11, 0.0  ;;  %v2464_v19 = vadd.f32 %v4284_v20, %v5519_v35  ;;  %v5565_v20 = vcombine.low %v2586_v1, %v2590_v33  ;;  %v2569_v11 = vld [vmem:[%s5918_s5 + $0x110] sm:$0xff]  ;;  %v2574_v1 = vld [vmem:[%s5918_s5 + $0x138] sm:$0xff] }
 0x3e3   : > { %v2455_v12 = vpop.f32.mrf.mxu1  ;;  %v5593_v57 = vcombine.high %v2569_v11, %v2573_v59  ;;  %v5595_v53 = vcombine.high %v2570_v46, %v2574_v1 }
 0x3e4   : > { %v2456_v29 = vadd.f32 %v5519_v35, %v2455_v12  ;;  %v2518_v12 = vmax.f32 %v2464_v19, 0.0  ;;  %v5591_v19 = vcombine.low %v2578_v56, %v2582_v51 }
 0x3e5   : > { %v5526_v32 = vpop.f32.mrf.mxu1  ;;  %5997 = vst [vmem:[#allocation16_spill] sm:$0xff] %v5593_v57  ;;  %5998 = vst [vmem:[#allocation17_spill] sm:$0xff] %v5595_v53 }
 0x3e6   : > { %v2516_v40 = vmax.f32 %v2456_v29, 0.0  ;;  %v5574_v29 = vcombine.high %v2578_v56, %v2582_v51  ;;  %5996 = vst [vmem:[#allocation15_spill] sm:$0xff] %v5591_v19  ;;  %v2562_v56 = vld [vmem:[%s5918_s5 + $0xd8] sm:$0xff]  ;;  %v5619_v51 = vcombine.low %v2569_v11, %v2573_v59  ;;  %v2557_v11 = vld [vmem:[%s5918_s5 + $0xb0] sm:$0xff] }
 0x3e7   : > { %v2468_v47 = vpop.f32.mrf.mxu1  ;;  %v2554_v59 = vld [vmem:[%s5918_s5 + $0x98] sm:$0xff] }
 0x3e8   : > { %v5538_v58 = vpack.c.bf16 %v2516_v40, %v2515_v2  ;;  %5994 = vst [vmem:[#allocation13_spill] sm:$0xff] %v5574_v29  ;;  %v2517_v2 = vmax.f32 %v2461_v52, 0.0  ;;  %v5587_v40 = vcombine.low %v2577_v27, %v2581_v4  ;;  %v2561_v27 = vld [vmem:[%s5918_s5 + $0xd0] sm:$0xff]  ;;  %v5621_v52 = vcombine.low %v2570_v46, %v2574_v1 }
 0x3e9   : > { %v5547_v63 = vpop.f32.mrf.mxu1  ;;  %v2565_v4 = vld [vmem:[%s5918_s5 + $0xf0] sm:$0xff] }
 0x3ea   : > { %2952 = vmatmul.mubr.bf16.vlgmr.msra.gmra.mxu0 %v5538_v58  ;;  %3025 = vmatmul.mubr.bf16.vlgmr.msra.gmra.mxu1 %v5538_v58  ;;  %5995 = vst [vmem:[#allocation14_spill] sm:$0xff] %v5587_v40 }
 0x3eb   : > { %3066 = vmatpush1.bf16.msra.mxu0 %v5508_v7  ;;  %3139 = vmatpush1.bf16.msra.mxu1 %v5510_v17  ;;  %v2471_v33 = vpop.f32.mrf.mxu1 }
 0x3ec   : > { %3067 = vmatprep.subr.bf16.mxu0 %v5540_v37  ;;  %3140 = vmatprep.subr.bf16.mxu1 %v5542_v8  ;;  %v5597_v8 = vpack.c.bf16 %v2518_v12, %v2517_v2  ;;  %v2469_v37 = vadd.f32 %v5519_v35, %v2468_v47  ;;  %v2472_v17 = vadd.f32 %v5519_v35, %v2471_v33  ;;  %v2566_v47 = vld [vmem:[%s5918_s5 + $0xf8] sm:$0xff]  ;;  %v2553_v12 = vld [vmem:[%s5918_s5 + $0x90] sm:$0xff] }
 0x3ed   : > { %2961 = vmatprep.mubr.bf16.mxu0 %v5968_v48  ;;  %3034 = vmatprep.mubr.bf16.mxu1 %v5968_v48  ;;  %v5647_v46 = vcombine.low %v2562_v56, %v2566_v47  ;;  %v5649_v1 = vcombine.high %v2553_v12, %v2557_v11 }
 0x3ee   : > { %v2519_v33 = vmax.f32 %v2469_v37, 0.0  ;;  %v2520_v2 = vmax.f32 %v2472_v17, 0.0  ;;  %v2558_v17 = vld [vmem:[%s5918_s5 + $0xb8] sm:$0xff]  ;;  %v5643_v37 = vcombine.low %v2561_v27, %v2565_v4 }
 0x3ef   : > { %3068 = vmatpush1.bf16.msra.mxu0 %v5563_v21  ;;  %3141 = vmatpush1.bf16.msra.mxu1 %v5565_v20  ;;  %6002 = vst [vmem:[#allocation21_spill] sm:$0xff] %v5649_v1 }
 0x3f0   : > { %3069 = vmatprep.subr.bf16.mxu0 %v5572_v10  ;;  %3142 = vmatprep.subr.bf16.mxu1 %v5574_v29  ;;  %v5628_v29 = vcombine.high %v2561_v27, %v2565_v4  ;;  %v5630_v10 = vcombine.high %v2562_v56, %v2566_v47  ;;  %6001 = vst [vmem:[#allocation20_spill] sm:$0xff] %v5643_v37  ;;  %v2545_v27 = vld [vmem:[%s5918_s5 + $0x50] sm:$0xff] }
 0x3f1   : > { %v2549_v4 = vld [vmem:[%s5918_s5 + $0x70] sm:$0xff]  ;;  %v5677_v56 = vcombine.low %v2553_v12, %v2557_v11  ;;  %v5679_v47 = vcombine.low %v2554_v59, %v2558_v17  ;;  %v2542_v12 = vld [vmem:[%s5918_s5 + $0x38] sm:$0xff] }
 0x3f2   : > { %2962 = vmatmul.mubr.bf16.gmra.mxu0 %v5597_v8  ;;  %3035 = vmatmul.mubr.bf16.gmra.mxu1 %v5597_v8  ;;  %5999 = vst [vmem:[#allocation18_spill] sm:$0xff] %v5628_v29  ;;  %6000 = vst [vmem:[#allocation19_spill] sm:$0xff] %v5630_v10  ;;  %v5703_v11 = vcombine.low %v2545_v27, %v2549_v4 }
 0x3f3   : > { %3070 = vmatpush1.bf16.msra.mxu0 %v5587_v40  ;;  %3143 = vmatpush1.bf16.msra.mxu1 %v5591_v19  ;;  %v2480_v19 = vadd.f32 %v5547_v63, %v5519_v35  ;;  %v5657_v40 = vpack.c.bf16 %v2520_v2, %v2519_v33  ;;  %v2550_v63 = vld [vmem:[%s5918_s5 + $0x78] sm:$0xff]  ;;  %6004 = vst [vmem:[#allocation23_spill] sm:$0xff] %v5679_v47 }
 0x3f4   : > { %3071 = vmatprep.subr.bf16.mxu0 %v5593_v57  ;;  %3144 = vmatprep.subr.bf16.mxu1 %v5595_v53  ;;  %v5651_v53 = vcombine.high %v2554_v59, %v2558_v17  ;;  %v2477_v57 = vadd.f32 %v5526_v32, %v5519_v35  ;;  %v2546_v32 = vld [vmem:[%s5918_s5 + $0x58] sm:$0xff] }
 0x3f5   : > { %2971 = vmatprep.mubr.bf16.mxu0 %v5968_v48  ;;  %3044 = vmatprep.mubr.bf16.mxu1 %v5968_v48  ;;  %v2522_v2 = vmax.f32 %v2480_v19, 0.0  ;;  %v2538_v19 = vld [vmem:[%s5918_s5 + $0x18] sm:$0xff]  ;;  %v5705_v59 = vcombine.low %v2546_v32, %v2550_v63 }
 0x3f6   : > { %6003 = vst [vmem:[#allocation22_spill] sm:$0xff] %v5651_v53  ;;  %v2521_v33 = vmax.f32 %v2477_v57, 0.0  ;;  %v2541_v57 = vld [vmem:[%s5918_s5 + $0x30] sm:$0xff] }
 0x3f7   : > { %3072 = vmatpush1.bf16.msra.mxu0 %v5619_v51  ;;  %3145 = vmatpush1.bf16.msra.mxu1 %v5621_v52 }
 0x3f8   : > { %3073 = vmatprep.subr.bf16.mxu0 %v5628_v29  ;;  %3146 = vmatprep.subr.bf16.mxu1 %v5630_v10  ;;  %v5683_v10 = vcombine.high %v2545_v27, %v2549_v4  ;;  %v5685_v29 = vcombine.high %v2546_v32, %v2550_v63  ;;  %v2534_v17 = vpack.c.bf16 %v2522_v2, %v2521_v33 }
 0x3f9   : > { %v5717_v27 = vcombine.low %v2538_v19, %v2542_v12 }
 0x3fa   : > { %2972 = vmatmul.mubr.bf16.gmra.mxu0 %v5657_v40  ;;  %3045 = vmatmul.mubr.bf16.gmra.mxu1 %v5657_v40 }
 0x3fb   : > { %3074 = vmatpush1.bf16.msra.mxu0 %v5643_v37  ;;  %3147 = vmatpush1.bf16.msra.mxu1 %v5647_v46  ;;  %v2537_v37 = vld [vmem:[%s5918_s5 + $0x10] sm:$0xff] }
 0x3fc   : > { %3075 = vmatprep.subr.bf16.mxu0 %v5649_v1  ;;  %3148 = vmatprep.subr.bf16.mxu1 %v5651_v53  ;;  %v5709_v53 = vcombine.high %v2537_v37, %v2541_v57  ;;  %v5711_v1 = vcombine.high %v2538_v19, %v2542_v12 }
 0x3fd   : > { %2981 = vmatprep.mubr.bf16.mxu0 %v5968_v48  ;;  %3054 = vmatprep.mubr.bf16.mxu1 %v5968_v48 }
 0x3ff   : > { %3076 = vmatpush1.bf16.msra.mxu0 %v5677_v56  ;;  %3149 = vmatpush1.bf16.msra.mxu1 %v5679_v47  ;;  %v5715_v47 = vcombine.low %v2537_v37, %v2541_v57 }
 0x400   : > { %3077 = vmatprep.subr.bf16.mxu0 %v5683_v10  ;;  %3150 = vmatprep.subr.bf16.mxu1 %v5685_v29 }
 0x402   : > { %2982 = vmatmul.mubr.bf16.gmra.mxu0 %v2534_v17  ;;  %3055 = vmatmul.mubr.bf16.gmra.mxu1 %v2534_v17 }
 0x403   : > { %3078 = vmatpush1.bf16.msra.mxu0 %v5703_v11  ;;  %3151 = vmatpush1.bf16.msra.mxu1 %v5705_v59 }
 0x404   : > { %3079 = vmatprep.subr.bf16.mxu0 %v5709_v53  ;;  %3152 = vmatprep.subr.bf16.mxu1 %v5711_v1 }
 0x405   : > { %3097 = vmatprep.mubr.bf16.mxu0 %v5968_v48  ;;  %3170 = vmatprep.mubr.bf16.mxu1 %v5968_v48 }
 0x407   : > { %3080 = vmatpush1.bf16.msra.mxu0 %v5715_v47  ;;  %3153 = vmatpush1.bf16.msra.mxu1 %v5717_v27 }
 0x408   : > { %3319 = vmatprep.subr.bf16.mxu0 %v5232_v43  ;;  %3392 = vmatprep.subr.bf16.mxu1 %v5243_v44  ;;  %v4291_v43 = vpop.f32.mrf.mxu1 }
 0x40a   : > { %3098 = vmatmul.mubr.bf16.vlgmr.msra.gmra.mxu0 %v5538_v58  ;;  %3171 = vmatmul.mubr.bf16.vlgmr.msra.gmra.mxu1 %v5538_v58  ;;  %v6015_v58 = vld [vmem:[#allocation19_spill] sm:$0xff] }
 0x40b   : > { %3320 = vmatpush1.bf16.msra.mxu0 %v5230_v36  ;;  %3393 = vmatpush1.bf16.msra.mxu1 %v5241_v42  ;;  %v2484_v36 = vpop.f32.mrf.mxu1 }
 0x40c   : > { %3321 = vmatprep.subr.bf16.mxu0 %v5255_v6  ;;  %3394 = vmatprep.subr.bf16.mxu1 %v5353_v39 }
 0x40d   : > { %3107 = vmatprep.mubr.bf16.mxu0 %v5968_v48  ;;  %3180 = vmatprep.mubr.bf16.mxu1 %v5968_v48  ;;  %v4292_v42 = vpop.f32.mrf.mxu1 }
 0x40f   : > { %3322 = vmatpush1.bf16.msra.mxu0 %v5253_v5  ;;  %3395 = vmatpush1.bf16.msra.mxu1 %v5366_v62  ;;  %v2487_v44 = vpop.f32.mrf.mxu1  ;;  %v2485_v5 = vadd.f32 %v5519_v35, %v2484_v36 }
 0x410   : > { %3323 = vmatprep.subr.bf16.mxu0 %v5257_v24  ;;  %3396 = vmatprep.subr.bf16.mxu1 %v5371_v38  ;;  %v2488_v6 = vadd.f32 %v5519_v35, %v2487_v44  ;;  %v6005_v38 = vld [vmem:[#allocation9_spill] sm:$0xff] }
 0x411   : > { %v4295_v24 = vpop.f32.mrf.mxu1 }
 0x412   : > { %3108 = vmatmul.mubr.bf16.gmra.mxu0 %v5597_v8  ;;  %3181 = vmatmul.mubr.bf16.gmra.mxu1 %v5597_v8  ;;  %v6016_v8 = vld [vmem:[#allocation20_spill] sm:$0xff] }
 0x413   : > { %3324 = vmatpush1.bf16.msra.mxu0 %v5267_v25  ;;  %3397 = vmatpush1.bf16.msra.mxu1 %v5383_v23  ;;  %v2523_v25 = vmax.f32 %v2485_v5, 0.0 }
 0x414   : > { %3325 = vmatprep.subr.bf16.mxu0 %v5270_v15  ;;  %3398 = vmatprep.subr.bf16.mxu1 %v5388_v30  ;;  %v2524_v15 = vmax.f32 %v2488_v6, 0.0 }
 0x415   : > { %3117 = vmatprep.mubr.bf16.mxu0 %v5968_v48  ;;  %3190 = vmatprep.mubr.bf16.mxu1 %v5968_v48 }
 0x416   : > { %v5775_v39 = vpack.c.bf16 %v2524_v15, %v2523_v25 }
 0x417   : > { %3326 = vmatpush1.bf16.msra.mxu0 %v5279_v26  ;;  %3399 = vmatpush1.bf16.msra.mxu1 %v5401_v14  ;;  %v2500_v26 = vpop.f32.mrf.mxu1  ;;  %v6006_v14 = vld [vmem:[#allocation10_spill] sm:$0xff] }
 0x418   : > { %3327 = vmatprep.subr.bf16.mxu0 %v5282_v55  ;;  %3400 = vmatprep.subr.bf16.mxu1 %v5406_v13  ;;  %v2493_v55 = vadd.f32 %v4291_v43, %v5519_v35  ;;  %v6007_v13 = vld [vmem:[#allocation11_spill] sm:$0xff] }
 0x419   : > { %v4296_v62 = vpop.f32.mrf.mxu1 }
 0x41a   : > { %3118 = vmatmul.mubr.bf16.gmra.mxu0 %v5657_v40  ;;  %3191 = vmatmul.mubr.bf16.gmra.mxu1 %v5657_v40  ;;  %v2525_v23 = vmax.f32 %v2493_v55, 0.0  ;;  %v6017_v40 = vld [vmem:[#allocation21_spill] sm:$0xff] }
 0x41b   : > { %3328 = vmatpush1.bf16.msra.mxu0 %v5285_v0  ;;  %3401 = vmatpush1.bf16.msra.mxu1 %v5412_v9  ;;  %v2496_v0 = vadd.f32 %v4292_v42, %v5519_v35  ;;  %v2503_v9 = vpop.f32.mrf.mxu1 }
 0x41c   : > { %3329 = vmatprep.subr.bf16.mxu0 %v5431_v61  ;;  %3402 = vmatprep.subr.bf16.mxu1 %v5440_v16  ;;  %v6008_v16 = vld [vmem:[#allocation12_spill] sm:$0xff] }
 0x41d   : > { %3127 = vmatprep.mubr.bf16.mxu0 %v5968_v48  ;;  %3200 = vmatprep.mubr.bf16.mxu1 %v5968_v48  ;;  %v2526_v30 = vmax.f32 %v2496_v0, 0.0 }
 0x41f   : > { %3330 = vmatpush1.bf16.msra.mxu0 %v5436_v28  ;;  %3403 = vmatpush1.bf16.msra.mxu1 %v5438_v50  ;;  %v3316_v61 = vpack.c.bf16 %v2526_v30, %v2525_v23  ;;  %v2501_v28 = vadd.f32 %v5519_v35, %v2500_v26  ;;  %v2504_v50 = vadd.f32 %v5519_v35, %v2503_v9 }
 0x420   : > { %3331 = vmatprep.subr.bf16.mxu0 %v5455_v34  ;;  %3404 = vmatprep.subr.bf16.mxu1 %v5464_v41  ;;  %v6009_v34 = vld [vmem:[#allocation13_spill] sm:$0xff] }
 0x421   : > { %v2527_v41 = vmax.f32 %v2501_v28, 0.0 }
 0x422   : > { %3128 = vmatmul.mubr.bf16.gmra.mxu0 %v2534_v17  ;;  %3201 = vmatmul.mubr.bf16.gmra.mxu1 %v2534_v17 }
 0x423   : > { %3332 = vmatpush1.bf16.msra.mxu0 %v5460_v54  ;;  %3405 = vmatpush1.bf16.msra.mxu1 %v5462_v22  ;;  %v6010_v54 = vld [vmem:[#allocation14_spill] sm:$0xff]  ;;  %v6011_v22 = vld [vmem:[#allocation15_spill] sm:$0xff] }
 0x424   : > { %3333 = vmatprep.subr.bf16.mxu0 %v5479_v3  ;;  %3406 = vmatprep.subr.bf16.mxu1 %v5488_v45  ;;  %v2528_v3 = vmax.f32 %v2504_v50, 0.0  ;;  %v2509_v45 = vadd.f32 %v4295_v24, %v5519_v35 }
 0x425   : > { %3351 = vmatprep.mubr.bf16.mxu0 %v5968_v48  ;;  %3424 = vmatprep.mubr.bf16.mxu1 %v5968_v48 }
 0x427   : > { %3334 = vmatpush1.bf16.msra.mxu0 %v5484_v60  ;;  %3407 = vmatpush1.bf16.msra.mxu1 %v5486_v49  ;;  %v6012_v60 = vld [vmem:[#allocation16_spill] sm:$0xff]  ;;  %v6013_v49 = vld [vmem:[#allocation17_spill] sm:$0xff] }
 0x428   : > { %3465 = vmatprep.subr.bf16.mxu0 %v5503_v18  ;;  %3538 = vmatprep.subr.bf16.mxu1 %v5512_v31  ;;  %v2512_v18 = vadd.f32 %v4296_v62, %v5519_v35  ;;  %v6014_v31 = vld [vmem:[#allocation18_spill] sm:$0xff]  ;;  %v6019_v35 = vld [vmem:[#allocation23_spill] sm:$0xff] }
 0x42a   : > { %3352 = vmatmul.mubr.bf16.vlgmr.msra.gmra.mxu0 %v5775_v39  ;;  %3425 = vmatmul.mubr.bf16.vlgmr.msra.gmra.mxu1 %v5775_v39 }
 0x42b   : > { %3466 = vmatpush1.bf16.msra.mxu0 %v5508_v7  ;;  %3539 = vmatpush1.bf16.msra.mxu1 %v6005_v38  ;;  %v3317_v7 = vpack.c.bf16 %v2528_v3, %v2527_v41 }
 0x42c   : > { %3467 = vmatprep.subr.bf16.mxu0 %v6006_v14  ;;  %3540 = vmatprep.subr.bf16.mxu1 %v6007_v13 }
 0x42d   : > { %3361 = vmatprep.mubr.bf16.mxu0 %v5968_v48  ;;  %3434 = vmatprep.mubr.bf16.mxu1 %v5968_v48 }
 0x42f   : > { %3468 = vmatpush1.bf16.msra.mxu0 %v5563_v21  ;;  %3541 = vmatpush1.bf16.msra.mxu1 %v5565_v20  ;;  %v2529_v21 = vmax.f32 %v2509_v45, 0.0  ;;  %v2530_v20 = vmax.f32 %v2512_v18, 0.0 }
 0x430   : > { %3469 = vmatprep.subr.bf16.mxu0 %v6008_v16  ;;  %3542 = vmatprep.subr.bf16.mxu1 %v6009_v34 }
 0x432   : > { %3362 = vmatmul.mubr.bf16.gmra.mxu0 %v3316_v61  ;;  %3435 = vmatmul.mubr.bf16.gmra.mxu1 %v3316_v61 }
 0x433   : > { %3470 = vmatpush1.bf16.msra.mxu0 %v6010_v54  ;;  %3543 = vmatpush1.bf16.msra.mxu1 %v6011_v22 }
 0x434   : > { %3471 = vmatprep.subr.bf16.mxu0 %v6012_v60  ;;  %3544 = vmatprep.subr.bf16.mxu1 %v6013_v49 }
 0x435   : > { %3371 = vmatprep.mubr.bf16.mxu0 %v5968_v48  ;;  %3444 = vmatprep.mubr.bf16.mxu1 %v5968_v48 }
 0x437   : > { %3472 = vmatpush1.bf16.msra.mxu0 %v5619_v51  ;;  %3545 = vmatpush1.bf16.msra.mxu1 %v5621_v52  ;;  %v6018_v51 = vld [vmem:[#allocation22_spill] sm:$0xff]  ;;  %v3318_v52 = vpack.c.bf16 %v2530_v20, %v2529_v21 }
 0x438   : > { %3473 = vmatprep.subr.bf16.mxu0 %v6014_v31  ;;  %3546 = vmatprep.subr.bf16.mxu1 %v6015_v58 }
 0x43a   : > { %3372 = vmatmul.mubr.bf16.gmra.mxu0 %v3317_v7  ;;  %3445 = vmatmul.mubr.bf16.gmra.mxu1 %v3317_v7 }
 0x43b   : > { %3474 = vmatpush1.bf16.msra.mxu0 %v6016_v8  ;;  %3547 = vmatpush1.bf16.msra.mxu1 %v5647_v46 }
 0x43c   : > { %3475 = vmatprep.subr.bf16.mxu0 %v6017_v40  ;;  %3548 = vmatprep.subr.bf16.mxu1 %v6018_v51 }
 0x43d   : > { %3381 = vmatprep.mubr.bf16.mxu0 %v5968_v48  ;;  %3454 = vmatprep.mubr.bf16.mxu1 %v5968_v48 }
 0x43f   : > { %3476 = vmatpush1.bf16.msra.mxu0 %v5677_v56  ;;  %3549 = vmatpush1.bf16.msra.mxu1 %v6019_v35 }
 0x440   : > { %3477 = vmatprep.subr.bf16.mxu0 %v5683_v10  ;;  %3550 = vmatprep.subr.bf16.mxu1 %v5685_v29 }
 0x442   : > { %3382 = vmatmul.mubr.bf16.gmra.mxu0 %v3318_v52  ;;  %3455 = vmatmul.mubr.bf16.gmra.mxu1 %v3318_v52 }
 0x443   : > { %3478 = vmatpush1.bf16.msra.mxu0 %v5703_v11  ;;  %3551 = vmatpush1.bf16.msra.mxu1 %v5705_v59 }
 0x444   : > { %3479 = vmatprep.subr.bf16.mxu0 %v5709_v53  ;;  %3552 = vmatprep.subr.bf16.mxu1 %v5711_v1 }
 0x445   : > { %3497 = vmatprep.mubr.bf16.mxu0 %v5968_v48  ;;  %3570 = vmatprep.mubr.bf16.mxu1 %v5968_v48 }
 0x447   : > { %3480 = vmatpush1.bf16.msra.mxu0 %v5715_v47  ;;  %3553 = vmatpush1.bf16.msra.mxu1 %v5717_v27 }
 0x44a   : > { %3498 = vmatmul.mubr.bf16.vlgmr.msra.gmra.mxu0 %v5775_v39  ;;  %3571 = vmatmul.mubr.bf16.vlgmr.msra.gmra.mxu1 %v5775_v39 }
 0x44b   : > { %3507 = vmatprep.mubr.bf16.mxu0 %v5968_v48  ;;  %3580 = vmatprep.mubr.bf16.mxu1 %v5968_v48 }
 0x452   : > { %3508 = vmatmul.mubr.bf16.gmra.mxu0 %v3316_v61  ;;  %3581 = vmatmul.mubr.bf16.gmra.mxu1 %v3316_v61 }
 0x453   : > { %3517 = vmatprep.mubr.bf16.mxu0 %v5968_v48  ;;  %3590 = vmatprep.mubr.bf16.mxu1 %v5968_v48 }
 0x45a   : > { %3518 = vmatmul.mubr.bf16.gmra.mxu0 %v3317_v7  ;;  %3591 = vmatmul.mubr.bf16.gmra.mxu1 %v3317_v7 }
 0x45b   : > { %3527 = vmatprep.mubr.bf16.mxu0 %v5968_v48  ;;  %3600 = vmatprep.mubr.bf16.mxu1 %v5968_v48 }
 0x462   : > { %3528 = vmatmul.mubr.bf16.gmra.mxu0 %v3318_v52  ;;  %3601 = vmatmul.mubr.bf16.gmra.mxu1 %v3318_v52 }
 0x4aa   : > { %v2953_v53 = vpop.f32.mrf.mxu0  ;;  %v3026_v10 = vpop.f32.mrf.mxu1 }
 0x4ac   : > { %v2955_v29 = vpop.f32.mrf.mxu0  ;;  %v3028_v37 = vpop.f32.mrf.mxu1 }
 0x4ae   : > { %v2957_v46 = vpop.f32.mrf.mxu0  ;;  %v3030_v1 = vpop.f32.mrf.mxu1 }
 0x4af   : > { %v3211_v4 = vmax.f32 %v2953_v53, %v2957_v46  ;;  %v3237_v32 = vmax.f32 %v3026_v10, %v3030_v1 }
 0x4b0   : > { %v2959_v63 = vpop.f32.mrf.mxu0  ;;  %v3032_v56 = vpop.f32.mrf.mxu1 }
 0x4b1   : > { %v3224_v47 = vmax.f32 %v2955_v29, %v2959_v63  ;;  %v3250_v33 = vmax.f32 %v3028_v37, %v3032_v56 }
 0x4b2   : > { %v2963_v2 = vpop.f32.mrf.mxu0  ;;  %v3036_v57 = vpop.f32.mrf.mxu1 }
 0x4b3   : > { %v3212_v19 = vmax.f32 %v3211_v4, %v2963_v2  ;;  %v3238_v12 = vmax.f32 %v3237_v32, %v3036_v57 }
 0x4b4   : > { %v2965_v11 = vpop.f32.mrf.mxu0  ;;  %v3038_v48 = vpop.f32.mrf.mxu1 }
 0x4b5   : > { %v3225_v59 = vmax.f32 %v3224_v47, %v2965_v11  ;;  %v3251_v17 = vmax.f32 %v3250_v33, %v3038_v48 }
 0x4b6   : > { %v2967_v27 = vpop.f32.mrf.mxu0  ;;  %v3040_v43 = vpop.f32.mrf.mxu1 }
 0x4b7   : > { %v3213_v36 = vmax.f32 %v3212_v19, %v2967_v27  ;;  %v3239_v42 = vmax.f32 %v3238_v12, %v3040_v43 }
 0x4b8   : > { %v2969_v44 = vpop.f32.mrf.mxu0  ;;  %v3042_v5 = vpop.f32.mrf.mxu1 }
 0x4b9   : > { %v3226_v6 = vmax.f32 %v3225_v59, %v2969_v44  ;;  %v3252_v24 = vmax.f32 %v3251_v17, %v3042_v5 }
 0x4ba   : > { %v2973_v25 = vpop.f32.mrf.mxu0  ;;  %v3046_v15 = vpop.f32.mrf.mxu1 }
 0x4bb   : > { %v3214_v26 = vmax.f32 %v3213_v36, %v2973_v25  ;;  %v3240_v55 = vmax.f32 %v3239_v42, %v3046_v15 }
 0x4bc   : > { %v2975_v0 = vpop.f32.mrf.mxu0  ;;  %v3048_v39 = vpop.f32.mrf.mxu1 }
 0x4bd   : > { %v3227_v62 = vmax.f32 %v3226_v6, %v2975_v0  ;;  %v3253_v38 = vmax.f32 %v3252_v24, %v3048_v39 }
 0x4be   : > { %v2977_v23 = vpop.f32.mrf.mxu0  ;;  %v3050_v30 = vpop.f32.mrf.mxu1 }
 0x4bf   : > { %v3215_v14 = vmax.f32 %v3214_v26, %v2977_v23  ;;  %v3241_v13 = vmax.f32 %v3240_v55, %v3050_v30 }
 0x4c0   : > { %v2979_v9 = vpop.f32.mrf.mxu0  ;;  %v3052_v61 = vpop.f32.mrf.mxu1 }
 0x4c1   : > { %v3228_v28 = vmax.f32 %v3227_v62, %v2979_v9  ;;  %v3254_v50 = vmax.f32 %v3253_v38, %v3052_v61 }
 0x4c2   : > { %v2983_v16 = vpop.f32.mrf.mxu0  ;;  %v3056_v34 = vpop.f32.mrf.mxu1 }
 0x4c3   : > { %v3216_v54 = vmax.f32 %v3215_v14, %v2983_v16  ;;  %v3242_v22 = vmax.f32 %v3241_v13, %v3056_v34 }
 0x4c4   : > { %v2985_v41 = vpop.f32.mrf.mxu0  ;;  %v3058_v3 = vpop.f32.mrf.mxu1 }
 0x4c5   : > { %v3229_v60 = vmax.f32 %v3228_v28, %v2985_v41  ;;  %v3255_v49 = vmax.f32 %v3254_v50, %v3058_v3 }
 0x4c6   : > { %v2987_v45 = vpop.f32.mrf.mxu0  ;;  %v3060_v18 = vpop.f32.mrf.mxu1 }
 0x4c7   : > { %v5831_v7 = vmax.f32 %v3216_v54, %v2987_v45  ;;  %v5833_v31 = vmax.f32 %v3242_v22, %v3060_v18 }
 0x4c8   : > { %v2989_v58 = vpop.f32.mrf.mxu0  ;;  %v3062_v8 = vpop.f32.mrf.mxu1 }
 0x4c9   : > { %v5835_v21 = vmax.f32 %v3229_v60, %v2989_v58  ;;  %v5837_v20 = vmax.f32 %v3255_v49, %v3062_v8 }
 0x4ca   : > { %v3099_v40 = vpop.f32.mrf.mxu0  ;;  %v3172_v51 = vpop.f32.mrf.mxu1 }
 0x4cc   : > { %v3101_v35 = vpop.f32.mrf.mxu0  ;;  %v3174_v52 = vpop.f32.mrf.mxu1 }
 0x4ce   : > { %v3103_v53 = vpop.f32.mrf.mxu0  ;;  %v3176_v10 = vpop.f32.mrf.mxu1 }
 0x4cf   : > { %v3263_v29 = vmax.f32 %v3099_v40, %v3103_v53  ;;  %v3289_v37 = vmax.f32 %v3172_v51, %v3176_v10 }
 0x4d0   : > { %v3105_v46 = vpop.f32.mrf.mxu0  ;;  %v3178_v1 = vpop.f32.mrf.mxu1 }
 0x4d1   : > { %v3276_v4 = vmax.f32 %v3101_v35, %v3105_v46  ;;  %v3302_v32 = vmax.f32 %v3174_v52, %v3178_v1 }
 0x4d2   : > { %v3109_v63 = vpop.f32.mrf.mxu0  ;;  %v3182_v56 = vpop.f32.mrf.mxu1 }
 0x4d3   : > { %v3264_v47 = vmax.f32 %v3263_v29, %v3109_v63  ;;  %v3290_v33 = vmax.f32 %v3289_v37, %v3182_v56 }
 0x4d4   : > { %v3111_v2 = vpop.f32.mrf.mxu0  ;;  %v3184_v57 = vpop.f32.mrf.mxu1 }
 0x4d5   : > { %v3277_v19 = vmax.f32 %v3276_v4, %v3111_v2  ;;  %v3303_v12 = vmax.f32 %v3302_v32, %v3184_v57 }
 0x4d6   : > { %v3113_v11 = vpop.f32.mrf.mxu0  ;;  %v3186_v48 = vpop.f32.mrf.mxu1 }
 0x4d7   : > { %v3265_v59 = vmax.f32 %v3264_v47, %v3113_v11  ;;  %v3291_v17 = vmax.f32 %v3290_v33, %v3186_v48 }
 0x4d8   : > { %v3115_v27 = vpop.f32.mrf.mxu0  ;;  %v3188_v43 = vpop.f32.mrf.mxu1 }
 0x4d9   : > { %v3278_v36 = vmax.f32 %v3277_v19, %v3115_v27  ;;  %v3304_v42 = vmax.f32 %v3303_v12, %v3188_v43 }
 0x4da   : > { %v3119_v44 = vpop.f32.mrf.mxu0  ;;  %v3192_v5 = vpop.f32.mrf.mxu1 }
 0x4db   : > { %v3266_v6 = vmax.f32 %v3265_v59, %v3119_v44  ;;  %v3292_v24 = vmax.f32 %v3291_v17, %v3192_v5 }
 0x4dc   : > { %v3121_v25 = vpop.f32.mrf.mxu0  ;;  %v3194_v15 = vpop.f32.mrf.mxu1 }
 0x4dd   : > { %v3279_v26 = vmax.f32 %v3278_v36, %v3121_v25  ;;  %v3305_v55 = vmax.f32 %v3304_v42, %v3194_v15  ;;  %v3218_v25 = vrot.slane %v5831_v7, 4  ;;  %v3244_v15 = vrot.slane %v5833_v31, 4 }
 0x4de   : > { %v3123_v0 = vpop.f32.mrf.mxu0  ;;  %v3196_v39 = vpop.f32.mrf.mxu1 }
 0x4df   : > { %v3267_v62 = vmax.f32 %v3266_v6, %v3123_v0  ;;  %v3293_v38 = vmax.f32 %v3292_v24, %v3196_v39 }
 0x4e0   : > { %v3125_v23 = vpop.f32.mrf.mxu0  ;;  %v3198_v30 = vpop.f32.mrf.mxu1 }
 0x4e1   : > { %v3280_v14 = vmax.f32 %v3279_v26, %v3125_v23  ;;  %v3306_v13 = vmax.f32 %v3305_v55, %v3198_v30  ;;  %v3231_v26 = vrot.slane %v5835_v21, 4  ;;  %v3257_v55 = vrot.slane %v5837_v20, 4 }
 0x4e2   : > { %v3129_v9 = vpop.f32.mrf.mxu0  ;;  %v3202_v61 = vpop.f32.mrf.mxu1 }
 0x4e3   : > { %v3268_v28 = vmax.f32 %v3267_v62, %v3129_v9  ;;  %v3294_v50 = vmax.f32 %v3293_v38, %v3202_v61 }
 0x4e4   : > { %v3131_v16 = vpop.f32.mrf.mxu0  ;;  %v3204_v34 = vpop.f32.mrf.mxu1 }
 0x4e5   : > { %v3281_v54 = vmax.f32 %v3280_v14, %v3131_v16  ;;  %v3307_v22 = vmax.f32 %v3306_v13, %v3204_v34  ;;  %v3219_v16 = vmax.f32 %v5831_v7, %v3218_v25  ;;  %v3245_v34 = vmax.f32 %v5833_v31, %v3244_v15 }
 0x4e6   : > { %v3133_v41 = vpop.f32.mrf.mxu0  ;;  %v3206_v3 = vpop.f32.mrf.mxu1 }
 0x4e7   : > { %v5839_v60 = vmax.f32 %v3268_v28, %v3133_v41  ;;  %v5841_v49 = vmax.f32 %v3294_v50, %v3206_v3  ;;  %v3246_v7 = vrot.slane %v3245_v34, 2 }
 0x4e8   : > { %v3135_v45 = vpop.f32.mrf.mxu0  ;;  %v3208_v18 = vpop.f32.mrf.mxu1 }
 0x4e9   : > { %v5843_v58 = vmax.f32 %v3281_v54, %v3135_v45  ;;  %v5845_v8 = vmax.f32 %v3307_v22, %v3208_v18  ;;  %v3232_v54 = vmax.f32 %v5835_v21, %v3231_v26  ;;  %v3258_v22 = vmax.f32 %v5837_v20, %v3257_v55 }
 0x4ea   : > { %v3353_v40 = vpop.f32.mrf.mxu0  ;;  %v3426_v51 = vpop.f32.mrf.mxu1 }
 0x4eb   : > { %v3259_v31 = vrot.slane %v3258_v22, 2 }
 0x4ec   : > { %v3355_v35 = vpop.f32.mrf.mxu0  ;;  %v3428_v52 = vpop.f32.mrf.mxu1 }
 0x4ee   : > { %v3357_v53 = vpop.f32.mrf.mxu0  ;;  %v3430_v10 = vpop.f32.mrf.mxu1 }
 0x4ef   : > { %v3611_v19 = vmax.f32 %v3353_v40, %v3357_v53  ;;  %v3637_v12 = vmax.f32 %v3426_v51, %v3430_v10 }
 0x4f0   : > { %v3359_v29 = vpop.f32.mrf.mxu0  ;;  %v3432_v37 = vpop.f32.mrf.mxu1 }
 0x4f1   : > { %v3624_v59 = vmax.f32 %v3355_v35, %v3359_v29  ;;  %v3650_v17 = vmax.f32 %v3428_v52, %v3432_v37 }
 0x4f2   : > { %v3363_v46 = vpop.f32.mrf.mxu0  ;;  %v3436_v1 = vpop.f32.mrf.mxu1 }
 0x4f3   : > { %v3612_v27 = vmax.f32 %v3611_v19, %v3363_v46  ;;  %v3638_v43 = vmax.f32 %v3637_v12, %v3436_v1  ;;  %v3220_v46 = vrot.slane %v3219_v16, 2  ;;  %v3233_v1 = vrot.slane %v3232_v54, 2 }
 0x4f4   : > { %v3365_v4 = vpop.f32.mrf.mxu0  ;;  %v3438_v32 = vpop.f32.mrf.mxu1 }
 0x4f5   : > { %v3625_v44 = vmax.f32 %v3624_v59, %v3365_v4  ;;  %v3651_v5 = vmax.f32 %v3650_v17, %v3438_v32  ;;  %v3234_v59 = vmax.f32 %v3232_v54, %v3233_v1  ;;  %v3260_v17 = vmax.f32 %v3258_v22, %v3259_v31 }
 0x4f6   : > { %v3367_v63 = vpop.f32.mrf.mxu0  ;;  %v3440_v56 = vpop.f32.mrf.mxu1 }
 0x4f7   : > { %v3613_v6 = vmax.f32 %v3612_v27, %v3367_v63  ;;  %v3639_v24 = vmax.f32 %v3638_v43, %v3440_v56 }
 0x4f8   : > { %v3369_v47 = vpop.f32.mrf.mxu0  ;;  %v3442_v33 = vpop.f32.mrf.mxu1 }
 0x4f9   : > { %v3626_v62 = vmax.f32 %v3625_v44, %v3369_v47  ;;  %v3652_v38 = vmax.f32 %v3651_v5, %v3442_v33 }
 0x4fa   : > { %v3373_v2 = vpop.f32.mrf.mxu0  ;;  %v3446_v57 = vpop.f32.mrf.mxu1 }
 0x4fb   : > { %v3614_v23 = vmax.f32 %v3613_v6, %v3373_v2  ;;  %v3640_v30 = vmax.f32 %v3639_v24, %v3446_v57 }
 0x4fc   : > { %v3375_v11 = vpop.f32.mrf.mxu0  ;;  %v3448_v48 = vpop.f32.mrf.mxu1 }
 0x4fd   : > { %v3627_v9 = vmax.f32 %v3626_v62, %v3375_v11  ;;  %v3653_v61 = vmax.f32 %v3652_v38, %v3448_v48  ;;  %v3221_v11 = vmax.f32 %v3219_v16, %v3220_v46  ;;  %v3247_v48 = vmax.f32 %v3245_v34, %v3246_v7 }
 0x4fe   : > { %v3377_v36 = vpop.f32.mrf.mxu0  ;;  %v3450_v42 = vpop.f32.mrf.mxu1  ;;  %v3235_v62 = vrot.slane %v3234_v59, 1  ;;  %v3261_v38 = vrot.slane %v3260_v17, 1 }
 0x4ff   : > { %v3615_v28 = vmax.f32 %v3614_v23, %v3377_v36  ;;  %v3641_v50 = vmax.f32 %v3640_v30, %v3450_v42 }
 0x500   : > { %v3379_v0 = vpop.f32.mrf.mxu0  ;;  %v3452_v39 = vpop.f32.mrf.mxu1 }
 0x501   : > { %v3628_v45 = vmax.f32 %v3627_v9, %v3379_v0  ;;  %v3654_v18 = vmax.f32 %v3653_v61, %v3452_v39  ;;  %v3222_v0 = vrot.slane %v3221_v11, 1  ;;  %v3248_v39 = vrot.slane %v3247_v48, 1 }
 0x502   : > { %v3383_v14 = vpop.f32.mrf.mxu0  ;;  %v3456_v13 = vpop.f32.mrf.mxu1 }
 0x503   : > { %v3616_v40 = vmax.f32 %v3615_v28, %v3383_v14  ;;  %v3642_v51 = vmax.f32 %v3641_v50, %v3456_v13 }
 0x504   : > { %v3385_v41 = vpop.f32.mrf.mxu0  ;;  %v3458_v3 = vpop.f32.mrf.mxu1 }
 0x505   : > { %v3629_v53 = vmax.f32 %v3628_v45, %v3385_v41  ;;  %v3655_v10 = vmax.f32 %v3654_v18, %v3458_v3  ;;  %v3223_v41 = vmax.f32 %v3221_v11, %v3222_v0  ;;  %v3249_v3 = vmax.f32 %v3247_v48, %v3248_v39 }
 0x506   : > { %v3387_v35 = vpop.f32.mrf.mxu0  ;;  %v3460_v52 = vpop.f32.mrf.mxu1  ;;  %v3270_v0 = vrot.slane %v5839_v60, 4 }
 0x507   : > { %v3617_v29 = vmax.f32 %v3616_v40, %v3387_v35  ;;  %v3643_v37 = vmax.f32 %v3642_v51, %v3460_v52  ;;  %v3236_v40 = vmax.f32 %v3234_v59, %v3235_v62  ;;  %v3262_v51 = vmax.f32 %v3260_v17, %v3261_v38 }
 0x508   : > { %v3389_v4 = vpop.f32.mrf.mxu0  ;;  %v3462_v21 = vpop.f32.mrf.mxu1 }
 0x509   : > { %v3618_v32 = vrot.slane %v3617_v29, 4  ;;  %v3644_v20 = vrot.slane %v3643_v37, 4  ;;  %v3630_v63 = vmax.f32 %v3629_v53, %v3389_v4  ;;  %v3656_v56 = vmax.f32 %v3655_v10, %v3462_v21 }
 0x50a   : > { %v5855_v47 = vpop.f32.mrf.mxu0  ;;  %v5857_v33 = vpop.f32.mrf.mxu1 }
 0x50b   : > { %v3619_v2 = vmax.f32 %v3617_v29, %v3618_v32  ;;  %v3645_v57 = vmax.f32 %v3643_v37, %v3644_v20  ;;  %v3631_v19 = vrot.slane %v3630_v63, 4  ;;  %v3657_v12 = vrot.slane %v3656_v56, 4 }
 0x50c   : > { %v3501_v27 = vpop.f32.mrf.mxu0  ;;  %v3574_v43 = vpop.f32.mrf.mxu1 }
 0x50d   : > { %v3620_v36 = vrot.slane %v3619_v2, 2  ;;  %v3646_v42 = vrot.slane %v3645_v57, 2  ;;  %v3632_v44 = vmax.f32 %v3630_v63, %v3631_v19  ;;  %v3658_v5 = vmax.f32 %v3656_v56, %v3657_v12  ;;  %v6020_v63 = vld [vmem:[#allocation8_spill] sm:$0xff] }
 0x50e   : > { %v3503_v6 = vpop.f32.mrf.mxu0  ;;  %v3576_v24 = vpop.f32.mrf.mxu1 }
 0x50f   : > { %v3621_v25 = vmax.f32 %v3619_v2, %v3620_v36  ;;  %v3647_v15 = vmax.f32 %v3645_v57, %v3646_v42  ;;  %v3633_v26 = vrot.slane %v3632_v44, 2  ;;  %v3659_v55 = vrot.slane %v3658_v5, 2 }
 0x510   : > { %v3505_v23 = vpop.f32.mrf.mxu0  ;;  %v3578_v30 = vpop.f32.mrf.mxu1  ;;  %v3663_v57 = vmax.f32 %v5855_v47, %v3503_v6  ;;  %v3689_v19 = vmax.f32 %v5857_v33, %v3576_v24  ;;  %v3296_v47 = vrot.slane %v5841_v49, 4  ;;  %v3283_v33 = vrot.slane %v5843_v58, 4 }
 0x511   : > { %v3622_v14 = vrot.slane %v3621_v25, 1  ;;  %v3648_v13 = vrot.slane %v3647_v15, 1  ;;  %v3634_v9 = vmax.f32 %v3632_v44, %v3633_v26  ;;  %v3660_v61 = vmax.f32 %v3658_v5, %v3659_v55 }
 0x512   : > { %v3509_v28 = vpop.f32.mrf.mxu0  ;;  %v3582_v50 = vpop.f32.mrf.mxu1  ;;  %v3676_v12 = vmax.f32 %v3501_v27, %v3505_v23  ;;  %v3702_v17 = vmax.f32 %v3574_v43, %v3578_v30  ;;  %v3309_v27 = vrot.slane %v5845_v8, 4 }
 0x513   : > { %v3623_v16 = vmax.f32 %v3621_v25, %v3622_v14  ;;  %v3649_v34 = vmax.f32 %v3647_v15, %v3648_v13  ;;  %v3635_v54 = vrot.slane %v3634_v9, 1  ;;  %v3661_v22 = vrot.slane %v3660_v61, 1 }
 0x514   : > { %v3511_v45 = vpop.f32.mrf.mxu0  ;;  %v3584_v18 = vpop.f32.mrf.mxu1  ;;  %v3664_v36 = vmax.f32 %v3663_v57, %v3509_v28  ;;  %v3690_v42 = vmax.f32 %v3689_v19, %v3582_v50  ;;  %v3271_v28 = vmax.f32 %v5839_v60, %v3270_v0  ;;  %v3297_v50 = vmax.f32 %v5841_v49, %v3296_v47 }
 0x515   : > { %v3636_v35 = vmax.f32 %v3634_v9, %v3635_v54  ;;  %v3662_v52 = vmax.f32 %v3660_v61, %v3661_v22  ;;  %v3715_v29 = vmax.f32 %v3223_v41, %v3623_v16  ;;  %v3717_v37 = vmax.f32 %v3249_v3, %v3649_v34 }
 0x516   : > { %v3513_v53 = vpop.f32.mrf.mxu0  ;;  %v3586_v10 = vpop.f32.mrf.mxu1  ;;  %v3677_v25 = vmax.f32 %v3676_v12, %v3511_v45  ;;  %v3703_v15 = vmax.f32 %v3702_v17, %v3584_v18  ;;  %v3284_v16 = vmax.f32 %v5843_v58, %v3283_v33  ;;  %v3310_v34 = vmax.f32 %v5845_v8, %v3309_v27 }
 0x517   : > { %v3716_v46 = vmax.f32 %v3236_v40, %v3636_v35  ;;  %v3718_v7 = vmax.f32 %v3262_v51, %v3662_v52  ;;  %v3665_v26 = vmax.f32 %v3664_v36, %v3513_v53  ;;  %v3691_v55 = vmax.f32 %v3690_v42, %v3586_v10 }
 0x518   : > { %v3515_v1 = vpop.f32.mrf.mxu0  ;;  %v3588_v31 = vpop.f32.mrf.mxu1  ;;  %v3298_v60 = vrot.slane %v3297_v50, 2  ;;  %v3311_v49 = vrot.slane %v3310_v34, 2 }
 0x519   : > { %v3733_v4 = vcombine.low %v3715_v29, %v3716_v46  ;;  %v3734_v21 = vcombine.low %v3717_v37, %v3718_v7  ;;  %v3678_v39 = vmax.f32 %v3677_v25, %v3515_v1  ;;  %v3704_v43 = vmax.f32 %v3703_v15, %v3588_v31 }
 0x51a   : > { %v3519_v32 = vpop.f32.mrf.mxu0  ;;  %v3592_v20 = vpop.f32.mrf.mxu1  ;;  %v3272_v29 = vrot.slane %v3271_v28, 2  ;;  %v3285_v37 = vrot.slane %v3284_v16, 2  ;;  %v3312_v19 = vmax.f32 %v3310_v34, %v3311_v49 }
 0x51b   : > { %v3743_v56 = vrot.slane %v3733_v4, %v6020_v63  ;;  %v3750_v2 = vrot.slane %v3734_v21, %v6020_v63  ;;  %v3666_v62 = vmax.f32 %v3665_v26, %v3519_v32  ;;  %v3692_v38 = vmax.f32 %v3691_v55, %v3592_v20 }
 0x51c   : > { %v3521_v11 = vpop.f32.mrf.mxu0  ;;  %v3594_v48 = vpop.f32.mrf.mxu1  ;;  %v3286_v57 = vmax.f32 %v3284_v16, %v3285_v37  ;;  %v3313_v55 = vrot.slane %v3312_v19, 1 }
 0x51d   : > { %v5863_v59 = vcombine.low %v3743_v56, %v3750_v2  ;;  %v3679_v14 = vmax.f32 %v3678_v39, %v3521_v11  ;;  %v3705_v13 = vmax.f32 %v3704_v43, %v3594_v48  ;;  %v3273_v56 = vmax.f32 %v3271_v28, %v3272_v29 }
 0x51e   : > { %v3523_v44 = vpop.f32.mrf.mxu0  ;;  %v3596_v5 = vpop.f32.mrf.mxu1  ;;  %v3299_v2 = vmax.f32 %v3297_v50, %v3298_v60  ;;  %v3287_v26 = vrot.slane %v3286_v57, 1 }
 0x51f   : > { %v3667_v9 = vmax.f32 %v3666_v62, %v3523_v44  ;;  %v3693_v61 = vmax.f32 %v3692_v38, %v3596_v5  ;;  %v3274_v25 = vrot.slane %v3273_v56, 1 }
 0x520   : > { %v3525_v6 = vpop.f32.mrf.mxu0  ;;  %v3598_v24 = vpop.f32.mrf.mxu1  ;;  %v3300_v15 = vrot.slane %v3299_v2, 1 }
 0x521   : > { %v3680_v41 = vmax.f32 %v3679_v14, %v3525_v6  ;;  %v3706_v3 = vmax.f32 %v3705_v13, %v3598_v24  ;;  %v3275_v62 = vmax.f32 %v3273_v56, %v3274_v25 }
 0x522   : > { %v3529_v23 = vpop.f32.mrf.mxu0  ;;  %v3602_v30 = vpop.f32.mrf.mxu1  ;;  %v3301_v38 = vmax.f32 %v3299_v2, %v3300_v15 }
 0x523   : > { %v3668_v45 = vmax.f32 %v3667_v9, %v3529_v23  ;;  %v3694_v18 = vmax.f32 %v3693_v61, %v3602_v30  ;;  %v3288_v23 = vmax.f32 %v3286_v57, %v3287_v26  ;;  %v3314_v30 = vmax.f32 %v3312_v19, %v3313_v55 }
 0x524   : > { %v3531_v54 = vpop.f32.mrf.mxu0  ;;  %v3604_v22 = vpop.f32.mrf.mxu1 }
 0x525   : > { %v3681_v35 = vmax.f32 %v3680_v41, %v3531_v54  ;;  %v3707_v52 = vmax.f32 %v3706_v3, %v3604_v22  ;;  %v3773_v3 = vrot.slane %v5863_v59, %v6020_v63 }
 0x526   : > { %v3533_v40 = vpop.f32.mrf.mxu0  ;;  %v3606_v51 = vpop.f32.mrf.mxu1 }
 0x527   : > { %v3669_v53 = vmax.f32 %v3668_v45, %v3533_v40  ;;  %v3695_v10 = vmax.f32 %v3694_v18, %v3606_v51  ;;  %v3724_v18 = vld [vmem:[#allocation2 + $0x1] ss:$2 sm:$0xff] }
 0x528   : > { %v3535_v46 = vpop.f32.mrf.mxu0  ;;  %v3608_v58 = vpop.f32.mrf.mxu1 }
 0x529   : > { %v3670_v7 = vrot.slane %v3669_v53, 4  ;;  %v3696_v8 = vrot.slane %v3695_v10, 4  ;;  %v3682_v1 = vmax.f32 %v3681_v35, %v3535_v46  ;;  %v3708_v31 = vmax.f32 %v3707_v52, %v3608_v58 }
 0x52b   : > { %v3671_v4 = vmax.f32 %v3669_v53, %v3670_v7  ;;  %v3697_v21 = vmax.f32 %v3695_v10, %v3696_v8  ;;  %v3683_v32 = vrot.slane %v3682_v1, 4  ;;  %v3709_v20 = vrot.slane %v3708_v31, 4 }
 0x52d   : > { %v3672_v12 = vrot.slane %v3671_v4, 2  ;;  %v3698_v11 = vrot.slane %v3697_v21, 2  ;;  %v3684_v48 = vmax.f32 %v3682_v1, %v3683_v32  ;;  %v3710_v17 = vmax.f32 %v3708_v31, %v3709_v20 }
 0x52f   : > { %v3673_v36 = vmax.f32 %v3671_v4, %v3672_v12  ;;  %v3699_v42 = vmax.f32 %v3697_v21, %v3698_v11  ;;  %v3685_v44 = vrot.slane %v3684_v48, 2  ;;  %v3711_v5 = vrot.slane %v3710_v17, 2 }
 0x531   : > { %v3674_v0 = vrot.slane %v3673_v36, 1  ;;  %v3700_v47 = vrot.slane %v3699_v42, 1  ;;  %v3686_v33 = vmax.f32 %v3684_v48, %v3685_v44  ;;  %v3712_v27 = vmax.f32 %v3710_v17, %v3711_v5 }
 0x533   : > { %v3675_v6 = vmax.f32 %v3673_v36, %v3674_v0  ;;  %v3701_v24 = vmax.f32 %v3699_v42, %v3700_v47  ;;  %v3687_v39 = vrot.slane %v3686_v33, 1  ;;  %v3713_v43 = vrot.slane %v3712_v27, 1 }
 0x535   : > { %v3688_v14 = vmax.f32 %v3686_v33, %v3687_v39  ;;  %v3714_v13 = vmax.f32 %v3712_v27, %v3713_v43  ;;  %v3719_v9 = vmax.f32 %v3275_v62, %v3675_v6  ;;  %v3721_v61 = vmax.f32 %v3301_v38, %v3701_v24 }
 0x537   : > { %v3720_v28 = vmax.f32 %v3288_v23, %v3688_v14  ;;  %v3722_v50 = vmax.f32 %v3314_v30, %v3714_v13 }
 0x539   : > { %v3735_v16 = vcombine.low %v3719_v9, %v3720_v28  ;;  %v3736_v34 = vcombine.low %v3721_v61, %v3722_v50 }
 0x53b   : > { %v3757_v54 = vrot.slane %v3735_v16, %v6020_v63  ;;  %v3764_v22 = vrot.slane %v3736_v34, %v6020_v63 }
 0x53d   : > { %v3766_v41 = vcombine.low %v3757_v54, %v3764_v22 }
 0x53f   : > { %v3780_v45 = vrot.slane %v3766_v41, %v6020_v63 }
 0x541   : > { %v3781_v40 = vcombine.low %v3773_v3, %v3780_v45  ;;  %3788 = sbr.rel (%p4133_p9) target bundleno = 1367 (0x557), region = 94 }
 0x543   : > { %v3783_v51 = vmax.f32 %v3724_v18, %v3781_v40 }
 0x545   : > { %3784 = vst [vmem:[#allocation2 + $0x1] ss:$2 sm:$0xff] %v3783_v51 }
 0x546   : > { %v3791_v35 = vld [vmem:[%s5919_s6] sm:$0xff]  ;;  %v4395_v8 = vmov 1983009808  }
 0x547   : > { %v6021_v52 = vld [vmem:[#allocation7_spill] sm:$0xff]  ;;  %v3828_v1 = vunpack.c.l.s4 %v4395_v8 }
 0x548   : > { %v3795_v53 = vsub.s32 0, %v6021_v52  ;;  %v3799_v10 = vsub.s32 1, %v6021_v52  ;;  %v3803_v29 = vsub.s32 2, %v6021_v52  ;;  %v3807_v59 = vsub.s32 3, %v6021_v52 }
 0x549   : > { %v3811_v63 = vsub.s32 4, %v6021_v52  ;;  %v3815_v60 = vsub.s32 5, %v6021_v52  ;;  %v3819_v37 = vsub.s32 6, %v6021_v52  ;;  %v3823_v32 = vsub.s32 7, %v6021_v52 }
 0x54a   : > { %v3796_v49 = vrot.slane %v3791_v35, %v3795_v53  ;;  %v3800_v46 = vrot.slane %v3791_v35, %v3799_v10  ;;  %v3804_v58 = vrot.slane %v3791_v35, %v3803_v29  ;;  %v3808_v7 = vrot.slane %v3791_v35, %v3807_v59 }
 0x54b   : > { %v3812_v31 = vrot.slane %v3791_v35, %v3811_v63  ;;  %v3816_v4 = vrot.slane %v3791_v35, %v3815_v60  ;;  %v3820_v21 = vrot.slane %v3791_v35, %v3819_v37  ;;  %v3829_v2 = vunpack.c.0.s8 %v3828_v1 }
 0x54c   : > { %v3825_v20 = vcombine.low %v3796_v49, %v3800_v46  ;;  %v3826_v56 = vcombine.low %v3804_v58, %v3808_v7  ;;  %v3824_v19 = vrot.slane %v3791_v35, %v3823_v32  ;;  %v3789_v42 = vld [vmem:[#allocation2] sm:$0xff]  ;;  %v3790_v25 = vld [vmem:[#allocation2 + $0x8] sm:$0xff] }
 0x54d   : > { %v3842_v57 = vcombine.low %v3812_v31, %v3816_v4  ;;  %v3832_v12 = vsub.s32 %v3829_v2, %v6021_v52 }
 0x54e   : > { %v3843_v11 = vcombine.low %v3820_v21, %v3824_v19 }
 0x54f   : > { %v3833_v48 = vrot.slane %v3825_v20, %v3832_v12  ;;  %v3840_v17 = vrot.slane %v3826_v56, %v3832_v12  ;;  %v3850_v36 = vrot.slane %v3842_v57, %v3832_v12 }
 0x550   : > { %v3857_v44 = vrot.slane %v3843_v11, %v3832_v12 }
 0x551   : > { %v3841_v5 = vcombine.low %v3833_v48, %v3840_v17 }
 0x552   : > { %v3858_v15 = vcombine.low %v3850_v36, %v3857_v44 }
 0x553   : > { %v3861_v26 = vadd.f32 %v3841_v5, %v3789_v42 }
 0x554   : > { %v3862_v55 = vadd.f32 %v3858_v15, %v3790_v25 }
 0x555   : > { %3863 = vst [vmem:[#allocation4] sm:$0xff] %v3861_v26 }
 0x556   : > { %3864 = vst [vmem:[#allocation4 + $0x8] sm:$0xff] %v3862_v55 }
 0x557 PF: > { %p4301_p10 = scmp.eq.s32.totalorder %s4453_s27, 3  ;;  %s4396_s30 = smov [#allocation4]  }
 0x558   : > { %s3872_s9 = sshll.u32 %s4396_s30, 4  ;;  %s3873_s9 = int_to_ptr.vmem [resolvable:$true] %s3872_s9 }
 0x559   : > { %s4340_s10 = scalar_lea.vmem %s3873_s9, 256  ;;  %p4347_p0 = scmp.lt.s32.totalorder %s3873_s9, %s3873_s9 }
 0x55a   : > { %p4341_p11 = scmp.ne.s32.totalorder %s3873_s9, %s4340_s10  ;;  %p4348_p1 = scmp.lt.s32.totalorder %s4340_s10, %s4340_s10 }
 0x55c   : > { %p4342_p12 = pnand %p4341_p11, %p4301_p10  ;;  %p4349_p2 = por %p4348_p1, %p4347_p0 }
 0x55e   : > { %p4343_p13 = pneg %p4342_p12 }
 0x560   : > { %p4350_p3 = pnand %p4349_p2, %p4343_p13 }
 0x562   : > { %4353 = shalt.err (!%p4350_p3)
}
 0x563   : > { %4298 = dma.vmem_to_hbm [thread:$0]  (%p4301_p10), %s3873_s9, 256, %s5920_s7, [#allocation5]  }
 0x564   : > { %4377 = dma.done.wait (%p4301_p10), [#allocation5], 256  }
 0x565   : > { %4379 = vsyncadd (%p4301_p10), [#allocation5], 4294967040 }
 0x566 PF: > { %p15_p4 = scmp.ge.s32.totalorder %s4456_s28, 6   ;;  %s6022_s24 = smov %s4386_s25 }
 0x567   : > { %s6023_s25 = smov %s4465_s8  ;;  %s6024_s26 = smov %s4456_s28 }
 0x568   :  { %17 = sbr.rel (!%p15_p4) target bundleno = 2 (0x2), region = 129 }
 0x56d   :  { %3885 = vsyncpa [#allocation5], 1 }
 0x56e   :  { %3887 = vsyncpa [#allocation5 + $0x1], 1 }

// kernel: pointnet_encoder_forward.2
= control target key start
LH: loop header
LB: loop body
LE: loop exit
PB: predicated region body
PF: predicated region fallthrough
CT: control target
= control target key end

     0   :  { %18 = vsyncpa [#allocation5], 0  ;;  %s8107_s25 = smov 0   ;;  %s8109_s26 = smov 0   ;;  %s9949_s0 = inlined_call_operand.vmem [shape: f32[2,512,6], index: 0, kind: input, shape index: {}]   ;;  %s9950_s1 = inlined_call_operand.vmem [shape: f32[2,6,64], index: 1, kind: input, shape index: {}]   ;;  %s9951_s2 = inlined_call_operand.vmem [shape: f32[1,64], index: 2, kind: input, shape index: {}]   ;;  %s9952_s3 = inlined_call_operand.vmem [shape: bf16[64,128], index: 3, kind: input, shape index: {}]   ;;  %s9953_s4 = inlined_call_operand.vmem [shape: f32[1,128], index: 4, kind: input, shape index: {}]   ;;  %s9954_s5 = inlined_call_operand.vmem [shape: bf16[128,1024], index: 5, kind: input, shape index: {}]   ;;  %s9955_s6 = inlined_call_operand.vmem [shape: f32[1,1024], index: 6, kind: input, shape index: {}]   ;;  %s9956_s7 = inlined_call_operand.hbm [shape: bf16[1024,512], index: 7, kind: input, shape index: {}]   ;;  %s9957_s8 = inlined_call_operand.vmem [shape: f32[1,512], index: 8, kind: input, shape index: {}]   ;;  %s9958_s9 = inlined_call_operand.vmem [shape: bf16[512,256], index: 9, kind: input, shape index: {}]   ;;  %s9959_s10 = inlined_call_operand.vmem [shape: f32[1,256], index: 10, kind: input, shape index: {}]   ;;  %s9960_s11 = inlined_call_operand.vmem [shape: bf16[256,9], index: 11, kind: input, shape index: {}]   ;;  %s9961_s12 = inlined_call_operand.vmem [shape: f32[1,9], index: 12, kind: input, shape index: {}]   ;;  %s9962_s13 = inlined_call_operand.vmem [shape: f32[2,9], index: 13, kind: output, shape index: {}]  }
   0x1   :  { %s8111_s27 = smov 0  }
   0x2 LB: > { %s8123_s28 = sadd.s32 4294967295, %s8028_s27   ;;  %s8126_s29 = sadd.s32 1, %s8028_s27   ;;  %s8028_s27 = sphi %s8111_s27, %s10071_s27   ;;  %s8024_s26 = sphi %s8109_s26, %s10074_s26   ;;  %s8020_s25 = sphi %s8107_s25, %s10073_s25  }
   0x3   : > { %10001 = sst [smem:[#allocation7_spill]] %s8126_s29  ;;  %s28_s30 = ssub.s32 %s8028_s27, %s8126_s29 }
   0x4   : > { %s31_s14 = sadd.s32 1, %s8024_s26  ;;  %p29_p0 = scmp.eq.s32.totalorder %s28_s30, 0 }
   0x5   : > { %p38_p1 = scmp.ne.s32.totalorder %s8024_s26, %s8020_s25  ;;  %p39_p2 = scmp.eq.s32.totalorder %s8028_s27, 0 }
   0x6   : > { %p6693_p3 = scmp.ge.s32.totalorder %s8028_s27, 1  ;;  %p328_p5 = scmp.lt.s32.totalorder %s8028_s27, 5 }
   0x7   : > { %s8136_s15 = scalar_select %p29_p0, %s8024_s26, %s31_s14  }
   0x8   : > { %p8138_p4 = por %p39_p2, %p38_p1  ;;  %p7439_p7 = scmp.eq.s32.totalorder %s8123_s28, 0 }
   0x9   : > { %10002 = sst [smem:[#allocation8_spill]] %s8136_s15  ;;  %p8145_p8 = pnand %p6693_p3, %p328_p5 }
   0xa   : > { %s8030_s18 = smov [#allocation4]  }
   0xb   : > { %s358_s19 = sshll.u32 %s8030_s18, 4  ;;  %p7435_p9 = pneg %p8145_p8  ;;  %s359_s19 = int_to_ptr.vmem [resolvable:$true] %s358_s19 }
   0xc   : > { %s7987_s20 = scalar_lea.vmem %s359_s19, 32768  ;;  %p7995_p1 = scmp.lt.s32.totalorder %s359_s19, %s359_s19 }
   0xd   : > { %p7436_p10 = pnand %p7439_p7, %p7435_p9  ;;  %p7988_p12 = scmp.ne.s32.totalorder %s359_s19, %s7987_s20 }
   0xe   : > { %p7996_p2 = scmp.lt.s32.totalorder %s7987_s20, %s7987_s20 }
   0xf   : > { %p7978_p11 = pneg %p7436_p10 }
  0x10   : > { %p7997_p6 = por %p7996_p2, %p7995_p1 }
  0x11   : > { %p7990_p13 = pnand %p7988_p12, %p7978_p11 }
  0x13   : > { %p7991_p0 = pneg %p7990_p13 }
  0x15   : > { %p7998_p3 = pnand %p7997_p6, %p7991_p0 }
  0x17   : > { %8001 = shalt.err (!%p7998_p3)
}
  0x18   : > { %s8031_s21 = smov 256   ;;  %s8032_s22 = smov 16  }
  0x19   : > { %7438 = dma.hbm_to_vmem [thread:$0]  (!%p7436_p10), %s9956_s7, 32768, %s359_s19, [#allocation5], %s8031_s21, %s8031_s21, %s8032_s22  }
  0x1a   : > { %p6695_p5 = scmp.ge.s32.totalorder %s8028_s27, 4 }
  0x1c   : > { %383 = sbr.rel (%p6695_p5) target bundleno = 53 (0x35), region = 64 }
  0x21   : > { %386 = sbr.rel (!%p8138_p4) target bundleno = 53 (0x35), region = 68  ;;  %s388_s30 = sand.u32 (%p8138_p4), 1, %s8024_s26  }
  0x22   : > { %s7250_s14 = sshll.u32 (%p8138_p4), %s8028_s27, 7  ;;  %s6696_s18 = sshll.u32 (%p8138_p4), %s388_s30, 8 }
  0x23   : > { %s8164_s29 = scalar_lea.vmem (%p8138_p4), %s9949_s0, %s7250_s14  ;;  %s8169_s16 = scalar_lea.vmem (%p8138_p4), [#allocation3], %s6696_s18 }
  0x24   : > { %v484_v0 = vld [vmem:[%s8164_s29] sm:$0xff] (%p8138_p4)  ;;  %v486_v1 = vld [vmem:[%s8164_s29 + $0x8] sm:$0xff] (%p8138_p4)  ;;  %v488_v2 = vld [vmem:[%s8164_s29 + $0x10] sm:$0xff] (%p8138_p4) }
  0x25   : > { %485 = vst [vmem:[%s8169_s16] sm:$0xff] (%p8138_p4), %v484_v0  ;;  %487 = vst [vmem:[%s8169_s16 + $0x8] sm:$0xff] (%p8138_p4), %v486_v1  ;;  %v490_v3 = vld [vmem:[%s8164_s29 + $0x18] sm:$0xff] (%p8138_p4)  ;;  %v492_v4 = vld [vmem:[%s8164_s29 + $0x20] sm:$0xff] (%p8138_p4) }
  0x26   : > { %489 = vst [vmem:[%s8169_s16 + $0x10] sm:$0xff] %v488_v2  ;;  %v494_v5 = vld [vmem:[%s8164_s29 + $0x28] sm:$0xff]  ;;  %491 = vst [vmem:[%s8169_s16 + $0x18] sm:$0xff] %v490_v3  ;;  %v496_v6 = vld [vmem:[%s8164_s29 + $0x30] sm:$0xff] }
  0x27   : > { %493 = vst [vmem:[%s8169_s16 + $0x20] sm:$0xff] %v492_v4  ;;  %495 = vst [vmem:[%s8169_s16 + $0x28] sm:$0xff] %v494_v5  ;;  %v498_v7 = vld [vmem:[%s8164_s29 + $0x38] sm:$0xff]  ;;  %v500_v8 = vld [vmem:[%s8164_s29 + $0x40] sm:$0xff] }
  0x28   : > { %497 = vst [vmem:[%s8169_s16 + $0x30] sm:$0xff] %v496_v6  ;;  %499 = vst [vmem:[%s8169_s16 + $0x38] sm:$0xff] %v498_v7  ;;  %v502_v9 = vld [vmem:[%s8164_s29 + $0x48] sm:$0xff]  ;;  %v504_v10 = vld [vmem:[%s8164_s29 + $0x50] sm:$0xff] }
  0x29   : > { %501 = vst [vmem:[%s8169_s16 + $0x40] sm:$0xff] %v500_v8  ;;  %v506_v11 = vld [vmem:[%s8164_s29 + $0x58] sm:$0xff]  ;;  %503 = vst [vmem:[%s8169_s16 + $0x48] sm:$0xff] %v502_v9  ;;  %v508_v12 = vld [vmem:[%s8164_s29 + $0x60] sm:$0xff] }
  0x2a   : > { %505 = vst [vmem:[%s8169_s16 + $0x50] sm:$0xff] %v504_v10  ;;  %507 = vst [vmem:[%s8169_s16 + $0x58] sm:$0xff] %v506_v11  ;;  %v510_v13 = vld [vmem:[%s8164_s29 + $0x68] sm:$0xff]  ;;  %v512_v14 = vld [vmem:[%s8164_s29 + $0x70] sm:$0xff] }
  0x2b   : > { %509 = vst [vmem:[%s8169_s16 + $0x60] sm:$0xff] %v508_v12  ;;  %511 = vst [vmem:[%s8169_s16 + $0x68] sm:$0xff] %v510_v13  ;;  %v514_v15 = vld [vmem:[%s8164_s29 + $0x78] sm:$0xff]  ;;  %v516_v16 = vld [vmem:[%s8164_s29 + $0x200] sm:$0xff] }
  0x2c   : > { %513 = vst [vmem:[%s8169_s16 + $0x70] sm:$0xff] %v512_v14  ;;  %v518_v17 = vld [vmem:[%s8164_s29 + $0x208] sm:$0xff]  ;;  %515 = vst [vmem:[%s8169_s16 + $0x78] sm:$0xff] %v514_v15  ;;  %v520_v18 = vld [vmem:[%s8164_s29 + $0x210] sm:$0xff] }
  0x2d   : > { %517 = vst [vmem:[%s8169_s16 + $0x80] sm:$0xff] %v516_v16  ;;  %519 = vst [vmem:[%s8169_s16 + $0x88] sm:$0xff] %v518_v17  ;;  %v522_v19 = vld [vmem:[%s8164_s29 + $0x218] sm:$0xff]  ;;  %v524_v20 = vld [vmem:[%s8164_s29 + $0x220] sm:$0xff] }
  0x2e   : > { %521 = vst [vmem:[%s8169_s16 + $0x90] sm:$0xff] %v520_v18  ;;  %523 = vst [vmem:[%s8169_s16 + $0x98] sm:$0xff] %v522_v19  ;;  %v526_v21 = vld [vmem:[%s8164_s29 + $0x228] sm:$0xff]  ;;  %v528_v22 = vld [vmem:[%s8164_s29 + $0x230] sm:$0xff] }
  0x2f   : > { %525 = vst [vmem:[%s8169_s16 + $0xa0] sm:$0xff] %v524_v20  ;;  %v530_v23 = vld [vmem:[%s8164_s29 + $0x238] sm:$0xff]  ;;  %527 = vst [vmem:[%s8169_s16 + $0xa8] sm:$0xff] %v526_v21  ;;  %v532_v24 = vld [vmem:[%s8164_s29 + $0x240] sm:$0xff] }
  0x30   : > { %529 = vst [vmem:[%s8169_s16 + $0xb0] sm:$0xff] %v528_v22  ;;  %531 = vst [vmem:[%s8169_s16 + $0xb8] sm:$0xff] %v530_v23  ;;  %v534_v25 = vld [vmem:[%s8164_s29 + $0x248] sm:$0xff]  ;;  %v536_v26 = vld [vmem:[%s8164_s29 + $0x250] sm:$0xff] }
  0x31   : > { %533 = vst [vmem:[%s8169_s16 + $0xc0] sm:$0xff] %v532_v24  ;;  %535 = vst [vmem:[%s8169_s16 + $0xc8] sm:$0xff] %v534_v25  ;;  %v538_v27 = vld [vmem:[%s8164_s29 + $0x258] sm:$0xff]  ;;  %v540_v28 = vld [vmem:[%s8164_s29 + $0x260] sm:$0xff] }
  0x32   : > { %537 = vst [vmem:[%s8169_s16 + $0xd0] sm:$0xff] %v536_v26  ;;  %v542_v29 = vld [vmem:[%s8164_s29 + $0x268] sm:$0xff]  ;;  %539 = vst [vmem:[%s8169_s16 + $0xd8] sm:$0xff] %v538_v27  ;;  %v544_v30 = vld [vmem:[%s8164_s29 + $0x270] sm:$0xff] }
  0x33   : > { %541 = vst [vmem:[%s8169_s16 + $0xe0] sm:$0xff] %v540_v28  ;;  %543 = vst [vmem:[%s8169_s16 + $0xe8] sm:$0xff] %v542_v29  ;;  %v546_v31 = vld [vmem:[%s8164_s29 + $0x278] sm:$0xff] }
  0x34   : > { %545 = vst [vmem:[%s8169_s16 + $0xf0] sm:$0xff] %v544_v30  ;;  %547 = vst [vmem:[%s8169_s16 + $0xf8] sm:$0xff] %v546_v31 }
  0x35 PF: > { %556 = sbr.rel (%p8145_p8) target bundleno = 2234 (0x8ba), region = 106 }
  0x3a   : > { %s559_s27 = sand.u32 1, %s8020_s25  }
  0x3b   : > { %s6700_s15 = sshll.u32 %s559_s27, 8 }
  0x3c   : > { %s8235_s19 = scalar_lea.vmem [#allocation3], %s6700_s15 }
  0x3d   : > { %8015 = dma.done.wait (%p7439_p7), [#allocation5], 32768  }
  0x3e   : > { %8017 = vsyncadd (%p7439_p7), [#allocation5], 4294934528  ;;  %p10005_p4 = scmp.ne.s32.totalorder %s8123_s28, 0 }
  0x40   : > { %606 = sbr.rel (%p10005_p4) target bundleno = 71 (0x47), region = 118 }
  0x45   : > { %v8033_v32 = vmov -inf  }
  0x46   : > { %607 = vst [vmem:[#allocation2] sm:$0xff] %v8033_v32  ;;  %608 = vst [vmem:[#allocation2 + $0x8] sm:$0xff] %v8033_v32 }
  0x47 PF: > { %v625_v33 = vld [vmem:[%s9950_s1] sm:$0x3f]  ;;  %vm682_vm0 = vcmask 1045504   ;;  %v609_v34 = vld [vmem:[%s8235_s19] sm:$0xff]  ;;  %vm633_vm1 = vcmask 48128   ;;  %v610_v35 = vld [vmem:[%s8235_s19 + $0x8] sm:$0xff] }
  0x48   : > { %7331 = vmatprep.subr.msk.mxu0 %vm682_vm0, %v625_v33  ;;  %7333 = vmatprep.mubr.msk.f32.mxu0 %vm633_vm1, %v609_v34  ;;  %v611_v36 = vld [vmem:[%s8235_s19 + $0x10] sm:$0xff]  ;;  %v612_v37 = vld [vmem:[%s8235_s19 + $0x18] sm:$0xff]  ;;  %v613_v38 = vld [vmem:[%s8235_s19 + $0x20] sm:$0xff]  ;;  %vm894_vm2 = vcmask 523264   ;;  %p6910_p6 = scmp.ne.s32.totalorder %s8123_s28, 3 }
  0x49   : > { %7332 = vmatpush3.msk.msra.mxu0 %vm682_vm0, %v625_v33  ;;  %v614_v39 = vld [vmem:[%s8235_s19 + $0x28] sm:$0xff]  ;;  %v615_v41 = vld [vmem:[%s8235_s19 + $0x30] sm:$0xff]  ;;  %v616_v42 = vld [vmem:[%s8235_s19 + $0x38] sm:$0xff] }
  0x4a   : > { %7334 = vmatmul.mubr.msk.f32.vlgmr.msra.gmra.mxu0 %vm633_vm1, %v610_v35  ;;  %v7472_v40 = vld [vmem:[%s9952_s3 + $0x18] sm:$0xff]   ;;  %v617_v43 = vld [vmem:[%s8235_s19 + $0x40] sm:$0xff]  ;;  %v619_v45 = vld [vmem:[%s8235_s19 + $0x50] sm:$0xff] }
  0x4b   : > { %7336 = vmatprep.mubr.msk.f32.mxu0 %vm633_vm1, %v611_v36  ;;  %7357 = vmatprep.subr.bf16.mxu1 %v7472_v40  ;;  %v618_v44 = vld [vmem:[%s8235_s19 + $0x48] sm:$0xff]  ;;  %v620_v46 = vld [vmem:[%s8235_s19 + $0x58] sm:$0xff]  ;;  %v621_v47 = vld [vmem:[%s8235_s19 + $0x60] sm:$0xff] }
  0x4c   : > { %7358 = vmatpush3.bf16.msra.mxu1 %v7472_v40  ;;  %v622_v48 = vld [vmem:[%s8235_s19 + $0x68] sm:$0xff]  ;;  %v623_v49 = vld [vmem:[%s8235_s19 + $0x70] sm:$0xff]  ;;  %v624_v50 = vld [vmem:[%s8235_s19 + $0x78] sm:$0xff] }
  0x4d   : > { %v7473_v51 = vld [vmem:[%s9952_s3 + $0x10] sm:$0xff]   ;;  %v7474_v52 = vld [vmem:[%s9952_s3 + $0x8] sm:$0xff]   ;;  %v7475_v53 = vld [vmem:[%s9952_s3] sm:$0xff]  }
  0x4e   : > { %7337 = vmatmul.mubr.msk.f32.gmra.mxu0 %vm633_vm1, %v612_v37  ;;  %7359 = vmatprep.subr.bf16.mxu1 %v7473_v51  ;;  %v1092_v54 = vld [vmem:[%s9954_s5 + $0x1c0] sm:$0xff]  ;;  %v1093_v56 = vld [vmem:[%s9954_s5 + $0x1c8] sm:$0xff] }
  0x4f   : > { %7339 = vmatprep.mubr.msk.f32.mxu0 %vm633_vm1, %v613_v38  ;;  %v1096_v55 = vld [vmem:[%s9954_s5 + $0x1e0] sm:$0xff]  ;;  %v1097_v59 = vld [vmem:[%s9954_s5 + $0x1e8] sm:$0xff] }
  0x50   : > { %7360 = vmatpush3.bf16.msra.mxu1 %v7473_v51  ;;  %v8301_v57 = vcombine.low %v1092_v54, %v1096_v55  ;;  %v8303_v58 = vcombine.high %v1092_v54, %v1096_v55  ;;  %v1084_v60 = vld [vmem:[%s9954_s5 + $0x180] sm:$0xff]  ;;  %v8314_v62 = vcombine.low %v1093_v56, %v1097_v59  ;;  %v8316_v63 = vcombine.high %v1093_v56, %v1097_v59  ;;  %v1085_v27 = vld [vmem:[%s9954_s5 + $0x188] sm:$0xff] }
  0x51   : > { %7361 = vmatprep.subr.bf16.mxu1 %v7474_v52  ;;  %v1088_v61 = vld [vmem:[%s9954_s5 + $0x1a0] sm:$0xff]  ;;  %v1089_v28 = vld [vmem:[%s9954_s5 + $0x1a8] sm:$0xff] }
  0x52   : > { %7340 = vmatmul.mubr.msk.f32.gmra.mxu0 %vm633_vm1, %v614_v39  ;;  %v8318_v0 = vcombine.high %v1084_v60, %v1088_v61  ;;  %v1076_v1 = vld [vmem:[%s9954_s5 + $0x140] sm:$0xff]  ;;  %1420 = vmatprep.subr.bf16.mxu0 %v8303_v58  ;;  %v8329_v3 = vcombine.low %v1084_v60, %v1088_v61  ;;  %v8381_v36 = vcombine.high %v1085_v27, %v1089_v28  ;;  %v1077_v38 = vld [vmem:[%s9954_s5 + $0x148] sm:$0xff] }
  0x53   : > { %7342 = vmatprep.mubr.msk.f32.mxu0 %vm633_vm1, %v615_v41  ;;  %v1080_v2 = vld [vmem:[%s9954_s5 + $0x160] sm:$0xff]  ;;  %1421 = vmatpush1.bf16.msra.mxu0 %v8301_v57  ;;  %v1081_v39 = vld [vmem:[%s9954_s5 + $0x168] sm:$0xff] }
  0x54   : > { %7362 = vmatpush3.bf16.msra.mxu1 %v7474_v52  ;;  %1422 = vmatprep.subr.bf16.mxu0 %v8318_v0  ;;  %v8332_v4 = vcombine.high %v1076_v1, %v1080_v2  ;;  %v1068_v5 = vld [vmem:[%s9954_s5 + $0x100] sm:$0xff]  ;;  %v8341_v7 = vcombine.low %v1076_v1, %v1080_v2  ;;  %v8407_v54 = vcombine.low %v1077_v38, %v1081_v39  ;;  %v1061_v1 = vld [vmem:[%s9954_s5 + $0xc8] sm:$0xff] }
  0x55   : > { %7363 = vmatprep.subr.bf16.mxu1 %v7475_v53  ;;  %v1072_v6 = vld [vmem:[%s9954_s5 + $0x120] sm:$0xff]  ;;  %v1065_v2 = vld [vmem:[%s9954_s5 + $0xe8] sm:$0xff] }
  0x56   : > { %7343 = vmatmul.mubr.msk.f32.gmra.mxu0 %vm633_vm1, %v616_v42  ;;  %v8344_v8 = vcombine.high %v1068_v5, %v1072_v6  ;;  %v1060_v9 = vld [vmem:[%s9954_s5 + $0xc0] sm:$0xff]  ;;  %v8353_v11 = vcombine.low %v1068_v5, %v1072_v6 }
  0x57   : > { %7345 = vmatprep.mubr.msk.f32.mxu0 %vm633_vm1, %v617_v43  ;;  %1423 = vmatpush1.bf16.msra.mxu0 %v8329_v3  ;;  %v1064_v10 = vld [vmem:[%s9954_s5 + $0xe0] sm:$0xff]  ;;  %v8392_v43 = vcombine.low %v1085_v27, %v1089_v28 }
  0x58   : > { %7364 = vmatpush3.bf16.msra.mxu1 %v7475_v53  ;;  %1424 = vmatprep.subr.bf16.mxu0 %v8332_v4  ;;  %v8356_v12 = vcombine.high %v1060_v9, %v1064_v10  ;;  %v8359_v13 = vcombine.low %v1060_v9, %v1064_v10  ;;  %v8366_v14 = vld [vmem:[%s9951_s2] ss:$0 sm:$0xff] }
  0x59   : > { %1493 = vmatprep.subr.bf16.mxu1 %v8316_v63 }
  0x5a   : > { %7346 = vmatmul.mubr.msk.f32.gmra.mxu0 %vm633_vm1, %v618_v44 }
  0x5b   : > { %7348 = vmatprep.mubr.msk.f32.mxu0 %vm633_vm1, %v619_v45  ;;  %1425 = vmatpush1.bf16.msra.mxu0 %v8341_v7 }
  0x5c   : > { %1426 = vmatprep.subr.bf16.mxu0 %v8344_v8 }
  0x5e   : > { %7349 = vmatmul.mubr.msk.f32.gmra.mxu0 %vm633_vm1, %v620_v46 }
  0x5f   : > { %7351 = vmatprep.mubr.msk.f32.mxu0 %vm633_vm1, %v621_v47  ;;  %1427 = vmatpush1.bf16.msra.mxu0 %v8353_v11  ;;  %v8396_v47 = vcombine.high %v1077_v38, %v1081_v39  ;;  %v1056_v38 = vld [vmem:[%s9954_s5 + $0xa0] sm:$0xff]  ;;  %v1053_v39 = vld [vmem:[%s9954_s5 + $0x88] sm:$0xff] }
  0x60   : > { %1428 = vmatprep.subr.bf16.mxu0 %v8356_v12 }
  0x62   : > { %7352 = vmatmul.mubr.msk.f32.gmra.mxu0 %vm633_vm1, %v622_v48 }
  0x63   : > { %7354 = vmatprep.mubr.msk.f32.mxu0 %vm633_vm1, %v623_v49  ;;  %1429 = vmatpush1.bf16.msra.mxu0 %v8359_v13  ;;  %v1069_v49 = vld [vmem:[%s9954_s5 + $0x108] sm:$0xff] }
  0x66   : > { %7355 = vmatmul.mubr.msk.f32.gmra.mxu0 %vm633_vm1, %v624_v50  ;;  %v1073_v50 = vld [vmem:[%s9954_s5 + $0x128] sm:$0xff] }
  0x67   : > { %v8411_v60 = vcombine.high %v1069_v49, %v1073_v50  ;;  %v8422_v10 = vcombine.low %v1069_v49, %v1073_v50  ;;  %v1049_v50 = vld [vmem:[%s9954_s5 + $0x68] sm:$0xff] }
 0x10a   : > { %v7335_v15 = vpop.f32.mrf.mxu0 }
 0x10b   : > { %v758_v16 = vadd.f32 %v7335_v15, %v8366_v14 }
 0x10c   : > { %v752_v17 = vpop.f32.mrf.mxu0 }
 0x10d   : > { %v753_v18 = vadd.f32 %v8366_v14, %v752_v17  ;;  %v832_v20 = vmax.f32 %v758_v16, 0.0 }
 0x10e   : > { %v7338_v19 = vpop.f32.mrf.mxu0 }
 0x10f   : > { %v831_v21 = vmax.f32 %v753_v18, 0.0  ;;  %v768_v22 = vadd.f32 %v7338_v19, %v8366_v14  ;;  %v8426_v18 = vcombine.high %v1061_v1, %v1065_v2 }
 0x110   : > { %v762_v23 = vpop.f32.mrf.mxu0 }
 0x111   : > { %v763_v24 = vadd.f32 %v8366_v14, %v762_v23  ;;  %v847_v25 = vpack.c.bf16 %v832_v20, %v831_v21  ;;  %v834_v29 = vmax.f32 %v768_v22, 0.0  ;;  %v8431_v23 = vcombine.low %v1061_v1, %v1065_v2  ;;  %v1041_v1 = vld [vmem:[%s9954_s5 + $0x28] sm:$0xff] }
 0x112   : > { %v7341_v26 = vpop.f32.mrf.mxu0 }
 0x113   : > { %v833_v30 = vmax.f32 %v763_v24, 0.0  ;;  %v778_v31 = vadd.f32 %v7341_v26, %v8366_v14  ;;  %7365 = vmatprep.mubr.msk.bf16.mxu1 %vm894_vm2, %v847_v25 }
 0x114   : > { %v772_v32 = vpop.f32.mrf.mxu0 }
 0x115   : > { %v848_v33 = vpack.c.bf16 %v834_v29, %v833_v30  ;;  %v836_v34 = vmax.f32 %v778_v31, 0.0  ;;  %v773_v35 = vadd.f32 %v8366_v14, %v772_v32 }
 0x116   : > { %v7344_v37 = vpop.f32.mrf.mxu0 }
 0x117   : > { %v835_v40 = vmax.f32 %v773_v35, 0.0  ;;  %v788_v41 = vadd.f32 %v7344_v37, %v8366_v14  ;;  %7366 = vmatmul.mubr.msk.bf16.vlgmr.msra.gmra.mxu1 %vm894_vm2, %v848_v33  ;;  %v1052_v37 = vld [vmem:[%s9954_s5 + $0x80] sm:$0xff] }
 0x118   : > { %v782_v42 = vpop.f32.mrf.mxu0  ;;  %1494 = vmatpush1.bf16.msra.mxu1 %v8314_v62 }
 0x119   : > { %v849_v44 = vpack.c.bf16 %v836_v34, %v835_v40  ;;  %v838_v45 = vmax.f32 %v788_v41, 0.0  ;;  %v783_v46 = vadd.f32 %v8366_v14, %v782_v42  ;;  %1495 = vmatprep.subr.bf16.mxu1 %v8381_v36  ;;  %v8450_v40 = vcombine.high %v1052_v37, %v1056_v38 }
 0x11a   : > { %v7347_v48 = vpop.f32.mrf.mxu0  ;;  %v8455_v41 = vcombine.low %v1052_v37, %v1056_v38  ;;  %v1091_v37 = vld [vmem:[%s9954_s5 + $0x1b8] sm:$0xff] }
 0x11b   : > { %v837_v51 = vmax.f32 %v783_v46, 0.0  ;;  %7369 = vmatprep.mubr.msk.bf16.mxu1 %vm894_vm2, %v849_v44  ;;  %v798_v52 = vadd.f32 %v7347_v48, %v8366_v14  ;;  %1430 = vmatprep.subr.bf16.mxu0 %v8450_v40  ;;  %v1048_v46 = vld [vmem:[%s9954_s5 + $0x60] sm:$0xff]  ;;  %v1045_v48 = vld [vmem:[%s9954_s5 + $0x48] sm:$0xff] }
 0x11c   : > { %v792_v53 = vpop.f32.mrf.mxu0  ;;  %1496 = vmatpush1.bf16.msra.mxu1 %v8392_v43  ;;  %1431 = vmatpush1.bf16.msra.mxu0 %v8455_v41 }
 0x11d   : > { %v850_v55 = vpack.c.bf16 %v838_v45, %v837_v51  ;;  %v840_v56 = vmax.f32 %v798_v52, 0.0  ;;  %v793_v59 = vadd.f32 %v8366_v14, %v792_v53  ;;  %1497 = vmatprep.subr.bf16.mxu1 %v8396_v47  ;;  %v1044_v45 = vld [vmem:[%s9954_s5 + $0x40] sm:$0xff]  ;;  %v8481_v52 = vcombine.low %v1045_v48, %v1049_v50 }
 0x11e   : > { %v7350_v61 = vpop.f32.mrf.mxu0  ;;  %v8474_v49 = vcombine.high %v1044_v45, %v1048_v46  ;;  %v8479_v51 = vcombine.low %v1044_v45, %v1048_v46  ;;  %v8483_v53 = vcombine.high %v1045_v48, %v1049_v50 }
 0x11f   : > { %7370 = vmatmul.mubr.msk.bf16.gmra.mxu1 %vm894_vm2, %v850_v55  ;;  %v839_v5 = vmax.f32 %v793_v59, 0.0  ;;  %v808_v6 = vadd.f32 %v7350_v61, %v8366_v14  ;;  %v1036_v55 = vld [vmem:[%s9954_s5] sm:$0xff]  ;;  %v1037_v59 = vld [vmem:[%s9954_s5 + $0x8] sm:$0xff] }
 0x120   : > { %v802_v9 = vpop.f32.mrf.mxu0  ;;  %1498 = vmatpush1.bf16.msra.mxu1 %v8407_v54  ;;  %1432 = vmatprep.subr.bf16.mxu0 %v8474_v49 }
 0x121   : > { %v851_v15 = vpack.c.bf16 %v840_v56, %v839_v5  ;;  %v842_v16 = vmax.f32 %v808_v6, 0.0  ;;  %v803_v17 = vadd.f32 %v8366_v14, %v802_v9  ;;  %1499 = vmatprep.subr.bf16.mxu1 %v8411_v60  ;;  %1433 = vmatpush1.bf16.msra.mxu0 %v8479_v51  ;;  %v1040_v56 = vld [vmem:[%s9954_s5 + $0x20] sm:$0xff]  ;;  %v8505_v5 = vcombine.low %v1037_v59, %v1041_v1  ;;  %v1094_v9 = vld [vmem:[%s9954_s5 + $0x1d0] sm:$0xff] }
 0x122   : > { %v7353_v19 = vpop.f32.mrf.mxu0  ;;  %v8498_v61 = vcombine.high %v1036_v55, %v1040_v56  ;;  %v8503_v2 = vcombine.low %v1036_v55, %v1040_v56  ;;  %v8507_v6 = vcombine.high %v1037_v59, %v1041_v1  ;;  %v1078_v55 = vld [vmem:[%s9954_s5 + $0x150] sm:$0xff]  ;;  %v1079_v1 = vld [vmem:[%s9954_s5 + $0x158] sm:$0xff] }
 0x123   : > { %v841_v20 = vmax.f32 %v803_v17, 0.0  ;;  %7373 = vmatprep.mubr.msk.bf16.mxu1 %vm894_vm2, %v851_v15  ;;  %v818_v21 = vadd.f32 %v7353_v19, %v8366_v14  ;;  %v1098_v15 = vld [vmem:[%s9954_s5 + $0x1f0] sm:$0xff]  ;;  %v1099_v19 = vld [vmem:[%s9954_s5 + $0x1f8] sm:$0xff] }
 0x124   : > { %v812_v22 = vpop.f32.mrf.mxu0  ;;  %1500 = vmatpush1.bf16.msra.mxu1 %v8422_v10  ;;  %1434 = vmatprep.subr.bf16.mxu0 %v8498_v61  ;;  %v8522_v17 = vcombine.high %v1094_v9, %v1098_v15  ;;  %v1082_v59 = vld [vmem:[%s9954_s5 + $0x170] sm:$0xff] }
 0x125   : > { %v852_v24 = vpack.c.bf16 %v842_v16, %v841_v20  ;;  %v844_v25 = vmax.f32 %v818_v21, 0.0  ;;  %v813_v26 = vadd.f32 %v8366_v14, %v812_v22  ;;  %1501 = vmatprep.subr.bf16.mxu1 %v8426_v18  ;;  %1435 = vmatpush1.bf16.msra.mxu0 %v8503_v2  ;;  %v1095_v16 = vld [vmem:[%s9954_s5 + $0x1d8] sm:$0xff]  ;;  %v9968_v20 = vmov 0  }
 0x126   : > { %v7356_v27 = vpop.f32.mrf.mxu0  ;;  %1452 = vmatprep.mubr.bf16.mxu0 %v9968_v20  ;;  %v8529_v21 = vcombine.low %v1094_v9, %v1098_v15  ;;  %v8531_v22 = vcombine.low %v1095_v16, %v1099_v19  ;;  %1566 = vmatprep.subr.bf16.mxu0 %v8522_v17  ;;  %v1083_v9 = vld [vmem:[%s9954_s5 + $0x178] sm:$0xff] }
 0x127   : > { %7374 = vmatmul.mubr.msk.bf16.gmra.mxu1 %vm894_vm2, %v852_v24  ;;  %v843_v28 = vmax.f32 %v813_v26, 0.0  ;;  %v828_v29 = vadd.f32 %v7356_v27, %v8366_v14  ;;  %v8533_v24 = vcombine.high %v1095_v16, %v1099_v19  ;;  %v8540_v27 = vld [vmem:[%s9953_s4] ss:$0 sm:$0xff] }
 0x128   : > { %v822_v30 = vpop.f32.mrf.mxu0  ;;  %1502 = vmatpush1.bf16.msra.mxu1 %v8431_v23  ;;  %10006 = vst [vmem:[#allocation9_spill] sm:$0xff] %v8531_v22 }
 0x129   : > { %v853_v31 = vpack.c.bf16 %v844_v25, %v843_v28  ;;  %v846_v32 = vmax.f32 %v828_v29, 0.0  ;;  %v823_v33 = vadd.f32 %v8366_v14, %v822_v30  ;;  %v1057_v14 = vld [vmem:[%s9954_s5 + $0xa8] sm:$0xff] }
 0x12a   : > { %v8457_v42 = vcombine.low %v1053_v39, %v1057_v14  ;;  %v8459_v44 = vcombine.high %v1053_v39, %v1057_v14 }
 0x12b   : > { %v845_v34 = vmax.f32 %v823_v33, 0.0  ;;  %7377 = vmatprep.mubr.msk.bf16.mxu1 %vm894_vm2, %v853_v31 }
 0x12c   : > { %1503 = vmatprep.subr.bf16.mxu1 %v8459_v44 }
 0x12d   : > { %v854_v35 = vpack.c.bf16 %v846_v32, %v845_v34  ;;  %1504 = vmatpush1.bf16.msra.mxu1 %v8457_v42  ;;  %v1086_v32 = vld [vmem:[%s9954_s5 + $0x190] sm:$0xff] }
 0x12e   : > { %1505 = vmatprep.subr.bf16.mxu1 %v8483_v53  ;;  %v1090_v34 = vld [vmem:[%s9954_s5 + $0x1b0] sm:$0xff] }
 0x12f   : > { %7378 = vmatmul.mubr.msk.bf16.gmra.mxu1 %vm894_vm2, %v854_v35  ;;  %v1087_v35 = vld [vmem:[%s9954_s5 + $0x198] sm:$0xff]  ;;  %v8561_v48 = vcombine.high %v1086_v32, %v1090_v34  ;;  %v8584_v16 = vcombine.low %v1086_v32, %v1090_v34 }
 0x130   : > { %1525 = vmatprep.mubr.bf16.mxu1 %v9968_v20  ;;  %v8563_v50 = vcombine.high %v1087_v35, %v1091_v37  ;;  %v8586_v19 = vcombine.low %v1087_v35, %v1091_v37  ;;  %v1075_v32 = vld [vmem:[%s9954_s5 + $0x138] sm:$0xff]  ;;  %v8608_v37 = vcombine.low %v1078_v55, %v1082_v59 }
 0x131   : > { %1506 = vmatpush1.bf16.msra.mxu1 %v8481_v52  ;;  %10007 = vst [vmem:[#allocation10_spill] sm:$0xff] %v8561_v48 }
 0x132   : > { %1507 = vmatprep.subr.bf16.mxu1 %v8507_v6  ;;  %10008 = vst [vmem:[#allocation11_spill] sm:$0xff] %v8563_v50  ;;  %10011 = vst [vmem:[#allocation14_spill] sm:$0xff] %v8608_v37 }
 0x135   : > { %1508 = vmatpush1.bf16.msra.mxu1 %v8505_v5 }
 0x136   : > { %1639 = vmatprep.subr.bf16.mxu1 %v8533_v24 }
 0x1d7   : > { %v7367_v25 = vpop.f32.mrf.mxu1 }
 0x1d8   : > { %v962_v15 = vadd.f32 %v7367_v25, %v8540_v27  ;;  %v8593_v25 = vcombine.high %v1078_v55, %v1082_v59  ;;  %v1062_v55 = vld [vmem:[%s9954_s5 + $0xd0] sm:$0xff] }
 0x1d9   : > { %v953_v26 = vpop.f32.mrf.mxu1  ;;  %v1066_v59 = vld [vmem:[%s9954_s5 + $0xf0] sm:$0xff] }
 0x1da   : > { %v954_v29 = vadd.f32 %v8540_v27, %v953_v26  ;;  %v1070_v26 = vld [vmem:[%s9954_s5 + $0x110] sm:$0xff]  ;;  %10009 = vst [vmem:[#allocation12_spill] sm:$0xff] %v8593_v25  ;;  %v1018_v35 = vmax.f32 %v962_v15, 0.0 }
 0x1db   : > { %v7368_v28 = vpop.f32.mrf.mxu1 }
 0x1dc   : > { %v1016_v38 = vmax.f32 %v954_v29, 0.0  ;;  %v965_v45 = vadd.f32 %v7368_v28, %v8540_v27  ;;  %v8595_v29 = vcombine.high %v1079_v1, %v1083_v9 }
 0x1dd   : > { %v956_v30 = vpop.f32.mrf.mxu1 }
 0x1de   : > { %v957_v31 = vadd.f32 %v8540_v27, %v956_v30  ;;  %v1019_v28 = vmax.f32 %v965_v45, 0.0  ;;  %10010 = vst [vmem:[#allocation13_spill] sm:$0xff] %v8595_v29  ;;  %v1074_v30 = vld [vmem:[%s9954_s5 + $0x130] sm:$0xff] }
 0x1df   : > { %v8547_v33 = vpop.f32.mrf.mxu1 }
 0x1e0   : > { %v1017_v39 = vmax.f32 %v957_v31, 0.0  ;;  %v1071_v31 = vld [vmem:[%s9954_s5 + $0x118] sm:$0xff] }
 0x1e1   : > { %v969_v14 = vpop.f32.mrf.mxu1  ;;  %v8616_v45 = vcombine.high %v1071_v31, %v1075_v32  ;;  %v8642_v15 = vcombine.low %v1071_v31, %v1075_v32  ;;  %v8664_v31 = vcombine.low %v1062_v55, %v1066_v59 }
 0x1e2   : > { %v8559_v46 = vpack.c.bf16 %v1017_v39, %v1016_v38  ;;  %v8612_v38 = vcombine.low %v1079_v1, %v1083_v9  ;;  %v8614_v39 = vcombine.high %v1070_v26, %v1074_v30  ;;  %v1063_v1 = vld [vmem:[%s9954_s5 + $0xd8] sm:$0xff]  ;;  %v8640_v9 = vcombine.low %v1070_v26, %v1074_v30  ;;  %v1058_v26 = vld [vmem:[%s9954_s5 + $0xb0] sm:$0xff] }
 0x1e3   : > { %v8568_v56 = vpop.f32.mrf.mxu1  ;;  %10014 = vst [vmem:[#allocation17_spill] sm:$0xff] %v8616_v45  ;;  %v1055_v30 = vld [vmem:[%s9954_s5 + $0x98] sm:$0xff]  ;;  %10018 = vst [vmem:[#allocation20_spill] sm:$0xff] %v8664_v31 }
 0x1e4   : > { %1453 = vmatmul.mubr.bf16.vlgmr.msra.gmra.mxu0 %v8559_v46  ;;  %1526 = vmatmul.mubr.bf16.vlgmr.msra.gmra.mxu1 %v8559_v46  ;;  %10012 = vst [vmem:[#allocation15_spill] sm:$0xff] %v8612_v38  ;;  %10013 = vst [vmem:[#allocation16_spill] sm:$0xff] %v8614_v39 }
 0x1e5   : > { %1567 = vmatpush1.bf16.msra.mxu0 %v8529_v21  ;;  %1640 = vmatpush1.bf16.msra.mxu1 %v8531_v22  ;;  %v972_v34 = vpop.f32.mrf.mxu1 }
 0x1e6   : > { %1568 = vmatprep.subr.bf16.mxu0 %v8561_v48  ;;  %1641 = vmatprep.subr.bf16.mxu1 %v8563_v50  ;;  %v8618_v50 = vpack.c.bf16 %v1019_v28, %v1018_v35  ;;  %v970_v48 = vadd.f32 %v8540_v27, %v969_v14  ;;  %v973_v22 = vadd.f32 %v8540_v27, %v972_v34  ;;  %v1067_v14 = vld [vmem:[%s9954_s5 + $0xf8] sm:$0xff]  ;;  %v1054_v28 = vld [vmem:[%s9954_s5 + $0x90] sm:$0xff] }
 0x1e7   : > { %1462 = vmatprep.mubr.bf16.mxu0 %v9968_v20  ;;  %1535 = vmatprep.mubr.bf16.mxu1 %v9968_v20  ;;  %v8649_v20 = vcombine.high %v1062_v55, %v1066_v59  ;;  %v8668_v32 = vcombine.low %v1063_v1, %v1067_v14  ;;  %v1046_v55 = vld [vmem:[%s9954_s5 + $0x50] sm:$0xff] }
 0x1e8   : > { %v1020_v34 = vmax.f32 %v970_v48, 0.0  ;;  %v1021_v35 = vmax.f32 %v973_v22, 0.0  ;;  %v1059_v22 = vld [vmem:[%s9954_s5 + $0xb8] sm:$0xff]  ;;  %v10017_v48 = vmov 0   ;;  %v1050_v59 = vld [vmem:[%s9954_s5 + $0x70] sm:$0xff] }
 0x1e9   : > { %1569 = vmatpush1.bf16.msra.mxu0 %v8584_v16  ;;  %1642 = vmatpush1.bf16.msra.mxu1 %v8586_v19  ;;  %10015 = vst [vmem:[#allocation18_spill] sm:$0xff] %v8649_v20 }
 0x1ea   : > { %1570 = vmatprep.subr.bf16.mxu0 %v8593_v25  ;;  %1643 = vmatprep.subr.bf16.mxu1 %v8595_v29  ;;  %v8651_v29 = vcombine.high %v1063_v1, %v1067_v14  ;;  %v8678_v25 = vpack.c.bf16 %v1021_v35, %v1020_v34  ;;  %v8698_v1 = vcombine.low %v1054_v28, %v1058_v26 }
 0x1eb   : > { %v8700_v14 = vcombine.low %v1055_v30, %v1059_v22 }
 0x1ec   : > { %1463 = vmatmul.mubr.bf16.gmra.mxu0 %v8618_v50  ;;  %1536 = vmatmul.mubr.bf16.gmra.mxu1 %v8618_v50  ;;  %10016 = vst [vmem:[#allocation19_spill] sm:$0xff] %v8651_v29 }
 0x1ed   : > { %1571 = vmatpush1.bf16.msra.mxu0 %v8608_v37  ;;  %1644 = vmatpush1.bf16.msra.mxu1 %v8612_v38  ;;  %v978_v38 = vadd.f32 %v8547_v33, %v8540_v27  ;;  %v981_v37 = vadd.f32 %v8568_v56, %v8540_v27  ;;  %v1047_v33 = vld [vmem:[%s9954_s5 + $0x58] sm:$0xff]  ;;  %10021 = vst [vmem:[#allocation23_spill] sm:$0xff] %v8700_v14 }
 0x1ee   : > { %1572 = vmatprep.subr.bf16.mxu0 %v8614_v39  ;;  %1645 = vmatprep.subr.bf16.mxu1 %v8616_v45  ;;  %v8670_v45 = vcombine.high %v1054_v28, %v1058_v26  ;;  %v8672_v39 = vcombine.high %v1055_v30, %v1059_v22  ;;  %v1051_v56 = vld [vmem:[%s9954_s5 + $0x78] sm:$0xff]  ;;  %v8724_v26 = vcombine.low %v1046_v55, %v1050_v59 }
 0x1ef   : > { %1472 = vmatprep.mubr.bf16.mxu0 %v10017_v48  ;;  %1545 = vmatprep.mubr.bf16.mxu1 %v10017_v48  ;;  %v1022_v34 = vmax.f32 %v978_v38, 0.0  ;;  %v1023_v35 = vmax.f32 %v981_v37, 0.0  ;;  %v1042_v37 = vld [vmem:[%s9954_s5 + $0x30] sm:$0xff]  ;;  %v1039_v38 = vld [vmem:[%s9954_s5 + $0x18] sm:$0xff]  ;;  %v8726_v30 = vcombine.low %v1047_v33, %v1051_v56 }
 0x1f0   : > { %10019 = vst [vmem:[#allocation21_spill] sm:$0xff] %v8670_v45  ;;  %10020 = vst [vmem:[#allocation22_spill] sm:$0xff] %v8672_v39  ;;  %v1043_v28 = vld [vmem:[%s9954_s5 + $0x38] sm:$0xff] }
 0x1f1   : > { %1573 = vmatpush1.bf16.msra.mxu0 %v8640_v9  ;;  %1646 = vmatpush1.bf16.msra.mxu1 %v8642_v15  ;;  %v1035_v22 = vpack.c.bf16 %v1023_v35, %v1022_v34  ;;  %v6808_v34 = vld [vmem:[%s8235_s19 + $0xd0] sm:$0xff]  ;;  %v6809_v35 = vld [vmem:[%s8235_s19 + $0xd8] sm:$0xff] }
 0x1f2   : > { %1574 = vmatprep.subr.bf16.mxu0 %v8649_v20  ;;  %1647 = vmatprep.subr.bf16.mxu1 %v8651_v29  ;;  %v8704_v29 = vcombine.high %v1046_v55, %v1050_v59  ;;  %v8706_v20 = vcombine.high %v1047_v33, %v1051_v56  ;;  %v8738_v55 = vcombine.low %v1039_v38, %v1043_v28  ;;  %v6803_v59 = vld [vmem:[%s8235_s19 + $0xa8] sm:$0xff]  ;;  %v6804_v33 = vld [vmem:[%s8235_s19 + $0xb0] sm:$0xff]  ;;  %v6805_v56 = vld [vmem:[%s8235_s19 + $0xb8] sm:$0xff] }
 0x1f4   : > { %1473 = vmatmul.mubr.bf16.gmra.mxu0 %v8678_v25  ;;  %1546 = vmatmul.mubr.bf16.gmra.mxu1 %v8678_v25 }
 0x1f5   : > { %1575 = vmatpush1.bf16.msra.mxu0 %v8664_v31  ;;  %1648 = vmatpush1.bf16.msra.mxu1 %v8668_v32  ;;  %v1038_v31 = vld [vmem:[%s9954_s5 + $0x10] sm:$0xff] }
 0x1f6   : > { %1576 = vmatprep.subr.bf16.mxu0 %v8670_v45  ;;  %1649 = vmatprep.subr.bf16.mxu1 %v8672_v39  ;;  %v8730_v39 = vcombine.high %v1038_v31, %v1042_v37  ;;  %v8732_v45 = vcombine.high %v1039_v38, %v1043_v28  ;;  %v6811_v38 = vld [vmem:[%s8235_s19 + $0xe8] sm:$0xff]  ;;  %v6812_v28 = vld [vmem:[%s8235_s19 + $0xf0] sm:$0xff] }
 0x1f7   : > { %1482 = vmatprep.mubr.bf16.mxu0 %v10017_v48  ;;  %1555 = vmatprep.mubr.bf16.mxu1 %v10017_v48 }
 0x1f9   : > { %1577 = vmatpush1.bf16.msra.mxu0 %v8698_v1  ;;  %1650 = vmatpush1.bf16.msra.mxu1 %v8700_v14  ;;  %v8736_v14 = vcombine.low %v1038_v31, %v1042_v37  ;;  %v6801_v31 = vld [vmem:[%s8235_s19 + $0x98] sm:$0xff]  ;;  %v6810_v37 = vld [vmem:[%s8235_s19 + $0xe0] sm:$0xff] }
 0x1fa   : > { %1578 = vmatprep.subr.bf16.mxu0 %v8704_v29  ;;  %1651 = vmatprep.subr.bf16.mxu1 %v8706_v20 }
 0x1fc   : > { %1483 = vmatmul.mubr.bf16.gmra.mxu0 %v1035_v22  ;;  %1556 = vmatmul.mubr.bf16.gmra.mxu1 %v1035_v22 }
 0x1fd   : > { %1579 = vmatpush1.bf16.msra.mxu0 %v8724_v26  ;;  %1652 = vmatpush1.bf16.msra.mxu1 %v8726_v30 }
 0x1fe   : > { %1580 = vmatprep.subr.bf16.mxu0 %v8730_v39  ;;  %1653 = vmatprep.subr.bf16.mxu1 %v8732_v45 }
 0x1ff   : > { %1598 = vmatprep.mubr.bf16.mxu0 %v10017_v48  ;;  %1671 = vmatprep.mubr.bf16.mxu1 %v10017_v48 }
 0x201   : > { %1581 = vmatpush1.bf16.msra.mxu0 %v8736_v14  ;;  %1654 = vmatpush1.bf16.msra.mxu1 %v8738_v55 }
 0x202   : > { %1820 = vmatprep.subr.bf16.mxu0 %v8303_v58  ;;  %1893 = vmatprep.subr.bf16.mxu1 %v8316_v63  ;;  %v7375_v58 = vpop.f32.mrf.mxu1 }
 0x204   : > { %1599 = vmatmul.mubr.bf16.vlgmr.msra.gmra.mxu0 %v8559_v46  ;;  %1672 = vmatmul.mubr.bf16.vlgmr.msra.gmra.mxu1 %v8559_v46  ;;  %v10032_v46 = vld [vmem:[#allocation19_spill] sm:$0xff] }
 0x205   : > { %1821 = vmatpush1.bf16.msra.mxu0 %v8301_v57  ;;  %1894 = vmatpush1.bf16.msra.mxu1 %v8314_v62  ;;  %v985_v57 = vpop.f32.mrf.mxu1 }
 0x206   : > { %1822 = vmatprep.subr.bf16.mxu0 %v8318_v0  ;;  %1895 = vmatprep.subr.bf16.mxu1 %v8381_v36  ;;  %v986_v0 = vadd.f32 %v8540_v27, %v985_v57 }
 0x207   : > { %1608 = vmatprep.mubr.bf16.mxu0 %v10017_v48  ;;  %1681 = vmatprep.mubr.bf16.mxu1 %v10017_v48  ;;  %v7376_v62 = vpop.f32.mrf.mxu1 }
 0x209   : > { %1823 = vmatpush1.bf16.msra.mxu0 %v8329_v3  ;;  %1896 = vmatpush1.bf16.msra.mxu1 %v8392_v43  ;;  %v988_v63 = vpop.f32.mrf.mxu1 }
 0x20a   : > { %1824 = vmatprep.subr.bf16.mxu0 %v8332_v4  ;;  %1897 = vmatprep.subr.bf16.mxu1 %v8396_v47  ;;  %v989_v3 = vadd.f32 %v8540_v27, %v988_v63  ;;  %v10022_v47 = vld [vmem:[#allocation9_spill] sm:$0xff] }
 0x20b   : > { %v7379_v4 = vpop.f32.mrf.mxu1 }
 0x20c   : > { %1609 = vmatmul.mubr.bf16.gmra.mxu0 %v8618_v50  ;;  %1682 = vmatmul.mubr.bf16.gmra.mxu1 %v8618_v50  ;;  %v10033_v50 = vld [vmem:[#allocation20_spill] sm:$0xff] }
 0x20d   : > { %1825 = vmatpush1.bf16.msra.mxu0 %v8341_v7  ;;  %1898 = vmatpush1.bf16.msra.mxu1 %v8407_v54  ;;  %v1024_v7 = vmax.f32 %v986_v0, 0.0 }
 0x20e   : > { %1826 = vmatprep.subr.bf16.mxu0 %v8344_v8  ;;  %1899 = vmatprep.subr.bf16.mxu1 %v8411_v60  ;;  %v1025_v8 = vmax.f32 %v989_v3, 0.0  ;;  %v7478_v3 = vld [vmem:[%s9952_s3 + $0x8] sm:$0xff]  }
 0x20f   : > { %1618 = vmatprep.mubr.bf16.mxu0 %v10017_v48  ;;  %1691 = vmatprep.mubr.bf16.mxu1 %v10017_v48 }
 0x210   : > { %v8796_v36 = vpack.c.bf16 %v1025_v8, %v1024_v7 }
 0x211   : > { %1827 = vmatpush1.bf16.msra.mxu0 %v8353_v11  ;;  %1900 = vmatpush1.bf16.msra.mxu1 %v8422_v10  ;;  %v1001_v11 = vpop.f32.mrf.mxu1  ;;  %v10023_v10 = vld [vmem:[#allocation10_spill] sm:$0xff] }
 0x212   : > { %1828 = vmatprep.subr.bf16.mxu0 %v8356_v12  ;;  %1901 = vmatprep.subr.bf16.mxu1 %v8426_v18  ;;  %v994_v12 = vadd.f32 %v7375_v58, %v8540_v27  ;;  %v10024_v18 = vld [vmem:[#allocation11_spill] sm:$0xff] }
 0x213   : > { %v7380_v43 = vpop.f32.mrf.mxu1 }
 0x214   : > { %1619 = vmatmul.mubr.bf16.gmra.mxu0 %v8678_v25  ;;  %1692 = vmatmul.mubr.bf16.gmra.mxu1 %v8678_v25  ;;  %v1026_v54 = vmax.f32 %v994_v12, 0.0  ;;  %v10034_v25 = vld [vmem:[#allocation21_spill] sm:$0xff] }
 0x215   : > { %1829 = vmatpush1.bf16.msra.mxu0 %v8359_v13  ;;  %1902 = vmatpush1.bf16.msra.mxu1 %v8431_v23  ;;  %v997_v13 = vadd.f32 %v7376_v62, %v8540_v27  ;;  %v1004_v23 = vpop.f32.mrf.mxu1 }
 0x216   : > { %1830 = vmatprep.subr.bf16.mxu0 %v8450_v40  ;;  %1903 = vmatprep.subr.bf16.mxu1 %v8459_v44  ;;  %v10025_v44 = vld [vmem:[#allocation12_spill] sm:$0xff] }
 0x217   : > { %1628 = vmatprep.mubr.bf16.mxu0 %v10017_v48  ;;  %1701 = vmatprep.mubr.bf16.mxu1 %v10017_v48  ;;  %v1027_v60 = vmax.f32 %v997_v13, 0.0 }
 0x219   : > { %1831 = vmatpush1.bf16.msra.mxu0 %v8455_v41  ;;  %1904 = vmatpush1.bf16.msra.mxu1 %v8457_v42  ;;  %v1817_v40 = vpack.c.bf16 %v1027_v60, %v1026_v54  ;;  %v1002_v41 = vadd.f32 %v8540_v27, %v1001_v11  ;;  %v1005_v42 = vadd.f32 %v8540_v27, %v1004_v23 }
 0x21a   : > { %1832 = vmatprep.subr.bf16.mxu0 %v8474_v49  ;;  %1905 = vmatprep.subr.bf16.mxu1 %v8483_v53  ;;  %v10026_v49 = vld [vmem:[#allocation13_spill] sm:$0xff] }
 0x21b   : > { %v1028_v53 = vmax.f32 %v1002_v41, 0.0 }
 0x21c   : > { %1629 = vmatmul.mubr.bf16.gmra.mxu0 %v1035_v22  ;;  %1702 = vmatmul.mubr.bf16.gmra.mxu1 %v1035_v22  ;;  %v7477_v22 = vld [vmem:[%s9952_s3 + $0x10] sm:$0xff]  }
 0x21d   : > { %1833 = vmatpush1.bf16.msra.mxu0 %v8479_v51  ;;  %1906 = vmatpush1.bf16.msra.mxu1 %v8481_v52  ;;  %v10027_v51 = vld [vmem:[#allocation14_spill] sm:$0xff]  ;;  %v10028_v52 = vld [vmem:[#allocation15_spill] sm:$0xff] }
 0x21e   : > { %1834 = vmatprep.subr.bf16.mxu0 %v8498_v61  ;;  %1907 = vmatprep.subr.bf16.mxu1 %v8507_v6  ;;  %v1029_v61 = vmax.f32 %v1005_v42, 0.0  ;;  %v1010_v6 = vadd.f32 %v7379_v4, %v8540_v27 }
 0x21f   : > { %1852 = vmatprep.mubr.bf16.mxu0 %v10017_v48  ;;  %1925 = vmatprep.mubr.bf16.mxu1 %v10017_v48 }
 0x221   : > { %1835 = vmatpush1.bf16.msra.mxu0 %v8503_v2  ;;  %1908 = vmatpush1.bf16.msra.mxu1 %v8505_v5  ;;  %v10029_v2 = vld [vmem:[#allocation16_spill] sm:$0xff]  ;;  %v10030_v5 = vld [vmem:[#allocation17_spill] sm:$0xff] }
 0x222   : > { %1966 = vmatprep.subr.bf16.mxu0 %v8522_v17  ;;  %2039 = vmatprep.subr.bf16.mxu1 %v8533_v24  ;;  %v1013_v17 = vadd.f32 %v7380_v43, %v8540_v27  ;;  %v10031_v24 = vld [vmem:[#allocation18_spill] sm:$0xff]  ;;  %v10036_v27 = vld [vmem:[#allocation23_spill] sm:$0xff] }
 0x224   : > { %1853 = vmatmul.mubr.bf16.vlgmr.msra.gmra.mxu0 %v8796_v36  ;;  %1926 = vmatmul.mubr.bf16.vlgmr.msra.gmra.mxu1 %v8796_v36 }
 0x225   : > { %1967 = vmatpush1.bf16.msra.mxu0 %v8529_v21  ;;  %2040 = vmatpush1.bf16.msra.mxu1 %v10022_v47  ;;  %v1818_v21 = vpack.c.bf16 %v1029_v61, %v1028_v53 }
 0x226   : > { %1968 = vmatprep.subr.bf16.mxu0 %v10023_v10  ;;  %2041 = vmatprep.subr.bf16.mxu1 %v10024_v18 }
 0x227   : > { %1862 = vmatprep.mubr.bf16.mxu0 %v10017_v48  ;;  %1935 = vmatprep.mubr.bf16.mxu1 %v10017_v48 }
 0x229   : > { %1969 = vmatpush1.bf16.msra.mxu0 %v8584_v16  ;;  %2042 = vmatpush1.bf16.msra.mxu1 %v8586_v19  ;;  %v1030_v16 = vmax.f32 %v1010_v6, 0.0  ;;  %v1031_v19 = vmax.f32 %v1013_v17, 0.0 }
 0x22a   : > { %1970 = vmatprep.subr.bf16.mxu0 %v10025_v44  ;;  %2043 = vmatprep.subr.bf16.mxu1 %v10026_v49 }
 0x22c   : > { %1863 = vmatmul.mubr.bf16.gmra.mxu0 %v1817_v40  ;;  %1936 = vmatmul.mubr.bf16.gmra.mxu1 %v1817_v40 }
 0x22d   : > { %1971 = vmatpush1.bf16.msra.mxu0 %v10027_v51  ;;  %2044 = vmatpush1.bf16.msra.mxu1 %v10028_v52 }
 0x22e   : > { %1972 = vmatprep.subr.bf16.mxu0 %v10029_v2  ;;  %2045 = vmatprep.subr.bf16.mxu1 %v10030_v5 }
 0x22f   : > { %1872 = vmatprep.mubr.bf16.mxu0 %v10017_v48  ;;  %1945 = vmatprep.mubr.bf16.mxu1 %v10017_v48 }
 0x231   : > { %1973 = vmatpush1.bf16.msra.mxu0 %v8640_v9  ;;  %2046 = vmatpush1.bf16.msra.mxu1 %v8642_v15  ;;  %v10035_v9 = vld [vmem:[#allocation22_spill] sm:$0xff]  ;;  %v1819_v15 = vpack.c.bf16 %v1031_v19, %v1030_v16 }
 0x232   : > { %1974 = vmatprep.subr.bf16.mxu0 %v10031_v24  ;;  %2047 = vmatprep.subr.bf16.mxu1 %v10032_v46 }
 0x234   : > { %1873 = vmatmul.mubr.bf16.gmra.mxu0 %v1818_v21  ;;  %1946 = vmatmul.mubr.bf16.gmra.mxu1 %v1818_v21 }
 0x235   : > { %1975 = vmatpush1.bf16.msra.mxu0 %v10033_v50  ;;  %2048 = vmatpush1.bf16.msra.mxu1 %v8668_v32  ;;  %v6802_v32 = vld [vmem:[%s8235_s19 + $0xa0] sm:$0xff] }
 0x236   : > { %1976 = vmatprep.subr.bf16.mxu0 %v10034_v25  ;;  %2049 = vmatprep.subr.bf16.mxu1 %v10035_v9 }
 0x237   : > { %1882 = vmatprep.mubr.bf16.mxu0 %v10017_v48  ;;  %1955 = vmatprep.mubr.bf16.mxu1 %v10017_v48 }
 0x239   : > { %1977 = vmatpush1.bf16.msra.mxu0 %v8698_v1  ;;  %2050 = vmatpush1.bf16.msra.mxu1 %v10036_v27  ;;  %v6806_v1 = vld [vmem:[%s8235_s19 + $0xc0] sm:$0xff] }
 0x23a   : > { %1978 = vmatprep.subr.bf16.mxu0 %v8704_v29  ;;  %2051 = vmatprep.subr.bf16.mxu1 %v8706_v20  ;;  %v6814_v29 = vld [vmem:[%s9950_s1 + $0x8] sm:$0x3f]  ;;  %v6798_v20 = vld [vmem:[%s8235_s19 + $0x80] sm:$0xff] }
 0x23c   : > { %1883 = vmatmul.mubr.bf16.gmra.mxu0 %v1819_v15  ;;  %1956 = vmatmul.mubr.bf16.gmra.mxu1 %v1819_v15 }
 0x23d   : > { %1979 = vmatpush1.bf16.msra.mxu0 %v8724_v26  ;;  %2052 = vmatpush1.bf16.msra.mxu1 %v8726_v30  ;;  %v6813_v26 = vld [vmem:[%s8235_s19 + $0xf8] sm:$0xff]  ;;  %v7476_v30 = vld [vmem:[%s9952_s3 + $0x18] sm:$0xff]  }
 0x23e   : > { %1980 = vmatprep.subr.bf16.mxu0 %v8730_v39  ;;  %2053 = vmatprep.subr.bf16.mxu1 %v8732_v45  ;;  %v6799_v39 = vld [vmem:[%s8235_s19 + $0x88] sm:$0xff]  ;;  %v6800_v45 = vld [vmem:[%s8235_s19 + $0x90] sm:$0xff] }
 0x23f   : > { %1998 = vmatprep.mubr.bf16.mxu0 %v10017_v48  ;;  %2071 = vmatprep.mubr.bf16.mxu1 %v10017_v48 }
 0x241   : > { %1981 = vmatpush1.bf16.msra.mxu0 %v8736_v14  ;;  %2054 = vmatpush1.bf16.msra.mxu1 %v8738_v55  ;;  %v6807_v14 = vld [vmem:[%s8235_s19 + $0xc8] sm:$0xff] }
 0x242   : > { %7381 = vmatprep.subr.msk.mxu0 %vm682_vm0, %v6814_v29  ;;  %7407 = vmatprep.subr.bf16.mxu1 %v7476_v30 }
 0x244   : > { %1999 = vmatmul.mubr.bf16.vlgmr.msra.gmra.mxu0 %v8796_v36  ;;  %2072 = vmatmul.mubr.bf16.vlgmr.msra.gmra.mxu1 %v8796_v36  ;;  %v7479_v36 = vld [vmem:[%s9952_s3] sm:$0xff]  }
 0x245   : > { %7382 = vmatpush3.msk.msra.mxu0 %vm682_vm0, %v6814_v29  ;;  %2008 = vmatprep.mubr.bf16.mxu0 %v10017_v48 }
 0x246   : > { %2081 = vmatprep.mubr.bf16.mxu1 %v10017_v48  ;;  %7408 = vmatpush3.bf16.msra.mxu1 %v7476_v30 }
 0x247   : > { %7409 = vmatprep.subr.bf16.mxu1 %v7477_v22 }
 0x24a   : > { %7410 = vmatpush3.bf16.msra.mxu1 %v7477_v22 }
 0x24b   : > { %7411 = vmatprep.subr.bf16.mxu1 %v7478_v3 }
 0x24c   : > { %2009 = vmatmul.mubr.bf16.gmra.mxu0 %v1817_v40  ;;  %2082 = vmatmul.mubr.bf16.gmra.mxu1 %v1817_v40 }
 0x24d   : > { %2018 = vmatprep.mubr.bf16.mxu0 %v10017_v48  ;;  %2091 = vmatprep.mubr.bf16.mxu1 %v10017_v48 }
 0x24e   : > { %7412 = vmatpush3.bf16.msra.mxu1 %v7478_v3 }
 0x24f   : > { %7413 = vmatprep.subr.bf16.mxu1 %v7479_v36 }
 0x252   : > { %7414 = vmatpush3.bf16.msra.mxu1 %v7479_v36 }
 0x254   : > { %2019 = vmatmul.mubr.bf16.gmra.mxu0 %v1818_v21  ;;  %2092 = vmatmul.mubr.bf16.gmra.mxu1 %v1818_v21 }
 0x255   : > { %2028 = vmatprep.mubr.bf16.mxu0 %v10017_v48  ;;  %2101 = vmatprep.mubr.bf16.mxu1 %v10017_v48 }
 0x25c   : > { %2029 = vmatmul.mubr.bf16.gmra.mxu0 %v1819_v15  ;;  %2102 = vmatmul.mubr.bf16.gmra.mxu1 %v1819_v15 }
 0x25d   : > { %7383 = vmatprep.mubr.msk.f32.mxu0 %vm633_vm1, %v6798_v20 }
 0x264   : > { %7384 = vmatmul.mubr.msk.f32.vlgmr.msra.gmra.mxu0 %vm633_vm1, %v6799_v39 }
 0x265   : > { %7386 = vmatprep.mubr.msk.f32.mxu0 %vm633_vm1, %v6800_v45 }
 0x268   : > { %7387 = vmatmul.mubr.msk.f32.gmra.mxu0 %vm633_vm1, %v6801_v31 }
 0x269   : > { %7389 = vmatprep.mubr.msk.f32.mxu0 %vm633_vm1, %v6802_v32 }
 0x26c   : > { %7390 = vmatmul.mubr.msk.f32.gmra.mxu0 %vm633_vm1, %v6803_v59 }
 0x26d   : > { %7392 = vmatprep.mubr.msk.f32.mxu0 %vm633_vm1, %v6804_v33 }
 0x270   : > { %7393 = vmatmul.mubr.msk.f32.gmra.mxu0 %vm633_vm1, %v6805_v56 }
 0x271   : > { %7395 = vmatprep.mubr.msk.f32.mxu0 %vm633_vm1, %v6806_v1 }
 0x274   : > { %7396 = vmatmul.mubr.msk.f32.gmra.mxu0 %vm633_vm1, %v6807_v14 }
 0x275   : > { %7398 = vmatprep.mubr.msk.f32.mxu0 %vm633_vm1, %v6808_v34 }
 0x278   : > { %7399 = vmatmul.mubr.msk.f32.gmra.mxu0 %vm633_vm1, %v6809_v35 }
 0x279   : > { %7401 = vmatprep.mubr.msk.f32.mxu0 %vm633_vm1, %v6810_v37 }
 0x27c   : > { %7402 = vmatmul.mubr.msk.f32.gmra.mxu0 %vm633_vm1, %v6811_v38 }
 0x27d   : > { %7404 = vmatprep.mubr.msk.f32.mxu0 %vm633_vm1, %v6812_v28 }
 0x280   : > { %7405 = vmatmul.mubr.msk.f32.gmra.mxu0 %vm633_vm1, %v6813_v26 }
 0x281   : > { %3127 = vmatprep.mubr.bf16.mxu0 %v10017_v48 }
 0x2a4   : > { %v1454_v55 = vpop.f32.mrf.mxu0  ;;  %v1527_v58 = vpop.f32.mrf.mxu1 }
 0x2a6   : > { %v1456_v57 = vpop.f32.mrf.mxu0  ;;  %v1529_v62 = vpop.f32.mrf.mxu1 }
 0x2a8   : > { %v1458_v63 = vpop.f32.mrf.mxu0  ;;  %v1531_v0 = vpop.f32.mrf.mxu1 }
 0x2a9   : > { %v1712_v4 = vmax.f32 %v1454_v55, %v1458_v63  ;;  %v1738_v7 = vmax.f32 %v1527_v58, %v1531_v0 }
 0x2aa   : > { %v1460_v8 = vpop.f32.mrf.mxu0  ;;  %v1533_v11 = vpop.f32.mrf.mxu1 }
 0x2ab   : > { %v1725_v43 = vmax.f32 %v1456_v57, %v1460_v8  ;;  %v1751_v47 = vmax.f32 %v1529_v62, %v1533_v11  ;;  %v2768_v8 = vld [vmem:[%s9954_s5 + $0x1c8] sm:$0xff] }
 0x2ac   : > { %v1464_v12 = vpop.f32.mrf.mxu0  ;;  %v1537_v13 = vpop.f32.mrf.mxu1  ;;  %v2772_v11 = vld [vmem:[%s9954_s5 + $0x1e8] sm:$0xff] }
 0x2ad   : > { %v1713_v54 = vmax.f32 %v1712_v4, %v1464_v12  ;;  %v1739_v60 = vmax.f32 %v1738_v7, %v1537_v13  ;;  %v2767_v4 = vld [vmem:[%s9954_s5 + $0x1c0] sm:$0xff] }
 0x2ae   : > { %v1466_v10 = vpop.f32.mrf.mxu0  ;;  %v1539_v18 = vpop.f32.mrf.mxu1  ;;  %v2771_v7 = vld [vmem:[%s9954_s5 + $0x1e0] sm:$0xff] }
 0x2af   : > { %v1726_v23 = vmax.f32 %v1725_v43, %v1466_v10  ;;  %v1752_v40 = vmax.f32 %v1751_v47, %v1539_v18  ;;  %v8926_v36 = vcombine.low %v2767_v4, %v2771_v7  ;;  %v8928_v43 = vcombine.high %v2767_v4, %v2771_v7  ;;  %v2763_v10 = vld [vmem:[%s9954_s5 + $0x1a0] sm:$0xff] }
 0x2b0   : > { %v1468_v41 = vpop.f32.mrf.mxu0  ;;  %v1541_v42 = vpop.f32.mrf.mxu1 }
 0x2b1   : > { %v1714_v44 = vmax.f32 %v1713_v54, %v1468_v41  ;;  %v1740_v49 = vmax.f32 %v1739_v60, %v1541_v42  ;;  %v2759_v60 = vld [vmem:[%s9954_s5 + $0x180] sm:$0xff]  ;;  %3095 = vmatprep.subr.bf16.mxu0 %v8928_v43  ;;  %v8937_v42 = vcombine.low %v2768_v8, %v2772_v11 }
 0x2b2   : > { %v1470_v51 = vpop.f32.mrf.mxu0  ;;  %v1543_v52 = vpop.f32.mrf.mxu1  ;;  %3096 = vmatpush1.bf16.msra.mxu0 %v8926_v36 }
 0x2b3   : > { %v1727_v2 = vmax.f32 %v1726_v23, %v1470_v51  ;;  %v1753_v5 = vmax.f32 %v1752_v40, %v1543_v52  ;;  %v2755_v51 = vld [vmem:[%s9954_s5 + $0x160] sm:$0xff] }
 0x2b4   : > { %v1474_v53 = vpop.f32.mrf.mxu0  ;;  %v1547_v61 = vpop.f32.mrf.mxu1 }
 0x2b5   : > { %v1715_v6 = vmax.f32 %v1714_v44, %v1474_v53  ;;  %v1741_v17 = vmax.f32 %v1740_v49, %v1547_v61  ;;  %v8939_v44 = vcombine.high %v2768_v8, %v2772_v11  ;;  %v2751_v49 = vld [vmem:[%s9954_s5 + $0x140] sm:$0xff] }
 0x2b6   : > { %v1476_v21 = vpop.f32.mrf.mxu0  ;;  %v1549_v24 = vpop.f32.mrf.mxu1 }
 0x2b7   : > { %v1728_v46 = vmax.f32 %v1727_v2, %v1476_v21  ;;  %v1754_v50 = vmax.f32 %v1753_v5, %v1549_v24  ;;  %3168 = vmatprep.subr.bf16.mxu1 %v8939_v44  ;;  %v8949_v5 = vcombine.low %v2759_v60, %v2763_v10  ;;  %v8953_v24 = vcombine.high %v2751_v49, %v2755_v51 }
 0x2b8   : > { %v1478_v16 = vpop.f32.mrf.mxu0  ;;  %v1551_v19 = vpop.f32.mrf.mxu1 }
 0x2b9   : > { %v1716_v25 = vmax.f32 %v1715_v6, %v1478_v16  ;;  %v1742_v9 = vmax.f32 %v1741_v17, %v1551_v19  ;;  %v8951_v6 = vcombine.high %v2759_v60, %v2763_v10 }
 0x2ba   : > { %v1480_v27 = vpop.f32.mrf.mxu0  ;;  %v1553_v15 = vpop.f32.mrf.mxu1 }
 0x2bb   : > { %v1729_v39 = vmax.f32 %v1728_v46, %v1480_v27  ;;  %v1755_v45 = vmax.f32 %v1754_v50, %v1553_v15  ;;  %v2743_v46 = vld [vmem:[%s9954_s5 + $0x100] sm:$0xff]  ;;  %3097 = vmatprep.subr.bf16.mxu0 %v8951_v6 }
 0x2bc   : > { %v1484_v29 = vpop.f32.mrf.mxu0  ;;  %v1557_v20 = vpop.f32.mrf.mxu1  ;;  %v2747_v50 = vld [vmem:[%s9954_s5 + $0x120] sm:$0xff]  ;;  %3098 = vmatpush1.bf16.msra.mxu0 %v8949_v5 }
 0x2bd   : > { %v1717_v31 = vmax.f32 %v1716_v25, %v1484_v29  ;;  %v1743_v32 = vmax.f32 %v1742_v9, %v1557_v20  ;;  %v8963_v25 = vcombine.low %v2751_v49, %v2755_v51  ;;  %3099 = vmatprep.subr.bf16.mxu0 %v8953_v24  ;;  %v8966_v15 = vcombine.high %v2743_v46, %v2747_v50 }
 0x2be   : > { %v1486_v59 = vpop.f32.mrf.mxu0  ;;  %v1559_v33 = vpop.f32.mrf.mxu1 }
 0x2bf   : > { %v8902_v56 = vmax.f32 %v1729_v39, %v1486_v59  ;;  %v8904_v1 = vmax.f32 %v1755_v45, %v1559_v33 }
 0x2c0   : > { %v1488_v14 = vpop.f32.mrf.mxu0  ;;  %v1561_v34 = vpop.f32.mrf.mxu1  ;;  %3100 = vmatpush1.bf16.msra.mxu0 %v8963_v25 }
 0x2c1   : > { %v8906_v35 = vmax.f32 %v1717_v31, %v1488_v14  ;;  %v8908_v37 = vmax.f32 %v1743_v32, %v1561_v34  ;;  %v2735_v31 = vld [vmem:[%s9954_s5 + $0xc0] sm:$0xff]  ;;  %3101 = vmatprep.subr.bf16.mxu0 %v8966_v15 }
 0x2c2   : > { %v8910_v38 = vpop.f32.mrf.mxu0  ;;  %v8912_v28 = vpop.f32.mrf.mxu1  ;;  %v2739_v32 = vld [vmem:[%s9954_s5 + $0xe0] sm:$0xff] }
 0x2c4   : > { %v1600_v26 = vpop.f32.mrf.mxu0  ;;  %v1673_v30 = vpop.f32.mrf.mxu1 }
 0x2c6   : > { %v1602_v22 = vpop.f32.mrf.mxu0  ;;  %v1675_v55 = vpop.f32.mrf.mxu1 }
 0x2c8   : > { %v1604_v58 = vpop.f32.mrf.mxu0  ;;  %v1677_v57 = vpop.f32.mrf.mxu1 }
 0x2c9   : > { %v1764_v62 = vmax.f32 %v1600_v26, %v1604_v58  ;;  %v1790_v63 = vmax.f32 %v1673_v30, %v1677_v57  ;;  %v8975_v26 = vcombine.low %v2743_v46, %v2747_v50 }
 0x2ca   : > { %v1606_v0 = vpop.f32.mrf.mxu0  ;;  %v1679_v3 = vpop.f32.mrf.mxu1 }
 0x2cb   : > { %v1777_v47 = vmax.f32 %v1602_v22, %v1606_v0  ;;  %v1803_v54 = vmax.f32 %v1675_v55, %v1679_v3  ;;  %v8978_v55 = vcombine.high %v2735_v31, %v2739_v32  ;;  %3102 = vmatpush1.bf16.msra.mxu0 %v8975_v26  ;;  %v8981_v0 = vcombine.low %v2735_v31, %v2739_v32 }
 0x2cc   : > { %v1610_v12 = vpop.f32.mrf.mxu0  ;;  %v1683_v13 = vpop.f32.mrf.mxu1 }
 0x2cd   : > { %v1765_v18 = vmax.f32 %v1764_v62, %v1610_v12  ;;  %v1791_v23 = vmax.f32 %v1790_v63, %v1683_v13  ;;  %3103 = vmatprep.subr.bf16.mxu0 %v8978_v55 }
 0x2ce   : > { %v1612_v40 = vpop.f32.mrf.mxu0  ;;  %v1685_v41 = vpop.f32.mrf.mxu1 }
 0x2cf   : > { %v1778_v52 = vmax.f32 %v1777_v47, %v1612_v40  ;;  %v1804_v53 = vmax.f32 %v1803_v54, %v1685_v41  ;;  %3104 = vmatpush1.bf16.msra.mxu0 %v8981_v0 }
 0x2d0   : > { %v1614_v61 = vpop.f32.mrf.mxu0  ;;  %v1687_v2 = vpop.f32.mrf.mxu1 }
 0x2d1   : > { %v1766_v17 = vmax.f32 %v1765_v18, %v1614_v61  ;;  %v1792_v21 = vmax.f32 %v1791_v23, %v1687_v2 }
 0x2d2   : > { %v1616_v16 = vpop.f32.mrf.mxu0  ;;  %v1689_v19 = vpop.f32.mrf.mxu1 }
 0x2d3   : > { %v1779_v29 = vmax.f32 %v1778_v52, %v1616_v16  ;;  %v1805_v20 = vmax.f32 %v1804_v53, %v1689_v19 }
 0x2d4   : > { %v1620_v9 = vpop.f32.mrf.mxu0  ;;  %v1693_v27 = vpop.f32.mrf.mxu1 }
 0x2d5   : > { %v1767_v39 = vmax.f32 %v1766_v17, %v1620_v9  ;;  %v1793_v45 = vmax.f32 %v1792_v21, %v1693_v27 }
 0x2d6   : > { %v1622_v59 = vpop.f32.mrf.mxu0  ;;  %v1695_v33 = vpop.f32.mrf.mxu1 }
 0x2d7   : > { %v1780_v14 = vmax.f32 %v1779_v29, %v1622_v59  ;;  %v1806_v34 = vmax.f32 %v1805_v20, %v1695_v33  ;;  %v1731_v33 = vmax.f32 %v8902_v56, %v8910_v38 }
 0x2d8   : > { %v1624_v30 = vpop.f32.mrf.mxu0  ;;  %v1697_v22 = vpop.f32.mrf.mxu1 }
 0x2d9   : > { %v1768_v58 = vmax.f32 %v1767_v39, %v1624_v30  ;;  %v1794_v57 = vmax.f32 %v1793_v45, %v1697_v22  ;;  %v1732_v56 = vrot.slane %v1731_v33, 4 }
 0x2da   : > { %v1626_v62 = vpop.f32.mrf.mxu0  ;;  %v1699_v63 = vpop.f32.mrf.mxu1 }
 0x2db   : > { %v1781_v7 = vmax.f32 %v1780_v14, %v1626_v62  ;;  %v1807_v8 = vmax.f32 %v1806_v34, %v1699_v63  ;;  %v1757_v14 = vmax.f32 %v8904_v1, %v8912_v28 }
 0x2dc   : > { %v1630_v3 = vpop.f32.mrf.mxu0  ;;  %v1703_v4 = vpop.f32.mrf.mxu1 }
 0x2dd   : > { %v1769_v11 = vmax.f32 %v1768_v58, %v1630_v3  ;;  %v1795_v12 = vmax.f32 %v1794_v57, %v1703_v4  ;;  %v1758_v38 = vrot.slane %v1757_v14, 4 }
 0x2de   : > { %v1632_v13 = vpop.f32.mrf.mxu0  ;;  %v1705_v47 = vpop.f32.mrf.mxu1 }
 0x2df   : > { %v8984_v54 = vmax.f32 %v1781_v7, %v1632_v13  ;;  %v8986_v60 = vmax.f32 %v1807_v8, %v1705_v47  ;;  %v1745_v13 = vrot.slane %v8908_v37, 4 }
 0x2e0   : > { %v1634_v10 = vpop.f32.mrf.mxu0  ;;  %v1707_v18 = vpop.f32.mrf.mxu1 }
 0x2e1   : > { %v8989_v23 = vmax.f32 %v1769_v11, %v1634_v10  ;;  %v8991_v40 = vmax.f32 %v1795_v12, %v1707_v18  ;;  %v1719_v12 = vrot.slane %v8906_v35, 4 }
 0x2e2   : > { %v8993_v41 = vpop.f32.mrf.mxu0  ;;  %v8995_v49 = vpop.f32.mrf.mxu1 }
 0x2e4   : > { %v1854_v51 = vpop.f32.mrf.mxu0  ;;  %v1927_v52 = vpop.f32.mrf.mxu1 }
 0x2e6   : > { %v1856_v53 = vpop.f32.mrf.mxu0  ;;  %v1929_v61 = vpop.f32.mrf.mxu1 }
 0x2e8   : > { %v1858_v2 = vpop.f32.mrf.mxu0  ;;  %v1931_v17 = vpop.f32.mrf.mxu1 }
 0x2e9   : > { %v2112_v32 = vmax.f32 %v1854_v51, %v1858_v2  ;;  %v2138_v59 = vmax.f32 %v1927_v52, %v1931_v17 }
 0x2ea   : > { %v1860_v21 = vpop.f32.mrf.mxu0  ;;  %v1933_v46 = vpop.f32.mrf.mxu1 }
 0x2eb   : > { %v2125_v22 = vmax.f32 %v1856_v53, %v1860_v21  ;;  %v2151_v58 = vmax.f32 %v1929_v61, %v1933_v46  ;;  %v1720_v46 = vmax.f32 %v8906_v35, %v1719_v12 }
 0x2ec   : > { %v1864_v50 = vpop.f32.mrf.mxu0  ;;  %v1937_v16 = vpop.f32.mrf.mxu1 }
 0x2ed   : > { %v2113_v57 = vmax.f32 %v2112_v32, %v1864_v50  ;;  %v2139_v62 = vmax.f32 %v2138_v59, %v1937_v16  ;;  %v1746_v50 = vmax.f32 %v8908_v37, %v1745_v13  ;;  %v1733_v16 = vmax.f32 %v1731_v33, %v1732_v56 }
 0x2ee   : > { %v1866_v19 = vpop.f32.mrf.mxu0  ;;  %v1939_v9 = vpop.f32.mrf.mxu1 }
 0x2ef   : > { %v2126_v4 = vmax.f32 %v2125_v22, %v1866_v19  ;;  %v2152_v7 = vmax.f32 %v2151_v58, %v1939_v9  ;;  %v1759_v19 = vmax.f32 %v1757_v14, %v1758_v38  ;;  %v1721_v58 = vrot.slane %v1720_v46, 2 }
 0x2f0   : > { %v1868_v27 = vpop.f32.mrf.mxu0  ;;  %v1941_v29 = vpop.f32.mrf.mxu1 }
 0x2f1   : > { %v2114_v8 = vmax.f32 %v2113_v57, %v1868_v27  ;;  %v2140_v11 = vmax.f32 %v2139_v62, %v1941_v29  ;;  %v1747_v57 = vrot.slane %v1746_v50, 2  ;;  %v1734_v62 = vrot.slane %v1733_v16, 2 }
 0x2f2   : > { %v1870_v20 = vpop.f32.mrf.mxu0  ;;  %v1943_v39 = vpop.f32.mrf.mxu1  ;;  %v1760_v35 = vrot.slane %v1759_v19, 2  ;;  %v1722_v38 = vmax.f32 %v1720_v46, %v1721_v58 }
 0x2f3   : > { %v2127_v28 = vmax.f32 %v2126_v4, %v1870_v20  ;;  %v2153_v10 = vmax.f32 %v2152_v7, %v1943_v39 }
 0x2f4   : > { %v1874_v45 = vpop.f32.mrf.mxu0  ;;  %v1947_v31 = vpop.f32.mrf.mxu1 }
 0x2f5   : > { %v2115_v18 = vmax.f32 %v2114_v8, %v1874_v45  ;;  %v2141_v51 = vmax.f32 %v2140_v11, %v1947_v31 }
 0x2f6   : > { %v1876_v34 = vpop.f32.mrf.mxu0  ;;  %v1949_v30 = vpop.f32.mrf.mxu1 }
 0x2f7   : > { %v2128_v61 = vmax.f32 %v2127_v28, %v1876_v34  ;;  %v2154_v2 = vmax.f32 %v2153_v10, %v1949_v30  ;;  %v1761_v28 = vmax.f32 %v1759_v19, %v1760_v35 }
 0x2f8   : > { %v1878_v63 = vpop.f32.mrf.mxu0  ;;  %v1951_v3 = vpop.f32.mrf.mxu1 }
 0x2f9   : > { %v2116_v17 = vmax.f32 %v2115_v18, %v1878_v63  ;;  %v2142_v21 = vmax.f32 %v2141_v51, %v1951_v3 }
 0x2fa   : > { %v1880_v47 = vpop.f32.mrf.mxu0  ;;  %v1953_v1 = vpop.f32.mrf.mxu1 }
 0x2fb   : > { %v2129_v29 = vmax.f32 %v2128_v61, %v1880_v47  ;;  %v2155_v32 = vmax.f32 %v2154_v2, %v1953_v1  ;;  %v1748_v47 = vmax.f32 %v1746_v50, %v1747_v57  ;;  %v1735_v1 = vmax.f32 %v1733_v16, %v1734_v62 }
 0x2fc   : > { %v1884_v52 = vpop.f32.mrf.mxu0  ;;  %v1957_v53 = vpop.f32.mrf.mxu1  ;;  %v8035_v2 = vmov 1966171168   ;;  %v1723_v50 = vrot.slane %v1722_v38, 1 }
 0x2fd   : > { %v2117_v20 = vmax.f32 %v2116_v17, %v1884_v52  ;;  %v2143_v39 = vmax.f32 %v2142_v21, %v1957_v53  ;;  %v2238_v17 = vunpack.c.l.s4 %v8035_v2  ;;  %v2240_v21 = vlaneseq }
 0x2fe   : > { %v1886_v9 = vpop.f32.mrf.mxu0  ;;  %v1959_v27 = vpop.f32.mrf.mxu1  ;;  %v1749_v16 = vrot.slane %v1748_v47, 1  ;;  %v1736_v19 = vrot.slane %v1735_v1, 1 }
 0x2ff   : > { %v2130_v59 = vmax.f32 %v2129_v29, %v1886_v9  ;;  %v2156_v22 = vmax.f32 %v2155_v32, %v1959_v27  ;;  %v2239_v58 = vunpack.c.0.s8 %v2238_v17  ;;  %v9013_v57 = vshrl.u32 %v2240_v21, 7 }
 0x300   : > { %v1888_v45 = vpop.f32.mrf.mxu0  ;;  %v1961_v31 = vpop.f32.mrf.mxu1 }
 0x301   : > { %v2118_v34 = vmax.f32 %v2117_v20, %v1888_v45  ;;  %v2144_v30 = vmax.f32 %v2143_v39, %v1961_v31  ;;  %v1762_v39 = vrot.slane %v1761_v28, 1  ;;  %10037 = vst [vmem:[#allocation9_spill] sm:$0xff] %v9013_v57 }
 0x302   : > { %v1890_v63 = vpop.f32.mrf.mxu0  ;;  %v1963_v37 = vpop.f32.mrf.mxu1 }
 0x303   : > { %v2119_v33 = vrot.slane %v2118_v34, 4  ;;  %v2145_v14 = vrot.slane %v2144_v30, 4  ;;  %v2131_v3 = vmax.f32 %v2130_v59, %v1890_v63  ;;  %v2157_v4 = vmax.f32 %v2156_v22, %v1963_v37 }
 0x304   : > { %v9005_v7 = vpop.f32.mrf.mxu0  ;;  %v9007_v8 = vpop.f32.mrf.mxu1 }
 0x305   : > { %v2120_v11 = vmax.f32 %v2118_v34, %v2119_v33  ;;  %v2146_v12 = vmax.f32 %v2144_v30, %v2145_v14  ;;  %v2132_v13 = vrot.slane %v2131_v3, 4  ;;  %v2158_v56 = vrot.slane %v2157_v4, 4 }
 0x306   : > { %v9009_v10 = vpop.f32.mrf.mxu0  ;;  %v9011_v18 = vpop.f32.mrf.mxu1 }
 0x307   : > { %v2121_v51 = vrot.slane %v2120_v11, 2  ;;  %v2147_v52 = vrot.slane %v2146_v12, 2  ;;  %v2133_v53 = vmax.f32 %v2131_v3, %v2132_v13  ;;  %v2159_v61 = vmax.f32 %v2157_v4, %v2158_v56 }
 0x308   : > { %v2004_v9 = vpop.f32.mrf.mxu0  ;;  %v2077_v27 = vpop.f32.mrf.mxu1  ;;  %v1724_v3 = vmax.f32 %v1722_v38, %v1723_v50  ;;  %v1750_v4 = vmax.f32 %v1748_v47, %v1749_v16  ;;  %v1737_v13 = vmax.f32 %v1735_v1, %v1736_v19  ;;  %v1763_v56 = vmax.f32 %v1761_v28, %v1762_v39 }
 0x309   : > { %v2122_v29 = vmax.f32 %v2120_v11, %v2121_v51  ;;  %v2148_v32 = vmax.f32 %v2146_v12, %v2147_v52  ;;  %v2134_v20 = vrot.slane %v2133_v53, 2  ;;  %v2160_v46 = vrot.slane %v2159_v61, 2 }
 0x30a   : > { %v2006_v45 = vpop.f32.mrf.mxu0  ;;  %v2079_v31 = vpop.f32.mrf.mxu1  ;;  %v1783_v47 = vmax.f32 %v8984_v54, %v8993_v41  ;;  %v2164_v19 = vmax.f32 %v9005_v7, %v2004_v9  ;;  %v2190_v39 = vmax.f32 %v9007_v8, %v2077_v27 }
 0x30b   : > { %v2123_v59 = vrot.slane %v2122_v29, 1  ;;  %v2149_v22 = vrot.slane %v2148_v32, 1  ;;  %v2135_v34 = vmax.f32 %v2133_v53, %v2134_v20  ;;  %v2161_v30 = vmax.f32 %v2159_v61, %v2160_v46 }
 0x30c   : > { %v2010_v62 = vpop.f32.mrf.mxu0  ;;  %v2083_v35 = vpop.f32.mrf.mxu1  ;;  %v9016_v53 = vsub.s32 %v2239_v58, %v9013_v57  ;;  %v2203_v54 = vmax.f32 %v9011_v18, %v2079_v31  ;;  %v1784_v7 = vrot.slane %v1783_v47, 4 }
 0x30d   : > { %v2124_v63 = vmax.f32 %v2122_v29, %v2123_v59  ;;  %v2150_v37 = vmax.f32 %v2148_v32, %v2149_v22  ;;  %v2136_v33 = vrot.slane %v2135_v34, 1  ;;  %v2162_v14 = vrot.slane %v2161_v30, 1 }
 0x30e   : > { %v2012_v11 = vpop.f32.mrf.mxu0  ;;  %v2085_v12 = vpop.f32.mrf.mxu1  ;;  %10038 = vst [vmem:[#allocation10_spill] sm:$0xff] %v9016_v53  ;;  %v1809_v22 = vmax.f32 %v8986_v60, %v8995_v49  ;;  %v2165_v41 = vmax.f32 %v2164_v19, %v2010_v62 }
 0x30f   : > { %v2137_v51 = vmax.f32 %v2135_v34, %v2136_v33  ;;  %v2163_v52 = vmax.f32 %v2161_v30, %v2162_v14  ;;  %v2216_v17 = vmax.f32 %v1724_v3, %v2124_v63  ;;  %v2218_v21 = vmax.f32 %v1750_v4, %v2150_v37 }
 0x310   : > { %v2014_v61 = vpop.f32.mrf.mxu0  ;;  %v2087_v2 = vpop.f32.mrf.mxu1  ;;  %v2177_v34 = vmax.f32 %v9009_v10, %v2006_v45  ;;  %v2191_v37 = vmax.f32 %v2190_v39, %v2083_v35  ;;  %v1771_v33 = vrot.slane %v8989_v23, 4  ;;  %v1797_v14 = vrot.slane %v8991_v40, 4 }
 0x311   : > { %v2217_v20 = vmax.f32 %v1737_v13, %v2137_v51  ;;  %v2219_v29 = vmax.f32 %v1763_v56, %v2163_v52  ;;  %v2204_v3 = vmax.f32 %v2203_v54, %v2085_v12  ;;  %v2166_v60 = vmax.f32 %v2165_v41, %v2014_v61 }
 0x312   : > { %v2016_v32 = vpop.f32.mrf.mxu0  ;;  %v2089_v46 = vpop.f32.mrf.mxu1  ;;  %v2178_v27 = vmax.f32 %v2177_v34, %v2012_v11  ;;  %v2192_v49 = vmax.f32 %v2191_v37, %v2087_v2  ;;  %v1810_v10 = vrot.slane %v1809_v22, 4  ;;  %v1772_v31 = vmax.f32 %v8989_v23, %v1771_v33  ;;  %v9037_v33 = vld [vmem:[%s9951_s2] ss:$0 sm:$0xff] }
 0x313   : > { %v2233_v59 = vcombine.low %v2216_v17, %v2217_v20  ;;  %v2234_v38 = vcombine.low %v2218_v21, %v2219_v29  ;;  %v2205_v56 = vmax.f32 %v2204_v3, %v2089_v46  ;;  %v1798_v62 = vmax.f32 %v8991_v40, %v1797_v14 }
 0x314   : > { %v2020_v1 = vpop.f32.mrf.mxu0  ;;  %v2093_v28 = vpop.f32.mrf.mxu1  ;;  %v2179_v13 = vmax.f32 %v2178_v27, %v2016_v32  ;;  %v1785_v35 = vmax.f32 %v1783_v47, %v1784_v7  ;;  %v1811_v61 = vmax.f32 %v1809_v22, %v1810_v10 }
 0x315   : > { %v2243_v50 = vrot.slane %v2233_v59, %v9016_v53  ;;  %v2250_v16 = vrot.slane %v2234_v38, %v9016_v53  ;;  %v2167_v51 = vmax.f32 %v2166_v60, %v2020_v1  ;;  %v2193_v18 = vmax.f32 %v2192_v49, %v2093_v28 }
 0x316   : > { %v2022_v30 = vpop.f32.mrf.mxu0  ;;  %v2095_v58 = vpop.f32.mrf.mxu1  ;;  %v1773_v1 = vrot.slane %v1772_v31, 2  ;;  %v1799_v28 = vrot.slane %v1798_v62, 2  ;;  %v1812_v34 = vrot.slane %v1811_v61, 2 }
 0x317   : > { %v9027_v63 = vcombine.low %v2243_v50, %v2250_v16  ;;  %v2180_v21 = vmax.f32 %v2179_v13, %v2022_v30  ;;  %v2206_v20 = vmax.f32 %v2205_v56, %v2095_v58  ;;  %v1786_v50 = vrot.slane %v1785_v35, 2 }
 0x318   : > { %v2024_v9 = vpop.f32.mrf.mxu0  ;;  %v2097_v8 = vpop.f32.mrf.mxu1  ;;  %v1774_v14 = vmax.f32 %v1772_v31, %v1773_v1  ;;  %v1800_v7 = vmax.f32 %v1798_v62, %v1799_v28  ;;  %v1813_v10 = vmax.f32 %v1811_v61, %v1812_v34  ;;  %v2760_v61 = vld [vmem:[%s9954_s5 + $0x188] sm:$0xff] }
 0x319   : > { %v2168_v11 = vmax.f32 %v2167_v51, %v2024_v9  ;;  %v2194_v12 = vmax.f32 %v2193_v18, %v2097_v8  ;;  %v1787_v9 = vmax.f32 %v1785_v35, %v1786_v50 }
 0x31a   : > { %v2026_v45 = vpop.f32.mrf.mxu0  ;;  %v2099_v4 = vpop.f32.mrf.mxu1 }
 0x31b   : > { %v2181_v59 = vmax.f32 %v2180_v21, %v2026_v45  ;;  %v2207_v38 = vmax.f32 %v2206_v20, %v2099_v4  ;;  %v1788_v21 = vrot.slane %v1787_v9, 1 }
 0x31c   : > { %v2030_v52 = vpop.f32.mrf.mxu0  ;;  %v2103_v17 = vpop.f32.mrf.mxu1 }
 0x31d   : > { %v2169_v32 = vmax.f32 %v2168_v11, %v2030_v52  ;;  %v2195_v46 = vmax.f32 %v2194_v12, %v2103_v17  ;;  %v1775_v52 = vrot.slane %v1774_v14, 1  ;;  %v1801_v17 = vrot.slane %v1800_v7, 1 }
 0x31e   : > { %v2032_v2 = vpop.f32.mrf.mxu0  ;;  %v2105_v29 = vpop.f32.mrf.mxu1 }
 0x31f   : > { %v2182_v40 = vmax.f32 %v2181_v59, %v2032_v2  ;;  %v2208_v47 = vmax.f32 %v2207_v38, %v2105_v29  ;;  %v2764_v2 = vld [vmem:[%s9954_s5 + $0x1a8] sm:$0xff]  ;;  %v1814_v29 = vrot.slane %v1813_v10, 1 }
 0x320   : > { %v2034_v23 = vpop.f32.mrf.mxu0  ;;  %v2107_v16 = vpop.f32.mrf.mxu1 }
 0x321   : > { %v2170_v19 = vmax.f32 %v2169_v32, %v2034_v23  ;;  %v2196_v39 = vmax.f32 %v2195_v46, %v2107_v16  ;;  %v1776_v16 = vmax.f32 %v1774_v14, %v1775_v52  ;;  %v1815_v14 = vmax.f32 %v1813_v10, %v1814_v29 }
 0x322   : > { %v2036_v30 = vpop.f32.mrf.mxu0  ;;  %v2109_v58 = vpop.f32.mrf.mxu1 }
 0x323   : > { %v2171_v54 = vrot.slane %v2170_v19, 4  ;;  %v2197_v22 = vrot.slane %v2196_v39, 4  ;;  %v2183_v41 = vmax.f32 %v2182_v40, %v2036_v30  ;;  %v2209_v37 = vmax.f32 %v2208_v47, %v2109_v58 }
 0x324   : > { %v7385_v8 = vpop.f32.mrf.mxu0 }
 0x325   : > { %v2172_v27 = vmax.f32 %v2170_v19, %v2171_v54  ;;  %v2198_v3 = vmax.f32 %v2196_v39, %v2197_v22  ;;  %v2184_v60 = vrot.slane %v2183_v41, 4  ;;  %v2210_v49 = vrot.slane %v2209_v37, 4 }
 0x326   : > { %v2434_v45 = vadd.f32 %v7385_v8, %v9037_v33  ;;  %v2428_v4 = vpop.f32.mrf.mxu0  ;;  %v9049_v39 = vcombine.high %v2760_v61, %v2764_v2  ;;  %v1802_v22 = vmax.f32 %v1800_v7, %v1801_v17 }
 0x327   : > { %v2173_v13 = vrot.slane %v2172_v27, 2  ;;  %v2199_v56 = vrot.slane %v2198_v3, 2  ;;  %v2185_v51 = vmax.f32 %v2183_v41, %v2184_v60  ;;  %v2211_v18 = vmax.f32 %v2209_v37, %v2210_v49 }
 0x328   : > { %v2429_v31 = vadd.f32 %v9037_v33, %v2428_v4  ;;  %v7388_v62 = vpop.f32.mrf.mxu0  ;;  %v2508_v59 = vmax.f32 %v2434_v45, 0.0 }
 0x329   : > { %v2174_v35 = vmax.f32 %v2172_v27, %v2173_v13  ;;  %v2200_v20 = vmax.f32 %v2198_v3, %v2199_v56  ;;  %v2186_v11 = vrot.slane %v2185_v51, 2  ;;  %v2212_v12 = vrot.slane %v2211_v18, 2 }
 0x32a   : > { %v2507_v38 = vmax.f32 %v2429_v31, 0.0  ;;  %v2444_v32 = vadd.f32 %v7388_v62, %v9037_v33  ;;  %v2438_v46 = vpop.f32.mrf.mxu0  ;;  %v1789_v3 = vmax.f32 %v1787_v9, %v1788_v21  ;;  %v2752_v31 = vld [vmem:[%s9954_s5 + $0x148] sm:$0xff]  ;;  %v9062_v62 = vcombine.low %v2760_v61, %v2764_v2 }
 0x32b   : > { %v2175_v1 = vrot.slane %v2174_v35, 1  ;;  %v2201_v28 = vrot.slane %v2200_v20, 1  ;;  %v2187_v50 = vmax.f32 %v2185_v51, %v2186_v11  ;;  %v2213_v23 = vmax.f32 %v2211_v18, %v2212_v12  ;;  %v2756_v9 = vld [vmem:[%s9954_s5 + $0x168] sm:$0xff] }
 0x32c   : > { %v2523_v40 = vpack.c.bf16 %v2508_v59, %v2507_v38  ;;  %v2439_v47 = vadd.f32 %v9037_v33, %v2438_v46  ;;  %v7391_v19 = vpop.f32.mrf.mxu0  ;;  %v2510_v41 = vmax.f32 %v2444_v32, 0.0  ;;  %v9067_v38 = vcombine.high %v2752_v31, %v2756_v9  ;;  %v2744_v2 = vld [vmem:[%s9954_s5 + $0x108] sm:$0xff] }
 0x32d   : > { %v2176_v34 = vmax.f32 %v2174_v35, %v2175_v1  ;;  %v2202_v30 = vmax.f32 %v2200_v20, %v2201_v28  ;;  %v2188_v58 = vrot.slane %v2187_v50, 1  ;;  %v2214_v54 = vrot.slane %v2213_v23, 1  ;;  %v2748_v28 = vld [vmem:[%s9954_s5 + $0x128] sm:$0xff] }
 0x32e   : > { %v2509_v37 = vmax.f32 %v2439_v47, 0.0  ;;  %v2454_v8 = vadd.f32 %v7391_v19, %v9037_v33  ;;  %7415 = vmatprep.mubr.msk.bf16.mxu1 %vm894_vm2, %v2523_v40  ;;  %v2448_v27 = vpop.f32.mrf.mxu0 }
 0x32f   : > { %v2189_v60 = vmax.f32 %v2187_v50, %v2188_v58  ;;  %v2215_v49 = vmax.f32 %v2213_v23, %v2214_v54  ;;  %v2220_v45 = vmax.f32 %v1776_v16, %v2176_v34  ;;  %v2449_v56 = vadd.f32 %v9037_v33, %v2448_v27  ;;  %v2224_v27 = vld [vmem:[#allocation2] ss:$2 sm:$0xff] }
 0x330   : > { %v2524_v4 = vpack.c.bf16 %v2510_v41, %v2509_v37  ;;  %v2512_v13 = vmax.f32 %v2454_v8, 0.0  ;;  %v7394_v51 = vpop.f32.mrf.mxu0  ;;  %v2222_v18 = vmax.f32 %v1802_v22, %v2202_v30  ;;  %v9079_v23 = vcombine.low %v2752_v31, %v2756_v9  ;;  %v2736_v37 = vld [vmem:[%s9954_s5 + $0xc8] sm:$0xff] }
 0x331   : > { %v2221_v52 = vmax.f32 %v1789_v3, %v2189_v60  ;;  %v2223_v7 = vmax.f32 %v1815_v14, %v2215_v49  ;;  %v2464_v17 = vadd.f32 %v7394_v51, %v9037_v33  ;;  %v2511_v10 = vmax.f32 %v2449_v56, 0.0  ;;  %v2740_v8 = vld [vmem:[%s9954_s5 + $0xe8] sm:$0xff] }
 0x332   : > { %7416 = vmatmul.mubr.msk.bf16.vlgmr.msra.gmra.mxu1 %vm894_vm2, %v2524_v4  ;;  %v2458_v21 = vpop.f32.mrf.mxu0  ;;  %v9084_v30 = vcombine.high %v2744_v2, %v2748_v28  ;;  %v2273_v58 = vrot.slane %v9027_v63, %v9016_v53  ;;  %v9097_v14 = vcombine.low %v2744_v2, %v2748_v28  ;;  %v9108_v9 = vcombine.low %v2736_v37, %v2740_v8  ;;  %v2732_v2 = vld [vmem:[%s9954_s5 + $0xa8] sm:$0xff] }
 0x333   : > { %v2235_v35 = vcombine.low %v2220_v45, %v2221_v52  ;;  %v2236_v20 = vcombine.low %v2222_v18, %v2223_v7  ;;  %v2514_v11 = vmax.f32 %v2464_v17, 0.0  ;;  %v2459_v12 = vadd.f32 %v9037_v33, %v2458_v21  ;;  %3169 = vmatpush1.bf16.msra.mxu1 %v8937_v42 }
 0x334   : > { %v2525_v29 = vpack.c.bf16 %v2512_v13, %v2511_v10  ;;  %v7397_v59 = vpop.f32.mrf.mxu0  ;;  %3170 = vmatprep.subr.bf16.mxu1 %v9049_v39  ;;  %v9102_v13 = vcombine.high %v2736_v37, %v2740_v8  ;;  %v2711_v37 = vld [vmem:[%s9954_s5] sm:$0xff] }
 0x335   : > { %v2257_v32 = vrot.slane %v2235_v35, %v9016_v53  ;;  %v2264_v46 = vrot.slane %v2236_v20, %v9016_v53  ;;  %v2513_v1 = vmax.f32 %v2459_v12, 0.0  ;;  %v2474_v61 = vadd.f32 %v7397_v59, %v9037_v33  ;;  %v2715_v8 = vld [vmem:[%s9954_s5 + $0x20] sm:$0xff] }
 0x336   : > { %7419 = vmatprep.mubr.msk.bf16.mxu1 %vm894_vm2, %v2525_v29  ;;  %v2468_v50 = vpop.f32.mrf.mxu0 }
 0x337   : > { %v2266_v16 = vcombine.low %v2257_v32, %v2264_v46  ;;  %v2526_v40 = vpack.c.bf16 %v2514_v11, %v2513_v1  ;;  %v2516_v47 = vmax.f32 %v2474_v61, 0.0  ;;  %v2469_v19 = vadd.f32 %v9037_v33, %v2468_v50  ;;  %3171 = vmatpush1.bf16.msra.mxu1 %v9062_v62  ;;  %v2727_v46 = vld [vmem:[%s9954_s5 + $0x80] sm:$0xff] }
 0x338   : > { %v7400_v34 = vpop.f32.mrf.mxu0  ;;  %3172 = vmatprep.subr.bf16.mxu1 %v9067_v38  ;;  %v2731_v1 = vld [vmem:[%s9954_s5 + $0xa0] sm:$0xff] }
 0x339   : > { %v2280_v54 = vrot.slane %v2266_v16, %v9016_v53  ;;  %v2515_v22 = vmax.f32 %v2469_v19, 0.0  ;;  %v2484_v41 = vadd.f32 %v7400_v34, %v9037_v33  ;;  %v9127_v61 = vcombine.high %v2727_v46, %v2731_v1  ;;  %v2720_v19 = vld [vmem:[%s9954_s5 + $0x48] sm:$0xff] }
 0x33a   : > { %7420 = vmatmul.mubr.msk.bf16.gmra.mxu1 %vm894_vm2, %v2526_v40  ;;  %v2478_v3 = vpop.f32.mrf.mxu0  ;;  %v9132_v28 = vcombine.low %v2727_v46, %v2731_v1  ;;  %v2719_v40 = vld [vmem:[%s9954_s5 + $0x40] sm:$0xff]  ;;  %v2765_v46 = vld [vmem:[%s9954_s5 + $0x1b0] sm:$0xff]  ;;  %v2762_v1 = vld [vmem:[%s9954_s5 + $0x198] sm:$0xff] }
 0x33b   : > { %v2281_v63 = vcombine.low %v2273_v58, %v2280_v54  ;;  %v2527_v60 = vpack.c.bf16 %v2516_v47, %v2515_v22  ;;  %v2518_v49 = vmax.f32 %v2484_v41, 0.0  ;;  %v2479_v45 = vadd.f32 %v9037_v33, %v2478_v3  ;;  %3173 = vmatpush1.bf16.msra.mxu1 %v9079_v23  ;;  %3105 = vmatprep.subr.bf16.mxu0 %v9127_v61  ;;  %v2723_v47 = vld [vmem:[%s9954_s5 + $0x60] sm:$0xff]  ;;  %v2724_v58 = vld [vmem:[%s9954_s5 + $0x68] sm:$0xff] }
 0x33c   : > { %v7403_v4 = vpop.f32.mrf.mxu0  ;;  %3174 = vmatprep.subr.bf16.mxu1 %v9084_v30  ;;  %3106 = vmatpush1.bf16.msra.mxu0 %v9132_v28  ;;  %v9151_v34 = vcombine.high %v2719_v40, %v2723_v47  ;;  %v9156_v54 = vcombine.low %v2719_v40, %v2723_v47  ;;  %v9158_v22 = vcombine.low %v2720_v19, %v2724_v58 }
 0x33d   : > { %v2283_v56 = vmax.f32 %v2224_v27, %v2281_v63  ;;  %v2517_v51 = vmax.f32 %v2479_v45, 0.0  ;;  %7423 = vmatprep.mubr.msk.bf16.mxu1 %vm894_vm2, %v2527_v60  ;;  %v2494_v18 = vadd.f32 %v7403_v4, %v9037_v33  ;;  %v9160_v41 = vcombine.high %v2720_v19, %v2724_v58  ;;  %v2712_v27 = vld [vmem:[%s9954_s5 + $0x8] sm:$0xff]  ;;  %v2769_v4 = vld [vmem:[%s9954_s5 + $0x1d0] sm:$0xff] }
 0x33e   : > { %v2488_v52 = vpop.f32.mrf.mxu0  ;;  %3107 = vmatprep.subr.bf16.mxu0 %v9151_v34  ;;  %v9175_v3 = vcombine.high %v2711_v37, %v2715_v8  ;;  %v2716_v63 = vld [vmem:[%s9954_s5 + $0x28] sm:$0xff]  ;;  %v9180_v60 = vcombine.low %v2711_v37, %v2715_v8 }
 0x33f   : > { %2284 = vst [vmem:[#allocation2] ss:$2 sm:$0xff] %v2283_v56  ;;  %v2528_v7 = vpack.c.bf16 %v2518_v49, %v2517_v51  ;;  %v2520_v17 = vmax.f32 %v2494_v18, 0.0  ;;  %v2489_v31 = vadd.f32 %v9037_v33, %v2488_v52  ;;  %3175 = vmatpush1.bf16.msra.mxu1 %v9097_v14  ;;  %v9182_v49 = vcombine.low %v2712_v27, %v2716_v63  ;;  %v2773_v56 = vld [vmem:[%s9954_s5 + $0x1f0] sm:$0xff]  ;;  %v2770_v51 = vld [vmem:[%s9954_s5 + $0x1d8] sm:$0xff] }
 0x340   : > { %v7406_v10 = vpop.f32.mrf.mxu0  ;;  %3176 = vmatprep.subr.bf16.mxu1 %v9102_v13  ;;  %3108 = vmatpush1.bf16.msra.mxu0 %v9156_v54  ;;  %v9184_v45 = vcombine.high %v2712_v27, %v2716_v63  ;;  %v9199_v18 = vcombine.high %v2769_v4, %v2773_v56  ;;  %v2774_v52 = vld [vmem:[%s9954_s5 + $0x1f8] sm:$0xff]  ;;  %v2753_v27 = vld [vmem:[%s9954_s5 + $0x150] sm:$0xff] }
 0x341   : > { %v2519_v21 = vmax.f32 %v2489_v31, 0.0  ;;  %v2504_v35 = vadd.f32 %v7406_v10, %v9037_v33  ;;  %3109 = vmatprep.subr.bf16.mxu0 %v9175_v3  ;;  %v9208_v31 = vcombine.high %v2770_v51, %v2774_v52 }
 0x342   : > { %7424 = vmatmul.mubr.msk.bf16.gmra.mxu1 %vm894_vm2, %v2528_v7  ;;  %v2498_v20 = vpop.f32.mrf.mxu0  ;;  %v9204_v7 = vcombine.low %v2769_v4, %v2773_v56  ;;  %v2757_v4 = vld [vmem:[%s9954_s5 + $0x170] sm:$0xff]  ;;  %v2754_v56 = vld [vmem:[%s9954_s5 + $0x158] sm:$0xff] }
 0x343   : > { %v2529_v11 = vpack.c.bf16 %v2520_v17, %v2519_v21  ;;  %v2522_v12 = vmax.f32 %v2504_v35, 0.0  ;;  %v2499_v29 = vadd.f32 %v9037_v33, %v2498_v20  ;;  %3177 = vmatpush1.bf16.msra.mxu1 %v9108_v9  ;;  %v2728_v33 = vld [vmem:[%s9954_s5 + $0x88] sm:$0xff]  ;;  %v9206_v17 = vcombine.low %v2770_v51, %v2774_v52  ;;  %v9215_v35 = vld [vmem:[%s9953_s4] ss:$0 sm:$0xff]  ;;  %v2758_v51 = vld [vmem:[%s9954_s5 + $0x178] sm:$0xff] }
 0x344   : > { %v9134_v50 = vcombine.low %v2728_v33, %v2732_v2  ;;  %v9136_v16 = vcombine.high %v2728_v33, %v2732_v2  ;;  %3110 = vmatpush1.bf16.msra.mxu0 %v9180_v60  ;;  %v2766_v33 = vld [vmem:[%s9954_s5 + $0x1b8] sm:$0xff] }
 0x345   : > { %v2521_v59 = vmax.f32 %v2499_v29, 0.0  ;;  %7427 = vmatprep.mubr.msk.bf16.mxu1 %vm894_vm2, %v2529_v11  ;;  %10039 = vst [vmem:[#allocation11_spill] sm:$0xff] %v9206_v17  ;;  %3241 = vmatprep.subr.bf16.mxu0 %v9199_v18  ;;  %v9238_v8 = vcombine.high %v2762_v1, %v2766_v33 }
 0x346   : > { %3178 = vmatprep.subr.bf16.mxu1 %v9136_v16 }
 0x347   : > { %v2530_v32 = vpack.c.bf16 %v2522_v12, %v2521_v59  ;;  %3179 = vmatpush1.bf16.msra.mxu1 %v9134_v50  ;;  %v2761_v59 = vld [vmem:[%s9954_s5 + $0x190] sm:$0xff]  ;;  %10041 = vst [vmem:[#allocation13_spill] sm:$0xff] %v9238_v8 }
 0x348   : > { %3180 = vmatprep.subr.bf16.mxu1 %v9160_v41  ;;  %v9236_v37 = vcombine.high %v2761_v59, %v2765_v46 }
 0x34a   : > { %7428 = vmatmul.mubr.msk.bf16.gmra.mxu1 %vm894_vm2, %v2530_v32  ;;  %10040 = vst [vmem:[#allocation12_spill] sm:$0xff] %v9236_v37 }
 0x34b   : > { %3200 = vmatprep.mubr.bf16.mxu1 %v10017_v48  ;;  %3181 = vmatpush1.bf16.msra.mxu1 %v9158_v22 }
 0x34c   : > { %3182 = vmatprep.subr.bf16.mxu1 %v9184_v45 }
 0x34f   : > { %3183 = vmatpush1.bf16.msra.mxu1 %v9182_v49 }
 0x350   : > { %3314 = vmatprep.subr.bf16.mxu1 %v9208_v31 }
 0x3f2   : > { %v7417_v10 = vpop.f32.mrf.mxu1 }
 0x3f3   : > { %v2637_v52 = vadd.f32 %v7417_v10, %v9215_v35  ;;  %v9268_v10 = vcombine.high %v2753_v27, %v2757_v4 }
 0x3f4   : > { %v2628_v21 = vpop.f32.mrf.mxu1 }
 0x3f5   : > { %v2629_v11 = vadd.f32 %v9215_v35, %v2628_v21  ;;  %v9259_v21 = vcombine.low %v2761_v59, %v2765_v46  ;;  %10042 = vst [vmem:[#allocation14_spill] sm:$0xff] %v9268_v10  ;;  %v2749_v59 = vld [vmem:[%s9954_s5 + $0x130] sm:$0xff]  ;;  %v2746_v46 = vld [vmem:[%s9954_s5 + $0x118] sm:$0xff] }
 0x3f6   : > { %v7418_v20 = vpop.f32.mrf.mxu1 }
 0x3f7   : > { %v2691_v2 = vmax.f32 %v2629_v11, 0.0  ;;  %v2640_v19 = vadd.f32 %v7418_v20, %v9215_v35  ;;  %v9261_v20 = vcombine.low %v2762_v1, %v2766_v33  ;;  %v2745_v11 = vld [vmem:[%s9954_s5 + $0x110] sm:$0xff]  ;;  %v2750_v1 = vld [vmem:[%s9954_s5 + $0x138] sm:$0xff] }
 0x3f8   : > { %v2631_v12 = vpop.f32.mrf.mxu1  ;;  %v9289_v57 = vcombine.high %v2745_v11, %v2749_v59  ;;  %v9291_v53 = vcombine.high %v2746_v46, %v2750_v1 }
 0x3f9   : > { %v2632_v29 = vadd.f32 %v9215_v35, %v2631_v12  ;;  %v2694_v12 = vmax.f32 %v2640_v19, 0.0  ;;  %v9287_v19 = vcombine.low %v2754_v56, %v2758_v51 }
 0x3fa   : > { %v9222_v32 = vpop.f32.mrf.mxu1  ;;  %10046 = vst [vmem:[#allocation18_spill] sm:$0xff] %v9289_v57  ;;  %10047 = vst [vmem:[#allocation19_spill] sm:$0xff] %v9291_v53 }
 0x3fb   : > { %v2692_v40 = vmax.f32 %v2632_v29, 0.0  ;;  %v9270_v29 = vcombine.high %v2754_v56, %v2758_v51  ;;  %10045 = vst [vmem:[#allocation17_spill] sm:$0xff] %v9287_v19  ;;  %v2738_v56 = vld [vmem:[%s9954_s5 + $0xd8] sm:$0xff]  ;;  %v9315_v51 = vcombine.low %v2745_v11, %v2749_v59  ;;  %v2733_v11 = vld [vmem:[%s9954_s5 + $0xb0] sm:$0xff] }
 0x3fc   : > { %v2644_v47 = vpop.f32.mrf.mxu1  ;;  %v2730_v59 = vld [vmem:[%s9954_s5 + $0x98] sm:$0xff] }
 0x3fd   : > { %v9234_v58 = vpack.c.bf16 %v2692_v40, %v2691_v2  ;;  %10043 = vst [vmem:[#allocation15_spill] sm:$0xff] %v9270_v29  ;;  %v2693_v2 = vmax.f32 %v2637_v52, 0.0  ;;  %v9283_v40 = vcombine.low %v2753_v27, %v2757_v4  ;;  %v2737_v27 = vld [vmem:[%s9954_s5 + $0xd0] sm:$0xff]  ;;  %v9317_v52 = vcombine.low %v2746_v46, %v2750_v1 }
 0x3fe   : > { %v9243_v63 = vpop.f32.mrf.mxu1  ;;  %v2741_v4 = vld [vmem:[%s9954_s5 + $0xf0] sm:$0xff] }
 0x3ff   : > { %3128 = vmatmul.mubr.bf16.vlgmr.msra.gmra.mxu0 %v9234_v58  ;;  %3201 = vmatmul.mubr.bf16.vlgmr.msra.gmra.mxu1 %v9234_v58  ;;  %10044 = vst [vmem:[#allocation16_spill] sm:$0xff] %v9283_v40 }
 0x400   : > { %3242 = vmatpush1.bf16.msra.mxu0 %v9204_v7  ;;  %3315 = vmatpush1.bf16.msra.mxu1 %v9206_v17  ;;  %v2647_v33 = vpop.f32.mrf.mxu1 }
 0x401   : > { %3243 = vmatprep.subr.bf16.mxu0 %v9236_v37  ;;  %3316 = vmatprep.subr.bf16.mxu1 %v9238_v8  ;;  %v9293_v8 = vpack.c.bf16 %v2694_v12, %v2693_v2  ;;  %v2645_v37 = vadd.f32 %v9215_v35, %v2644_v47  ;;  %v2648_v17 = vadd.f32 %v9215_v35, %v2647_v33  ;;  %v2742_v47 = vld [vmem:[%s9954_s5 + $0xf8] sm:$0xff]  ;;  %v2729_v12 = vld [vmem:[%s9954_s5 + $0x90] sm:$0xff] }
 0x402   : > { %3137 = vmatprep.mubr.bf16.mxu0 %v10017_v48  ;;  %3210 = vmatprep.mubr.bf16.mxu1 %v10017_v48  ;;  %v9343_v46 = vcombine.low %v2738_v56, %v2742_v47  ;;  %v9345_v1 = vcombine.high %v2729_v12, %v2733_v11 }
 0x403   : > { %v2695_v33 = vmax.f32 %v2645_v37, 0.0  ;;  %v2696_v2 = vmax.f32 %v2648_v17, 0.0  ;;  %v2734_v17 = vld [vmem:[%s9954_s5 + $0xb8] sm:$0xff]  ;;  %v9339_v37 = vcombine.low %v2737_v27, %v2741_v4 }
 0x404   : > { %3244 = vmatpush1.bf16.msra.mxu0 %v9259_v21  ;;  %3317 = vmatpush1.bf16.msra.mxu1 %v9261_v20  ;;  %10051 = vst [vmem:[#allocation23_spill] sm:$0xff] %v9345_v1 }
 0x405   : > { %3245 = vmatprep.subr.bf16.mxu0 %v9268_v10  ;;  %3318 = vmatprep.subr.bf16.mxu1 %v9270_v29  ;;  %v9324_v29 = vcombine.high %v2737_v27, %v2741_v4  ;;  %v9326_v10 = vcombine.high %v2738_v56, %v2742_v47  ;;  %10050 = vst [vmem:[#allocation22_spill] sm:$0xff] %v9339_v37  ;;  %v2721_v27 = vld [vmem:[%s9954_s5 + $0x50] sm:$0xff] }
 0x406   : > { %v2725_v4 = vld [vmem:[%s9954_s5 + $0x70] sm:$0xff]  ;;  %v9373_v56 = vcombine.low %v2729_v12, %v2733_v11  ;;  %v9375_v47 = vcombine.low %v2730_v59, %v2734_v17  ;;  %v2718_v12 = vld [vmem:[%s9954_s5 + $0x38] sm:$0xff] }
 0x407   : > { %3138 = vmatmul.mubr.bf16.gmra.mxu0 %v9293_v8  ;;  %3211 = vmatmul.mubr.bf16.gmra.mxu1 %v9293_v8  ;;  %10048 = vst [vmem:[#allocation20_spill] sm:$0xff] %v9324_v29  ;;  %10049 = vst [vmem:[#allocation21_spill] sm:$0xff] %v9326_v10  ;;  %v9399_v11 = vcombine.low %v2721_v27, %v2725_v4 }
 0x408   : > { %3246 = vmatpush1.bf16.msra.mxu0 %v9283_v40  ;;  %3319 = vmatpush1.bf16.msra.mxu1 %v9287_v19  ;;  %v2656_v19 = vadd.f32 %v9243_v63, %v9215_v35  ;;  %v9353_v40 = vpack.c.bf16 %v2696_v2, %v2695_v33  ;;  %v2726_v63 = vld [vmem:[%s9954_s5 + $0x78] sm:$0xff]  ;;  %10053 = vst [vmem:[#allocation25_spill] sm:$0xff] %v9375_v47 }
 0x409   : > { %3247 = vmatprep.subr.bf16.mxu0 %v9289_v57  ;;  %3320 = vmatprep.subr.bf16.mxu1 %v9291_v53  ;;  %v9347_v53 = vcombine.high %v2730_v59, %v2734_v17  ;;  %v2653_v57 = vadd.f32 %v9222_v32, %v9215_v35  ;;  %v2722_v32 = vld [vmem:[%s9954_s5 + $0x58] sm:$0xff] }
 0x40a   : > { %3147 = vmatprep.mubr.bf16.mxu0 %v10017_v48  ;;  %3220 = vmatprep.mubr.bf16.mxu1 %v10017_v48  ;;  %v2698_v2 = vmax.f32 %v2656_v19, 0.0  ;;  %v2714_v19 = vld [vmem:[%s9954_s5 + $0x18] sm:$0xff]  ;;  %v9401_v59 = vcombine.low %v2722_v32, %v2726_v63 }
 0x40b   : > { %10052 = vst [vmem:[#allocation24_spill] sm:$0xff] %v9347_v53  ;;  %v2697_v33 = vmax.f32 %v2653_v57, 0.0  ;;  %v2717_v57 = vld [vmem:[%s9954_s5 + $0x30] sm:$0xff] }
 0x40c   : > { %3248 = vmatpush1.bf16.msra.mxu0 %v9315_v51  ;;  %3321 = vmatpush1.bf16.msra.mxu1 %v9317_v52 }
 0x40d   : > { %3249 = vmatprep.subr.bf16.mxu0 %v9324_v29  ;;  %3322 = vmatprep.subr.bf16.mxu1 %v9326_v10  ;;  %v9379_v10 = vcombine.high %v2721_v27, %v2725_v4  ;;  %v9381_v29 = vcombine.high %v2722_v32, %v2726_v63  ;;  %v2710_v17 = vpack.c.bf16 %v2698_v2, %v2697_v33 }
 0x40e   : > { %v9413_v27 = vcombine.low %v2714_v19, %v2718_v12 }
 0x40f   : > { %3148 = vmatmul.mubr.bf16.gmra.mxu0 %v9353_v40  ;;  %3221 = vmatmul.mubr.bf16.gmra.mxu1 %v9353_v40 }
 0x410   : > { %3250 = vmatpush1.bf16.msra.mxu0 %v9339_v37  ;;  %3323 = vmatpush1.bf16.msra.mxu1 %v9343_v46  ;;  %v2713_v37 = vld [vmem:[%s9954_s5 + $0x10] sm:$0xff] }
 0x411   : > { %3251 = vmatprep.subr.bf16.mxu0 %v9345_v1  ;;  %3324 = vmatprep.subr.bf16.mxu1 %v9347_v53  ;;  %v9405_v53 = vcombine.high %v2713_v37, %v2717_v57  ;;  %v9407_v1 = vcombine.high %v2714_v19, %v2718_v12 }
 0x412   : > { %3157 = vmatprep.mubr.bf16.mxu0 %v10017_v48  ;;  %3230 = vmatprep.mubr.bf16.mxu1 %v10017_v48 }
 0x414   : > { %3252 = vmatpush1.bf16.msra.mxu0 %v9373_v56  ;;  %3325 = vmatpush1.bf16.msra.mxu1 %v9375_v47  ;;  %v9411_v47 = vcombine.low %v2713_v37, %v2717_v57 }
 0x415   : > { %3253 = vmatprep.subr.bf16.mxu0 %v9379_v10  ;;  %3326 = vmatprep.subr.bf16.mxu1 %v9381_v29 }
 0x417   : > { %3158 = vmatmul.mubr.bf16.gmra.mxu0 %v2710_v17  ;;  %3231 = vmatmul.mubr.bf16.gmra.mxu1 %v2710_v17 }
 0x418   : > { %3254 = vmatpush1.bf16.msra.mxu0 %v9399_v11  ;;  %3327 = vmatpush1.bf16.msra.mxu1 %v9401_v59 }
 0x419   : > { %3255 = vmatprep.subr.bf16.mxu0 %v9405_v53  ;;  %3328 = vmatprep.subr.bf16.mxu1 %v9407_v1 }
 0x41a   : > { %3273 = vmatprep.mubr.bf16.mxu0 %v10017_v48  ;;  %3346 = vmatprep.mubr.bf16.mxu1 %v10017_v48 }
 0x41c   : > { %3256 = vmatpush1.bf16.msra.mxu0 %v9411_v47  ;;  %3329 = vmatpush1.bf16.msra.mxu1 %v9413_v27 }
 0x41d   : > { %3495 = vmatprep.subr.bf16.mxu0 %v8928_v43  ;;  %3568 = vmatprep.subr.bf16.mxu1 %v8939_v44  ;;  %v7425_v43 = vpop.f32.mrf.mxu1 }
 0x41f   : > { %3274 = vmatmul.mubr.bf16.vlgmr.msra.gmra.mxu0 %v9234_v58  ;;  %3347 = vmatmul.mubr.bf16.vlgmr.msra.gmra.mxu1 %v9234_v58  ;;  %v10064_v58 = vld [vmem:[#allocation21_spill] sm:$0xff] }
 0x420   : > { %3496 = vmatpush1.bf16.msra.mxu0 %v8926_v36  ;;  %3569 = vmatpush1.bf16.msra.mxu1 %v8937_v42  ;;  %v2660_v36 = vpop.f32.mrf.mxu1 }
 0x421   : > { %3497 = vmatprep.subr.bf16.mxu0 %v8951_v6  ;;  %3570 = vmatprep.subr.bf16.mxu1 %v9049_v39 }
 0x422   : > { %3283 = vmatprep.mubr.bf16.mxu0 %v10017_v48  ;;  %3356 = vmatprep.mubr.bf16.mxu1 %v10017_v48  ;;  %v7426_v42 = vpop.f32.mrf.mxu1 }
 0x424   : > { %3498 = vmatpush1.bf16.msra.mxu0 %v8949_v5  ;;  %3571 = vmatpush1.bf16.msra.mxu1 %v9062_v62  ;;  %v2663_v44 = vpop.f32.mrf.mxu1  ;;  %v2661_v5 = vadd.f32 %v9215_v35, %v2660_v36 }
 0x425   : > { %3499 = vmatprep.subr.bf16.mxu0 %v8953_v24  ;;  %3572 = vmatprep.subr.bf16.mxu1 %v9067_v38  ;;  %v2664_v6 = vadd.f32 %v9215_v35, %v2663_v44  ;;  %v10054_v38 = vld [vmem:[#allocation11_spill] sm:$0xff] }
 0x426   : > { %v7429_v24 = vpop.f32.mrf.mxu1 }
 0x427   : > { %3284 = vmatmul.mubr.bf16.gmra.mxu0 %v9293_v8  ;;  %3357 = vmatmul.mubr.bf16.gmra.mxu1 %v9293_v8  ;;  %v10065_v8 = vld [vmem:[#allocation22_spill] sm:$0xff] }
 0x428   : > { %3500 = vmatpush1.bf16.msra.mxu0 %v8963_v25  ;;  %3573 = vmatpush1.bf16.msra.mxu1 %v9079_v23  ;;  %v2699_v25 = vmax.f32 %v2661_v5, 0.0 }
 0x429   : > { %3501 = vmatprep.subr.bf16.mxu0 %v8966_v15  ;;  %3574 = vmatprep.subr.bf16.mxu1 %v9084_v30  ;;  %v2700_v15 = vmax.f32 %v2664_v6, 0.0 }
 0x42a   : > { %3293 = vmatprep.mubr.bf16.mxu0 %v10017_v48  ;;  %3366 = vmatprep.mubr.bf16.mxu1 %v10017_v48 }
 0x42b   : > { %v9471_v39 = vpack.c.bf16 %v2700_v15, %v2699_v25 }
 0x42c   : > { %3502 = vmatpush1.bf16.msra.mxu0 %v8975_v26  ;;  %3575 = vmatpush1.bf16.msra.mxu1 %v9097_v14  ;;  %v2676_v26 = vpop.f32.mrf.mxu1  ;;  %v10055_v14 = vld [vmem:[#allocation12_spill] sm:$0xff] }
 0x42d   : > { %3503 = vmatprep.subr.bf16.mxu0 %v8978_v55  ;;  %3576 = vmatprep.subr.bf16.mxu1 %v9102_v13  ;;  %v2669_v55 = vadd.f32 %v7425_v43, %v9215_v35  ;;  %v10056_v13 = vld [vmem:[#allocation13_spill] sm:$0xff] }
 0x42e   : > { %v7430_v62 = vpop.f32.mrf.mxu1 }
 0x42f   : > { %3294 = vmatmul.mubr.bf16.gmra.mxu0 %v9353_v40  ;;  %3367 = vmatmul.mubr.bf16.gmra.mxu1 %v9353_v40  ;;  %v2701_v23 = vmax.f32 %v2669_v55, 0.0  ;;  %v10066_v40 = vld [vmem:[#allocation23_spill] sm:$0xff] }
 0x430   : > { %3504 = vmatpush1.bf16.msra.mxu0 %v8981_v0  ;;  %3577 = vmatpush1.bf16.msra.mxu1 %v9108_v9  ;;  %v2672_v0 = vadd.f32 %v7426_v42, %v9215_v35  ;;  %v2679_v9 = vpop.f32.mrf.mxu1 }
 0x431   : > { %3505 = vmatprep.subr.bf16.mxu0 %v9127_v61  ;;  %3578 = vmatprep.subr.bf16.mxu1 %v9136_v16  ;;  %v10057_v16 = vld [vmem:[#allocation14_spill] sm:$0xff] }
 0x432   : > { %3303 = vmatprep.mubr.bf16.mxu0 %v10017_v48  ;;  %3376 = vmatprep.mubr.bf16.mxu1 %v10017_v48  ;;  %v2702_v30 = vmax.f32 %v2672_v0, 0.0 }
 0x434   : > { %3506 = vmatpush1.bf16.msra.mxu0 %v9132_v28  ;;  %3579 = vmatpush1.bf16.msra.mxu1 %v9134_v50  ;;  %v3492_v61 = vpack.c.bf16 %v2702_v30, %v2701_v23  ;;  %v2677_v28 = vadd.f32 %v9215_v35, %v2676_v26  ;;  %v2680_v50 = vadd.f32 %v9215_v35, %v2679_v9 }
 0x435   : > { %3507 = vmatprep.subr.bf16.mxu0 %v9151_v34  ;;  %3580 = vmatprep.subr.bf16.mxu1 %v9160_v41  ;;  %v10058_v34 = vld [vmem:[#allocation15_spill] sm:$0xff] }
 0x436   : > { %v2703_v41 = vmax.f32 %v2677_v28, 0.0 }
 0x437   : > { %3304 = vmatmul.mubr.bf16.gmra.mxu0 %v2710_v17  ;;  %3377 = vmatmul.mubr.bf16.gmra.mxu1 %v2710_v17 }
 0x438   : > { %3508 = vmatpush1.bf16.msra.mxu0 %v9156_v54  ;;  %3581 = vmatpush1.bf16.msra.mxu1 %v9158_v22  ;;  %v10059_v54 = vld [vmem:[#allocation16_spill] sm:$0xff]  ;;  %v10060_v22 = vld [vmem:[#allocation17_spill] sm:$0xff] }
 0x439   : > { %3509 = vmatprep.subr.bf16.mxu0 %v9175_v3  ;;  %3582 = vmatprep.subr.bf16.mxu1 %v9184_v45  ;;  %v2704_v3 = vmax.f32 %v2680_v50, 0.0  ;;  %v2685_v45 = vadd.f32 %v7429_v24, %v9215_v35 }
 0x43a   : > { %3527 = vmatprep.mubr.bf16.mxu0 %v10017_v48  ;;  %3600 = vmatprep.mubr.bf16.mxu1 %v10017_v48 }
 0x43c   : > { %3510 = vmatpush1.bf16.msra.mxu0 %v9180_v60  ;;  %3583 = vmatpush1.bf16.msra.mxu1 %v9182_v49  ;;  %v10061_v60 = vld [vmem:[#allocation18_spill] sm:$0xff]  ;;  %v10062_v49 = vld [vmem:[#allocation19_spill] sm:$0xff] }
 0x43d   : > { %3641 = vmatprep.subr.bf16.mxu0 %v9199_v18  ;;  %3714 = vmatprep.subr.bf16.mxu1 %v9208_v31  ;;  %v2688_v18 = vadd.f32 %v7430_v62, %v9215_v35  ;;  %v10063_v31 = vld [vmem:[#allocation20_spill] sm:$0xff]  ;;  %v10068_v35 = vld [vmem:[#allocation25_spill] sm:$0xff] }
 0x43f   : > { %3528 = vmatmul.mubr.bf16.vlgmr.msra.gmra.mxu0 %v9471_v39  ;;  %3601 = vmatmul.mubr.bf16.vlgmr.msra.gmra.mxu1 %v9471_v39 }
 0x440   : > { %3642 = vmatpush1.bf16.msra.mxu0 %v9204_v7  ;;  %3715 = vmatpush1.bf16.msra.mxu1 %v10054_v38  ;;  %v3493_v7 = vpack.c.bf16 %v2704_v3, %v2703_v41 }
 0x441   : > { %3643 = vmatprep.subr.bf16.mxu0 %v10055_v14  ;;  %3716 = vmatprep.subr.bf16.mxu1 %v10056_v13 }
 0x442   : > { %3537 = vmatprep.mubr.bf16.mxu0 %v10017_v48  ;;  %3610 = vmatprep.mubr.bf16.mxu1 %v10017_v48 }
 0x444   : > { %3644 = vmatpush1.bf16.msra.mxu0 %v9259_v21  ;;  %3717 = vmatpush1.bf16.msra.mxu1 %v9261_v20  ;;  %v2705_v21 = vmax.f32 %v2685_v45, 0.0  ;;  %v2706_v20 = vmax.f32 %v2688_v18, 0.0 }
 0x445   : > { %3645 = vmatprep.subr.bf16.mxu0 %v10057_v16  ;;  %3718 = vmatprep.subr.bf16.mxu1 %v10058_v34 }
 0x447   : > { %3538 = vmatmul.mubr.bf16.gmra.mxu0 %v3492_v61  ;;  %3611 = vmatmul.mubr.bf16.gmra.mxu1 %v3492_v61 }
 0x448   : > { %3646 = vmatpush1.bf16.msra.mxu0 %v10059_v54  ;;  %3719 = vmatpush1.bf16.msra.mxu1 %v10060_v22 }
 0x449   : > { %3647 = vmatprep.subr.bf16.mxu0 %v10061_v60  ;;  %3720 = vmatprep.subr.bf16.mxu1 %v10062_v49 }
 0x44a   : > { %3547 = vmatprep.mubr.bf16.mxu0 %v10017_v48  ;;  %3620 = vmatprep.mubr.bf16.mxu1 %v10017_v48 }
 0x44c   : > { %3648 = vmatpush1.bf16.msra.mxu0 %v9315_v51  ;;  %3721 = vmatpush1.bf16.msra.mxu1 %v9317_v52  ;;  %v10067_v51 = vld [vmem:[#allocation24_spill] sm:$0xff]  ;;  %v3494_v52 = vpack.c.bf16 %v2706_v20, %v2705_v21 }
 0x44d   : > { %3649 = vmatprep.subr.bf16.mxu0 %v10063_v31  ;;  %3722 = vmatprep.subr.bf16.mxu1 %v10064_v58 }
 0x44f   : > { %3548 = vmatmul.mubr.bf16.gmra.mxu0 %v3493_v7  ;;  %3621 = vmatmul.mubr.bf16.gmra.mxu1 %v3493_v7 }
 0x450   : > { %3650 = vmatpush1.bf16.msra.mxu0 %v10065_v8  ;;  %3723 = vmatpush1.bf16.msra.mxu1 %v9343_v46 }
 0x451   : > { %3651 = vmatprep.subr.bf16.mxu0 %v10066_v40  ;;  %3724 = vmatprep.subr.bf16.mxu1 %v10067_v51 }
 0x452   : > { %3557 = vmatprep.mubr.bf16.mxu0 %v10017_v48  ;;  %3630 = vmatprep.mubr.bf16.mxu1 %v10017_v48 }
 0x454   : > { %3652 = vmatpush1.bf16.msra.mxu0 %v9373_v56  ;;  %3725 = vmatpush1.bf16.msra.mxu1 %v10068_v35 }
 0x455   : > { %3653 = vmatprep.subr.bf16.mxu0 %v9379_v10  ;;  %3726 = vmatprep.subr.bf16.mxu1 %v9381_v29 }
 0x457   : > { %3558 = vmatmul.mubr.bf16.gmra.mxu0 %v3494_v52  ;;  %3631 = vmatmul.mubr.bf16.gmra.mxu1 %v3494_v52 }
 0x458   : > { %3654 = vmatpush1.bf16.msra.mxu0 %v9399_v11  ;;  %3727 = vmatpush1.bf16.msra.mxu1 %v9401_v59 }
 0x459   : > { %3655 = vmatprep.subr.bf16.mxu0 %v9405_v53  ;;  %3728 = vmatprep.subr.bf16.mxu1 %v9407_v1 }
 0x45a   : > { %3673 = vmatprep.mubr.bf16.mxu0 %v10017_v48  ;;  %3746 = vmatprep.mubr.bf16.mxu1 %v10017_v48 }
 0x45c   : > { %3656 = vmatpush1.bf16.msra.mxu0 %v9411_v47  ;;  %3729 = vmatpush1.bf16.msra.mxu1 %v9413_v27 }
 0x45f   : > { %3674 = vmatmul.mubr.bf16.vlgmr.msra.gmra.mxu0 %v9471_v39  ;;  %3747 = vmatmul.mubr.bf16.vlgmr.msra.gmra.mxu1 %v9471_v39 }
 0x460   : > { %3683 = vmatprep.mubr.bf16.mxu0 %v10017_v48  ;;  %3756 = vmatprep.mubr.bf16.mxu1 %v10017_v48 }
 0x467   : > { %3684 = vmatmul.mubr.bf16.gmra.mxu0 %v3492_v61  ;;  %3757 = vmatmul.mubr.bf16.gmra.mxu1 %v3492_v61 }
 0x468   : > { %3693 = vmatprep.mubr.bf16.mxu0 %v10017_v48  ;;  %3766 = vmatprep.mubr.bf16.mxu1 %v10017_v48 }
 0x46f   : > { %3694 = vmatmul.mubr.bf16.gmra.mxu0 %v3493_v7  ;;  %3767 = vmatmul.mubr.bf16.gmra.mxu1 %v3493_v7 }
 0x470   : > { %3703 = vmatprep.mubr.bf16.mxu0 %v10017_v48  ;;  %3776 = vmatprep.mubr.bf16.mxu1 %v10017_v48 }
 0x477   : > { %3704 = vmatmul.mubr.bf16.gmra.mxu0 %v3494_v52  ;;  %3777 = vmatmul.mubr.bf16.gmra.mxu1 %v3494_v52 }
 0x4bf   : > { %v3129_v53 = vpop.f32.mrf.mxu0  ;;  %v3202_v10 = vpop.f32.mrf.mxu1 }
 0x4c1   : > { %v3131_v29 = vpop.f32.mrf.mxu0  ;;  %v3204_v37 = vpop.f32.mrf.mxu1 }
 0x4c3   : > { %v3133_v46 = vpop.f32.mrf.mxu0  ;;  %v3206_v1 = vpop.f32.mrf.mxu1 }
 0x4c4   : > { %v3387_v4 = vmax.f32 %v3129_v53, %v3133_v46  ;;  %v3413_v32 = vmax.f32 %v3202_v10, %v3206_v1 }
 0x4c5   : > { %v3135_v63 = vpop.f32.mrf.mxu0  ;;  %v3208_v56 = vpop.f32.mrf.mxu1 }
 0x4c6   : > { %v3400_v47 = vmax.f32 %v3131_v29, %v3135_v63  ;;  %v3426_v33 = vmax.f32 %v3204_v37, %v3208_v56 }
 0x4c7   : > { %v3139_v2 = vpop.f32.mrf.mxu0  ;;  %v3212_v57 = vpop.f32.mrf.mxu1 }
 0x4c8   : > { %v3388_v19 = vmax.f32 %v3387_v4, %v3139_v2  ;;  %v3414_v12 = vmax.f32 %v3413_v32, %v3212_v57 }
 0x4c9   : > { %v3141_v11 = vpop.f32.mrf.mxu0  ;;  %v3214_v48 = vpop.f32.mrf.mxu1 }
 0x4ca   : > { %v3401_v59 = vmax.f32 %v3400_v47, %v3141_v11  ;;  %v3427_v17 = vmax.f32 %v3426_v33, %v3214_v48 }
 0x4cb   : > { %v3143_v27 = vpop.f32.mrf.mxu0  ;;  %v3216_v43 = vpop.f32.mrf.mxu1 }
 0x4cc   : > { %v3389_v36 = vmax.f32 %v3388_v19, %v3143_v27  ;;  %v3415_v42 = vmax.f32 %v3414_v12, %v3216_v43 }
 0x4cd   : > { %v3145_v44 = vpop.f32.mrf.mxu0  ;;  %v3218_v5 = vpop.f32.mrf.mxu1 }
 0x4ce   : > { %v3402_v6 = vmax.f32 %v3401_v59, %v3145_v44  ;;  %v3428_v24 = vmax.f32 %v3427_v17, %v3218_v5 }
 0x4cf   : > { %v3149_v25 = vpop.f32.mrf.mxu0  ;;  %v3222_v15 = vpop.f32.mrf.mxu1 }
 0x4d0   : > { %v3390_v26 = vmax.f32 %v3389_v36, %v3149_v25  ;;  %v3416_v55 = vmax.f32 %v3415_v42, %v3222_v15 }
 0x4d1   : > { %v3151_v0 = vpop.f32.mrf.mxu0  ;;  %v3224_v39 = vpop.f32.mrf.mxu1 }
 0x4d2   : > { %v3403_v62 = vmax.f32 %v3402_v6, %v3151_v0  ;;  %v3429_v38 = vmax.f32 %v3428_v24, %v3224_v39 }
 0x4d3   : > { %v3153_v23 = vpop.f32.mrf.mxu0  ;;  %v3226_v30 = vpop.f32.mrf.mxu1 }
 0x4d4   : > { %v3391_v14 = vmax.f32 %v3390_v26, %v3153_v23  ;;  %v3417_v13 = vmax.f32 %v3416_v55, %v3226_v30 }
 0x4d5   : > { %v3155_v9 = vpop.f32.mrf.mxu0  ;;  %v3228_v61 = vpop.f32.mrf.mxu1 }
 0x4d6   : > { %v3404_v28 = vmax.f32 %v3403_v62, %v3155_v9  ;;  %v3430_v50 = vmax.f32 %v3429_v38, %v3228_v61 }
 0x4d7   : > { %v3159_v16 = vpop.f32.mrf.mxu0  ;;  %v3232_v34 = vpop.f32.mrf.mxu1 }
 0x4d8   : > { %v3392_v54 = vmax.f32 %v3391_v14, %v3159_v16  ;;  %v3418_v22 = vmax.f32 %v3417_v13, %v3232_v34 }
 0x4d9   : > { %v3161_v41 = vpop.f32.mrf.mxu0  ;;  %v3234_v3 = vpop.f32.mrf.mxu1 }
 0x4da   : > { %v3405_v60 = vmax.f32 %v3404_v28, %v3161_v41  ;;  %v3431_v49 = vmax.f32 %v3430_v50, %v3234_v3 }
 0x4db   : > { %v3163_v45 = vpop.f32.mrf.mxu0  ;;  %v3236_v18 = vpop.f32.mrf.mxu1 }
 0x4dc   : > { %v9527_v7 = vmax.f32 %v3392_v54, %v3163_v45  ;;  %v9529_v31 = vmax.f32 %v3418_v22, %v3236_v18 }
 0x4dd   : > { %v3165_v58 = vpop.f32.mrf.mxu0  ;;  %v3238_v8 = vpop.f32.mrf.mxu1 }
 0x4de   : > { %v9531_v21 = vmax.f32 %v3405_v60, %v3165_v58  ;;  %v9533_v20 = vmax.f32 %v3431_v49, %v3238_v8 }
 0x4df   : > { %v3275_v40 = vpop.f32.mrf.mxu0  ;;  %v3348_v51 = vpop.f32.mrf.mxu1 }
 0x4e1   : > { %v3277_v35 = vpop.f32.mrf.mxu0  ;;  %v3350_v52 = vpop.f32.mrf.mxu1 }
 0x4e3   : > { %v3279_v53 = vpop.f32.mrf.mxu0  ;;  %v3352_v10 = vpop.f32.mrf.mxu1 }
 0x4e4   : > { %v3439_v29 = vmax.f32 %v3275_v40, %v3279_v53  ;;  %v3465_v37 = vmax.f32 %v3348_v51, %v3352_v10 }
 0x4e5   : > { %v3281_v46 = vpop.f32.mrf.mxu0  ;;  %v3354_v1 = vpop.f32.mrf.mxu1 }
 0x4e6   : > { %v3452_v4 = vmax.f32 %v3277_v35, %v3281_v46  ;;  %v3478_v32 = vmax.f32 %v3350_v52, %v3354_v1 }
 0x4e7   : > { %v3285_v63 = vpop.f32.mrf.mxu0  ;;  %v3358_v56 = vpop.f32.mrf.mxu1 }
 0x4e8   : > { %v3440_v47 = vmax.f32 %v3439_v29, %v3285_v63  ;;  %v3466_v33 = vmax.f32 %v3465_v37, %v3358_v56 }
 0x4e9   : > { %v3287_v2 = vpop.f32.mrf.mxu0  ;;  %v3360_v57 = vpop.f32.mrf.mxu1 }
 0x4ea   : > { %v3453_v19 = vmax.f32 %v3452_v4, %v3287_v2  ;;  %v3479_v12 = vmax.f32 %v3478_v32, %v3360_v57 }
 0x4eb   : > { %v3289_v11 = vpop.f32.mrf.mxu0  ;;  %v3362_v48 = vpop.f32.mrf.mxu1 }
 0x4ec   : > { %v3441_v59 = vmax.f32 %v3440_v47, %v3289_v11  ;;  %v3467_v17 = vmax.f32 %v3466_v33, %v3362_v48 }
 0x4ed   : > { %v3291_v27 = vpop.f32.mrf.mxu0  ;;  %v3364_v43 = vpop.f32.mrf.mxu1 }
 0x4ee   : > { %v3454_v36 = vmax.f32 %v3453_v19, %v3291_v27  ;;  %v3480_v42 = vmax.f32 %v3479_v12, %v3364_v43 }
 0x4ef   : > { %v3295_v44 = vpop.f32.mrf.mxu0  ;;  %v3368_v5 = vpop.f32.mrf.mxu1 }
 0x4f0   : > { %v3442_v6 = vmax.f32 %v3441_v59, %v3295_v44  ;;  %v3468_v24 = vmax.f32 %v3467_v17, %v3368_v5 }
 0x4f1   : > { %v3297_v25 = vpop.f32.mrf.mxu0  ;;  %v3370_v15 = vpop.f32.mrf.mxu1 }
 0x4f2   : > { %v3455_v26 = vmax.f32 %v3454_v36, %v3297_v25  ;;  %v3481_v55 = vmax.f32 %v3480_v42, %v3370_v15  ;;  %v3394_v25 = vrot.slane %v9527_v7, 4  ;;  %v3420_v15 = vrot.slane %v9529_v31, 4 }
 0x4f3   : > { %v3299_v0 = vpop.f32.mrf.mxu0  ;;  %v3372_v39 = vpop.f32.mrf.mxu1 }
 0x4f4   : > { %v3443_v62 = vmax.f32 %v3442_v6, %v3299_v0  ;;  %v3469_v38 = vmax.f32 %v3468_v24, %v3372_v39 }
 0x4f5   : > { %v3301_v23 = vpop.f32.mrf.mxu0  ;;  %v3374_v30 = vpop.f32.mrf.mxu1 }
 0x4f6   : > { %v3456_v14 = vmax.f32 %v3455_v26, %v3301_v23  ;;  %v3482_v13 = vmax.f32 %v3481_v55, %v3374_v30  ;;  %v3407_v26 = vrot.slane %v9531_v21, 4  ;;  %v3433_v55 = vrot.slane %v9533_v20, 4 }
 0x4f7   : > { %v3305_v9 = vpop.f32.mrf.mxu0  ;;  %v3378_v61 = vpop.f32.mrf.mxu1 }
 0x4f8   : > { %v3444_v28 = vmax.f32 %v3443_v62, %v3305_v9  ;;  %v3470_v50 = vmax.f32 %v3469_v38, %v3378_v61 }
 0x4f9   : > { %v3307_v16 = vpop.f32.mrf.mxu0  ;;  %v3380_v34 = vpop.f32.mrf.mxu1 }
 0x4fa   : > { %v3457_v54 = vmax.f32 %v3456_v14, %v3307_v16  ;;  %v3483_v22 = vmax.f32 %v3482_v13, %v3380_v34  ;;  %v3395_v16 = vmax.f32 %v9527_v7, %v3394_v25  ;;  %v3421_v34 = vmax.f32 %v9529_v31, %v3420_v15 }
 0x4fb   : > { %v3309_v41 = vpop.f32.mrf.mxu0  ;;  %v3382_v3 = vpop.f32.mrf.mxu1 }
 0x4fc   : > { %v9535_v60 = vmax.f32 %v3444_v28, %v3309_v41  ;;  %v9537_v49 = vmax.f32 %v3470_v50, %v3382_v3  ;;  %v3422_v7 = vrot.slane %v3421_v34, 2 }
 0x4fd   : > { %v3311_v45 = vpop.f32.mrf.mxu0  ;;  %v3384_v18 = vpop.f32.mrf.mxu1 }
 0x4fe   : > { %v9539_v58 = vmax.f32 %v3457_v54, %v3311_v45  ;;  %v9541_v8 = vmax.f32 %v3483_v22, %v3384_v18  ;;  %v3408_v54 = vmax.f32 %v9531_v21, %v3407_v26  ;;  %v3434_v22 = vmax.f32 %v9533_v20, %v3433_v55 }
 0x4ff   : > { %v3529_v40 = vpop.f32.mrf.mxu0  ;;  %v3602_v51 = vpop.f32.mrf.mxu1 }
 0x500   : > { %v3435_v31 = vrot.slane %v3434_v22, 2 }
 0x501   : > { %v3531_v35 = vpop.f32.mrf.mxu0  ;;  %v3604_v52 = vpop.f32.mrf.mxu1 }
 0x503   : > { %v3533_v53 = vpop.f32.mrf.mxu0  ;;  %v3606_v10 = vpop.f32.mrf.mxu1 }
 0x504   : > { %v3787_v19 = vmax.f32 %v3529_v40, %v3533_v53  ;;  %v3813_v12 = vmax.f32 %v3602_v51, %v3606_v10 }
 0x505   : > { %v3535_v29 = vpop.f32.mrf.mxu0  ;;  %v3608_v37 = vpop.f32.mrf.mxu1 }
 0x506   : > { %v3800_v59 = vmax.f32 %v3531_v35, %v3535_v29  ;;  %v3826_v17 = vmax.f32 %v3604_v52, %v3608_v37 }
 0x507   : > { %v3539_v46 = vpop.f32.mrf.mxu0  ;;  %v3612_v1 = vpop.f32.mrf.mxu1 }
 0x508   : > { %v3788_v27 = vmax.f32 %v3787_v19, %v3539_v46  ;;  %v3814_v43 = vmax.f32 %v3813_v12, %v3612_v1  ;;  %v3396_v46 = vrot.slane %v3395_v16, 2  ;;  %v3409_v1 = vrot.slane %v3408_v54, 2 }
 0x509   : > { %v3541_v4 = vpop.f32.mrf.mxu0  ;;  %v3614_v32 = vpop.f32.mrf.mxu1 }
 0x50a   : > { %v3801_v44 = vmax.f32 %v3800_v59, %v3541_v4  ;;  %v3827_v5 = vmax.f32 %v3826_v17, %v3614_v32  ;;  %v3410_v59 = vmax.f32 %v3408_v54, %v3409_v1  ;;  %v3436_v17 = vmax.f32 %v3434_v22, %v3435_v31 }
 0x50b   : > { %v3543_v63 = vpop.f32.mrf.mxu0  ;;  %v3616_v56 = vpop.f32.mrf.mxu1 }
 0x50c   : > { %v3789_v6 = vmax.f32 %v3788_v27, %v3543_v63  ;;  %v3815_v24 = vmax.f32 %v3814_v43, %v3616_v56 }
 0x50d   : > { %v3545_v47 = vpop.f32.mrf.mxu0  ;;  %v3618_v33 = vpop.f32.mrf.mxu1 }
 0x50e   : > { %v3802_v62 = vmax.f32 %v3801_v44, %v3545_v47  ;;  %v3828_v38 = vmax.f32 %v3827_v5, %v3618_v33 }
 0x50f   : > { %v3549_v2 = vpop.f32.mrf.mxu0  ;;  %v3622_v57 = vpop.f32.mrf.mxu1 }
 0x510   : > { %v3790_v23 = vmax.f32 %v3789_v6, %v3549_v2  ;;  %v3816_v30 = vmax.f32 %v3815_v24, %v3622_v57 }
 0x511   : > { %v3551_v11 = vpop.f32.mrf.mxu0  ;;  %v3624_v48 = vpop.f32.mrf.mxu1 }
 0x512   : > { %v3803_v9 = vmax.f32 %v3802_v62, %v3551_v11  ;;  %v3829_v61 = vmax.f32 %v3828_v38, %v3624_v48  ;;  %v3397_v11 = vmax.f32 %v3395_v16, %v3396_v46  ;;  %v3423_v48 = vmax.f32 %v3421_v34, %v3422_v7 }
 0x513   : > { %v3553_v36 = vpop.f32.mrf.mxu0  ;;  %v3626_v42 = vpop.f32.mrf.mxu1  ;;  %v3411_v62 = vrot.slane %v3410_v59, 1  ;;  %v3437_v38 = vrot.slane %v3436_v17, 1 }
 0x514   : > { %v3791_v28 = vmax.f32 %v3790_v23, %v3553_v36  ;;  %v3817_v50 = vmax.f32 %v3816_v30, %v3626_v42 }
 0x515   : > { %v3555_v0 = vpop.f32.mrf.mxu0  ;;  %v3628_v39 = vpop.f32.mrf.mxu1 }
 0x516   : > { %v3804_v45 = vmax.f32 %v3803_v9, %v3555_v0  ;;  %v3830_v18 = vmax.f32 %v3829_v61, %v3628_v39  ;;  %v3398_v0 = vrot.slane %v3397_v11, 1  ;;  %v3424_v39 = vrot.slane %v3423_v48, 1 }
 0x517   : > { %v3559_v14 = vpop.f32.mrf.mxu0  ;;  %v3632_v13 = vpop.f32.mrf.mxu1 }
 0x518   : > { %v3792_v40 = vmax.f32 %v3791_v28, %v3559_v14  ;;  %v3818_v51 = vmax.f32 %v3817_v50, %v3632_v13 }
 0x519   : > { %v3561_v41 = vpop.f32.mrf.mxu0  ;;  %v3634_v3 = vpop.f32.mrf.mxu1 }
 0x51a   : > { %v3805_v53 = vmax.f32 %v3804_v45, %v3561_v41  ;;  %v3831_v10 = vmax.f32 %v3830_v18, %v3634_v3  ;;  %v3399_v41 = vmax.f32 %v3397_v11, %v3398_v0  ;;  %v3425_v3 = vmax.f32 %v3423_v48, %v3424_v39 }
 0x51b   : > { %v3563_v35 = vpop.f32.mrf.mxu0  ;;  %v3636_v52 = vpop.f32.mrf.mxu1  ;;  %v3446_v0 = vrot.slane %v9535_v60, 4 }
 0x51c   : > { %v3793_v29 = vmax.f32 %v3792_v40, %v3563_v35  ;;  %v3819_v37 = vmax.f32 %v3818_v51, %v3636_v52  ;;  %v3412_v40 = vmax.f32 %v3410_v59, %v3411_v62  ;;  %v3438_v51 = vmax.f32 %v3436_v17, %v3437_v38 }
 0x51d   : > { %v3565_v4 = vpop.f32.mrf.mxu0  ;;  %v3638_v21 = vpop.f32.mrf.mxu1 }
 0x51e   : > { %v3794_v32 = vrot.slane %v3793_v29, 4  ;;  %v3820_v20 = vrot.slane %v3819_v37, 4  ;;  %v3806_v63 = vmax.f32 %v3805_v53, %v3565_v4  ;;  %v3832_v56 = vmax.f32 %v3831_v10, %v3638_v21 }
 0x51f   : > { %v9551_v47 = vpop.f32.mrf.mxu0  ;;  %v9553_v33 = vpop.f32.mrf.mxu1 }
 0x520   : > { %v3795_v2 = vmax.f32 %v3793_v29, %v3794_v32  ;;  %v3821_v57 = vmax.f32 %v3819_v37, %v3820_v20  ;;  %v3807_v19 = vrot.slane %v3806_v63, 4  ;;  %v3833_v12 = vrot.slane %v3832_v56, 4 }
 0x521   : > { %v3677_v27 = vpop.f32.mrf.mxu0  ;;  %v3750_v43 = vpop.f32.mrf.mxu1 }
 0x522   : > { %v3796_v36 = vrot.slane %v3795_v2, 2  ;;  %v3822_v42 = vrot.slane %v3821_v57, 2  ;;  %v3808_v44 = vmax.f32 %v3806_v63, %v3807_v19  ;;  %v3834_v5 = vmax.f32 %v3832_v56, %v3833_v12  ;;  %v10069_v63 = vld [vmem:[#allocation10_spill] sm:$0xff] }
 0x523   : > { %v3679_v6 = vpop.f32.mrf.mxu0  ;;  %v3752_v24 = vpop.f32.mrf.mxu1 }
 0x524   : > { %v3797_v25 = vmax.f32 %v3795_v2, %v3796_v36  ;;  %v3823_v15 = vmax.f32 %v3821_v57, %v3822_v42  ;;  %v3809_v26 = vrot.slane %v3808_v44, 2  ;;  %v3835_v55 = vrot.slane %v3834_v5, 2 }
 0x525   : > { %v3681_v23 = vpop.f32.mrf.mxu0  ;;  %v3754_v30 = vpop.f32.mrf.mxu1  ;;  %v3839_v57 = vmax.f32 %v9551_v47, %v3679_v6  ;;  %v3865_v19 = vmax.f32 %v9553_v33, %v3752_v24  ;;  %v3472_v47 = vrot.slane %v9537_v49, 4  ;;  %v3459_v33 = vrot.slane %v9539_v58, 4 }
 0x526   : > { %v3798_v14 = vrot.slane %v3797_v25, 1  ;;  %v3824_v13 = vrot.slane %v3823_v15, 1  ;;  %v3810_v9 = vmax.f32 %v3808_v44, %v3809_v26  ;;  %v3836_v61 = vmax.f32 %v3834_v5, %v3835_v55 }
 0x527   : > { %v3685_v28 = vpop.f32.mrf.mxu0  ;;  %v3758_v50 = vpop.f32.mrf.mxu1  ;;  %v3852_v12 = vmax.f32 %v3677_v27, %v3681_v23  ;;  %v3878_v17 = vmax.f32 %v3750_v43, %v3754_v30  ;;  %v3485_v27 = vrot.slane %v9541_v8, 4 }
 0x528   : > { %v3799_v16 = vmax.f32 %v3797_v25, %v3798_v14  ;;  %v3825_v34 = vmax.f32 %v3823_v15, %v3824_v13  ;;  %v3811_v54 = vrot.slane %v3810_v9, 1  ;;  %v3837_v22 = vrot.slane %v3836_v61, 1 }
 0x529   : > { %v3687_v45 = vpop.f32.mrf.mxu0  ;;  %v3760_v18 = vpop.f32.mrf.mxu1  ;;  %v3840_v36 = vmax.f32 %v3839_v57, %v3685_v28  ;;  %v3866_v42 = vmax.f32 %v3865_v19, %v3758_v50  ;;  %v3447_v28 = vmax.f32 %v9535_v60, %v3446_v0  ;;  %v3473_v50 = vmax.f32 %v9537_v49, %v3472_v47 }
 0x52a   : > { %v3812_v35 = vmax.f32 %v3810_v9, %v3811_v54  ;;  %v3838_v52 = vmax.f32 %v3836_v61, %v3837_v22  ;;  %v3891_v29 = vmax.f32 %v3399_v41, %v3799_v16  ;;  %v3893_v37 = vmax.f32 %v3425_v3, %v3825_v34 }
 0x52b   : > { %v3689_v53 = vpop.f32.mrf.mxu0  ;;  %v3762_v10 = vpop.f32.mrf.mxu1  ;;  %v3853_v25 = vmax.f32 %v3852_v12, %v3687_v45  ;;  %v3879_v15 = vmax.f32 %v3878_v17, %v3760_v18  ;;  %v3460_v16 = vmax.f32 %v9539_v58, %v3459_v33  ;;  %v3486_v34 = vmax.f32 %v9541_v8, %v3485_v27 }
 0x52c   : > { %v3892_v46 = vmax.f32 %v3412_v40, %v3812_v35  ;;  %v3894_v7 = vmax.f32 %v3438_v51, %v3838_v52  ;;  %v3841_v26 = vmax.f32 %v3840_v36, %v3689_v53  ;;  %v3867_v55 = vmax.f32 %v3866_v42, %v3762_v10 }
 0x52d   : > { %v3691_v1 = vpop.f32.mrf.mxu0  ;;  %v3764_v31 = vpop.f32.mrf.mxu1  ;;  %v3474_v60 = vrot.slane %v3473_v50, 2  ;;  %v3487_v49 = vrot.slane %v3486_v34, 2 }
 0x52e   : > { %v3909_v4 = vcombine.low %v3891_v29, %v3892_v46  ;;  %v3910_v21 = vcombine.low %v3893_v37, %v3894_v7  ;;  %v3854_v39 = vmax.f32 %v3853_v25, %v3691_v1  ;;  %v3880_v43 = vmax.f32 %v3879_v15, %v3764_v31 }
 0x52f   : > { %v3695_v32 = vpop.f32.mrf.mxu0  ;;  %v3768_v20 = vpop.f32.mrf.mxu1  ;;  %v3448_v29 = vrot.slane %v3447_v28, 2  ;;  %v3461_v37 = vrot.slane %v3460_v16, 2  ;;  %v3488_v19 = vmax.f32 %v3486_v34, %v3487_v49 }
 0x530   : > { %v3919_v56 = vrot.slane %v3909_v4, %v10069_v63  ;;  %v3926_v2 = vrot.slane %v3910_v21, %v10069_v63  ;;  %v3842_v62 = vmax.f32 %v3841_v26, %v3695_v32  ;;  %v3868_v38 = vmax.f32 %v3867_v55, %v3768_v20 }
 0x531   : > { %v3697_v11 = vpop.f32.mrf.mxu0  ;;  %v3770_v48 = vpop.f32.mrf.mxu1  ;;  %v3462_v57 = vmax.f32 %v3460_v16, %v3461_v37  ;;  %v3489_v55 = vrot.slane %v3488_v19, 1 }
 0x532   : > { %v9559_v59 = vcombine.low %v3919_v56, %v3926_v2  ;;  %v3855_v14 = vmax.f32 %v3854_v39, %v3697_v11  ;;  %v3881_v13 = vmax.f32 %v3880_v43, %v3770_v48  ;;  %v3449_v56 = vmax.f32 %v3447_v28, %v3448_v29 }
 0x533   : > { %v3699_v44 = vpop.f32.mrf.mxu0  ;;  %v3772_v5 = vpop.f32.mrf.mxu1  ;;  %v3475_v2 = vmax.f32 %v3473_v50, %v3474_v60  ;;  %v3463_v26 = vrot.slane %v3462_v57, 1 }
 0x534   : > { %v3843_v9 = vmax.f32 %v3842_v62, %v3699_v44  ;;  %v3869_v61 = vmax.f32 %v3868_v38, %v3772_v5  ;;  %v3450_v25 = vrot.slane %v3449_v56, 1 }
 0x535   : > { %v3701_v6 = vpop.f32.mrf.mxu0  ;;  %v3774_v24 = vpop.f32.mrf.mxu1  ;;  %v3476_v15 = vrot.slane %v3475_v2, 1 }
 0x536   : > { %v3856_v41 = vmax.f32 %v3855_v14, %v3701_v6  ;;  %v3882_v3 = vmax.f32 %v3881_v13, %v3774_v24  ;;  %v3451_v62 = vmax.f32 %v3449_v56, %v3450_v25 }
 0x537   : > { %v3705_v23 = vpop.f32.mrf.mxu0  ;;  %v3778_v30 = vpop.f32.mrf.mxu1  ;;  %v3477_v38 = vmax.f32 %v3475_v2, %v3476_v15 }
 0x538   : > { %v3844_v45 = vmax.f32 %v3843_v9, %v3705_v23  ;;  %v3870_v18 = vmax.f32 %v3869_v61, %v3778_v30  ;;  %v3464_v23 = vmax.f32 %v3462_v57, %v3463_v26  ;;  %v3490_v30 = vmax.f32 %v3488_v19, %v3489_v55 }
 0x539   : > { %v3707_v54 = vpop.f32.mrf.mxu0  ;;  %v3780_v22 = vpop.f32.mrf.mxu1 }
 0x53a   : > { %v3857_v35 = vmax.f32 %v3856_v41, %v3707_v54  ;;  %v3883_v52 = vmax.f32 %v3882_v3, %v3780_v22  ;;  %v3949_v3 = vrot.slane %v9559_v59, %v10069_v63 }
 0x53b   : > { %v3709_v40 = vpop.f32.mrf.mxu0  ;;  %v3782_v51 = vpop.f32.mrf.mxu1 }
 0x53c   : > { %v3845_v53 = vmax.f32 %v3844_v45, %v3709_v40  ;;  %v3871_v10 = vmax.f32 %v3870_v18, %v3782_v51  ;;  %v3900_v18 = vld [vmem:[#allocation2 + $0x1] ss:$2 sm:$0xff] }
 0x53d   : > { %v3711_v46 = vpop.f32.mrf.mxu0  ;;  %v3784_v58 = vpop.f32.mrf.mxu1 }
 0x53e   : > { %v3846_v7 = vrot.slane %v3845_v53, 4  ;;  %v3872_v8 = vrot.slane %v3871_v10, 4  ;;  %v3858_v1 = vmax.f32 %v3857_v35, %v3711_v46  ;;  %v3884_v31 = vmax.f32 %v3883_v52, %v3784_v58 }
 0x540   : > { %v3847_v4 = vmax.f32 %v3845_v53, %v3846_v7  ;;  %v3873_v21 = vmax.f32 %v3871_v10, %v3872_v8  ;;  %v3859_v32 = vrot.slane %v3858_v1, 4  ;;  %v3885_v20 = vrot.slane %v3884_v31, 4 }
 0x542   : > { %v3848_v12 = vrot.slane %v3847_v4, 2  ;;  %v3874_v11 = vrot.slane %v3873_v21, 2  ;;  %v3860_v48 = vmax.f32 %v3858_v1, %v3859_v32  ;;  %v3886_v17 = vmax.f32 %v3884_v31, %v3885_v20 }
 0x544   : > { %v3849_v36 = vmax.f32 %v3847_v4, %v3848_v12  ;;  %v3875_v42 = vmax.f32 %v3873_v21, %v3874_v11  ;;  %v3861_v44 = vrot.slane %v3860_v48, 2  ;;  %v3887_v5 = vrot.slane %v3886_v17, 2 }
 0x546   : > { %v3850_v0 = vrot.slane %v3849_v36, 1  ;;  %v3876_v47 = vrot.slane %v3875_v42, 1  ;;  %v3862_v33 = vmax.f32 %v3860_v48, %v3861_v44  ;;  %v3888_v27 = vmax.f32 %v3886_v17, %v3887_v5 }
 0x548   : > { %v3851_v6 = vmax.f32 %v3849_v36, %v3850_v0  ;;  %v3877_v24 = vmax.f32 %v3875_v42, %v3876_v47  ;;  %v3863_v39 = vrot.slane %v3862_v33, 1  ;;  %v3889_v43 = vrot.slane %v3888_v27, 1 }
 0x54a   : > { %v3864_v14 = vmax.f32 %v3862_v33, %v3863_v39  ;;  %v3890_v13 = vmax.f32 %v3888_v27, %v3889_v43  ;;  %v3895_v9 = vmax.f32 %v3451_v62, %v3851_v6  ;;  %v3897_v61 = vmax.f32 %v3477_v38, %v3877_v24 }
 0x54c   : > { %v3896_v28 = vmax.f32 %v3464_v23, %v3864_v14  ;;  %v3898_v50 = vmax.f32 %v3490_v30, %v3890_v13 }
 0x54e   : > { %v3911_v16 = vcombine.low %v3895_v9, %v3896_v28  ;;  %v3912_v34 = vcombine.low %v3897_v61, %v3898_v50 }
 0x550   : > { %v3933_v54 = vrot.slane %v3911_v16, %v10069_v63  ;;  %v3940_v22 = vrot.slane %v3912_v34, %v10069_v63 }
 0x552   : > { %v3942_v41 = vcombine.low %v3933_v54, %v3940_v22 }
 0x554   : > { %v3956_v45 = vrot.slane %v3942_v41, %v10069_v63 }
 0x556   : > { %v3957_v40 = vcombine.low %v3949_v3, %v3956_v45  ;;  %3964 = sbr.rel (%p6910_p6) target bundleno = 2234 (0x8ba), region = 122 }
 0x558   : > { %v3959_v51 = vmax.f32 %v3900_v18, %v3957_v40 }
 0x55a   : > { %3960 = vst [vmem:[#allocation2 + $0x1] ss:$2 sm:$0xff] %v3959_v51 }
 0x55b   : > { %v7480_v35 = vld [vmem:[#allocation4 + $0xe4] ss:$16 sps:$4 sm:$0xff]   ;;  %v7484_v53 = vld [vmem:[#allocation4 + $0xe0] ss:$16 sps:$4 sm:$0xff]   ;;  %v8036_v27 = vmov 1983009808  }
 0x55c   : > { %v7482_v52 = vld [vmem:[#allocation4 + $0x2e4] ss:$16 sps:$4 sm:$0xff]   ;;  %5651 = vmatprep.subr.bf16.mxu0 %v7480_v35  ;;  %v7485_v10 = vld [vmem:[#allocation4 + $0x2e0] ss:$16 sps:$4 sm:$0xff]   ;;  %v4004_v6 = vunpack.c.l.s4 %v8036_v27  ;;  %vm6644_vm3 = vcmask 66560  }
 0x55d   : > { %5692 = vmatprep.subr.bf16.mxu1 %v7482_v52  ;;  %v7486_v29 = vld [vmem:[#allocation4 + $0xc4] ss:$16 sps:$4 sm:$0xff]   ;;  %5652 = vmatpush1.bf16.msra.mxu0 %v7484_v53  ;;  %v7490_v59 = vld [vmem:[#allocation4 + $0xc0] ss:$16 sps:$4 sm:$0xff]  }
 0x55e   : > { %5693 = vmatpush1.bf16.msra.mxu1 %v7485_v10  ;;  %v7488_v60 = vld [vmem:[#allocation4 + $0x2c4] ss:$16 sps:$4 sm:$0xff]   ;;  %5653 = vmatprep.subr.bf16.mxu0 %v7486_v29  ;;  %v7491_v63 = vld [vmem:[#allocation4 + $0x2c0] ss:$16 sps:$4 sm:$0xff]   ;;  %v4005_v14 = vunpack.c.0.s8 %v4004_v6 }
 0x55f   : > { %5694 = vmatprep.subr.bf16.mxu1 %v7488_v60  ;;  %v7492_v37 = vld [vmem:[#allocation4 + $0xa4] ss:$16 sps:$4 sm:$0xff]   ;;  %v7496_v46 = vld [vmem:[#allocation4 + $0xa0] ss:$16 sps:$4 sm:$0xff]  }
 0x560   : > { %v7494_v49 = vld [vmem:[#allocation4 + $0x2a4] ss:$16 sps:$4 sm:$0xff]   ;;  %v7497_v58 = vld [vmem:[#allocation4 + $0x2a0] ss:$16 sps:$4 sm:$0xff]  }
 0x561   : > { %5654 = vmatpush1.bf16.msra.mxu0 %v7490_v59  ;;  %v7498_v7 = vld [vmem:[#allocation4 + $0x84] ss:$16 sps:$4 sm:$0xff]   ;;  %v7502_v1 = vld [vmem:[#allocation4 + $0x80] ss:$16 sps:$4 sm:$0xff]  }
 0x562   : > { %5695 = vmatpush1.bf16.msra.mxu1 %v7491_v63  ;;  %5655 = vmatprep.subr.bf16.mxu0 %v7492_v37  ;;  %v7500_v8 = vld [vmem:[#allocation4 + $0x284] ss:$16 sps:$4 sm:$0xff]   ;;  %v7503_v31 = vld [vmem:[#allocation4 + $0x280] ss:$16 sps:$4 sm:$0xff]  }
 0x563   : > { %5696 = vmatprep.subr.bf16.mxu1 %v7494_v49  ;;  %v7504_v4 = vld [vmem:[#allocation4 + $0x64] ss:$16 sps:$4 sm:$0xff]   ;;  %v7508_v32 = vld [vmem:[#allocation4 + $0x60] ss:$16 sps:$4 sm:$0xff]  }
 0x564   : > { %v7506_v21 = vld [vmem:[#allocation4 + $0x264] ss:$16 sps:$4 sm:$0xff]   ;;  %v7509_v20 = vld [vmem:[#allocation4 + $0x260] ss:$16 sps:$4 sm:$0xff]  }
 0x565   : > { %5656 = vmatpush1.bf16.msra.mxu0 %v7496_v46  ;;  %v7510_v56 = vld [vmem:[#allocation4 + $0x44] ss:$16 sps:$4 sm:$0xff]   ;;  %v7514_v57 = vld [vmem:[#allocation4 + $0x40] ss:$16 sps:$4 sm:$0xff]  }
 0x566   : > { %5697 = vmatpush1.bf16.msra.mxu1 %v7497_v58  ;;  %5657 = vmatprep.subr.bf16.mxu0 %v7498_v7  ;;  %v7512_v2 = vld [vmem:[#allocation4 + $0x244] ss:$16 sps:$4 sm:$0xff]   ;;  %v7515_v19 = vld [vmem:[#allocation4 + $0x240] ss:$16 sps:$4 sm:$0xff]  }
 0x567   : > { %5698 = vmatprep.subr.bf16.mxu1 %v7500_v8  ;;  %v7516_v12 = vld [vmem:[#allocation4 + $0x24] ss:$16 sps:$4 sm:$0xff]   ;;  %v7520_v48 = vld [vmem:[#allocation4 + $0x20] ss:$16 sps:$4 sm:$0xff]  }
 0x568   : > { %v7518_v11 = vld [vmem:[#allocation4 + $0x224] ss:$16 sps:$4 sm:$0xff]   ;;  %v7521_v17 = vld [vmem:[#allocation4 + $0x220] ss:$16 sps:$4 sm:$0xff]  }
 0x569   : > { %5658 = vmatpush1.bf16.msra.mxu0 %v7502_v1  ;;  %v7522_v36 = vld [vmem:[#allocation4 + $0x4] ss:$16 sps:$4 sm:$0xff]   ;;  %v7526_v44 = vld [vmem:[#allocation4] ss:$16 sps:$4 sm:$0xff]  }
 0x56a   : > { %5699 = vmatpush1.bf16.msra.mxu1 %v7503_v31  ;;  %5659 = vmatprep.subr.bf16.mxu0 %v7504_v4  ;;  %v7524_v42 = vld [vmem:[#allocation4 + $0x204] ss:$16 sps:$4 sm:$0xff]   ;;  %v7527_v5 = vld [vmem:[#allocation4 + $0x200] ss:$16 sps:$4 sm:$0xff]  }
 0x56b   : > { %5700 = vmatprep.subr.bf16.mxu1 %v7506_v21  ;;  %v7528_v25 = vld [vmem:[#allocation4 + $0x1e4] ss:$16 sps:$4 sm:$0xff]   ;;  %v7532_v26 = vld [vmem:[#allocation4 + $0x1e0] ss:$16 sps:$4 sm:$0xff]  }
 0x56c   : > { %v7530_v15 = vld [vmem:[#allocation4 + $0x3e4] ss:$16 sps:$4 sm:$0xff]   ;;  %v7533_v55 = vld [vmem:[#allocation4 + $0x3e0] ss:$16 sps:$4 sm:$0xff]  }
 0x56d   : > { %5660 = vmatpush1.bf16.msra.mxu0 %v7508_v32  ;;  %v7534_v0 = vld [vmem:[#allocation4 + $0x1c4] ss:$16 sps:$4 sm:$0xff]   ;;  %v7538_v33 = vld [vmem:[#allocation4 + $0x1c0] ss:$16 sps:$4 sm:$0xff]  }
 0x56e   : > { %5701 = vmatpush1.bf16.msra.mxu1 %v7509_v20  ;;  %5661 = vmatprep.subr.bf16.mxu0 %v7510_v56  ;;  %v7536_v47 = vld [vmem:[#allocation4 + $0x3c4] ss:$16 sps:$4 sm:$0xff]   ;;  %v7539_v24 = vld [vmem:[#allocation4 + $0x3c0] ss:$16 sps:$4 sm:$0xff]  }
 0x56f   : > { %5702 = vmatprep.subr.bf16.mxu1 %v7512_v2  ;;  %v7540_v39 = vld [vmem:[#allocation4 + $0x1a4] ss:$16 sps:$4 sm:$0xff]   ;;  %v7544_v62 = vld [vmem:[#allocation4 + $0x1a0] ss:$16 sps:$4 sm:$0xff]  }
 0x570   : > { %v7542_v43 = vld [vmem:[#allocation4 + $0x3a4] ss:$16 sps:$4 sm:$0xff]   ;;  %v7545_v38 = vld [vmem:[#allocation4 + $0x3a0] ss:$16 sps:$4 sm:$0xff]  }
 0x571   : > { %5662 = vmatpush1.bf16.msra.mxu0 %v7514_v57  ;;  %v10070_v23 = vld [vmem:[#allocation9_spill] sm:$0xff]  ;;  %v9586_v16 = vld [vmem:[%s9955_s6] sm:$0xff] }
 0x572   : > { %5703 = vmatpush1.bf16.msra.mxu1 %v7515_v19  ;;  %5663 = vmatprep.subr.bf16.mxu0 %v7516_v12  ;;  %v9576_v30 = vsub.s32 0, %v10070_v23  ;;  %v7546_v13 = vld [vmem:[#allocation4 + $0x184] ss:$16 sps:$4 sm:$0xff]   ;;  %v9579_v9 = vsub.s32 1, %v10070_v23  ;;  %v3979_v61 = vsub.s32 2, %v10070_v23  ;;  %v3983_v50 = vsub.s32 3, %v10070_v23 }
 0x573   : > { %5704 = vmatprep.subr.bf16.mxu1 %v7518_v11  ;;  %v7548_v28 = vld [vmem:[#allocation4 + $0x384] ss:$16 sps:$4 sm:$0xff]   ;;  %v9589_v34 = vsub.s32 %v4005_v14, %v10070_v23  ;;  %v7550_v54 = vld [vmem:[#allocation4 + $0x180] ss:$16 sps:$4 sm:$0xff]   ;;  %v3995_v27 = vsub.s32 6, %v10070_v23  ;;  %v3999_v6 = vsub.s32 7, %v10070_v23 }
 0x574   : > { %v7551_v22 = vld [vmem:[#allocation4 + $0x380] ss:$16 sps:$4 sm:$0xff]   ;;  %v3972_v41 = vrot.slane %v9586_v16, %v9576_v30  ;;  %v3976_v3 = vrot.slane %v9586_v16, %v9579_v9  ;;  %v3980_v45 = vrot.slane %v9586_v16, %v3979_v61  ;;  %v7552_v18 = vld [vmem:[#allocation4 + $0x164] ss:$16 sps:$4 sm:$0xff]   ;;  %v3984_v51 = vrot.slane %v9586_v16, %v3983_v50 }
 0x575   : > { %5664 = vmatpush1.bf16.msra.mxu0 %v7520_v48  ;;  %v7554_v40 = vld [vmem:[#allocation4 + $0x364] ss:$16 sps:$4 sm:$0xff]   ;;  %v7556_v53 = vld [vmem:[#allocation4 + $0x160] ss:$16 sps:$4 sm:$0xff]  }
 0x576   : > { %5705 = vmatpush1.bf16.msra.mxu1 %v7521_v17  ;;  %5665 = vmatprep.subr.bf16.mxu0 %v7522_v36  ;;  %v4001_v35 = vcombine.low %v3972_v41, %v3976_v3  ;;  %v4002_v52 = vcombine.low %v3980_v45, %v3984_v51  ;;  %v7557_v10 = vld [vmem:[#allocation4 + $0x360] ss:$16 sps:$4 sm:$0xff]   ;;  %v7558_v60 = vld [vmem:[#allocation4 + $0x144] ss:$16 sps:$4 sm:$0xff]  }
 0x577   : > { %5706 = vmatprep.subr.bf16.mxu1 %v7524_v42  ;;  %v7560_v59 = vld [vmem:[#allocation4 + $0x344] ss:$16 sps:$4 sm:$0xff]   ;;  %v7562_v46 = vld [vmem:[#allocation4 + $0x140] ss:$16 sps:$4 sm:$0xff]  }
 0x578   : > { %v4009_v29 = vrot.slane %v4001_v35, %v9589_v34  ;;  %v4016_v63 = vrot.slane %v4002_v52, %v9589_v34  ;;  %v3965_v37 = vld [vmem:[#allocation2] sm:$0xff] }
 0x579   : > { %5666 = vmatpush1.bf16.msra.mxu0 %v7526_v44  ;;  %v7563_v58 = vld [vmem:[#allocation4 + $0x340] ss:$16 sps:$4 sm:$0xff]   ;;  %v7564_v7 = vld [vmem:[#allocation4 + $0x124] ss:$16 sps:$4 sm:$0xff]  }
 0x57a   : > { %5707 = vmatpush1.bf16.msra.mxu1 %v7527_v5  ;;  %5667 = vmatprep.subr.bf16.mxu0 %v7528_v25  ;;  %v4017_v49 = vcombine.low %v4009_v29, %v4016_v63  ;;  %v7566_v8 = vld [vmem:[#allocation4 + $0x324] ss:$16 sps:$4 sm:$0xff]   ;;  %v7568_v4 = vld [vmem:[#allocation4 + $0x120] ss:$16 sps:$4 sm:$0xff]  }
 0x57b   : > { %5708 = vmatprep.subr.bf16.mxu1 %v7530_v15  ;;  %v7569_v21 = vld [vmem:[#allocation4 + $0x320] ss:$16 sps:$4 sm:$0xff]   ;;  %v7570_v32 = vld [vmem:[#allocation4 + $0x104] ss:$16 sps:$4 sm:$0xff]  }
 0x57c   : > { %v4037_v1 = vadd.f32 %v4017_v49, %v3965_v37  ;;  %v7572_v20 = vld [vmem:[#allocation4 + $0x304] ss:$16 sps:$4 sm:$0xff]   ;;  %v7574_v12 = vld [vmem:[#allocation4 + $0x100] ss:$16 sps:$4 sm:$0xff]  }
 0x57d   : > { %5668 = vmatpush2.bf16.msra.mxu0 %v7532_v26  ;;  %v7575_v11 = vld [vmem:[#allocation4 + $0x300] ss:$16 sps:$4 sm:$0xff]   ;;  %v7578_v36 = vld [vmem:[#allocation4 + $0x4e4] ss:$16 sps:$4 sm:$0xff]  }
 0x57e   : > { %5709 = vmatpush2.bf16.msra.mxu1 %v7533_v55  ;;  %5669 = vmatprep.subr.bf16.mxu0 %v7534_v0  ;;  %v4039_v31 = vmax.f32 %v4037_v1, 0.0  ;;  %v7581_v42 = vld [vmem:[#allocation4 + $0x6e4] ss:$16 sps:$4 sm:$0xff]   ;;  %v7576_v15 = vld [vmem:[#allocation4 + $0x4e0] ss:$16 sps:$4 sm:$0xff]  }
 0x57f   : > { %5710 = vmatprep.subr.bf16.mxu1 %v7536_v47  ;;  %v7579_v26 = vld [vmem:[#allocation4 + $0x6e0] ss:$16 sps:$4 sm:$0xff]   ;;  %v7584_v55 = vld [vmem:[#allocation4 + $0x4c4] ss:$16 sps:$4 sm:$0xff]   ;;  %v3987_v47 = vsub.s32 4, %v10070_v23 }
 0x580   : > { %v4050_v56 = vrot.slane %v4039_v31, %v9589_v34  ;;  %v4043_v2 = vcombine.high %v4039_v31, %v4039_v31  ;;  %v7587_v0 = vld [vmem:[#allocation4 + $0x6c4] ss:$16 sps:$4 sm:$0xff]   ;;  %v7597_v51 = vld [vmem:[#allocation4 + $0x680] ss:$16 sps:$4 sm:$0xff]  }
 0x581   : > { %5670 = vmatpush2.bf16.msra.mxu0 %v7538_v33  ;;  %v3991_v33 = vsub.s32 5, %v10070_v23  ;;  %v7596_v41 = vld [vmem:[#allocation4 + $0x484] ss:$16 sps:$4 sm:$0xff]   ;;  %v7603_v29 = vld [vmem:[#allocation4 + $0x660] ss:$16 sps:$4 sm:$0xff]  }
 0x582   : > { %5711 = vmatpush2.bf16.msra.mxu1 %v7539_v24  ;;  %5671 = vmatprep.subr.bf16.mxu0 %v7540_v39  ;;  %v4058_v57 = vcombine.high %v4050_v56, %v4050_v56  ;;  %v4057_v19 = vrot.slane %v4043_v2, %v9589_v34  ;;  %v9610_v5 = vpack.c.bf16 %v4050_v56, %v4050_v56  ;;  %v7582_v24 = vld [vmem:[#allocation4 + $0x4c0] ss:$16 sps:$4 sm:$0xff]   ;;  %v7599_v3 = vld [vmem:[#allocation4 + $0x684] ss:$16 sps:$4 sm:$0xff]  }
 0x583   : > { %5712 = vmatprep.subr.bf16.mxu1 %v7542_v43  ;;  %v7585_v39 = vld [vmem:[#allocation4 + $0x6c0] ss:$16 sps:$4 sm:$0xff]   ;;  %v7590_v43 = vld [vmem:[#allocation4 + $0x4a4] ss:$16 sps:$4 sm:$0xff]   ;;  %v3992_v14 = vrot.slane %v9586_v16, %v3991_v33 }
 0x584   : > { %v9605_v48 = vpack.c.bf16 %v4058_v57, %v4058_v57  ;;  %v4059_v17 = vcombine.high %v4057_v19, %v4057_v19  ;;  %v9612_v25 = vpack.c.bf16 %v4057_v19, %v4057_v19  ;;  %v7602_v35 = vld [vmem:[#allocation4 + $0x464] ss:$16 sps:$4 sm:$0xff]   ;;  %v7606_v37 = vld [vmem:[#allocation4 + $0x440] ss:$16 sps:$4 sm:$0xff]  }
 0x585   : > { %5672 = vmatpush2.bf16.msra.mxu0 %v7544_v62  ;;  %v7593_v62 = vld [vmem:[#allocation4 + $0x6a4] ss:$16 sps:$4 sm:$0xff]   ;;  %v7609_v49 = vld [vmem:[#allocation4 + $0x640] ss:$16 sps:$4 sm:$0xff]  }
 0x586   : > { %5713 = vmatpush2.bf16.msra.mxu1 %v7545_v38  ;;  %5673 = vmatprep.subr.bf16.mxu0 %v7546_v13  ;;  %v9608_v44 = vpack.c.bf16 %v4059_v17, %v4059_v17  ;;  %v3988_v38 = vrot.slane %v9586_v16, %v3987_v47  ;;  %v3996_v13 = vrot.slane %v9586_v16, %v3995_v27  ;;  %v7605_v52 = vld [vmem:[#allocation4 + $0x664] ss:$16 sps:$4 sm:$0xff]   ;;  %v7615_v31 = vld [vmem:[#allocation4 + $0x620] ss:$16 sps:$4 sm:$0xff]  }
 0x587   : > { %5714 = vmatprep.subr.bf16.mxu1 %v7548_v28  ;;  %5683 = vmatprep.mubr.bf16.mxu0 %v9605_v48  ;;  %v4000_v28 = vrot.slane %v9586_v16, %v3999_v6  ;;  %v7621_v57 = vld [vmem:[#allocation4 + $0x600] ss:$16 sps:$4 sm:$0xff]   ;;  %v7626_v19 = vld [vmem:[#allocation4 + $0x5e4] ss:$16 sps:$4 sm:$0xff]  }
 0x588   : > { %5724 = vmatprep.mubr.bf16.mxu1 %v9608_v44  ;;  %v4018_v45 = vcombine.low %v3988_v38, %v3992_v14  ;;  %v7630_v33 = vld [vmem:[#allocation4 + $0x5c0] ss:$16 sps:$4 sm:$0xff]   ;;  %v7638_v27 = vld [vmem:[#allocation4 + $0x5a4] ss:$16 sps:$4 sm:$0xff]  }
 0x589   : > { %5674 = vmatpush2.bf16.msra.mxu0 %v7550_v54  ;;  %v7588_v54 = vld [vmem:[#allocation4 + $0x4a0] ss:$16 sps:$4 sm:$0xff]   ;;  %v7641_v6 = vld [vmem:[#allocation4 + $0x7a4] ss:$16 sps:$4 sm:$0xff]  }
 0x58a   : > { %5715 = vmatpush2.bf16.msra.mxu1 %v7551_v22  ;;  %5675 = vmatprep.subr.bf16.mxu0 %v7552_v18  ;;  %v7591_v22 = vld [vmem:[#allocation4 + $0x6a0] ss:$16 sps:$4 sm:$0xff]   ;;  %v4019_v18 = vcombine.low %v3996_v13, %v4000_v28  ;;  %v4026_v16 = vrot.slane %v4018_v45, %v9589_v34  ;;  %v7650_v13 = vld [vmem:[#allocation4 + $0x564] ss:$16 sps:$4 sm:$0xff]  }
 0x58b   : > { %5716 = vmatprep.subr.bf16.mxu1 %v7554_v40  ;;  %v7594_v40 = vld [vmem:[#allocation4 + $0x480] ss:$16 sps:$4 sm:$0xff]   ;;  %v7653_v28 = vld [vmem:[#allocation4 + $0x764] ss:$16 sps:$4 sm:$0xff]  }
 0x58c   : > { %v7642_v38 = vld [vmem:[#allocation4 + $0x580] ss:$16 sps:$4 sm:$0xff]  }
 0x58d   : > { %5676 = vmatpush2.bf16.msra.mxu0 %v7556_v53  ;;  %v4033_v53 = vrot.slane %v4019_v18, %v9589_v34  ;;  %v7645_v14 = vld [vmem:[#allocation4 + $0x780] ss:$16 sps:$4 sm:$0xff]  }
 0x58e   : > { %5717 = vmatpush2.bf16.msra.mxu1 %v7557_v10  ;;  %5677 = vmatprep.subr.bf16.mxu0 %v7558_v60  ;;  %v7600_v10 = vld [vmem:[#allocation4 + $0x460] ss:$16 sps:$4 sm:$0xff]   ;;  %v7608_v60 = vld [vmem:[#allocation4 + $0x444] ss:$16 sps:$4 sm:$0xff]  }
 0x58f   : > { %5718 = vmatprep.subr.bf16.mxu1 %v7560_v59  ;;  %v7611_v59 = vld [vmem:[#allocation4 + $0x644] ss:$16 sps:$4 sm:$0xff]   ;;  %v4034_v63 = vcombine.low %v4026_v16, %v4033_v53  ;;  %v7654_v45 = vld [vmem:[#allocation4 + $0x540] ss:$16 sps:$4 sm:$0xff]  }
 0x590   : > { %v7657_v18 = vld [vmem:[#allocation4 + $0x740] ss:$16 sps:$4 sm:$0xff]   ;;  %v7668_v16 = vld [vmem:[#allocation4 + $0x504] ss:$16 sps:$4 sm:$0xff]  }
 0x591   : > { %5678 = vmatpush2.bf16.msra.mxu0 %v7562_v46  ;;  %v7614_v46 = vld [vmem:[#allocation4 + $0x424] ss:$16 sps:$4 sm:$0xff]  }
 0x592   : > { %5719 = vmatpush2.bf16.msra.mxu1 %v7563_v58  ;;  %5679 = vmatprep.subr.bf16.mxu0 %v7564_v7  ;;  %v7617_v58 = vld [vmem:[#allocation4 + $0x624] ss:$16 sps:$4 sm:$0xff]   ;;  %v3966_v7 = vld [vmem:[#allocation2 + $0x8] sm:$0xff] }
 0x593   : > { %5720 = vmatprep.subr.bf16.mxu1 %v7566_v8  ;;  %v7612_v8 = vld [vmem:[#allocation4 + $0x420] ss:$16 sps:$4 sm:$0xff]   ;;  %v4038_v1 = vadd.f32 %v4034_v63, %v3966_v7  ;;  %v7671_v53 = vld [vmem:[#allocation4 + $0x704] ss:$16 sps:$4 sm:$0xff]   ;;  %v7683_v7 = vld [vmem:[#allocation4 + $0x2cc] ss:$16 sps:$4 sm:$0xff]  }
 0x595   : > { %5680 = vmatpush2.bf16.msra.mxu0 %v7568_v4  ;;  %v7620_v4 = vld [vmem:[#allocation4 + $0x404] ss:$16 sps:$4 sm:$0xff]  }
 0x596   : > { %5721 = vmatpush2.bf16.msra.mxu1 %v7569_v21  ;;  %5681 = vmatprep.subr.bf16.mxu0 %v7570_v32  ;;  %v7623_v21 = vld [vmem:[#allocation4 + $0x604] ss:$16 sps:$4 sm:$0xff]   ;;  %v4040_v32 = vmax.f32 %v4038_v1, 0.0  ;;  %v7681_v1 = vld [vmem:[#allocation4 + $0x2c8] ss:$16 sps:$4 sm:$0xff]  }
 0x597   : > { %5722 = vmatprep.subr.bf16.mxu1 %v7572_v20  ;;  %v7618_v20 = vld [vmem:[#allocation4 + $0x400] ss:$16 sps:$4 sm:$0xff]  }
 0x598   : > { %v9628_v56 = vrot.slane %v4040_v32, %v9589_v34  ;;  %v4060_v2 = vcombine.high %v4040_v32, %v4040_v32  ;;  %v7687_v32 = vld [vmem:[#allocation4 + $0x2a8] ss:$16 sps:$4 sm:$0xff]  }
 0x599   : > { %5682 = vmatpush2.bf16.msra.mxu0 %v7574_v12  ;;  %v7629_v12 = vld [vmem:[#allocation4 + $0x7e4] ss:$16 sps:$4 sm:$0xff]  }
 0x59a   : > { %5723 = vmatpush2.bf16.msra.mxu1 %v7575_v11  ;;  %5733 = vmatprep.subr.bf16.mxu0 %v7578_v36  ;;  %v4075_v11 = vcombine.high %v9628_v56, %v9628_v56  ;;  %v9633_v17 = vrot.slane %v4060_v2, %v9589_v34  ;;  %v7624_v36 = vld [vmem:[#allocation4 + $0x5e0] ss:$16 sps:$4 sm:$0xff]   ;;  %v9645_v63 = vpack.c.bf16 %v9628_v56, %v9628_v56  ;;  %v7695_v56 = vld [vmem:[#allocation4 + $0x28c] ss:$16 sps:$4 sm:$0xff]   ;;  %v7690_v2 = vld [vmem:[#allocation4 + $0x88] ss:$16 sps:$4 sm:$0xff]  }
 0x59b   : > { %5774 = vmatprep.subr.bf16.mxu1 %v7581_v42  ;;  %v7633_v34 = vld [vmem:[#allocation4 + $0x7c0] ss:$16 sps:$4 sm:$0xff]  }
 0x59c   : > { %5684 = vmatmul.mubr.bf16.vlgmr.msra.gmra.mxu0 %v9610_v5  ;;  %v9635_v42 = vpack.c.bf16 %v4075_v11, %v4075_v11  ;;  %v7696_v11 = vld [vmem:[#allocation4 + $0x68] ss:$16 sps:$4 sm:$0xff]  }
 0x59d   : > { %5725 = vmatmul.mubr.bf16.vlgmr.msra.gmra.mxu1 %v9612_v25  ;;  %5734 = vmatpush1.bf16.msra.mxu0 %v7576_v15  ;;  %v4076_v15 = vcombine.high %v9633_v17, %v9633_v17 }
 0x59e   : > { %5775 = vmatpush1.bf16.msra.mxu1 %v7579_v26  ;;  %5735 = vmatprep.subr.bf16.mxu0 %v7584_v55  ;;  %v7627_v26 = vld [vmem:[#allocation4 + $0x7e0] ss:$16 sps:$4 sm:$0xff]   ;;  %v7632_v55 = vld [vmem:[#allocation4 + $0x5c4] ss:$16 sps:$4 sm:$0xff]  }
 0x59f   : > { %5776 = vmatprep.subr.bf16.mxu1 %v7587_v0  ;;  %v7635_v0 = vld [vmem:[#allocation4 + $0x7c4] ss:$16 sps:$4 sm:$0xff]   ;;  %v9639_v47 = vpack.c.bf16 %v4076_v15, %v4076_v15  ;;  %5765 = vmatprep.mubr.bf16.mxu0 %v9635_v42  ;;  %v7705_v15 = vld [vmem:[#allocation4 + $0x248] ss:$16 sps:$4 sm:$0xff]  }
 0x5a1   : > { %5736 = vmatpush1.bf16.msra.mxu0 %v7582_v24  ;;  %5806 = vmatprep.mubr.bf16.mxu1 %v9639_v47  ;;  %v7636_v24 = vld [vmem:[#allocation4 + $0x5a0] ss:$16 sps:$4 sm:$0xff]  }
 0x5a2   : > { %5777 = vmatpush1.bf16.msra.mxu1 %v7585_v39  ;;  %5737 = vmatprep.subr.bf16.mxu0 %v7590_v43  ;;  %v7639_v39 = vld [vmem:[#allocation4 + $0x7a0] ss:$16 sps:$4 sm:$0xff]   ;;  %v7644_v43 = vld [vmem:[#allocation4 + $0x584] ss:$16 sps:$4 sm:$0xff]  }
 0x5a3   : > { %5778 = vmatprep.subr.bf16.mxu1 %v7593_v62  ;;  %v7647_v62 = vld [vmem:[#allocation4 + $0x784] ss:$16 sps:$4 sm:$0xff]  }
 0x5a5   : > { %5738 = vmatpush1.bf16.msra.mxu0 %v7588_v54  ;;  %v7648_v54 = vld [vmem:[#allocation4 + $0x560] ss:$16 sps:$4 sm:$0xff]  }
 0x5a6   : > { %5779 = vmatpush1.bf16.msra.mxu1 %v7591_v22  ;;  %5739 = vmatprep.subr.bf16.mxu0 %v7596_v41  ;;  %v7651_v22 = vld [vmem:[#allocation4 + $0x760] ss:$16 sps:$4 sm:$0xff]   ;;  %v7656_v41 = vld [vmem:[#allocation4 + $0x544] ss:$16 sps:$4 sm:$0xff]  }
 0x5a7   : > { %5780 = vmatprep.subr.bf16.mxu1 %v7599_v3  ;;  %v7659_v3 = vld [vmem:[#allocation4 + $0x744] ss:$16 sps:$4 sm:$0xff]  }
 0x5a9   : > { %5740 = vmatpush1.bf16.msra.mxu0 %v7594_v40  ;;  %v7662_v40 = vld [vmem:[#allocation4 + $0x524] ss:$16 sps:$4 sm:$0xff]  }
 0x5aa   : > { %5781 = vmatpush1.bf16.msra.mxu1 %v7597_v51  ;;  %5741 = vmatprep.subr.bf16.mxu0 %v7602_v35  ;;  %v7665_v51 = vld [vmem:[#allocation4 + $0x724] ss:$16 sps:$4 sm:$0xff]   ;;  %v7660_v35 = vld [vmem:[#allocation4 + $0x520] ss:$16 sps:$4 sm:$0xff]  }
 0x5ab   : > { %5782 = vmatprep.subr.bf16.mxu1 %v7605_v52  ;;  %v7663_v52 = vld [vmem:[#allocation4 + $0x720] ss:$16 sps:$4 sm:$0xff]  }
 0x5ad   : > { %5742 = vmatpush1.bf16.msra.mxu0 %v7600_v10  ;;  %v7666_v10 = vld [vmem:[#allocation4 + $0x500] ss:$16 sps:$4 sm:$0xff]  }
 0x5ae   : > { %5783 = vmatpush1.bf16.msra.mxu1 %v7603_v29  ;;  %5743 = vmatprep.subr.bf16.mxu0 %v7608_v60  ;;  %v7669_v29 = vld [vmem:[#allocation4 + $0x700] ss:$16 sps:$4 sm:$0xff]   ;;  %v7674_v60 = vld [vmem:[#allocation4 + $0xec] ss:$16 sps:$4 sm:$0xff]  }
 0x5af   : > { %5784 = vmatprep.subr.bf16.mxu1 %v7611_v59  ;;  %v7677_v59 = vld [vmem:[#allocation4 + $0x2ec] ss:$16 sps:$4 sm:$0xff]  }
 0x5b1   : > { %5744 = vmatpush1.bf16.msra.mxu0 %v7606_v37  ;;  %v9649_v37 = vpack.c.bf16 %v9633_v17, %v9633_v17  ;;  %v7707_v17 = vld [vmem:[#allocation4 + $0x24c] ss:$16 sps:$4 sm:$0xff]  }
 0x5b2   : > { %5785 = vmatpush1.bf16.msra.mxu1 %v7609_v49  ;;  %5745 = vmatprep.subr.bf16.mxu0 %v7614_v46  ;;  %v7672_v49 = vld [vmem:[#allocation4 + $0xe8] ss:$16 sps:$4 sm:$0xff]  }
 0x5b3   : > { %5786 = vmatprep.subr.bf16.mxu1 %v7617_v58  ;;  %v7675_v46 = vld [vmem:[#allocation4 + $0x2e8] ss:$16 sps:$4 sm:$0xff]   ;;  %v7680_v58 = vld [vmem:[#allocation4 + $0xcc] ss:$16 sps:$4 sm:$0xff]  }
 0x5b5   : > { %5746 = vmatpush1.bf16.msra.mxu0 %v7612_v8  ;;  %v7678_v8 = vld [vmem:[#allocation4 + $0xc8] ss:$16 sps:$4 sm:$0xff]  }
 0x5b6   : > { %5787 = vmatpush1.bf16.msra.mxu1 %v7615_v31  ;;  %5747 = vmatprep.subr.bf16.mxu0 %v7620_v4  ;;  %v7686_v31 = vld [vmem:[#allocation4 + $0xac] ss:$16 sps:$4 sm:$0xff]  }
 0x5b7   : > { %5788 = vmatprep.subr.bf16.mxu1 %v7623_v21  ;;  %v7689_v4 = vld [vmem:[#allocation4 + $0x2ac] ss:$16 sps:$4 sm:$0xff]   ;;  %v7684_v21 = vld [vmem:[#allocation4 + $0xa8] ss:$16 sps:$4 sm:$0xff]  }
 0x5b9   : > { %5748 = vmatpush1.bf16.msra.mxu0 %v7618_v20  ;;  %v7692_v20 = vld [vmem:[#allocation4 + $0x8c] ss:$16 sps:$4 sm:$0xff]  }
 0x5ba   : > { %5789 = vmatpush1.bf16.msra.mxu1 %v7621_v57  ;;  %5749 = vmatprep.subr.bf16.mxu0 %v7626_v19  ;;  %v7693_v57 = vld [vmem:[#allocation4 + $0x288] ss:$16 sps:$4 sm:$0xff]   ;;  %v7698_v19 = vld [vmem:[#allocation4 + $0x6c] ss:$16 sps:$4 sm:$0xff]  }
 0x5bb   : > { %5790 = vmatprep.subr.bf16.mxu1 %v7629_v12  ;;  %v7701_v12 = vld [vmem:[#allocation4 + $0x26c] ss:$16 sps:$4 sm:$0xff]  }
 0x5bd   : > { %5750 = vmatpush2.bf16.msra.mxu0 %v7624_v36  ;;  %v7702_v36 = vld [vmem:[#allocation4 + $0x48] ss:$16 sps:$4 sm:$0xff]  }
 0x5be   : > { %5791 = vmatpush2.bf16.msra.mxu1 %v7627_v26  ;;  %5751 = vmatprep.subr.bf16.mxu0 %v7632_v55  ;;  %v7710_v26 = vld [vmem:[#allocation4 + $0x2c] ss:$16 sps:$4 sm:$0xff]  }
 0x5bf   : > { %5792 = vmatprep.subr.bf16.mxu1 %v7635_v0  ;;  %v7713_v55 = vld [vmem:[#allocation4 + $0x22c] ss:$16 sps:$4 sm:$0xff]   ;;  %v7708_v0 = vld [vmem:[#allocation4 + $0x28] ss:$16 sps:$4 sm:$0xff]  }
 0x5c1   : > { %5752 = vmatpush2.bf16.msra.mxu0 %v7630_v33  ;;  %v7711_v33 = vld [vmem:[#allocation4 + $0x228] ss:$16 sps:$4 sm:$0xff]  }
 0x5c2   : > { %5793 = vmatpush2.bf16.msra.mxu1 %v7633_v34  ;;  %5753 = vmatprep.subr.bf16.mxu0 %v7638_v27  ;;  %v7716_v34 = vld [vmem:[#allocation4 + $0xc] ss:$16 sps:$4 sm:$0xff]  }
 0x5c3   : > { %5794 = vmatprep.subr.bf16.mxu1 %v7641_v6  ;;  %v7719_v27 = vld [vmem:[#allocation4 + $0x20c] ss:$16 sps:$4 sm:$0xff]   ;;  %v7714_v6 = vld [vmem:[#allocation4 + $0x8] ss:$16 sps:$4 sm:$0xff]  }
 0x5c5   : > { %5754 = vmatpush2.bf16.msra.mxu0 %v7636_v24  ;;  %v7717_v24 = vld [vmem:[#allocation4 + $0x208] ss:$16 sps:$4 sm:$0xff]  }
 0x5c6   : > { %5795 = vmatpush2.bf16.msra.mxu1 %v7639_v39  ;;  %5755 = vmatprep.subr.bf16.mxu0 %v7644_v43  ;;  %v7722_v39 = vld [vmem:[#allocation4 + $0x1ec] ss:$16 sps:$4 sm:$0xff]  }
 0x5c7   : > { %5796 = vmatprep.subr.bf16.mxu1 %v7647_v62  ;;  %v7725_v43 = vld [vmem:[#allocation4 + $0x3ec] ss:$16 sps:$4 sm:$0xff]   ;;  %v7720_v62 = vld [vmem:[#allocation4 + $0x1e8] ss:$16 sps:$4 sm:$0xff]  }
 0x5c9   : > { %5756 = vmatpush2.bf16.msra.mxu0 %v7642_v38  ;;  %v7723_v38 = vld [vmem:[#allocation4 + $0x3e8] ss:$16 sps:$4 sm:$0xff]  }
 0x5ca   : > { %5797 = vmatpush2.bf16.msra.mxu1 %v7645_v14  ;;  %5757 = vmatprep.subr.bf16.mxu0 %v7650_v13  ;;  %v7728_v14 = vld [vmem:[#allocation4 + $0x1cc] ss:$16 sps:$4 sm:$0xff]  }
 0x5cb   : > { %5798 = vmatprep.subr.bf16.mxu1 %v7653_v28  ;;  %v7731_v13 = vld [vmem:[#allocation4 + $0x3cc] ss:$16 sps:$4 sm:$0xff]   ;;  %v7726_v28 = vld [vmem:[#allocation4 + $0x1c8] ss:$16 sps:$4 sm:$0xff]  }
 0x5cd   : > { %5758 = vmatpush2.bf16.msra.mxu0 %v7648_v54  ;;  %v7729_v54 = vld [vmem:[#allocation4 + $0x3c8] ss:$16 sps:$4 sm:$0xff]  }
 0x5ce   : > { %5799 = vmatpush2.bf16.msra.mxu1 %v7651_v22  ;;  %5759 = vmatprep.subr.bf16.mxu0 %v7656_v41  ;;  %v7734_v22 = vld [vmem:[#allocation4 + $0x1ac] ss:$16 sps:$4 sm:$0xff]  }
 0x5cf   : > { %5800 = vmatprep.subr.bf16.mxu1 %v7659_v3  ;;  %v7737_v41 = vld [vmem:[#allocation4 + $0x3ac] ss:$16 sps:$4 sm:$0xff]   ;;  %v7732_v3 = vld [vmem:[#allocation4 + $0x1a8] ss:$16 sps:$4 sm:$0xff]  }
 0x5d1   : > { %5760 = vmatpush2.bf16.msra.mxu0 %v7654_v45  ;;  %v7735_v45 = vld [vmem:[#allocation4 + $0x3a8] ss:$16 sps:$4 sm:$0xff]  }
 0x5d2   : > { %5801 = vmatpush2.bf16.msra.mxu1 %v7657_v18  ;;  %5761 = vmatprep.subr.bf16.mxu0 %v7662_v40  ;;  %v7740_v18 = vld [vmem:[#allocation4 + $0x18c] ss:$16 sps:$4 sm:$0xff]  }
 0x5d3   : > { %5802 = vmatprep.subr.bf16.mxu1 %v7665_v51  ;;  %v7743_v40 = vld [vmem:[#allocation4 + $0x38c] ss:$16 sps:$4 sm:$0xff]   ;;  %v7738_v51 = vld [vmem:[#allocation4 + $0x188] ss:$16 sps:$4 sm:$0xff]  }
 0x5d5   : > { %5762 = vmatpush2.bf16.msra.mxu0 %v7660_v35  ;;  %v7741_v35 = vld [vmem:[#allocation4 + $0x388] ss:$16 sps:$4 sm:$0xff]  }
 0x5d6   : > { %5803 = vmatpush2.bf16.msra.mxu1 %v7663_v52  ;;  %5763 = vmatprep.subr.bf16.mxu0 %v7668_v16  ;;  %v7746_v52 = vld [vmem:[#allocation4 + $0x16c] ss:$16 sps:$4 sm:$0xff]  }
 0x5d7   : > { %5804 = vmatprep.subr.bf16.mxu1 %v7671_v53  ;;  %v7749_v16 = vld [vmem:[#allocation4 + $0x36c] ss:$16 sps:$4 sm:$0xff]   ;;  %v7744_v53 = vld [vmem:[#allocation4 + $0x168] ss:$16 sps:$4 sm:$0xff]  }
 0x5d9   : > { %5764 = vmatpush2.bf16.msra.mxu0 %v7666_v10  ;;  %v7747_v10 = vld [vmem:[#allocation4 + $0x368] ss:$16 sps:$4 sm:$0xff]  }
 0x5da   : > { %5805 = vmatpush2.bf16.msra.mxu1 %v7669_v29  ;;  %5815 = vmatprep.subr.bf16.mxu0 %v7674_v60  ;;  %v7752_v29 = vld [vmem:[#allocation4 + $0x14c] ss:$16 sps:$4 sm:$0xff]  }
 0x5db   : > { %5856 = vmatprep.subr.bf16.mxu1 %v7677_v59  ;;  %v7755_v60 = vld [vmem:[#allocation4 + $0x34c] ss:$16 sps:$4 sm:$0xff]   ;;  %v7750_v59 = vld [vmem:[#allocation4 + $0x148] ss:$16 sps:$4 sm:$0xff]  }
 0x5dc   : > { %5766 = vmatmul.mubr.bf16.vlgmr.msra.gmra.mxu0 %v9645_v63 }
 0x5dd   : > { %5807 = vmatmul.mubr.bf16.vlgmr.msra.gmra.mxu1 %v9649_v37  ;;  %5816 = vmatpush1.bf16.msra.mxu0 %v7672_v49  ;;  %v7753_v49 = vld [vmem:[#allocation4 + $0x348] ss:$16 sps:$4 sm:$0xff]  }
 0x5de   : > { %5857 = vmatpush1.bf16.msra.mxu1 %v7675_v46  ;;  %5817 = vmatprep.subr.bf16.mxu0 %v7680_v58  ;;  %v7758_v46 = vld [vmem:[#allocation4 + $0x12c] ss:$16 sps:$4 sm:$0xff]  }
 0x5df   : > { %5858 = vmatprep.subr.bf16.mxu1 %v7683_v7  ;;  %5847 = vmatprep.mubr.bf16.mxu0 %v9605_v48  ;;  %v7699_v48 = vld [vmem:[#allocation4 + $0x268] ss:$16 sps:$4 sm:$0xff]   ;;  %v7761_v58 = vld [vmem:[#allocation4 + $0x32c] ss:$16 sps:$4 sm:$0xff]  }
 0x5e0   : > { %5888 = vmatprep.mubr.bf16.mxu1 %v9608_v44  ;;  %v7704_v44 = vld [vmem:[#allocation4 + $0x4c] ss:$16 sps:$4 sm:$0xff]   ;;  %v7756_v7 = vld [vmem:[#allocation4 + $0x128] ss:$16 sps:$4 sm:$0xff]  }
 0x5e1   : > { %5818 = vmatpush1.bf16.msra.mxu0 %v7678_v8  ;;  %v7759_v8 = vld [vmem:[#allocation4 + $0x328] ss:$16 sps:$4 sm:$0xff]  }
 0x5e2   : > { %5859 = vmatpush1.bf16.msra.mxu1 %v7681_v1  ;;  %5819 = vmatprep.subr.bf16.mxu0 %v7686_v31  ;;  %v7764_v1 = vld [vmem:[#allocation4 + $0x10c] ss:$16 sps:$4 sm:$0xff]  }
 0x5e3   : > { %5860 = vmatprep.subr.bf16.mxu1 %v7689_v4  ;;  %v7767_v31 = vld [vmem:[#allocation4 + $0x30c] ss:$16 sps:$4 sm:$0xff]   ;;  %v7762_v4 = vld [vmem:[#allocation4 + $0x108] ss:$16 sps:$4 sm:$0xff]  }
 0x5e5   : > { %5820 = vmatpush1.bf16.msra.mxu0 %v7684_v21  ;;  %v7765_v21 = vld [vmem:[#allocation4 + $0x308] ss:$16 sps:$4 sm:$0xff]  }
 0x5e6   : > { %5861 = vmatpush1.bf16.msra.mxu1 %v7687_v32  ;;  %5821 = vmatprep.subr.bf16.mxu0 %v7692_v20  ;;  %v7770_v32 = vld [vmem:[#allocation4 + $0x4ec] ss:$16 sps:$4 sm:$0xff]  }
 0x5e7   : > { %5862 = vmatprep.subr.bf16.mxu1 %v7695_v56  ;;  %v7773_v20 = vld [vmem:[#allocation4 + $0x6ec] ss:$16 sps:$4 sm:$0xff]   ;;  %v7768_v56 = vld [vmem:[#allocation4 + $0x4e8] ss:$16 sps:$4 sm:$0xff]  }
 0x5e9   : > { %5822 = vmatpush1.bf16.msra.mxu0 %v7690_v2  ;;  %v7771_v2 = vld [vmem:[#allocation4 + $0x6e8] ss:$16 sps:$4 sm:$0xff]  }
 0x5ea   : > { %5863 = vmatpush1.bf16.msra.mxu1 %v7693_v57  ;;  %5823 = vmatprep.subr.bf16.mxu0 %v7698_v19  ;;  %v7776_v57 = vld [vmem:[#allocation4 + $0x4cc] ss:$16 sps:$4 sm:$0xff]  }
 0x5eb   : > { %5864 = vmatprep.subr.bf16.mxu1 %v7701_v12  ;;  %v7779_v19 = vld [vmem:[#allocation4 + $0x6cc] ss:$16 sps:$4 sm:$0xff]   ;;  %v7774_v12 = vld [vmem:[#allocation4 + $0x4c8] ss:$16 sps:$4 sm:$0xff]  }
 0x5ed   : > { %5824 = vmatpush1.bf16.msra.mxu0 %v7696_v11  ;;  %v7777_v11 = vld [vmem:[#allocation4 + $0x6c8] ss:$16 sps:$4 sm:$0xff]  }
 0x5ee   : > { %5865 = vmatpush1.bf16.msra.mxu1 %v7699_v48  ;;  %5825 = vmatprep.subr.bf16.mxu0 %v7704_v44  ;;  %v7782_v48 = vld [vmem:[#allocation4 + $0x4ac] ss:$16 sps:$4 sm:$0xff]  }
 0x5ef   : > { %5866 = vmatprep.subr.bf16.mxu1 %v7707_v17  ;;  %v7785_v44 = vld [vmem:[#allocation4 + $0x6ac] ss:$16 sps:$4 sm:$0xff]   ;;  %v7780_v17 = vld [vmem:[#allocation4 + $0x4a8] ss:$16 sps:$4 sm:$0xff]  }
 0x5f1   : > { %5826 = vmatpush1.bf16.msra.mxu0 %v7702_v36  ;;  %v7783_v36 = vld [vmem:[#allocation4 + $0x6a8] ss:$16 sps:$4 sm:$0xff]  }
 0x5f2   : > { %5867 = vmatpush1.bf16.msra.mxu1 %v7705_v15  ;;  %5827 = vmatprep.subr.bf16.mxu0 %v7710_v26  ;;  %v7788_v15 = vld [vmem:[#allocation4 + $0x48c] ss:$16 sps:$4 sm:$0xff]   ;;  %v7786_v26 = vld [vmem:[#allocation4 + $0x488] ss:$16 sps:$4 sm:$0xff]  }
 0x5f3   : > { %5868 = vmatprep.subr.bf16.mxu1 %v7713_v55  ;;  %v7794_v55 = vld [vmem:[#allocation4 + $0x46c] ss:$16 sps:$4 sm:$0xff]  }
 0x5f5   : > { %5828 = vmatpush1.bf16.msra.mxu0 %v7708_v0  ;;  %v7797_v0 = vld [vmem:[#allocation4 + $0x66c] ss:$16 sps:$4 sm:$0xff]  }
 0x5f6   : > { %5869 = vmatpush1.bf16.msra.mxu1 %v7711_v33  ;;  %5829 = vmatprep.subr.bf16.mxu0 %v7716_v34  ;;  %v7792_v33 = vld [vmem:[#allocation4 + $0x468] ss:$16 sps:$4 sm:$0xff]  }
 0x5f7   : > { %5870 = vmatprep.subr.bf16.mxu1 %v7719_v27  ;;  %v7795_v34 = vld [vmem:[#allocation4 + $0x668] ss:$16 sps:$4 sm:$0xff]   ;;  %v7800_v27 = vld [vmem:[#allocation4 + $0x44c] ss:$16 sps:$4 sm:$0xff]  }
 0x5f9   : > { %5830 = vmatpush1.bf16.msra.mxu0 %v7714_v6  ;;  %v7801_v6 = vld [vmem:[#allocation4 + $0x648] ss:$16 sps:$4 sm:$0xff]  }
 0x5fa   : > { %5871 = vmatpush1.bf16.msra.mxu1 %v7717_v24  ;;  %5831 = vmatprep.subr.bf16.mxu0 %v7722_v39  ;;  %v7806_v24 = vld [vmem:[#allocation4 + $0x42c] ss:$16 sps:$4 sm:$0xff]  }
 0x5fb   : > { %5872 = vmatprep.subr.bf16.mxu1 %v7725_v43  ;;  %v7809_v39 = vld [vmem:[#allocation4 + $0x62c] ss:$16 sps:$4 sm:$0xff]   ;;  %v7804_v43 = vld [vmem:[#allocation4 + $0x428] ss:$16 sps:$4 sm:$0xff]  }
 0x5fd   : > { %5832 = vmatpush2.bf16.msra.mxu0 %v7720_v62  ;;  %v7807_v62 = vld [vmem:[#allocation4 + $0x628] ss:$16 sps:$4 sm:$0xff]  }
 0x5fe   : > { %5873 = vmatpush2.bf16.msra.mxu1 %v7723_v38  ;;  %5833 = vmatprep.subr.bf16.mxu0 %v7728_v14  ;;  %v7812_v38 = vld [vmem:[#allocation4 + $0x40c] ss:$16 sps:$4 sm:$0xff]  }
 0x5ff   : > { %5874 = vmatprep.subr.bf16.mxu1 %v7731_v13  ;;  %v7815_v14 = vld [vmem:[#allocation4 + $0x60c] ss:$16 sps:$4 sm:$0xff]   ;;  %v7810_v13 = vld [vmem:[#allocation4 + $0x408] ss:$16 sps:$4 sm:$0xff]  }
 0x601   : > { %5834 = vmatpush2.bf16.msra.mxu0 %v7726_v28  ;;  %v7813_v28 = vld [vmem:[#allocation4 + $0x608] ss:$16 sps:$4 sm:$0xff]  }
 0x602   : > { %5875 = vmatpush2.bf16.msra.mxu1 %v7729_v54  ;;  %5835 = vmatprep.subr.bf16.mxu0 %v7734_v22  ;;  %v7818_v54 = vld [vmem:[#allocation4 + $0x5ec] ss:$16 sps:$4 sm:$0xff]  }
 0x603   : > { %5876 = vmatprep.subr.bf16.mxu1 %v7737_v41  ;;  %v7821_v22 = vld [vmem:[#allocation4 + $0x7ec] ss:$16 sps:$4 sm:$0xff]   ;;  %v7816_v41 = vld [vmem:[#allocation4 + $0x5e8] ss:$16 sps:$4 sm:$0xff]  }
 0x605   : > { %5836 = vmatpush2.bf16.msra.mxu0 %v7732_v3  ;;  %v7819_v3 = vld [vmem:[#allocation4 + $0x7e8] ss:$16 sps:$4 sm:$0xff]  }
 0x606   : > { %5877 = vmatpush2.bf16.msra.mxu1 %v7735_v45  ;;  %5837 = vmatprep.subr.bf16.mxu0 %v7740_v18  ;;  %v7824_v45 = vld [vmem:[#allocation4 + $0x5cc] ss:$16 sps:$4 sm:$0xff]  }
 0x607   : > { %5878 = vmatprep.subr.bf16.mxu1 %v7743_v40  ;;  %v7827_v18 = vld [vmem:[#allocation4 + $0x7cc] ss:$16 sps:$4 sm:$0xff]   ;;  %v7822_v40 = vld [vmem:[#allocation4 + $0x5c8] ss:$16 sps:$4 sm:$0xff]  }
 0x609   : > { %5838 = vmatpush2.bf16.msra.mxu0 %v7738_v51  ;;  %v7825_v51 = vld [vmem:[#allocation4 + $0x7c8] ss:$16 sps:$4 sm:$0xff]  }
 0x60a   : > { %5879 = vmatpush2.bf16.msra.mxu1 %v7741_v35  ;;  %5839 = vmatprep.subr.bf16.mxu0 %v7746_v52  ;;  %v7830_v35 = vld [vmem:[#allocation4 + $0x5ac] ss:$16 sps:$4 sm:$0xff]  }
 0x60b   : > { %5880 = vmatprep.subr.bf16.mxu1 %v7749_v16  ;;  %v7833_v52 = vld [vmem:[#allocation4 + $0x7ac] ss:$16 sps:$4 sm:$0xff]   ;;  %v7828_v16 = vld [vmem:[#allocation4 + $0x5a8] ss:$16 sps:$4 sm:$0xff]  }
 0x60d   : > { %5840 = vmatpush2.bf16.msra.mxu0 %v7744_v53  ;;  %v7831_v53 = vld [vmem:[#allocation4 + $0x7a8] ss:$16 sps:$4 sm:$0xff]  }
 0x60e   : > { %5881 = vmatpush2.bf16.msra.mxu1 %v7747_v10  ;;  %5841 = vmatprep.subr.bf16.mxu0 %v7752_v29  ;;  %v7836_v10 = vld [vmem:[#allocation4 + $0x58c] ss:$16 sps:$4 sm:$0xff]  }
 0x60f   : > { %5882 = vmatprep.subr.bf16.mxu1 %v7755_v60  ;;  %v7839_v29 = vld [vmem:[#allocation4 + $0x78c] ss:$16 sps:$4 sm:$0xff]   ;;  %v7834_v60 = vld [vmem:[#allocation4 + $0x588] ss:$16 sps:$4 sm:$0xff]  }
 0x611   : > { %5842 = vmatpush2.bf16.msra.mxu0 %v7750_v59  ;;  %v7837_v59 = vld [vmem:[#allocation4 + $0x788] ss:$16 sps:$4 sm:$0xff]  }
 0x612   : > { %5883 = vmatpush2.bf16.msra.mxu1 %v7753_v49  ;;  %5843 = vmatprep.subr.bf16.mxu0 %v7758_v46  ;;  %v7842_v49 = vld [vmem:[#allocation4 + $0x56c] ss:$16 sps:$4 sm:$0xff]  }
 0x613   : > { %5884 = vmatprep.subr.bf16.mxu1 %v7761_v58  ;;  %v7845_v46 = vld [vmem:[#allocation4 + $0x76c] ss:$16 sps:$4 sm:$0xff]   ;;  %v7840_v58 = vld [vmem:[#allocation4 + $0x568] ss:$16 sps:$4 sm:$0xff]  }
 0x615   : > { %5844 = vmatpush2.bf16.msra.mxu0 %v7756_v7  ;;  %v7843_v7 = vld [vmem:[#allocation4 + $0x768] ss:$16 sps:$4 sm:$0xff]  }
 0x616   : > { %5885 = vmatpush2.bf16.msra.mxu1 %v7759_v8  ;;  %5845 = vmatprep.subr.bf16.mxu0 %v7764_v1  ;;  %v7848_v8 = vld [vmem:[#allocation4 + $0x54c] ss:$16 sps:$4 sm:$0xff]  }
 0x617   : > { %5886 = vmatprep.subr.bf16.mxu1 %v7767_v31  ;;  %v7851_v1 = vld [vmem:[#allocation4 + $0x74c] ss:$16 sps:$4 sm:$0xff]   ;;  %v7846_v31 = vld [vmem:[#allocation4 + $0x548] ss:$16 sps:$4 sm:$0xff]  }
 0x619   : > { %5846 = vmatpush2.bf16.msra.mxu0 %v7762_v4  ;;  %v7849_v4 = vld [vmem:[#allocation4 + $0x748] ss:$16 sps:$4 sm:$0xff]  }
 0x61a   : > { %5887 = vmatpush2.bf16.msra.mxu1 %v7765_v21  ;;  %5897 = vmatprep.subr.bf16.mxu0 %v7770_v32  ;;  %v7854_v21 = vld [vmem:[#allocation4 + $0x52c] ss:$16 sps:$4 sm:$0xff]  }
 0x61b   : > { %5938 = vmatprep.subr.bf16.mxu1 %v7773_v20  ;;  %v7857_v32 = vld [vmem:[#allocation4 + $0x72c] ss:$16 sps:$4 sm:$0xff]   ;;  %v7852_v20 = vld [vmem:[#allocation4 + $0x528] ss:$16 sps:$4 sm:$0xff]  }
 0x61c   : > { %5848 = vmatmul.mubr.bf16.vlgmr.msra.gmra.mxu0 %v9610_v5  ;;  %v7791_v5 = vld [vmem:[#allocation4 + $0x68c] ss:$16 sps:$4 sm:$0xff]  }
 0x61d   : > { %5889 = vmatmul.mubr.bf16.vlgmr.msra.gmra.mxu1 %v9612_v25  ;;  %5898 = vmatpush1.bf16.msra.mxu0 %v7768_v56  ;;  %v7789_v25 = vld [vmem:[#allocation4 + $0x688] ss:$16 sps:$4 sm:$0xff]  }
 0x61e   : > { %5939 = vmatpush1.bf16.msra.mxu1 %v7771_v2  ;;  %5899 = vmatprep.subr.bf16.mxu0 %v7776_v57  ;;  %v7855_v56 = vld [vmem:[#allocation4 + $0x728] ss:$16 sps:$4 sm:$0xff]   ;;  %v7860_v2 = vld [vmem:[#allocation4 + $0x50c] ss:$16 sps:$4 sm:$0xff]  }
 0x61f   : > { %5940 = vmatprep.subr.bf16.mxu1 %v7779_v19  ;;  %5929 = vmatprep.mubr.bf16.mxu0 %v9635_v42  ;;  %v7803_v42 = vld [vmem:[#allocation4 + $0x64c] ss:$16 sps:$4 sm:$0xff]   ;;  %v7858_v19 = vld [vmem:[#allocation4 + $0x508] ss:$16 sps:$4 sm:$0xff]  }
 0x620   : > { %5970 = vmatprep.mubr.bf16.mxu1 %v9639_v47  ;;  %v7798_v47 = vld [vmem:[#allocation4 + $0x448] ss:$16 sps:$4 sm:$0xff]   ;;  %v7863_v57 = vld [vmem:[#allocation4 + $0x70c] ss:$16 sps:$4 sm:$0xff]  }
 0x621   : > { %5900 = vmatpush1.bf16.msra.mxu0 %v7774_v12  ;;  %v7861_v12 = vld [vmem:[#allocation4 + $0x708] ss:$16 sps:$4 sm:$0xff]  }
 0x622   : > { %5941 = vmatpush1.bf16.msra.mxu1 %v7777_v11  ;;  %5901 = vmatprep.subr.bf16.mxu0 %v7782_v48  ;;  %v7866_v11 = vld [vmem:[%s9958_s9 + $0x74] ss:$8 sps:$4 sm:$0xff]   ;;  %v7864_v48 = vld [vmem:[%s9958_s9 + $0x70] ss:$8 sps:$4 sm:$0xff]  }
 0x623   : > { %5942 = vmatprep.subr.bf16.mxu1 %v7785_v44  ;;  %v7869_v44 = vld [vmem:[%s9958_s9 + $0x64] ss:$8 sps:$4 sm:$0xff]  }
 0x625   : > { %5902 = vmatpush1.bf16.msra.mxu0 %v7780_v17 }
 0x626   : > { %5943 = vmatpush1.bf16.msra.mxu1 %v7783_v36  ;;  %5903 = vmatprep.subr.bf16.mxu0 %v7788_v15  ;;  %v7867_v15 = vld [vmem:[%s9958_s9 + $0x60] ss:$8 sps:$4 sm:$0xff]  }
 0x627   : > { %5944 = vmatprep.subr.bf16.mxu1 %v7791_v5 }
 0x629   : > { %5904 = vmatpush1.bf16.msra.mxu0 %v7786_v26 }
 0x62a   : > { %5945 = vmatpush1.bf16.msra.mxu1 %v7789_v25  ;;  %5905 = vmatprep.subr.bf16.mxu0 %v7794_v55  ;;  %v7872_v25 = vld [vmem:[%s9958_s9 + $0x54] ss:$8 sps:$4 sm:$0xff]  }
 0x62b   : > { %5946 = vmatprep.subr.bf16.mxu1 %v7797_v0 }
 0x62d   : > { %5906 = vmatpush1.bf16.msra.mxu0 %v7792_v33 }
 0x62e   : > { %5947 = vmatpush1.bf16.msra.mxu1 %v7795_v34  ;;  %5907 = vmatprep.subr.bf16.mxu0 %v7800_v27  ;;  %v7875_v34 = vld [vmem:[%s9958_s9 + $0x44] ss:$8 sps:$4 sm:$0xff]   ;;  %v7912_v27 = vld [vmem:[%s9958_s9 + $0x170] ss:$8 sps:$4 sm:$0xff]  }
 0x62f   : > { %5948 = vmatprep.subr.bf16.mxu1 %v7803_v42  ;;  %v7914_v42 = vld [vmem:[%s9958_s9 + $0x174] ss:$8 sps:$4 sm:$0xff]  }
 0x631   : > { %5908 = vmatpush1.bf16.msra.mxu0 %v7798_v47  ;;  %v7917_v47 = vld [vmem:[%s9958_s9 + $0x164] ss:$8 sps:$4 sm:$0xff]  }
 0x632   : > { %5949 = vmatpush1.bf16.msra.mxu1 %v7801_v6  ;;  %5909 = vmatprep.subr.bf16.mxu0 %v7806_v24  ;;  %v7873_v6 = vld [vmem:[%s9958_s9 + $0x40] ss:$8 sps:$4 sm:$0xff]  }
 0x633   : > { %5950 = vmatprep.subr.bf16.mxu1 %v7809_v39  ;;  %v7915_v24 = vld [vmem:[%s9958_s9 + $0x160] ss:$8 sps:$4 sm:$0xff]   ;;  %v7878_v39 = vld [vmem:[%s9958_s9 + $0x34] ss:$8 sps:$4 sm:$0xff]  }
 0x635   : > { %5910 = vmatpush1.bf16.msra.mxu0 %v7804_v43  ;;  %v7920_v43 = vld [vmem:[%s9958_s9 + $0x154] ss:$8 sps:$4 sm:$0xff]  }
 0x636   : > { %5951 = vmatpush1.bf16.msra.mxu1 %v7807_v62  ;;  %5911 = vmatprep.subr.bf16.mxu0 %v7812_v38  ;;  %v7876_v62 = vld [vmem:[%s9958_s9 + $0x30] ss:$8 sps:$4 sm:$0xff]  }
 0x637   : > { %5952 = vmatprep.subr.bf16.mxu1 %v7815_v14  ;;  %v7918_v38 = vld [vmem:[%s9958_s9 + $0x150] ss:$8 sps:$4 sm:$0xff]   ;;  %v7881_v14 = vld [vmem:[%s9958_s9 + $0x24] ss:$8 sps:$4 sm:$0xff]  }
 0x639   : > { %5912 = vmatpush1.bf16.msra.mxu0 %v7810_v13  ;;  %v7923_v13 = vld [vmem:[%s9958_s9 + $0x144] ss:$8 sps:$4 sm:$0xff]  }
 0x63a   : > { %5953 = vmatpush1.bf16.msra.mxu1 %v7813_v28  ;;  %5913 = vmatprep.subr.bf16.mxu0 %v7818_v54  ;;  %v7879_v28 = vld [vmem:[%s9958_s9 + $0x20] ss:$8 sps:$4 sm:$0xff]  }
 0x63b   : > { %5954 = vmatprep.subr.bf16.mxu1 %v7821_v22  ;;  %v7921_v54 = vld [vmem:[%s9958_s9 + $0x140] ss:$8 sps:$4 sm:$0xff]   ;;  %v7884_v22 = vld [vmem:[%s9958_s9 + $0x14] ss:$8 sps:$4 sm:$0xff]  }
 0x63d   : > { %5914 = vmatpush2.bf16.msra.mxu0 %v7816_v41  ;;  %v7926_v41 = vld [vmem:[%s9958_s9 + $0x134] ss:$8 sps:$4 sm:$0xff]  }
 0x63e   : > { %5955 = vmatpush2.bf16.msra.mxu1 %v7819_v3  ;;  %5915 = vmatprep.subr.bf16.mxu0 %v7824_v45  ;;  %v7882_v3 = vld [vmem:[%s9958_s9 + $0x10] ss:$8 sps:$4 sm:$0xff]  }
 0x63f   : > { %5956 = vmatprep.subr.bf16.mxu1 %v7827_v18  ;;  %v7924_v45 = vld [vmem:[%s9958_s9 + $0x130] ss:$8 sps:$4 sm:$0xff]   ;;  %v7887_v18 = vld [vmem:[%s9958_s9 + $0x4] ss:$8 sps:$4 sm:$0xff]  }
 0x641   : > { %5916 = vmatpush2.bf16.msra.mxu0 %v7822_v40  ;;  %v7929_v40 = vld [vmem:[%s9958_s9 + $0x124] ss:$8 sps:$4 sm:$0xff]  }
 0x642   : > { %5957 = vmatpush2.bf16.msra.mxu1 %v7825_v51  ;;  %5917 = vmatprep.subr.bf16.mxu0 %v7830_v35  ;;  %v7885_v51 = vld [vmem:[%s9958_s9] ss:$8 sps:$4 sm:$0xff]  }
 0x643   : > { %5958 = vmatprep.subr.bf16.mxu1 %v7833_v52  ;;  %v7927_v35 = vld [vmem:[%s9958_s9 + $0x120] ss:$8 sps:$4 sm:$0xff]   ;;  %v7890_v52 = vld [vmem:[%s9958_s9 + $0xf4] ss:$8 sps:$4 sm:$0xff]  }
 0x645   : > { %5918 = vmatpush2.bf16.msra.mxu0 %v7828_v16  ;;  %v7932_v16 = vld [vmem:[%s9958_s9 + $0x114] ss:$8 sps:$4 sm:$0xff]  }
 0x646   : > { %5959 = vmatpush2.bf16.msra.mxu1 %v7831_v53  ;;  %5919 = vmatprep.subr.bf16.mxu0 %v7836_v10  ;;  %v7888_v53 = vld [vmem:[%s9958_s9 + $0xf0] ss:$8 sps:$4 sm:$0xff]  }
 0x647   : > { %5960 = vmatprep.subr.bf16.mxu1 %v7839_v29  ;;  %v7930_v10 = vld [vmem:[%s9958_s9 + $0x110] ss:$8 sps:$4 sm:$0xff]   ;;  %v7893_v29 = vld [vmem:[%s9958_s9 + $0xe4] ss:$8 sps:$4 sm:$0xff]  }
 0x649   : > { %5920 = vmatpush2.bf16.msra.mxu0 %v7834_v60  ;;  %v7935_v60 = vld [vmem:[%s9958_s9 + $0x104] ss:$8 sps:$4 sm:$0xff]  }
 0x64a   : > { %5961 = vmatpush2.bf16.msra.mxu1 %v7837_v59  ;;  %5921 = vmatprep.subr.bf16.mxu0 %v7842_v49  ;;  %v7891_v59 = vld [vmem:[%s9958_s9 + $0xe0] ss:$8 sps:$4 sm:$0xff]  }
 0x64b   : > { %5962 = vmatprep.subr.bf16.mxu1 %v7845_v46  ;;  %v7933_v49 = vld [vmem:[%s9958_s9 + $0x100] ss:$8 sps:$4 sm:$0xff]   ;;  %v7896_v46 = vld [vmem:[%s9958_s9 + $0xd4] ss:$8 sps:$4 sm:$0xff]  }
 0x64d   : > { %5922 = vmatpush2.bf16.msra.mxu0 %v7840_v58  ;;  %v7938_v58 = vld [vmem:[%s9958_s9 + $0x1f4] ss:$8 sps:$4 sm:$0xff]  }
 0x64e   : > { %5963 = vmatpush2.bf16.msra.mxu1 %v7843_v7  ;;  %5923 = vmatprep.subr.bf16.mxu0 %v7848_v8  ;;  %v7894_v7 = vld [vmem:[%s9958_s9 + $0xd0] ss:$8 sps:$4 sm:$0xff]  }
 0x64f   : > { %5964 = vmatprep.subr.bf16.mxu1 %v7851_v1  ;;  %v7936_v8 = vld [vmem:[%s9958_s9 + $0x1f0] ss:$8 sps:$4 sm:$0xff]   ;;  %v7899_v1 = vld [vmem:[%s9958_s9 + $0xc4] ss:$8 sps:$4 sm:$0xff]  }
 0x651   : > { %5924 = vmatpush2.bf16.msra.mxu0 %v7846_v31  ;;  %v7941_v31 = vld [vmem:[%s9958_s9 + $0x1e4] ss:$8 sps:$4 sm:$0xff]  }
 0x652   : > { %5965 = vmatpush2.bf16.msra.mxu1 %v7849_v4  ;;  %5925 = vmatprep.subr.bf16.mxu0 %v7854_v21  ;;  %v7897_v4 = vld [vmem:[%s9958_s9 + $0xc0] ss:$8 sps:$4 sm:$0xff]  }
 0x653   : > { %5966 = vmatprep.subr.bf16.mxu1 %v7857_v32  ;;  %v7939_v21 = vld [vmem:[%s9958_s9 + $0x1e0] ss:$8 sps:$4 sm:$0xff]   ;;  %v7902_v32 = vld [vmem:[%s9958_s9 + $0xb4] ss:$8 sps:$4 sm:$0xff]  }
 0x655   : > { %5926 = vmatpush2.bf16.msra.mxu0 %v7852_v20  ;;  %v7944_v20 = vld [vmem:[%s9958_s9 + $0x1d4] ss:$8 sps:$4 sm:$0xff]  }
 0x656   : > { %5967 = vmatpush2.bf16.msra.mxu1 %v7855_v56  ;;  %5927 = vmatprep.subr.bf16.mxu0 %v7860_v2  ;;  %v7900_v56 = vld [vmem:[%s9958_s9 + $0xb0] ss:$8 sps:$4 sm:$0xff]  }
 0x657   : > { %5968 = vmatprep.subr.bf16.mxu1 %v7863_v57  ;;  %v7942_v2 = vld [vmem:[%s9958_s9 + $0x1d0] ss:$8 sps:$4 sm:$0xff]   ;;  %v7905_v57 = vld [vmem:[%s9958_s9 + $0xa4] ss:$8 sps:$4 sm:$0xff]  }
 0x659   : > { %5928 = vmatpush2.bf16.msra.mxu0 %v7858_v19  ;;  %v7947_v19 = vld [vmem:[%s9958_s9 + $0x1c4] ss:$8 sps:$4 sm:$0xff]  }
 0x65a   : > { %5969 = vmatpush2.bf16.msra.mxu1 %v7861_v12  ;;  %6383 = vmatprep.subr.bf16.mxu0 %v7866_v11  ;;  %v7903_v12 = vld [vmem:[%s9958_s9 + $0xa0] ss:$8 sps:$4 sm:$0xff]  }
 0x65b   : > { %6424 = vmatprep.subr.bf16.mxu1 %v7914_v42  ;;  %v7945_v11 = vld [vmem:[%s9958_s9 + $0x1c0] ss:$8 sps:$4 sm:$0xff]   ;;  %v7953_v42 = vld [vmem:[%s9958_s9 + $0x1a4] ss:$8 sps:$4 sm:$0xff]  }
 0x65c   : > { %v9668_v17 = vpop.f32.mrf.mxu0  ;;  %5930 = vmatmul.mubr.bf16.vlgmr.msra.gmra.mxu0 %v9645_v63  ;;  %v7870_v63 = vld [vmem:[%s9958_s9 + $0x50] ss:$8 sps:$4 sm:$0xff]  }
 0x65d   : > { %v9670_v36 = vpop.f32.mrf.mxu1  ;;  %5971 = vmatmul.mubr.bf16.vlgmr.msra.gmra.mxu1 %v9649_v37  ;;  %6384 = vmatpush1.bf16.msra.mxu0 %v7864_v48  ;;  %v7908_v48 = vld [vmem:[%s9958_s9 + $0x94] ss:$8 sps:$4 sm:$0xff]  }
 0x65e   : > { %v9677_v5 = vpop.f32.mrf.mxu0  ;;  %6385 = vmatprep.subr.bf16.mxu0 %v7869_v44  ;;  %6425 = vmatpush1.bf16.msra.mxu1 %v7912_v27  ;;  %v7950_v44 = vld [vmem:[%s9958_s9 + $0x1b4] ss:$8 sps:$4 sm:$0xff]  }
 0x65f   : > { %v9679_v26 = vpop.f32.mrf.mxu1  ;;  %6426 = vmatprep.subr.bf16.mxu1 %v7917_v47 }
 0x660   : > { %v5689_v55 = vpop.f32.mrf.mxu0 }
 0x661   : > { %v5730_v0 = vpop.f32.mrf.mxu1  ;;  %6386 = vmatpush1.bf16.msra.mxu0 %v7867_v15  ;;  %v9834_v15 = vld [vmem:[%s9957_s8] sm:$0xf]  ;;  %v7948_v55 = vld [vmem:[%s9958_s9 + $0x1b0] ss:$8 sps:$4 sm:$0xff]  }
 0x662   : > { %v5690_v37 = vpop.f32.mrf.mxu0  ;;  %6387 = vmatprep.subr.bf16.mxu0 %v7872_v25  ;;  %6427 = vmatpush1.bf16.msra.mxu1 %v7915_v24  ;;  %v7906_v25 = vld [vmem:[%s9958_s9 + $0x90] ss:$8 sps:$4 sm:$0xff]   ;;  %v7911_v0 = vld [vmem:[%s9958_s9 + $0x84] ss:$8 sps:$4 sm:$0xff]  }
 0x663   : > { %v5731_v33 = vpop.f32.mrf.mxu1  ;;  %6428 = vmatprep.subr.bf16.mxu1 %v7920_v43  ;;  %v4358_v37 = vrot.slane %v9834_v15, %v9579_v9 }
 0x664   : > { %v7909_v33 = vld [vmem:[%s9958_s9 + $0x80] ss:$8 sps:$4 sm:$0xff]  }
 0x665   : > { %6388 = vmatpush1.bf16.msra.mxu0 %v7870_v63  ;;  %v4354_v63 = vrot.slane %v9834_v15, %v9576_v30  ;;  %v5688_v27 = vadd.f32 %v9677_v5, %v4358_v37 }
 0x666   : > { %6389 = vmatprep.subr.bf16.mxu0 %v7875_v34  ;;  %6429 = vmatpush1.bf16.msra.mxu1 %v7918_v38  ;;  %v7956_v38 = vld [vmem:[%s9958_s9 + $0x194] ss:$8 sps:$4 sm:$0xff]  }
 0x667   : > { %6430 = vmatprep.subr.bf16.mxu1 %v7923_v13  ;;  %v5686_v34 = vadd.f32 %v9668_v17, %v4354_v63  ;;  %v5729_v43 = vadd.f32 %v9679_v26, %v5688_v27 }
 0x669   : > { %6390 = vmatpush1.bf16.msra.mxu0 %v7873_v6  ;;  %v5727_v47 = vadd.f32 %v9670_v36, %v5686_v34  ;;  %v7951_v6 = vld [vmem:[%s9958_s9 + $0x1a0] ss:$8 sps:$4 sm:$0xff]   ;;  %v7954_v36 = vld [vmem:[%s9958_s9 + $0x190] ss:$8 sps:$4 sm:$0xff]  }
 0x66a   : > { %6391 = vmatprep.subr.bf16.mxu0 %v7878_v39  ;;  %6431 = vmatpush1.bf16.msra.mxu1 %v7921_v54 }
 0x66b   : > { %6432 = vmatprep.subr.bf16.mxu1 %v7926_v41 }
 0x66d   : > { %6392 = vmatpush1.bf16.msra.mxu0 %v7876_v62 }
 0x66e   : > { %6393 = vmatprep.subr.bf16.mxu0 %v7881_v14  ;;  %6433 = vmatpush1.bf16.msra.mxu1 %v7924_v45  ;;  %v7959_v45 = vld [vmem:[%s9958_s9 + $0x184] ss:$8 sps:$4 sm:$0xff]  }
 0x66f   : > { %6434 = vmatprep.subr.bf16.mxu1 %v7929_v40  ;;  %v7957_v40 = vld [vmem:[%s9958_s9 + $0x180] ss:$8 sps:$4 sm:$0xff]  }
 0x671   : > { %6394 = vmatpush1.bf16.msra.mxu0 %v7879_v28 }
 0x672   : > { %6395 = vmatprep.subr.bf16.mxu0 %v7884_v22  ;;  %6435 = vmatpush1.bf16.msra.mxu1 %v7927_v35 }
 0x673   : > { %6436 = vmatprep.subr.bf16.mxu1 %v7932_v16 }
 0x675   : > { %6396 = vmatpush1.bf16.msra.mxu0 %v7882_v3 }
 0x676   : > { %6397 = vmatprep.subr.bf16.mxu0 %v7887_v18  ;;  %6437 = vmatpush1.bf16.msra.mxu1 %v7930_v10 }
 0x677   : > { %6438 = vmatprep.subr.bf16.mxu1 %v7935_v60 }
 0x679   : > { %6398 = vmatpush1.bf16.msra.mxu0 %v7885_v51 }
 0x67a   : > { %6399 = vmatprep.subr.bf16.mxu0 %v7890_v52  ;;  %6439 = vmatpush1.bf16.msra.mxu1 %v7933_v49 }
 0x67b   : > { %6440 = vmatprep.subr.bf16.mxu1 %v7938_v58  ;;  %v7961_v58 = vld [vmem:[%s9960_s11 + $0x38] sm:$0xff]  }
 0x67d   : > { %6400 = vmatpush2.bf16.msra.mxu0 %v7888_v53 }
 0x67e   : > { %6401 = vmatprep.subr.bf16.mxu0 %v7893_v29  ;;  %6441 = vmatpush2.bf16.msra.mxu1 %v7936_v8  ;;  %v7963_v8 = vld [vmem:[%s9960_s11 + $0x30] sm:$0xff]  }
 0x67f   : > { %6442 = vmatprep.subr.bf16.mxu1 %v7941_v31  ;;  %v7965_v31 = vld [vmem:[%s9960_s11 + $0x28] sm:$0xff]  }
 0x681   : > { %6402 = vmatpush2.bf16.msra.mxu0 %v7891_v59 }
 0x682   : > { %6403 = vmatprep.subr.bf16.mxu0 %v7896_v46  ;;  %6443 = vmatpush2.bf16.msra.mxu1 %v7939_v21  ;;  %v7960_v46 = vld [vmem:[%s9960_s11 + $0x78] sm:$0xff]   ;;  %v7967_v21 = vld [vmem:[%s9960_s11 + $0x20] sm:$0xff]  }
 0x683   : > { %6444 = vmatprep.subr.bf16.mxu1 %v7944_v20  ;;  %v7969_v20 = vld [vmem:[%s9960_s11 + $0x18] sm:$0xff]  }
 0x685   : > { %6404 = vmatpush2.bf16.msra.mxu0 %v7894_v7  ;;  %v7962_v7 = vld [vmem:[%s9960_s11 + $0x70] sm:$0xff]  }
 0x686   : > { %6405 = vmatprep.subr.bf16.mxu0 %v7899_v1  ;;  %6445 = vmatpush2.bf16.msra.mxu1 %v7942_v2  ;;  %v7964_v1 = vld [vmem:[%s9960_s11 + $0x68] sm:$0xff]   ;;  %v7971_v2 = vld [vmem:[%s9960_s11 + $0x10] sm:$0xff]  }
 0x687   : > { %6446 = vmatprep.subr.bf16.mxu1 %v7947_v19  ;;  %v4366_v19 = vrot.slane %v9834_v15, %v3983_v50 }
 0x689   : > { %6406 = vmatpush2.bf16.msra.mxu0 %v7897_v4  ;;  %v7966_v4 = vld [vmem:[%s9960_s11 + $0x60] sm:$0xff]  }
 0x68a   : > { %6407 = vmatprep.subr.bf16.mxu0 %v7902_v32  ;;  %6447 = vmatpush2.bf16.msra.mxu1 %v7945_v11  ;;  %v7968_v32 = vld [vmem:[%s9960_s11 + $0x58] sm:$0xff]  }
 0x68b   : > { %6448 = vmatprep.subr.bf16.mxu1 %v7950_v44 }
 0x68d   : > { %6408 = vmatpush2.bf16.msra.mxu0 %v7900_v56  ;;  %v7970_v56 = vld [vmem:[%s9960_s11 + $0x50] sm:$0xff]  }
 0x68e   : > { %6409 = vmatprep.subr.bf16.mxu0 %v7905_v57  ;;  %6449 = vmatpush2.bf16.msra.mxu1 %v7948_v55  ;;  %v4362_v57 = vrot.slane %v9834_v15, %v3979_v61 }
 0x68f   : > { %6450 = vmatprep.subr.bf16.mxu1 %v7953_v42 }
 0x691   : > { %6410 = vmatpush2.bf16.msra.mxu0 %v7903_v12 }
 0x692   : > { %6411 = vmatprep.subr.bf16.mxu0 %v7908_v48  ;;  %6451 = vmatpush2.bf16.msra.mxu1 %v7951_v6 }
 0x693   : > { %6452 = vmatprep.subr.bf16.mxu1 %v7956_v38  ;;  %v7974_v38 = vld [vmem:[%s9960_s11 + $0x40] sm:$0xff]  }
 0x695   : > { %6412 = vmatpush2.bf16.msra.mxu0 %v7906_v25 }
 0x696   : > { %6413 = vmatprep.subr.bf16.mxu0 %v7911_v0  ;;  %6453 = vmatpush2.bf16.msra.mxu1 %v7954_v36  ;;  %v6051_v36 = vld [vmem:[%s9959_s10] sm:$0x3] }
 0x697   : > { %6454 = vmatprep.subr.bf16.mxu1 %v7959_v45 }
 0x699   : > { %6414 = vmatpush2.bf16.msra.mxu0 %v7909_v33 }
 0x69a   : > { %6455 = vmatpush2.bf16.msra.mxu1 %v7957_v40  ;;  %7309 = vmatprep.subr.bf16.mxu0 %v7960_v46 }
 0x69c   : > { %v5767_v24 = vpop.f32.mrf.mxu0 }
 0x69d   : > { %v5808_v39 = vpop.f32.mrf.mxu1  ;;  %v5768_v62 = vadd.f32 %v5767_v24, %v5727_v47 }
 0x69e   : > { %v5769_v17 = vpop.f32.mrf.mxu0 }
 0x69f   : > { %v5810_v5 = vpop.f32.mrf.mxu1  ;;  %v5809_v14 = vadd.f32 %v5808_v39, %v5768_v62  ;;  %v5770_v13 = vadd.f32 %v5769_v17, %v5729_v43  ;;  %v7972_v43 = vld [vmem:[%s9960_s11 + $0x48] sm:$0xff]  }
 0x6a0   : > { %v5771_v28 = vpop.f32.mrf.mxu0  ;;  %v7973_v62 = vld [vmem:[%s9960_s11 + $0x8] sm:$0xff]  }
 0x6a1   : > { %v5812_v54 = vpop.f32.mrf.mxu1  ;;  %v5811_v22 = vadd.f32 %v5810_v5, %v5770_v13  ;;  %v5979_v26 = vmax.f32 %v5809_v14, 0.0  ;;  %v7975_v14 = vld [vmem:[%s9960_s11] sm:$0xff]   ;;  %v6056_v28 = vrot.slane %v6051_v36, %v9576_v30 }
 0x6a2   : > { %v5772_v41 = vpop.f32.mrf.mxu0  ;;  %v6060_v54 = vrot.slane %v6051_v36, %v9579_v9  ;;  %v7231_v30 = vld [vmem:[%s9961_s12] ss:$0 sm:$0xff] }
 0x6a3   : > { %v5813_v3 = vpop.f32.mrf.mxu1  ;;  %v5980_v18 = vmax.f32 %v5811_v22, 0.0  ;;  %v5983_v35 = vpack.c.bf16 %v5979_v26, %v5979_v26 }
 0x6a5   : > { %v5984_v51 = vpack.c.bf16 %v5980_v18, %v5980_v18 }
 0x6a7   : > { %6415 = vmatprep.mubr.bf16.mxu0 %v5984_v51 }
 0x6a8   : > { %6416 = vmatmul.mubr.bf16.vlgmr.msra.gmra.mxu0 %v5983_v35 }
 0x6a9   : > { %7310 = vmatpush3.bf16.msra.mxu0 %v7961_v58 }
 0x6aa   : > { %7311 = vmatprep.subr.bf16.mxu0 %v7962_v7 }
 0x6ad   : > { %7312 = vmatpush3.bf16.msra.mxu0 %v7963_v8 }
 0x6ae   : > { %7313 = vmatprep.subr.bf16.mxu0 %v7964_v1 }
 0x6b1   : > { %7314 = vmatpush3.bf16.msra.mxu0 %v7965_v31 }
 0x6b2   : > { %7315 = vmatprep.subr.bf16.mxu0 %v7966_v4 }
 0x6b5   : > { %7316 = vmatpush3.bf16.msra.mxu0 %v7967_v21 }
 0x6b6   : > { %7317 = vmatprep.subr.bf16.mxu0 %v7968_v32 }
 0x6b9   : > { %7318 = vmatpush3.bf16.msra.mxu0 %v7969_v20 }
 0x6ba   : > { %7319 = vmatprep.subr.bf16.mxu0 %v7970_v56 }
 0x6bd   : > { %7320 = vmatpush3.bf16.msra.mxu0 %v7971_v2 }
 0x6be   : > { %7321 = vmatprep.subr.bf16.mxu0 %v7972_v43 }
 0x6c1   : > { %7322 = vmatpush3.bf16.msra.mxu0 %v7973_v62 }
 0x6c2   : > { %7323 = vmatprep.subr.bf16.mxu0 %v7974_v38 }
 0x6c5   : > { %7324 = vmatpush3.bf16.msra.mxu0 %v7975_v14 }
 0x6dc   : > { %v5849_v52 = vpop.f32.mrf.mxu0 }
 0x6dd   : > { %v5890_v16 = vpop.f32.mrf.mxu1  ;;  %v5850_v12 = vadd.f32 %v5849_v52, %v4362_v57 }
 0x6de   : > { %v5851_v53 = vpop.f32.mrf.mxu0 }
 0x6df   : > { %v5892_v10 = vpop.f32.mrf.mxu1  ;;  %v5852_v11 = vadd.f32 %v5851_v53, %v4366_v19  ;;  %v5891_v48 = vadd.f32 %v5890_v16, %v5850_v12 }
 0x6e0   : > { %v5853_v29 = vpop.f32.mrf.mxu0 }
 0x6e1   : > { %v5894_v60 = vpop.f32.mrf.mxu1  ;;  %v5893_v55 = vadd.f32 %v5892_v10, %v5852_v11 }
 0x6e2   : > { %v5854_v59 = vpop.f32.mrf.mxu0 }
 0x6e3   : > { %v5895_v49 = vpop.f32.mrf.mxu1 }
 0x71c   : > { %v5931_v44 = vpop.f32.mrf.mxu0 }
 0x71d   : > { %v5972_v25 = vpop.f32.mrf.mxu1  ;;  %v5932_v0 = vadd.f32 %v5931_v44, %v5891_v48 }
 0x71e   : > { %v5933_v63 = vpop.f32.mrf.mxu0 }
 0x71f   : > { %v5974_v37 = vpop.f32.mrf.mxu1  ;;  %v5973_v33 = vadd.f32 %v5972_v25, %v5932_v0  ;;  %v5934_v34 = vadd.f32 %v5933_v63, %v5893_v55 }
 0x720   : > { %v5935_v27 = vpop.f32.mrf.mxu0 }
 0x721   : > { %v5976_v42 = vpop.f32.mrf.mxu1  ;;  %v5975_v47 = vadd.f32 %v5974_v37, %v5934_v34  ;;  %v5981_v6 = vmax.f32 %v5973_v33, 0.0 }
 0x722   : > { %v5936_v61 = vpop.f32.mrf.mxu0 }
 0x723   : > { %v5977_v24 = vpop.f32.mrf.mxu1  ;;  %v5982_v23 = vmax.f32 %v5975_v47, 0.0  ;;  %v5985_v50 = vpack.c.bf16 %v5981_v6, %v5981_v6 }
 0x725   : > { %v5986_v39 = vpack.c.bf16 %v5982_v23, %v5982_v23 }
 0x727   : > { %6456 = vmatprep.mubr.bf16.mxu1 %v5986_v39 }
 0x728   : > { %6457 = vmatmul.mubr.bf16.vlgmr.msra.gmra.mxu1 %v5985_v50 }
 0x768   : > { %v6417_v15 = vpop.f32.mrf.mxu0 }
 0x769   : > { %v6418_v22 = vadd.f32 %v6417_v15, %v6056_v28 }
 0x76a   : > { %v6419_v17 = vpop.f32.mrf.mxu0 }
 0x76b   : > { %v6420_v41 = vadd.f32 %v6419_v17, %v6060_v54 }
 0x76c   : > { %v6421_v5 = vpop.f32.mrf.mxu0 }
 0x76e   : > { %v6422_v13 = vpop.f32.mrf.mxu0 }
 0x7e8   : > { %v6458_v26 = vpop.f32.mrf.mxu1 }
 0x7e9   : > { %v6459_v3 = vadd.f32 %v6458_v26, %v6418_v22 }
 0x7ea   : > { %v6460_v45 = vpop.f32.mrf.mxu1 }
 0x7eb   : > { %v6461_v18 = vadd.f32 %v6460_v45, %v6420_v41  ;;  %v6465_v40 = vmax.f32 %v6459_v3, 0.0 }
 0x7ec   : > { %v6462_v51 = vpop.f32.mrf.mxu1 }
 0x7ed   : > { %v6466_v35 = vmax.f32 %v6461_v18, 0.0  ;;  %v6467_v53 = vpack.c.bf16 %v6465_v40, %v6465_v40 }
 0x7ee   : > { %v6463_v52 = vpop.f32.mrf.mxu1 }
 0x7ef   : > { %v6468_v16 = vpack.c.bf16 %v6466_v35, %v6466_v35 }
 0x7f1   : > { %6636 = vmatprep.mubr.bf16.mxu0 %v6468_v16 }
 0x7f2   : > { %6637 = vmatmul.mubr.bf16.vlgmr.msra.gmra.mxu0 %v6467_v53 }
 0x8b2   : > { %v7325_v10 = vpop.f32.mrf.mxu0 }
 0x8b4   : > { %v7326_v9 = vpop.f32.mrf.mxu0 }
 0x8b5   : > { %v7327_v29 = vadd.f32 %v7326_v9, %v7325_v10 }
 0x8b6   : > { %v7328_v60 = vpop.f32.mrf.mxu0 }
 0x8b7   : > { %v6639_v59 = vadd.f32 %v7327_v29, %v7231_v30 }
 0x8b8   : > { %v7329_v49 = vpop.f32.mrf.mxu0 }
 0x8b9   : > { %6645 = vst.msk [vmem:[%s9962_s13] sm:$0x3] %vm6644_vm3, %v6639_v59 }
 0x8ba PF: > { %s10071_s27 = sld [smem:[#allocation7_spill]]  ;;  %s10073_s25 = smov %s8024_s26 }
 0x8bb   : > { %s10072_s21 = sld [smem:[#allocation8_spill]] }
 0x8c0   : > { %p21_p7 = scmp.ge.s32.totalorder %s10071_s27, 6  }
 0x8c1   : > { %s10074_s26 = smov %s10072_s21 }
 0x8c2   :  { %23 = sbr.rel (!%p21_p7) target bundleno = 2 (0x2), region = 157 }
 0x8c7   :  { %6657 = vsyncpa [#allocation5], 1 }
 0x8c8   :  { %6659 = vsyncpa [#allocation5 + $0x1], 1 }

</bundles_post_ra>
